<compile_context>
chip_gen: v7x
topology: tpu7x:2x2x1
jax: 0.10.0
libtpu: 0.0.40
codegen_flags: <defaults>
</compile_context>

<pallas_src>
import functools
import math

import numpy as np

import jax
import jax.numpy as jnp
from jax.experimental import pallas as pl
from jax.experimental.pallas import tpu as pltpu


# -----------------------------------------------------------------------------
# Pallas kernel: fused Linear projection + CSR segment-max + BN(eval) + GELU
# -----------------------------------------------------------------------------
def _pool_kernel(blk_start_ref, blk_count_ref,               # scalar prefetch
                 cluster_ref, feat_ref, wt_ref, scale_ref, shift_ref,
                 out_ref, acc_ref, *, tm):
    m = pl.program_id(0)          # segment tile
    j = pl.program_id(1)          # point-block step within this tile's range

    @pl.when(j == 0)
    def _init():
        acc_ref[...] = jnp.full(acc_ref.shape, -jnp.inf, acc_ref.dtype)

    @pl.when(j < blk_count_ref[m])
    def _reduce():
        # Projection of this point block, done once per visited block:
        #   (cout, cin) @ (tn, cin)^T -> (cout, tn); point axis is lane-dense.
        xt = jax.lax.dot_general(
            wt_ref[...], feat_ref[...],
            dimension_numbers=(((1,), (1,)), ((), ())),
            preferred_element_type=jnp.float32)
        minf = jnp.float32(-jnp.inf)
        rel = cluster_ref[...] - m * tm              # (1, tn), relative seg id
        # Per-segment-row masked max over the lane axis; live data stays at a
        # few (cout, tn) vregs instead of a (tm, tn, cout) broadcast.
        cols = []
        for r in range(tm):
            sel = jnp.where(rel == r, xt, minf)              # (cout, tn)
            cols.append(jnp.max(sel, axis=1, keepdims=True))  # (cout, 1)
        contrib = jnp.concatenate(cols, axis=1)              # (cout, tm)
        acc_ref[...] = jnp.maximum(acc_ref[...], contrib)

    @pl.when(j == pl.num_programs(1) - 1)
    def _finalize():
        a = acc_ref[...]
        valid = a > -jnp.inf          # padded segment rows never see a point
        a0 = jnp.where(valid, a, 0.0)
        # BatchNorm1d(eval) folded to per-channel scale/shift (the linear bias
        # is pre-folded into `shift`), then exact (erf) GELU.
        y = a0 * scale_ref[...] + shift_ref[...]
        g = 0.5 * y * (1.0 + jax.lax.erf(y * 0.7071067811865476))
        out_ref[...] = jnp.where(valid, g, 0.0).astype(out_ref.dtype)


def pooled_proj_reduce(feat, cluster, indices, idx_ptr, num_segments,
                       w, b, bn_scale, bn_shift, *, tm=128, tn=512):
    """GELU(BN_eval(segment_max_csr(feat @ w + b))) in one fused Pallas kernel.

    `indices` sorts points by cluster; `idx_ptr` is the CSR row pointer over
    the sorted points (both computed by the caller, as in the torch module).
    """
    n, cin = feat.shape
    cout = w.shape[1]

    tn = min(tn, pl.cdiv(n, 128) * 128)          # don't over-pad tiny inputs
    np_pad = pl.cdiv(n, tn) * tn
    mp = pl.cdiv(num_segments, tm) * tm
    m_tiles = mp // tm

    # Gather points into cluster-sorted (CSR) order.  The gather is required by
    # the reference (proj(feat)[indices]); padding rides along by padding the
    # *index* vector, so no extra zero-padded copy of feat is materialized.
    pad = np_pad - n
    idx = indices.astype(jnp.int32)
    if pad:
        idx = jnp.concatenate([idx, jnp.zeros((pad,), jnp.int32)])
    feat_sorted = feat[idx]                                   # (np_pad, cin)
    # Only the cheap int32 cluster row gets an explicit pad; sentinel -1 never
    # matches any segment id, so the padded feat rows may hold arbitrary data.
    clu_row = jnp.full((1, np_pad), -1, jnp.int32)
    clu_row = clu_row.at[0, :n].set(cluster[indices].astype(jnp.int32))

    # Per-segment-tile CSR block ranges (host side; the surrounding forward is
    # eager anyway because jnp.unique produces data-dependent shapes).
    ptr = np.asarray(jax.device_get(idx_ptr)).astype(np.int64)
    seg_lo = np.arange(m_tiles, dtype=np.int64) * tm
    seg_hi = np.minimum(seg_lo + tm, num_segments)
    row_lo = ptr[seg_lo]
    row_hi = ptr[seg_hi]                         # every tile owns >= 1 point
    blk_start = (row_lo // tn).astype(np.int32)
    blk_count = ((row_hi - 1) // tn - row_lo // tn + 1).astype(np.int32)
    kmax = int(blk_count.max())

    # Fold linear bias + BN into one per-channel scale/shift:
    #   BN(max(xW + b)) = max(xW) * s + (b * s + t)
    scale = bn_scale.reshape(cout, 1).astype(jnp.float32)
    shift = (bn_shift + bn_scale * b).reshape(cout, 1).astype(jnp.float32)
    w_t = jnp.asarray(w.T, feat.dtype)           # (cout, cin), VMEM-resident

    def blk(m, j, bs, bc):
        # Clamp past-the-end steps to the last block: unchanged block index
        # means the pipeline skips the DMA, and pl.when skips the compute.
        return bs[m] + jnp.minimum(j, bc[m] - 1)

    out_t = pl.pallas_call(
        functools.partial(_pool_kernel, tm=tm),
        out_shape=jax.ShapeDtypeStruct((cout, mp), jnp.float32),
        grid_spec=pltpu.PrefetchScalarGridSpec(
            num_scalar_prefetch=2,
            grid=(m_tiles, kmax),
            in_specs=[
                pl.BlockSpec((1, tn),
                             lambda m, j, bs, bc: (0, blk(m, j, bs, bc))),
                pl.BlockSpec((tn, cin),
                             lambda m, j, bs, bc: (blk(m, j, bs, bc), 0)),
                pl.BlockSpec((cout, cin), lambda m, j, bs, bc: (0, 0)),
                pl.BlockSpec((cout, 1), lambda m, j, bs, bc: (0, 0)),
                pl.BlockSpec((cout, 1), lambda m, j, bs, bc: (0, 0)),
            ],
            out_specs=pl.BlockSpec((cout, tm), lambda m, j, bs, bc: (0, m)),
            scratch_shapes=[pltpu.VMEM((cout, tm), jnp.float32)],
        ),
        # Segment tiles are independent -> "parallel" (v7x 2-TC sharding);
        # the CSR point-block sweep is the reduction -> "arbitrary", last.
        compiler_params=pltpu.CompilerParams(
            dimension_semantics=("parallel", "arbitrary")),
    )(jnp.asarray(blk_start), jnp.asarray(blk_count),
      clu_row, feat_sorted, w_t, scale, shift)

    return out_t[:, :num_segments].T


# -----------------------------------------------------------------------------
# Serialization glue (plain JAX) — mirrors Point.serialization with z-orders
# -----------------------------------------------------------------------------
def z_order_encode(grid_coord, depth):
    x = grid_coord[:, 0].astype(jnp.int32)
    y = grid_coord[:, 1].astype(jnp.int32)
    z = grid_coord[:, 2].astype(jnp.int32)
    key = jnp.zeros_like(x)
    for i in range(depth):
        m = 1 << i
        key = (key
               | ((x & m) << (2 * i + 2))
               | ((y & m) << (2 * i + 1))
               | ((z & m) << (2 * i + 0)))
    return key


def encode(grid_coord, batch, depth, order):
    if order == "z":
        code = z_order_encode(grid_coord, depth)
    elif order == "z-trans":
        code = z_order_encode(grid_coord[:, jnp.array([1, 0, 2])], depth)
    else:
        # TODO(synk): hilbert encoding (uint8/uint64 bit-unpacking LUT walk) not ported.
        raise NotImplementedError(order)
    return (batch.astype(jnp.int32) << (depth * 3)) | code


def _argsort_and_inverse(code):
    order = jnp.argsort(code, axis=1)
    nrow, ncol = code.shape
    inverse = jnp.zeros_like(order).at[
        jnp.arange(nrow)[:, None], order].set(
        jnp.broadcast_to(jnp.arange(ncol, dtype=order.dtype), (nrow, ncol)))
    return order, inverse


def serialization(point, orders=("z", "z-trans"), depth=6):
    code = jnp.stack([encode(point["grid_coord"], point["batch"], depth, o)
                      for o in orders])
    order, inverse = _argsort_and_inverse(code)
    point["serialized_depth"] = depth
    point["serialized_code"] = code
    point["serialized_order"] = order
    point["serialized_inverse"] = inverse
    return point


# -----------------------------------------------------------------------------
# SerializedPooling.forward
# -----------------------------------------------------------------------------
def serialized_pooling_forward(point, params, *, stride=2, reduce="max",
                               shuffle_orders=True, rng=None):
    assert reduce == "max"
    pooling_depth = (math.ceil(stride) - 1).bit_length()
    if pooling_depth > point["serialized_depth"]:
        pooling_depth = 0

    code = point["serialized_code"] >> (pooling_depth * 3)
    # Data-dependent shapes (jnp.unique) keep this bookkeeping eager, matching
    # the torch reference; the Pallas hot path below is shape-static per call.
    code_, cluster, counts = jnp.unique(
        code[0], return_inverse=True, return_counts=True)
    indices = jnp.argsort(cluster)
    idx_ptr = jnp.concatenate(
        [jnp.zeros((1,), counts.dtype), jnp.cumsum(counts)])
    head_indices = indices[idx_ptr[:-1]]

    code = code[:, head_indices]
    order, inverse = _argsort_and_inverse(code)
    if shuffle_orders:
        # torch.randperm replaced by a deterministic, fixed-key permutation.
        perm = jax.random.permutation(rng, code.shape[0])
        code, order, inverse = code[perm], order[perm], inverse[perm]

    num_seg = int(code_.shape[0])

    # --- Pallas hot path: proj + CSR segment-max + BN(eval) + GELU -----------
    feat = pooled_proj_reduce(point["feat"], cluster, indices, idx_ptr,
                              num_seg, params["w"], params["b"],
                              params["bn_scale"], params["bn_shift"])

    # segment mean of coordinates (3 columns; tiny glue in plain JAX).
    coord_sum = jnp.zeros((num_seg, point["coord"].shape[1]),
                          point["coord"].dtype).at[cluster].add(point["coord"])
    coord = coord_sum / counts[:, None].astype(point["coord"].dtype)

    out = dict(
        feat=feat,
        coord=coord,
        grid_coord=point["grid_coord"][head_indices] >> pooling_depth,
        serialized_code=code,
        serialized_order=order,
        serialized_inverse=inverse,
        serialized_depth=point["serialized_depth"] - pooling_depth,
        batch=point["batch"][head_indices],
        pooling_inverse=cluster,     # traceable=True
        pooling_parent=point,        # traceable=True
    )
    # TODO(synk): point.sparsify() builds a spconv.SparseConvTensor; no Pallas/JAX equivalent, skipped.
    return out, cluster, num_seg


# -----------------------------------------------------------------------------
if __name__ == "__main__":
    key = jax.random.PRNGKey(0)
    k1, k2, k3, k4, k5, k6, k7 = jax.random.split(key, 7)

    N, C_IN, C_OUT, DEPTH = 256, 16, 32, 6
    sizes = (160, 96)

    batch = jnp.concatenate(
        [jnp.full((s,), i, jnp.int32) for i, s in enumerate(sizes)])
    grid_coord = jax.random.randint(k1, (N, 3), 0, 2 ** DEPTH, dtype=jnp.int32)
    coord = grid_coord.astype(jnp.float32) * 0.05 + \
        0.05 * jax.random.uniform(k2, (N, 3), jnp.float32)
    feat = jax.random.normal(k3, (N, C_IN), jnp.float32)

    # Deterministic parameters (nn.Linear + BatchNorm1d(eval) + GELU).
    w = jax.random.normal(k4, (C_IN, C_OUT), jnp.float32) / math.sqrt(C_IN)
    b = 0.1 * jax.random.normal(k5, (C_OUT,), jnp.float32)
    gamma = 1.0 + 0.1 * jax.random.normal(k6, (C_OUT,), jnp.float32)
    beta = 0.1 * jax.random.normal(k7, (C_OUT,), jnp.float32)
    running_mean = jnp.zeros((C_OUT,), jnp.float32)
    running_var = jnp.ones((C_OUT,), jnp.float32)
    eps = 1e-5
    bn_scale = gamma / jnp.sqrt(running_var + eps)
    bn_shift = beta - running_mean * bn_scale
    params = dict(w=w, b=b, bn_scale=bn_scale, bn_shift=bn_shift)

    point = dict(feat=feat, coord=coord, grid_coord=grid_coord, batch=batch,
                 offset=jnp.cumsum(jnp.asarray(sizes, jnp.int32)))
    point = serialization(point, orders=("z", "z-trans"), depth=DEPTH)

    out, cluster, num_seg = serialized_pooling_forward(
        point, params, stride=2, reduce="max", shuffle_orders=True,
        rng=jax.random.PRNGKey(1))
    jax.block_until_ready(out["feat"])

    # --- reference check (plain JAX) -----------------------------------------
    proj = feat @ w + b
    seg_max = jnp.full((num_seg, C_OUT), -jnp.inf, jnp.float32)
    seg_max = seg_max.at[cluster].max(proj)
    y = seg_max * bn_scale + bn_shift
    ref = 0.5 * y * (1.0 + jax.lax.erf(y * 0.7071067811865476))
    assert out["feat"].shape == (num_seg, C_OUT)
    assert bool(jnp.isfinite(out["feat"]).all()), "non-finite pooled features"
    assert jnp.allclose(out["feat"], ref, rtol=1e-2, atol=1e-2), \
        "Pallas pooled features mismatch reference"

    print("KERNEL_OK")
</pallas_src>

<mosaic_0001>
module attributes {stable_mosaic.version = 11 : i64} {
  func.func @_pool_kernel(%arg0: i32, %arg1: i32, %arg2: memref<2xi32, #tpu.memory_space<smem>>, %arg3: memref<2xi32, #tpu.memory_space<smem>>, %arg4: memref<1x256xi32, #tpu.memory_space<vmem>>, %arg5: memref<256x16xf32, #tpu.memory_space<vmem>>, %arg6: memref<32x16xf32, #tpu.memory_space<vmem>>, %arg7: memref<32x1xf32, #tpu.memory_space<vmem>>, %arg8: memref<32x1xf32, #tpu.memory_space<vmem>>, %arg9: memref<32x128xf32, #tpu.memory_space<vmem>>, %arg10: memref<32x128xf32, #tpu.memory_space<vmem>>) attributes {dimension_semantics = [#tpu.dimension_semantics<parallel>, #tpu.dimension_semantics<arbitrary>], iteration_bounds = array<i64: 2, 1>, scalar_prefetch = 2 : i64, scratch_operands = 1 : i64, tpu.core_type = #tpu.core_type<tc>, window_params = [{transform_indices = @transform_0, window_bounds = array<i64: 1, 256>}, {transform_indices = @transform_1, window_bounds = array<i64: 256, 16>}, {pipeline_mode = #tpu.pipeline_mode<synchronous>, transform_indices = @transform_2, window_bounds = array<i64: 32, 16>}, {pipeline_mode = #tpu.pipeline_mode<synchronous>, transform_indices = @transform_3, window_bounds = array<i64: 32, 1>}, {pipeline_mode = #tpu.pipeline_mode<synchronous>, transform_indices = @transform_4, window_bounds = array<i64: 32, 1>}, {transform_indices = @transform_5, window_bounds = array<i64: 32, 128>}]} {
    %c0_i32 = arith.constant 0 : i32
    %0 = arith.cmpi eq, %arg1, %c0_i32 : i32
    %1 = arith.extui %0 : i1 to i32
    %c0_i32_0 = arith.constant 0 : i32
    %2 = arith.cmpi ne, %1, %c0_i32_0 : i32
    scf.if %2 {
      %cst = arith.constant 0xFF800000 : f32
      %11 = vector.broadcast %cst : f32 to vector<32x128xf32>
      %c0 = arith.constant 0 : index
      %c0_4 = arith.constant 0 : index
      %12 = vector.load %arg10[%c0, %c0_4] : memref<32x128xf32, #tpu.memory_space<vmem>>, vector<32x128xf32>
      tpu.vector_store %arg10[%c0, %c0_4], %11 {strides = array<i32>} : memref<32x128xf32, #tpu.memory_space<vmem>>, vector<32x128xf32>,
    } else {
    }
    %3 = arith.index_cast %arg0 : i32 to index
    %4 = memref.load %arg3[%3] : memref<2xi32, #tpu.memory_space<smem>>
    %5 = arith.cmpi slt, %arg1, %4 : i32
    %6 = arith.extui %5 : i1 to i32
    %c0_i32_1 = arith.constant 0 : i32
    %7 = arith.cmpi ne, %6, %c0_i32_1 : i32
    scf.if %7 {
      %c0 = arith.constant 0 : index
      %c0_4 = arith.constant 0 : index
      %11 = vector.load %arg6[%c0, %c0_4] : memref<32x16xf32, #tpu.memory_space<vmem>>, vector<32x16xf32>
      %c0_5 = arith.constant 0 : index
      %c0_6 = arith.constant 0 : index
      %12 = vector.load %arg5[%c0_5, %c0_6] : memref<256x16xf32, #tpu.memory_space<vmem>>, vector<256x16xf32>
      %cst = arith.constant dense<0.000000e+00> : vector<32x256xf32>
      %13 = tpu.matmul %11, %12, %cst {dimension_numbers = #tpu.dot_dimension_numbers<[1], [1], [0], [0], [0, 0, 1, 0], [], []>} : vector<32x16xf32>, vector<256x16xf32>, vector<32x256xf32> -> vector<32x256xf32>
      %c0_7 = arith.constant 0 : index
      %c0_8 = arith.constant 0 : index
      %14 = vector.load %arg4[%c0_7, %c0_8] : memref<1x256xi32, #tpu.memory_space<vmem>>, vector<1x256xi32>
      %c128_i32 = arith.constant 128 : i32
      %15 = arith.muli %arg0, %c128_i32 : i32
      %16 = vector.broadcast %15 : i32 to vector<1x256xi32>
      %17 = arith.subi %14, %16 : vector<1x256xi32>
      %c0_i32_9 = arith.constant 0 : i32
      %18 = vector.broadcast %c0_i32_9 : i32 to vector<1x256xi32>
      %19 = arith.cmpi eq, %17, %18 : vector<1x256xi32>
      %cst_10 = arith.constant 0xFF800000 : f32
      %20 = vector.shape_cast %19 : vector<1x256xi1> to vector<1x256xi1>
      %21 = vector.broadcast %20 : vector<1x256xi1> to vector<32x256xi1>
      %22 = vector.broadcast %cst_10 : f32 to vector<32x256xf32>
      %23 = arith.select %21, %13, %22 : vector<32x256xi1>, vector<32x256xf32>
      %cst_11 = arith.constant dense<0xFF800000> : vector<32xf32>
      %24 = vector.multi_reduction <maximumf>, %23, %cst_11 [1] : vector<32x256xf32> to vector<32xf32>
      %25 = vector.shape_cast %24 : vector<32xf32> to vector<32x1xf32>
      %c1_i32 = arith.constant 1 : i32
      %26 = vector.broadcast %c1_i32 : i32 to vector<1x256xi32>
      %27 = arith.cmpi eq, %17, %26 : vector<1x256xi32>
      %cst_12 = arith.constant 0xFF800000 : f32
      %28 = vector.shape_cast %27 : vector<1x256xi1> to vector<1x256xi1>
      %29 = vector.broadcast %28 : vector<1x256xi1> to vector<32x256xi1>
      %30 = vector.broadcast %cst_12 : f32 to vector<32x256xf32>
      %31 = arith.select %29, %13, %30 : vector<32x256xi1>, vector<32x256xf32>
      %cst_13 = arith.constant dense<0xFF800000> : vector<32xf32>
      %32 = vector.multi_reduction <maximumf>, %31, %cst_13 [1] : vector<32x256xf32> to vector<32xf32>
      %33 = vector.shape_cast %32 : vector<32xf32> to vector<32x1xf32>
      %c2_i32 = arith.constant 2 : i32
      %34 = vector.broadcast %c2_i32 : i32 to vector<1x256xi32>
      %35 = arith.cmpi eq, %17, %34 : vector<1x256xi32>
      %cst_14 = arith.constant 0xFF800000 : f32
      %36 = vector.shape_cast %35 : vector<1x256xi1> to vector<1x256xi1>
      %37 = vector.broadcast %36 : vector<1x256xi1> to vector<32x256xi1>
      %38 = vector.broadcast %cst_14 : f32 to vector<32x256xf32>
      %39 = arith.select %37, %13, %38 : vector<32x256xi1>, vector<32x256xf32>
      %cst_15 = arith.constant dense<0xFF800000> : vector<32xf32>
      %40 = vector.multi_reduction <maximumf>, %39, %cst_15 [1] : vector<32x256xf32> to vector<32xf32>
      %41 = vector.shape_cast %40 : vector<32xf32> to vector<32x1xf32>
      %c3_i32 = arith.constant 3 : i32
      %42 = vector.broadcast %c3_i32 : i32 to vector<1x256xi32>
      %43 = arith.cmpi eq, %17, %42 : vector<1x256xi32>
      %cst_16 = arith.constant 0xFF800000 : f32
      %44 = vector.shape_cast %43 : vector<1x256xi1> to vector<1x256xi1>
      %45 = vector.broadcast %44 : vector<1x256xi1> to vector<32x256xi1>
      %46 = vector.broadcast %cst_16 : f32 to vector<32x256xf32>
      %47 = arith.select %45, %13, %46 : vector<32x256xi1>, vector<32x256xf32>
      %cst_17 = arith.constant dense<0xFF800000> : vector<32xf32>
      %48 = vector.multi_reduction <maximumf>, %47, %cst_17 [1] : vector<32x256xf32> to vector<32xf32>
      %49 = vector.shape_cast %48 : vector<32xf32> to vector<32x1xf32>
      %c4_i32 = arith.constant 4 : i32
      %50 = vector.broadcast %c4_i32 : i32 to vector<1x256xi32>
      %51 = arith.cmpi eq, %17, %50 : vector<1x256xi32>
      %cst_18 = arith.constant 0xFF800000 : f32
      %52 = vector.shape_cast %51 : vector<1x256xi1> to vector<1x256xi1>
      %53 = vector.broadcast %52 : vector<1x256xi1> to vector<32x256xi1>
      %54 = vector.broadcast %cst_18 : f32 to vector<32x256xf32>
      %55 = arith.select %53, %13, %54 : vector<32x256xi1>, vector<32x256xf32>
      %cst_19 = arith.constant dense<0xFF800000> : vector<32xf32>
      %56 = vector.multi_reduction <maximumf>, %55, %cst_19 [1] : vector<32x256xf32> to vector<32xf32>
      %57 = vector.shape_cast %56 : vector<32xf32> to vector<32x1xf32>
      %c5_i32 = arith.constant 5 : i32
      %58 = vector.broadcast %c5_i32 : i32 to vector<1x256xi32>
      %59 = arith.cmpi eq, %17, %58 : vector<1x256xi32>
      %cst_20 = arith.constant 0xFF800000 : f32
      %60 = vector.shape_cast %59 : vector<1x256xi1> to vector<1x256xi1>
      %61 = vector.broadcast %60 : vector<1x256xi1> to vector<32x256xi1>
      %62 = vector.broadcast %cst_20 : f32 to vector<32x256xf32>
      %63 = arith.select %61, %13, %62 : vector<32x256xi1>, vector<32x256xf32>
      %cst_21 = arith.constant dense<0xFF800000> : vector<32xf32>
      %64 = vector.multi_reduction <maximumf>, %63, %cst_21 [1] : vector<32x256xf32> to vector<32xf32>
      %65 = vector.shape_cast %64 : vector<32xf32> to vector<32x1xf32>
      %c6_i32 = arith.constant 6 : i32
      %66 = vector.broadcast %c6_i32 : i32 to vector<1x256xi32>
      %67 = arith.cmpi eq, %17, %66 : vector<1x256xi32>
      %cst_22 = arith.constant 0xFF800000 : f32
      %68 = vector.shape_cast %67 : vector<1x256xi1> to vector<1x256xi1>
      %69 = vector.broadcast %68 : vector<1x256xi1> to vector<32x256xi1>
      %70 = vector.broadcast %cst_22 : f32 to vector<32x256xf32>
      %71 = arith.select %69, %13, %70 : vector<32x256xi1>, vector<32x256xf32>
      %cst_23 = arith.constant dense<0xFF800000> : vector<32xf32>
      %72 = vector.multi_reduction <maximumf>, %71, %cst_23 [1] : vector<32x256xf32> to vector<32xf32>
      %73 = vector.shape_cast %72 : vector<32xf32> to vector<32x1xf32>
      %c7_i32 = arith.constant 7 : i32
      %74 = vector.broadcast %c7_i32 : i32 to vector<1x256xi32>
      %75 = arith.cmpi eq, %17, %74 : vector<1x256xi32>
      %cst_24 = arith.constant 0xFF800000 : f32
      %76 = vector.shape_cast %75 : vector<1x256xi1> to vector<1x256xi1>
      %77 = vector.broadcast %76 : vector<1x256xi1> to vector<32x256xi1>
      %78 = vector.broadcast %cst_24 : f32 to vector<32x256xf32>
      %79 = arith.select %77, %13, %78 : vector<32x256xi1>, vector<32x256xf32>
      %cst_25 = arith.constant dense<0xFF800000> : vector<32xf32>
      %80 = vector.multi_reduction <maximumf>, %79, %cst_25 [1] : vector<32x256xf32> to vector<32xf32>
      %81 = vector.shape_cast %80 : vector<32xf32> to vector<32x1xf32>
      %c8_i32 = arith.constant 8 : i32
      %82 = vector.broadcast %c8_i32 : i32 to vector<1x256xi32>
      %83 = arith.cmpi eq, %17, %82 : vector<1x256xi32>
      %cst_26 = arith.constant 0xFF800000 : f32
      %84 = vector.shape_cast %83 : vector<1x256xi1> to vector<1x256xi1>
      %85 = vector.broadcast %84 : vector<1x256xi1> to vector<32x256xi1>
      %86 = vector.broadcast %cst_26 : f32 to vector<32x256xf32>
      %87 = arith.select %85, %13, %86 : vector<32x256xi1>, vector<32x256xf32>
      %cst_27 = arith.constant dense<0xFF800000> : vector<32xf32>
      %88 = vector.multi_reduction <maximumf>, %87, %cst_27 [1] : vector<32x256xf32> to vector<32xf32>
      %89 = vector.shape_cast %88 : vector<32xf32> to vector<32x1xf32>
      %c9_i32 = arith.constant 9 : i32
      %90 = vector.broadcast %c9_i32 : i32 to vector<1x256xi32>
      %91 = arith.cmpi eq, %17, %90 : vector<1x256xi32>
      %cst_28 = arith.constant 0xFF800000 : f32
      %92 = vector.shape_cast %91 : vector<1x256xi1> to vector<1x256xi1>
      %93 = vector.broadcast %92 : vector<1x256xi1> to vector<32x256xi1>
      %94 = vector.broadcast %cst_28 : f32 to vector<32x256xf32>
      %95 = arith.select %93, %13, %94 : vector<32x256xi1>, vector<32x256xf32>
      %cst_29 = arith.constant dense<0xFF800000> : vector<32xf32>
      %96 = vector.multi_reduction <maximumf>, %95, %cst_29 [1] : vector<32x256xf32> to vector<32xf32>
      %97 = vector.shape_cast %96 : vector<32xf32> to vector<32x1xf32>
      %c10_i32 = arith.constant 10 : i32
      %98 = vector.broadcast %c10_i32 : i32 to vector<1x256xi32>
      %99 = arith.cmpi eq, %17, %98 : vector<1x256xi32>
      %cst_30 = arith.constant 0xFF800000 : f32
      %100 = vector.shape_cast %99 : vector<1x256xi1> to vector<1x256xi1>
      %101 = vector.broadcast %100 : vector<1x256xi1> to vector<32x256xi1>
      %102 = vector.broadcast %cst_30 : f32 to vector<32x256xf32>
      %103 = arith.select %101, %13, %102 : vector<32x256xi1>, vector<32x256xf32>
      %cst_31 = arith.constant dense<0xFF800000> : vector<32xf32>
      %104 = vector.multi_reduction <maximumf>, %103, %cst_31 [1] : vector<32x256xf32> to vector<32xf32>
      %105 = vector.shape_cast %104 : vector<32xf32> to vector<32x1xf32>
      %c11_i32 = arith.constant 11 : i32
      %106 = vector.broadcast %c11_i32 : i32 to vector<1x256xi32>
      %107 = arith.cmpi eq, %17, %106 : vector<1x256xi32>
      %cst_32 = arith.constant 0xFF800000 : f32
      %108 = vector.shape_cast %107 : vector<1x256xi1> to vector<1x256xi1>
      %109 = vector.broadcast %108 : vector<1x256xi1> to vector<32x256xi1>
      %110 = vector.broadcast %cst_32 : f32 to vector<32x256xf32>
      %111 = arith.select %109, %13, %110 : vector<32x256xi1>, vector<32x256xf32>
      %cst_33 = arith.constant dense<0xFF800000> : vector<32xf32>
      %112 = vector.multi_reduction <maximumf>, %111, %cst_33 [1] : vector<32x256xf32> to vector<32xf32>
      %113 = vector.shape_cast %112 : vector<32xf32> to vector<32x1xf32>
      %c12_i32 = arith.constant 12 : i32
      %114 = vector.broadcast %c12_i32 : i32 to vector<1x256xi32>
      %115 = arith.cmpi eq, %17, %114 : vector<1x256xi32>
      %cst_34 = arith.constant 0xFF800000 : f32
      %116 = vector.shape_cast %115 : vector<1x256xi1> to vector<1x256xi1>
      %117 = vector.broadcast %116 : vector<1x256xi1> to vector<32x256xi1>
      %118 = vector.broadcast %cst_34 : f32 to vector<32x256xf32>
      %119 = arith.select %117, %13, %118 : vector<32x256xi1>, vector<32x256xf32>
      %cst_35 = arith.constant dense<0xFF800000> : vector<32xf32>
      %120 = vector.multi_reduction <maximumf>, %119, %cst_35 [1] : vector<32x256xf32> to vector<32xf32>
      %121 = vector.shape_cast %120 : vector<32xf32> to vector<32x1xf32>
      %c13_i32 = arith.constant 13 : i32
      %122 = vector.broadcast %c13_i32 : i32 to vector<1x256xi32>
      %123 = arith.cmpi eq, %17, %122 : vector<1x256xi32>
      %cst_36 = arith.constant 0xFF800000 : f32
      %124 = vector.shape_cast %123 : vector<1x256xi1> to vector<1x256xi1>
      %125 = vector.broadcast %124 : vector<1x256xi1> to vector<32x256xi1>
      %126 = vector.broadcast %cst_36 : f32 to vector<32x256xf32>
      %127 = arith.select %125, %13, %126 : vector<32x256xi1>, vector<32x256xf32>
      %cst_37 = arith.constant dense<0xFF800000> : vector<32xf32>
      %128 = vector.multi_reduction <maximumf>, %127, %cst_37 [1] : vector<32x256xf32> to vector<32xf32>
      %129 = vector.shape_cast %128 : vector<32xf32> to vector<32x1xf32>
      %c14_i32 = arith.constant 14 : i32
      %130 = vector.broadcast %c14_i32 : i32 to vector<1x256xi32>
      %131 = arith.cmpi eq, %17, %130 : vector<1x256xi32>
      %cst_38 = arith.constant 0xFF800000 : f32
      %132 = vector.shape_cast %131 : vector<1x256xi1> to vector<1x256xi1>
      %133 = vector.broadcast %132 : vector<1x256xi1> to vector<32x256xi1>
      %134 = vector.broadcast %cst_38 : f32 to vector<32x256xf32>
      %135 = arith.select %133, %13, %134 : vector<32x256xi1>, vector<32x256xf32>
      %cst_39 = arith.constant dense<0xFF800000> : vector<32xf32>
      %136 = vector.multi_reduction <maximumf>, %135, %cst_39 [1] : vector<32x256xf32> to vector<32xf32>
      %137 = vector.shape_cast %136 : vector<32xf32> to vector<32x1xf32>
      %c15_i32 = arith.constant 15 : i32
      %138 = vector.broadcast %c15_i32 : i32 to vector<1x256xi32>
      %139 = arith.cmpi eq, %17, %138 : vector<1x256xi32>
      %cst_40 = arith.constant 0xFF800000 : f32
      %140 = vector.shape_cast %139 : vector<1x256xi1> to vector<1x256xi1>
      %141 = vector.broadcast %140 : vector<1x256xi1> to vector<32x256xi1>
      %142 = vector.broadcast %cst_40 : f32 to vector<32x256xf32>
      %143 = arith.select %141, %13, %142 : vector<32x256xi1>, vector<32x256xf32>
      %cst_41 = arith.constant dense<0xFF800000> : vector<32xf32>
      %144 = vector.multi_reduction <maximumf>, %143, %cst_41 [1] : vector<32x256xf32> to vector<32xf32>
      %145 = vector.shape_cast %144 : vector<32xf32> to vector<32x1xf32>
      %c16_i32 = arith.constant 16 : i32
      %146 = vector.broadcast %c16_i32 : i32 to vector<1x256xi32>
      %147 = arith.cmpi eq, %17, %146 : vector<1x256xi32>
      %cst_42 = arith.constant 0xFF800000 : f32
      %148 = vector.shape_cast %147 : vector<1x256xi1> to vector<1x256xi1>
      %149 = vector.broadcast %148 : vector<1x256xi1> to vector<32x256xi1>
      %150 = vector.broadcast %cst_42 : f32 to vector<32x256xf32>
      %151 = arith.select %149, %13, %150 : vector<32x256xi1>, vector<32x256xf32>
      %cst_43 = arith.constant dense<0xFF800000> : vector<32xf32>
      %152 = vector.multi_reduction <maximumf>, %151, %cst_43 [1] : vector<32x256xf32> to vector<32xf32>
      %153 = vector.shape_cast %152 : vector<32xf32> to vector<32x1xf32>
      %c17_i32 = arith.constant 17 : i32
      %154 = vector.broadcast %c17_i32 : i32 to vector<1x256xi32>
      %155 = arith.cmpi eq, %17, %154 : vector<1x256xi32>
      %cst_44 = arith.constant 0xFF800000 : f32
      %156 = vector.shape_cast %155 : vector<1x256xi1> to vector<1x256xi1>
      %157 = vector.broadcast %156 : vector<1x256xi1> to vector<32x256xi1>
      %158 = vector.broadcast %cst_44 : f32 to vector<32x256xf32>
      %159 = arith.select %157, %13, %158 : vector<32x256xi1>, vector<32x256xf32>
      %cst_45 = arith.constant dense<0xFF800000> : vector<32xf32>
      %160 = vector.multi_reduction <maximumf>, %159, %cst_45 [1] : vector<32x256xf32> to vector<32xf32>
      %161 = vector.shape_cast %160 : vector<32xf32> to vector<32x1xf32>
      %c18_i32 = arith.constant 18 : i32
      %162 = vector.broadcast %c18_i32 : i32 to vector<1x256xi32>
      %163 = arith.cmpi eq, %17, %162 : vector<1x256xi32>
      %cst_46 = arith.constant 0xFF800000 : f32
      %164 = vector.shape_cast %163 : vector<1x256xi1> to vector<1x256xi1>
      %165 = vector.broadcast %164 : vector<1x256xi1> to vector<32x256xi1>
      %166 = vector.broadcast %cst_46 : f32 to vector<32x256xf32>
      %167 = arith.select %165, %13, %166 : vector<32x256xi1>, vector<32x256xf32>
      %cst_47 = arith.constant dense<0xFF800000> : vector<32xf32>
      %168 = vector.multi_reduction <maximumf>, %167, %cst_47 [1] : vector<32x256xf32> to vector<32xf32>
      %169 = vector.shape_cast %168 : vector<32xf32> to vector<32x1xf32>
      %c19_i32 = arith.constant 19 : i32
      %170 = vector.broadcast %c19_i32 : i32 to vector<1x256xi32>
      %171 = arith.cmpi eq, %17, %170 : vector<1x256xi32>
      %cst_48 = arith.constant 0xFF800000 : f32
      %172 = vector.shape_cast %171 : vector<1x256xi1> to vector<1x256xi1>
      %173 = vector.broadcast %172 : vector<1x256xi1> to vector<32x256xi1>
      %174 = vector.broadcast %cst_48 : f32 to vector<32x256xf32>
      %175 = arith.select %173, %13, %174 : vector<32x256xi1>, vector<32x256xf32>
      %cst_49 = arith.constant dense<0xFF800000> : vector<32xf32>
      %176 = vector.multi_reduction <maximumf>, %175, %cst_49 [1] : vector<32x256xf32> to vector<32xf32>
      %177 = vector.shape_cast %176 : vector<32xf32> to vector<32x1xf32>
      %c20_i32 = arith.constant 20 : i32
      %178 = vector.broadcast %c20_i32 : i32 to vector<1x256xi32>
      %179 = arith.cmpi eq, %17, %178 : vector<1x256xi32>
      %cst_50 = arith.constant 0xFF800000 : f32
      %180 = vector.shape_cast %179 : vector<1x256xi1> to vector<1x256xi1>
      %181 = vector.broadcast %180 : vector<1x256xi1> to vector<32x256xi1>
      %182 = vector.broadcast %cst_50 : f32 to vector<32x256xf32>
      %183 = arith.select %181, %13, %182 : vector<32x256xi1>, vector<32x256xf32>
      %cst_51 = arith.constant dense<0xFF800000> : vector<32xf32>
      %184 = vector.multi_reduction <maximumf>, %183, %cst_51 [1] : vector<32x256xf32> to vector<32xf32>
      %185 = vector.shape_cast %184 : vector<32xf32> to vector<32x1xf32>
      %c21_i32 = arith.constant 21 : i32
      %186 = vector.broadcast %c21_i32 : i32 to vector<1x256xi32>
      %187 = arith.cmpi eq, %17, %186 : vector<1x256xi32>
      %cst_52 = arith.constant 0xFF800000 : f32
      %188 = vector.shape_cast %187 : vector<1x256xi1> to vector<1x256xi1>
      %189 = vector.broadcast %188 : vector<1x256xi1> to vector<32x256xi1>
      %190 = vector.broadcast %cst_52 : f32 to vector<32x256xf32>
      %191 = arith.select %189, %13, %190 : vector<32x256xi1>, vector<32x256xf32>
      %cst_53 = arith.constant dense<0xFF800000> : vector<32xf32>
      %192 = vector.multi_reduction <maximumf>, %191, %cst_53 [1] : vector<32x256xf32> to vector<32xf32>
      %193 = vector.shape_cast %192 : vector<32xf32> to vector<32x1xf32>
      %c22_i32 = arith.constant 22 : i32
      %194 = vector.broadcast %c22_i32 : i32 to vector<1x256xi32>
      %195 = arith.cmpi eq, %17, %194 : vector<1x256xi32>
      %cst_54 = arith.constant 0xFF800000 : f32
      %196 = vector.shape_cast %195 : vector<1x256xi1> to vector<1x256xi1>
      %197 = vector.broadcast %196 : vector<1x256xi1> to vector<32x256xi1>
      %198 = vector.broadcast %cst_54 : f32 to vector<32x256xf32>
      %199 = arith.select %197, %13, %198 : vector<32x256xi1>, vector<32x256xf32>
      %cst_55 = arith.constant dense<0xFF800000> : vector<32xf32>
      %200 = vector.multi_reduction <maximumf>, %199, %cst_55 [1] : vector<32x256xf32> to vector<32xf32>
      %201 = vector.shape_cast %200 : vector<32xf32> to vector<32x1xf32>
      %c23_i32 = arith.constant 23 : i32
      %202 = vector.broadcast %c23_i32 : i32 to vector<1x256xi32>
      %203 = arith.cmpi eq, %17, %202 : vector<1x256xi32>
      %cst_56 = arith.constant 0xFF800000 : f32
      %204 = vector.shape_cast %203 : vector<1x256xi1> to vector<1x256xi1>
      %205 = vector.broadcast %204 : vector<1x256xi1> to vector<32x256xi1>
      %206 = vector.broadcast %cst_56 : f32 to vector<32x256xf32>
      %207 = arith.select %205, %13, %206 : vector<32x256xi1>, vector<32x256xf32>
      %cst_57 = arith.constant dense<0xFF800000> : vector<32xf32>
      %208 = vector.multi_reduction <maximumf>, %207, %cst_57 [1] : vector<32x256xf32> to vector<32xf32>
      %209 = vector.shape_cast %208 : vector<32xf32> to vector<32x1xf32>
      %c24_i32 = arith.constant 24 : i32
      %210 = vector.broadcast %c24_i32 : i32 to vector<1x256xi32>
      %211 = arith.cmpi eq, %17, %210 : vector<1x256xi32>
      %cst_58 = arith.constant 0xFF800000 : f32
      %212 = vector.shape_cast %211 : vector<1x256xi1> to vector<1x256xi1>
      %213 = vector.broadcast %212 : vector<1x256xi1> to vector<32x256xi1>
      %214 = vector.broadcast %cst_58 : f32 to vector<32x256xf32>
      %215 = arith.select %213, %13, %214 : vector<32x256xi1>, vector<32x256xf32>
      %cst_59 = arith.constant dense<0xFF800000> : vector<32xf32>
      %216 = vector.multi_reduction <maximumf>, %215, %cst_59 [1] : vector<32x256xf32> to vector<32xf32>
      %217 = vector.shape_cast %216 : vector<32xf32> to vector<32x1xf32>
      %c25_i32 = arith.constant 25 : i32
      %218 = vector.broadcast %c25_i32 : i32 to vector<1x256xi32>
      %219 = arith.cmpi eq, %17, %218 : vector<1x256xi32>
      %cst_60 = arith.constant 0xFF800000 : f32
      %220 = vector.shape_cast %219 : vector<1x256xi1> to vector<1x256xi1>
      %221 = vector.broadcast %220 : vector<1x256xi1> to vector<32x256xi1>
      %222 = vector.broadcast %cst_60 : f32 to vector<32x256xf32>
      %223 = arith.select %221, %13, %222 : vector<32x256xi1>, vector<32x256xf32>
      %cst_61 = arith.constant dense<0xFF800000> : vector<32xf32>
      %224 = vector.multi_reduction <maximumf>, %223, %cst_61 [1] : vector<32x256xf32> to vector<32xf32>
      %225 = vector.shape_cast %224 : vector<32xf32> to vector<32x1xf32>
      %c26_i32 = arith.constant 26 : i32
      %226 = vector.broadcast %c26_i32 : i32 to vector<1x256xi32>
      %227 = arith.cmpi eq, %17, %226 : vector<1x256xi32>
      %cst_62 = arith.constant 0xFF800000 : f32
      %228 = vector.shape_cast %227 : vector<1x256xi1> to vector<1x256xi1>
      %229 = vector.broadcast %228 : vector<1x256xi1> to vector<32x256xi1>
      %230 = vector.broadcast %cst_62 : f32 to vector<32x256xf32>
      %231 = arith.select %229, %13, %230 : vector<32x256xi1>, vector<32x256xf32>
      %cst_63 = arith.constant dense<0xFF800000> : vector<32xf32>
      %232 = vector.multi_reduction <maximumf>, %231, %cst_63 [1] : vector<32x256xf32> to vector<32xf32>
      %233 = vector.shape_cast %232 : vector<32xf32> to vector<32x1xf32>
      %c27_i32 = arith.constant 27 : i32
      %234 = vector.broadcast %c27_i32 : i32 to vector<1x256xi32>
      %235 = arith.cmpi eq, %17, %234 : vector<1x256xi32>
      %cst_64 = arith.constant 0xFF800000 : f32
      %236 = vector.shape_cast %235 : vector<1x256xi1> to vector<1x256xi1>
      %237 = vector.broadcast %236 : vector<1x256xi1> to vector<32x256xi1>
      %238 = vector.broadcast %cst_64 : f32 to vector<32x256xf32>
      %239 = arith.select %237, %13, %238 : vector<32x256xi1>, vector<32x256xf32>
      %cst_65 = arith.constant dense<0xFF800000> : vector<32xf32>
      %240 = vector.multi_reduction <maximumf>, %239, %cst_65 [1] : vector<32x256xf32> to vector<32xf32>
      %241 = vector.shape_cast %240 : vector<32xf32> to vector<32x1xf32>
      %c28_i32 = arith.constant 28 : i32
      %242 = vector.broadcast %c28_i32 : i32 to vector<1x256xi32>
      %243 = arith.cmpi eq, %17, %242 : vector<1x256xi32>
      %cst_66 = arith.constant 0xFF800000 : f32
      %244 = vector.shape_cast %243 : vector<1x256xi1> to vector<1x256xi1>
      %245 = vector.broadcast %244 : vector<1x256xi1> to vector<32x256xi1>
      %246 = vector.broadcast %cst_66 : f32 to vector<32x256xf32>
      %247 = arith.select %245, %13, %246 : vector<32x256xi1>, vector<32x256xf32>
      %cst_67 = arith.constant dense<0xFF800000> : vector<32xf32>
      %248 = vector.multi_reduction <maximumf>, %247, %cst_67 [1] : vector<32x256xf32> to vector<32xf32>
      %249 = vector.shape_cast %248 : vector<32xf32> to vector<32x1xf32>
      %c29_i32 = arith.constant 29 : i32
      %250 = vector.broadcast %c29_i32 : i32 to vector<1x256xi32>
      %251 = arith.cmpi eq, %17, %250 : vector<1x256xi32>
      %cst_68 = arith.constant 0xFF800000 : f32
      %252 = vector.shape_cast %251 : vector<1x256xi1> to vector<1x256xi1>
      %253 = vector.broadcast %252 : vector<1x256xi1> to vector<32x256xi1>
      %254 = vector.broadcast %cst_68 : f32 to vector<32x256xf32>
      %255 = arith.select %253, %13, %254 : vector<32x256xi1>, vector<32x256xf32>
      %cst_69 = arith.constant dense<0xFF800000> : vector<32xf32>
      %256 = vector.multi_reduction <maximumf>, %255, %cst_69 [1] : vector<32x256xf32> to vector<32xf32>
      %257 = vector.shape_cast %256 : vector<32xf32> to vector<32x1xf32>
      %c30_i32 = arith.constant 30 : i32
      %258 = vector.broadcast %c30_i32 : i32 to vector<1x256xi32>
      %259 = arith.cmpi eq, %17, %258 : vector<1x256xi32>
      %cst_70 = arith.constant 0xFF800000 : f32
      %260 = vector.shape_cast %259 : vector<1x256xi1> to vector<1x256xi1>
      %261 = vector.broadcast %260 : vector<1x256xi1> to vector<32x256xi1>
      %262 = vector.broadcast %cst_70 : f32 to vector<32x256xf32>
      %263 = arith.select %261, %13, %262 : vector<32x256xi1>, vector<32x256xf32>
      %cst_71 = arith.constant dense<0xFF800000> : vector<32xf32>
      %264 = vector.multi_reduction <maximumf>, %263, %cst_71 [1] : vector<32x256xf32> to vector<32xf32>
      %265 = vector.shape_cast %264 : vector<32xf32> to vector<32x1xf32>
      %c31_i32 = arith.constant 31 : i32
      %266 = vector.broadcast %c31_i32 : i32 to vector<1x256xi32>
      %267 = arith.cmpi eq, %17, %266 : vector<1x256xi32>
      %cst_72 = arith.constant 0xFF800000 : f32
      %268 = vector.shape_cast %267 : vector<1x256xi1> to vector<1x256xi1>
      %269 = vector.broadcast %268 : vector<1x256xi1> to vector<32x256xi1>
      %270 = vector.broadcast %cst_72 : f32 to vector<32x256xf32>
      %271 = arith.select %269, %13, %270 : vector<32x256xi1>, vector<32x256xf32>
      %cst_73 = arith.constant dense<0xFF800000> : vector<32xf32>
      %272 = vector.multi_reduction <maximumf>, %271, %cst_73 [1] : vector<32x256xf32> to vector<32xf32>
      %273 = vector.shape_cast %272 : vector<32xf32> to vector<32x1xf32>
      %c32_i32 = arith.constant 32 : i32
      %274 = vector.broadcast %c32_i32 : i32 to vector<1x256xi32>
      %275 = arith.cmpi eq, %17, %274 : vector<1x256xi32>
      %cst_74 = arith.constant 0xFF800000 : f32
      %276 = vector.shape_cast %275 : vector<1x256xi1> to vector<1x256xi1>
      %277 = vector.broadcast %276 : vector<1x256xi1> to vector<32x256xi1>
      %278 = vector.broadcast %cst_74 : f32 to vector<32x256xf32>
      %279 = arith.select %277, %13, %278 : vector<32x256xi1>, vector<32x256xf32>
      %cst_75 = arith.constant dense<0xFF800000> : vector<32xf32>
      %280 = vector.multi_reduction <maximumf>, %279, %cst_75 [1] : vector<32x256xf32> to vector<32xf32>
      %281 = vector.shape_cast %280 : vector<32xf32> to vector<32x1xf32>
      %c33_i32 = arith.constant 33 : i32
      %282 = vector.broadcast %c33_i32 : i32 to vector<1x256xi32>
      %283 = arith.cmpi eq, %17, %282 : vector<1x256xi32>
      %cst_76 = arith.constant 0xFF800000 : f32
      %284 = vector.shape_cast %283 : vector<1x256xi1> to vector<1x256xi1>
      %285 = vector.broadcast %284 : vector<1x256xi1> to vector<32x256xi1>
      %286 = vector.broadcast %cst_76 : f32 to vector<32x256xf32>
      %287 = arith.select %285, %13, %286 : vector<32x256xi1>, vector<32x256xf32>
      %cst_77 = arith.constant dense<0xFF800000> : vector<32xf32>
      %288 = vector.multi_reduction <maximumf>, %287, %cst_77 [1] : vector<32x256xf32> to vector<32xf32>
      %289 = vector.shape_cast %288 : vector<32xf32> to vector<32x1xf32>
      %c34_i32 = arith.constant 34 : i32
      %290 = vector.broadcast %c34_i32 : i32 to vector<1x256xi32>
      %291 = arith.cmpi eq, %17, %290 : vector<1x256xi32>
      %cst_78 = arith.constant 0xFF800000 : f32
      %292 = vector.shape_cast %291 : vector<1x256xi1> to vector<1x256xi1>
      %293 = vector.broadcast %292 : vector<1x256xi1> to vector<32x256xi1>
      %294 = vector.broadcast %cst_78 : f32 to vector<32x256xf32>
      %295 = arith.select %293, %13, %294 : vector<32x256xi1>, vector<32x256xf32>
      %cst_79 = arith.constant dense<0xFF800000> : vector<32xf32>
      %296 = vector.multi_reduction <maximumf>, %295, %cst_79 [1] : vector<32x256xf32> to vector<32xf32>
      %297 = vector.shape_cast %296 : vector<32xf32> to vector<32x1xf32>
      %c35_i32 = arith.constant 35 : i32
      %298 = vector.broadcast %c35_i32 : i32 to vector<1x256xi32>
      %299 = arith.cmpi eq, %17, %298 : vector<1x256xi32>
      %cst_80 = arith.constant 0xFF800000 : f32
      %300 = vector.shape_cast %299 : vector<1x256xi1> to vector<1x256xi1>
      %301 = vector.broadcast %300 : vector<1x256xi1> to vector<32x256xi1>
      %302 = vector.broadcast %cst_80 : f32 to vector<32x256xf32>
      %303 = arith.select %301, %13, %302 : vector<32x256xi1>, vector<32x256xf32>
      %cst_81 = arith.constant dense<0xFF800000> : vector<32xf32>
      %304 = vector.multi_reduction <maximumf>, %303, %cst_81 [1] : vector<32x256xf32> to vector<32xf32>
      %305 = vector.shape_cast %304 : vector<32xf32> to vector<32x1xf32>
      %c36_i32 = arith.constant 36 : i32
      %306 = vector.broadcast %c36_i32 : i32 to vector<1x256xi32>
      %307 = arith.cmpi eq, %17, %306 : vector<1x256xi32>
      %cst_82 = arith.constant 0xFF800000 : f32
      %308 = vector.shape_cast %307 : vector<1x256xi1> to vector<1x256xi1>
      %309 = vector.broadcast %308 : vector<1x256xi1> to vector<32x256xi1>
      %310 = vector.broadcast %cst_82 : f32 to vector<32x256xf32>
      %311 = arith.select %309, %13, %310 : vector<32x256xi1>, vector<32x256xf32>
      %cst_83 = arith.constant dense<0xFF800000> : vector<32xf32>
      %312 = vector.multi_reduction <maximumf>, %311, %cst_83 [1] : vector<32x256xf32> to vector<32xf32>
      %313 = vector.shape_cast %312 : vector<32xf32> to vector<32x1xf32>
      %c37_i32 = arith.constant 37 : i32
      %314 = vector.broadcast %c37_i32 : i32 to vector<1x256xi32>
      %315 = arith.cmpi eq, %17, %314 : vector<1x256xi32>
      %cst_84 = arith.constant 0xFF800000 : f32
      %316 = vector.shape_cast %315 : vector<1x256xi1> to vector<1x256xi1>
      %317 = vector.broadcast %316 : vector<1x256xi1> to vector<32x256xi1>
      %318 = vector.broadcast %cst_84 : f32 to vector<32x256xf32>
      %319 = arith.select %317, %13, %318 : vector<32x256xi1>, vector<32x256xf32>
      %cst_85 = arith.constant dense<0xFF800000> : vector<32xf32>
      %320 = vector.multi_reduction <maximumf>, %319, %cst_85 [1] : vector<32x256xf32> to vector<32xf32>
      %321 = vector.shape_cast %320 : vector<32xf32> to vector<32x1xf32>
      %c38_i32 = arith.constant 38 : i32
      %322 = vector.broadcast %c38_i32 : i32 to vector<1x256xi32>
      %323 = arith.cmpi eq, %17, %322 : vector<1x256xi32>
      %cst_86 = arith.constant 0xFF800000 : f32
      %324 = vector.shape_cast %323 : vector<1x256xi1> to vector<1x256xi1>
      %325 = vector.broadcast %324 : vector<1x256xi1> to vector<32x256xi1>
      %326 = vector.broadcast %cst_86 : f32 to vector<32x256xf32>
      %327 = arith.select %325, %13, %326 : vector<32x256xi1>, vector<32x256xf32>
      %cst_87 = arith.constant dense<0xFF800000> : vector<32xf32>
      %328 = vector.multi_reduction <maximumf>, %327, %cst_87 [1] : vector<32x256xf32> to vector<32xf32>
      %329 = vector.shape_cast %328 : vector<32xf32> to vector<32x1xf32>
      %c39_i32 = arith.constant 39 : i32
      %330 = vector.broadcast %c39_i32 : i32 to vector<1x256xi32>
      %331 = arith.cmpi eq, %17, %330 : vector<1x256xi32>
      %cst_88 = arith.constant 0xFF800000 : f32
      %332 = vector.shape_cast %331 : vector<1x256xi1> to vector<1x256xi1>
      %333 = vector.broadcast %332 : vector<1x256xi1> to vector<32x256xi1>
      %334 = vector.broadcast %cst_88 : f32 to vector<32x256xf32>
      %335 = arith.select %333, %13, %334 : vector<32x256xi1>, vector<32x256xf32>
      %cst_89 = arith.constant dense<0xFF800000> : vector<32xf32>
      %336 = vector.multi_reduction <maximumf>, %335, %cst_89 [1] : vector<32x256xf32> to vector<32xf32>
      %337 = vector.shape_cast %336 : vector<32xf32> to vector<32x1xf32>
      %c40_i32 = arith.constant 40 : i32
      %338 = vector.broadcast %c40_i32 : i32 to vector<1x256xi32>
      %339 = arith.cmpi eq, %17, %338 : vector<1x256xi32>
      %cst_90 = arith.constant 0xFF800000 : f32
      %340 = vector.shape_cast %339 : vector<1x256xi1> to vector<1x256xi1>
      %341 = vector.broadcast %340 : vector<1x256xi1> to vector<32x256xi1>
      %342 = vector.broadcast %cst_90 : f32 to vector<32x256xf32>
      %343 = arith.select %341, %13, %342 : vector<32x256xi1>, vector<32x256xf32>
      %cst_91 = arith.constant dense<0xFF800000> : vector<32xf32>
      %344 = vector.multi_reduction <maximumf>, %343, %cst_91 [1] : vector<32x256xf32> to vector<32xf32>
      %345 = vector.shape_cast %344 : vector<32xf32> to vector<32x1xf32>
      %c41_i32 = arith.constant 41 : i32
      %346 = vector.broadcast %c41_i32 : i32 to vector<1x256xi32>
      %347 = arith.cmpi eq, %17, %346 : vector<1x256xi32>
      %cst_92 = arith.constant 0xFF800000 : f32
      %348 = vector.shape_cast %347 : vector<1x256xi1> to vector<1x256xi1>
      %349 = vector.broadcast %348 : vector<1x256xi1> to vector<32x256xi1>
      %350 = vector.broadcast %cst_92 : f32 to vector<32x256xf32>
      %351 = arith.select %349, %13, %350 : vector<32x256xi1>, vector<32x256xf32>
      %cst_93 = arith.constant dense<0xFF800000> : vector<32xf32>
      %352 = vector.multi_reduction <maximumf>, %351, %cst_93 [1] : vector<32x256xf32> to vector<32xf32>
      %353 = vector.shape_cast %352 : vector<32xf32> to vector<32x1xf32>
      %c42_i32 = arith.constant 42 : i32
      %354 = vector.broadcast %c42_i32 : i32 to vector<1x256xi32>
      %355 = arith.cmpi eq, %17, %354 : vector<1x256xi32>
      %cst_94 = arith.constant 0xFF800000 : f32
      %356 = vector.shape_cast %355 : vector<1x256xi1> to vector<1x256xi1>
      %357 = vector.broadcast %356 : vector<1x256xi1> to vector<32x256xi1>
      %358 = vector.broadcast %cst_94 : f32 to vector<32x256xf32>
      %359 = arith.select %357, %13, %358 : vector<32x256xi1>, vector<32x256xf32>
      %cst_95 = arith.constant dense<0xFF800000> : vector<32xf32>
      %360 = vector.multi_reduction <maximumf>, %359, %cst_95 [1] : vector<32x256xf32> to vector<32xf32>
      %361 = vector.shape_cast %360 : vector<32xf32> to vector<32x1xf32>
      %c43_i32 = arith.constant 43 : i32
      %362 = vector.broadcast %c43_i32 : i32 to vector<1x256xi32>
      %363 = arith.cmpi eq, %17, %362 : vector<1x256xi32>
      %cst_96 = arith.constant 0xFF800000 : f32
      %364 = vector.shape_cast %363 : vector<1x256xi1> to vector<1x256xi1>
      %365 = vector.broadcast %364 : vector<1x256xi1> to vector<32x256xi1>
      %366 = vector.broadcast %cst_96 : f32 to vector<32x256xf32>
      %367 = arith.select %365, %13, %366 : vector<32x256xi1>, vector<32x256xf32>
      %cst_97 = arith.constant dense<0xFF800000> : vector<32xf32>
      %368 = vector.multi_reduction <maximumf>, %367, %cst_97 [1] : vector<32x256xf32> to vector<32xf32>
      %369 = vector.shape_cast %368 : vector<32xf32> to vector<32x1xf32>
      %c44_i32 = arith.constant 44 : i32
      %370 = vector.broadcast %c44_i32 : i32 to vector<1x256xi32>
      %371 = arith.cmpi eq, %17, %370 : vector<1x256xi32>
      %cst_98 = arith.constant 0xFF800000 : f32
      %372 = vector.shape_cast %371 : vector<1x256xi1> to vector<1x256xi1>
      %373 = vector.broadcast %372 : vector<1x256xi1> to vector<32x256xi1>
      %374 = vector.broadcast %cst_98 : f32 to vector<32x256xf32>
      %375 = arith.select %373, %13, %374 : vector<32x256xi1>, vector<32x256xf32>
      %cst_99 = arith.constant dense<0xFF800000> : vector<32xf32>
      %376 = vector.multi_reduction <maximumf>, %375, %cst_99 [1] : vector<32x256xf32> to vector<32xf32>
      %377 = vector.shape_cast %376 : vector<32xf32> to vector<32x1xf32>
      %c45_i32 = arith.constant 45 : i32
      %378 = vector.broadcast %c45_i32 : i32 to vector<1x256xi32>
      %379 = arith.cmpi eq, %17, %378 : vector<1x256xi32>
      %cst_100 = arith.constant 0xFF800000 : f32
      %380 = vector.shape_cast %379 : vector<1x256xi1> to vector<1x256xi1>
      %381 = vector.broadcast %380 : vector<1x256xi1> to vector<32x256xi1>
      %382 = vector.broadcast %cst_100 : f32 to vector<32x256xf32>
      %383 = arith.select %381, %13, %382 : vector<32x256xi1>, vector<32x256xf32>
      %cst_101 = arith.constant dense<0xFF800000> : vector<32xf32>
      %384 = vector.multi_reduction <maximumf>, %383, %cst_101 [1] : vector<32x256xf32> to vector<32xf32>
      %385 = vector.shape_cast %384 : vector<32xf32> to vector<32x1xf32>
      %c46_i32 = arith.constant 46 : i32
      %386 = vector.broadcast %c46_i32 : i32 to vector<1x256xi32>
      %387 = arith.cmpi eq, %17, %386 : vector<1x256xi32>
      %cst_102 = arith.constant 0xFF800000 : f32
      %388 = vector.shape_cast %387 : vector<1x256xi1> to vector<1x256xi1>
      %389 = vector.broadcast %388 : vector<1x256xi1> to vector<32x256xi1>
      %390 = vector.broadcast %cst_102 : f32 to vector<32x256xf32>
      %391 = arith.select %389, %13, %390 : vector<32x256xi1>, vector<32x256xf32>
      %cst_103 = arith.constant dense<0xFF800000> : vector<32xf32>
      %392 = vector.multi_reduction <maximumf>, %391, %cst_103 [1] : vector<32x256xf32> to vector<32xf32>
      %393 = vector.shape_cast %392 : vector<32xf32> to vector<32x1xf32>
      %c47_i32 = arith.constant 47 : i32
      %394 = vector.broadcast %c47_i32 : i32 to vector<1x256xi32>
      %395 = arith.cmpi eq, %17, %394 : vector<1x256xi32>
      %cst_104 = arith.constant 0xFF800000 : f32
      %396 = vector.shape_cast %395 : vector<1x256xi1> to vector<1x256xi1>
      %397 = vector.broadcast %396 : vector<1x256xi1> to vector<32x256xi1>
      %398 = vector.broadcast %cst_104 : f32 to vector<32x256xf32>
      %399 = arith.select %397, %13, %398 : vector<32x256xi1>, vector<32x256xf32>
      %cst_105 = arith.constant dense<0xFF800000> : vector<32xf32>
      %400 = vector.multi_reduction <maximumf>, %399, %cst_105 [1] : vector<32x256xf32> to vector<32xf32>
      %401 = vector.shape_cast %400 : vector<32xf32> to vector<32x1xf32>
      %c48_i32 = arith.constant 48 : i32
      %402 = vector.broadcast %c48_i32 : i32 to vector<1x256xi32>
      %403 = arith.cmpi eq, %17, %402 : vector<1x256xi32>
      %cst_106 = arith.constant 0xFF800000 : f32
      %404 = vector.shape_cast %403 : vector<1x256xi1> to vector<1x256xi1>
      %405 = vector.broadcast %404 : vector<1x256xi1> to vector<32x256xi1>
      %406 = vector.broadcast %cst_106 : f32 to vector<32x256xf32>
      %407 = arith.select %405, %13, %406 : vector<32x256xi1>, vector<32x256xf32>
      %cst_107 = arith.constant dense<0xFF800000> : vector<32xf32>
      %408 = vector.multi_reduction <maximumf>, %407, %cst_107 [1] : vector<32x256xf32> to vector<32xf32>
      %409 = vector.shape_cast %408 : vector<32xf32> to vector<32x1xf32>
      %c49_i32 = arith.constant 49 : i32
      %410 = vector.broadcast %c49_i32 : i32 to vector<1x256xi32>
      %411 = arith.cmpi eq, %17, %410 : vector<1x256xi32>
      %cst_108 = arith.constant 0xFF800000 : f32
      %412 = vector.shape_cast %411 : vector<1x256xi1> to vector<1x256xi1>
      %413 = vector.broadcast %412 : vector<1x256xi1> to vector<32x256xi1>
      %414 = vector.broadcast %cst_108 : f32 to vector<32x256xf32>
      %415 = arith.select %413, %13, %414 : vector<32x256xi1>, vector<32x256xf32>
      %cst_109 = arith.constant dense<0xFF800000> : vector<32xf32>
      %416 = vector.multi_reduction <maximumf>, %415, %cst_109 [1] : vector<32x256xf32> to vector<32xf32>
      %417 = vector.shape_cast %416 : vector<32xf32> to vector<32x1xf32>
      %c50_i32 = arith.constant 50 : i32
      %418 = vector.broadcast %c50_i32 : i32 to vector<1x256xi32>
      %419 = arith.cmpi eq, %17, %418 : vector<1x256xi32>
      %cst_110 = arith.constant 0xFF800000 : f32
      %420 = vector.shape_cast %419 : vector<1x256xi1> to vector<1x256xi1>
      %421 = vector.broadcast %420 : vector<1x256xi1> to vector<32x256xi1>
      %422 = vector.broadcast %cst_110 : f32 to vector<32x256xf32>
      %423 = arith.select %421, %13, %422 : vector<32x256xi1>, vector<32x256xf32>
      %cst_111 = arith.constant dense<0xFF800000> : vector<32xf32>
      %424 = vector.multi_reduction <maximumf>, %423, %cst_111 [1] : vector<32x256xf32> to vector<32xf32>
      %425 = vector.shape_cast %424 : vector<32xf32> to vector<32x1xf32>
      %c51_i32 = arith.constant 51 : i32
      %426 = vector.broadcast %c51_i32 : i32 to vector<1x256xi32>
      %427 = arith.cmpi eq, %17, %426 : vector<1x256xi32>
      %cst_112 = arith.constant 0xFF800000 : f32
      %428 = vector.shape_cast %427 : vector<1x256xi1> to vector<1x256xi1>
      %429 = vector.broadcast %428 : vector<1x256xi1> to vector<32x256xi1>
      %430 = vector.broadcast %cst_112 : f32 to vector<32x256xf32>
      %431 = arith.select %429, %13, %430 : vector<32x256xi1>, vector<32x256xf32>
      %cst_113 = arith.constant dense<0xFF800000> : vector<32xf32>
      %432 = vector.multi_reduction <maximumf>, %431, %cst_113 [1] : vector<32x256xf32> to vector<32xf32>
      %433 = vector.shape_cast %432 : vector<32xf32> to vector<32x1xf32>
      %c52_i32 = arith.constant 52 : i32
      %434 = vector.broadcast %c52_i32 : i32 to vector<1x256xi32>
      %435 = arith.cmpi eq, %17, %434 : vector<1x256xi32>
      %cst_114 = arith.constant 0xFF800000 : f32
      %436 = vector.shape_cast %435 : vector<1x256xi1> to vector<1x256xi1>
      %437 = vector.broadcast %436 : vector<1x256xi1> to vector<32x256xi1>
      %438 = vector.broadcast %cst_114 : f32 to vector<32x256xf32>
      %439 = arith.select %437, %13, %438 : vector<32x256xi1>, vector<32x256xf32>
      %cst_115 = arith.constant dense<0xFF800000> : vector<32xf32>
      %440 = vector.multi_reduction <maximumf>, %439, %cst_115 [1] : vector<32x256xf32> to vector<32xf32>
      %441 = vector.shape_cast %440 : vector<32xf32> to vector<32x1xf32>
      %c53_i32 = arith.constant 53 : i32
      %442 = vector.broadcast %c53_i32 : i32 to vector<1x256xi32>
      %443 = arith.cmpi eq, %17, %442 : vector<1x256xi32>
      %cst_116 = arith.constant 0xFF800000 : f32
      %444 = vector.shape_cast %443 : vector<1x256xi1> to vector<1x256xi1>
      %445 = vector.broadcast %444 : vector<1x256xi1> to vector<32x256xi1>
      %446 = vector.broadcast %cst_116 : f32 to vector<32x256xf32>
      %447 = arith.select %445, %13, %446 : vector<32x256xi1>, vector<32x256xf32>
      %cst_117 = arith.constant dense<0xFF800000> : vector<32xf32>
      %448 = vector.multi_reduction <maximumf>, %447, %cst_117 [1] : vector<32x256xf32> to vector<32xf32>
      %449 = vector.shape_cast %448 : vector<32xf32> to vector<32x1xf32>
      %c54_i32 = arith.constant 54 : i32
      %450 = vector.broadcast %c54_i32 : i32 to vector<1x256xi32>
      %451 = arith.cmpi eq, %17, %450 : vector<1x256xi32>
      %cst_118 = arith.constant 0xFF800000 : f32
      %452 = vector.shape_cast %451 : vector<1x256xi1> to vector<1x256xi1>
      %453 = vector.broadcast %452 : vector<1x256xi1> to vector<32x256xi1>
      %454 = vector.broadcast %cst_118 : f32 to vector<32x256xf32>
      %455 = arith.select %453, %13, %454 : vector<32x256xi1>, vector<32x256xf32>
      %cst_119 = arith.constant dense<0xFF800000> : vector<32xf32>
      %456 = vector.multi_reduction <maximumf>, %455, %cst_119 [1] : vector<32x256xf32> to vector<32xf32>
      %457 = vector.shape_cast %456 : vector<32xf32> to vector<32x1xf32>
      %c55_i32 = arith.constant 55 : i32
      %458 = vector.broadcast %c55_i32 : i32 to vector<1x256xi32>
      %459 = arith.cmpi eq, %17, %458 : vector<1x256xi32>
      %cst_120 = arith.constant 0xFF800000 : f32
      %460 = vector.shape_cast %459 : vector<1x256xi1> to vector<1x256xi1>
      %461 = vector.broadcast %460 : vector<1x256xi1> to vector<32x256xi1>
      %462 = vector.broadcast %cst_120 : f32 to vector<32x256xf32>
      %463 = arith.select %461, %13, %462 : vector<32x256xi1>, vector<32x256xf32>
      %cst_121 = arith.constant dense<0xFF800000> : vector<32xf32>
      %464 = vector.multi_reduction <maximumf>, %463, %cst_121 [1] : vector<32x256xf32> to vector<32xf32>
      %465 = vector.shape_cast %464 : vector<32xf32> to vector<32x1xf32>
      %c56_i32 = arith.constant 56 : i32
      %466 = vector.broadcast %c56_i32 : i32 to vector<1x256xi32>
      %467 = arith.cmpi eq, %17, %466 : vector<1x256xi32>
      %cst_122 = arith.constant 0xFF800000 : f32
      %468 = vector.shape_cast %467 : vector<1x256xi1> to vector<1x256xi1>
      %469 = vector.broadcast %468 : vector<1x256xi1> to vector<32x256xi1>
      %470 = vector.broadcast %cst_122 : f32 to vector<32x256xf32>
      %471 = arith.select %469, %13, %470 : vector<32x256xi1>, vector<32x256xf32>
      %cst_123 = arith.constant dense<0xFF800000> : vector<32xf32>
      %472 = vector.multi_reduction <maximumf>, %471, %cst_123 [1] : vector<32x256xf32> to vector<32xf32>
      %473 = vector.shape_cast %472 : vector<32xf32> to vector<32x1xf32>
      %c57_i32 = arith.constant 57 : i32
      %474 = vector.broadcast %c57_i32 : i32 to vector<1x256xi32>
      %475 = arith.cmpi eq, %17, %474 : vector<1x256xi32>
      %cst_124 = arith.constant 0xFF800000 : f32
      %476 = vector.shape_cast %475 : vector<1x256xi1> to vector<1x256xi1>
      %477 = vector.broadcast %476 : vector<1x256xi1> to vector<32x256xi1>
      %478 = vector.broadcast %cst_124 : f32 to vector<32x256xf32>
      %479 = arith.select %477, %13, %478 : vector<32x256xi1>, vector<32x256xf32>
      %cst_125 = arith.constant dense<0xFF800000> : vector<32xf32>
      %480 = vector.multi_reduction <maximumf>, %479, %cst_125 [1] : vector<32x256xf32> to vector<32xf32>
      %481 = vector.shape_cast %480 : vector<32xf32> to vector<32x1xf32>
      %c58_i32 = arith.constant 58 : i32
      %482 = vector.broadcast %c58_i32 : i32 to vector<1x256xi32>
      %483 = arith.cmpi eq, %17, %482 : vector<1x256xi32>
      %cst_126 = arith.constant 0xFF800000 : f32
      %484 = vector.shape_cast %483 : vector<1x256xi1> to vector<1x256xi1>
      %485 = vector.broadcast %484 : vector<1x256xi1> to vector<32x256xi1>
      %486 = vector.broadcast %cst_126 : f32 to vector<32x256xf32>
      %487 = arith.select %485, %13, %486 : vector<32x256xi1>, vector<32x256xf32>
      %cst_127 = arith.constant dense<0xFF800000> : vector<32xf32>
      %488 = vector.multi_reduction <maximumf>, %487, %cst_127 [1] : vector<32x256xf32> to vector<32xf32>
      %489 = vector.shape_cast %488 : vector<32xf32> to vector<32x1xf32>
      %c59_i32 = arith.constant 59 : i32
      %490 = vector.broadcast %c59_i32 : i32 to vector<1x256xi32>
      %491 = arith.cmpi eq, %17, %490 : vector<1x256xi32>
      %cst_128 = arith.constant 0xFF800000 : f32
      %492 = vector.shape_cast %491 : vector<1x256xi1> to vector<1x256xi1>
      %493 = vector.broadcast %492 : vector<1x256xi1> to vector<32x256xi1>
      %494 = vector.broadcast %cst_128 : f32 to vector<32x256xf32>
      %495 = arith.select %493, %13, %494 : vector<32x256xi1>, vector<32x256xf32>
      %cst_129 = arith.constant dense<0xFF800000> : vector<32xf32>
      %496 = vector.multi_reduction <maximumf>, %495, %cst_129 [1] : vector<32x256xf32> to vector<32xf32>
      %497 = vector.shape_cast %496 : vector<32xf32> to vector<32x1xf32>
      %c60_i32 = arith.constant 60 : i32
      %498 = vector.broadcast %c60_i32 : i32 to vector<1x256xi32>
      %499 = arith.cmpi eq, %17, %498 : vector<1x256xi32>
      %cst_130 = arith.constant 0xFF800000 : f32
      %500 = vector.shape_cast %499 : vector<1x256xi1> to vector<1x256xi1>
      %501 = vector.broadcast %500 : vector<1x256xi1> to vector<32x256xi1>
      %502 = vector.broadcast %cst_130 : f32 to vector<32x256xf32>
      %503 = arith.select %501, %13, %502 : vector<32x256xi1>, vector<32x256xf32>
      %cst_131 = arith.constant dense<0xFF800000> : vector<32xf32>
      %504 = vector.multi_reduction <maximumf>, %503, %cst_131 [1] : vector<32x256xf32> to vector<32xf32>
      %505 = vector.shape_cast %504 : vector<32xf32> to vector<32x1xf32>
      %c61_i32 = arith.constant 61 : i32
      %506 = vector.broadcast %c61_i32 : i32 to vector<1x256xi32>
      %507 = arith.cmpi eq, %17, %506 : vector<1x256xi32>
      %cst_132 = arith.constant 0xFF800000 : f32
      %508 = vector.shape_cast %507 : vector<1x256xi1> to vector<1x256xi1>
      %509 = vector.broadcast %508 : vector<1x256xi1> to vector<32x256xi1>
      %510 = vector.broadcast %cst_132 : f32 to vector<32x256xf32>
      %511 = arith.select %509, %13, %510 : vector<32x256xi1>, vector<32x256xf32>
      %cst_133 = arith.constant dense<0xFF800000> : vector<32xf32>
      %512 = vector.multi_reduction <maximumf>, %511, %cst_133 [1] : vector<32x256xf32> to vector<32xf32>
      %513 = vector.shape_cast %512 : vector<32xf32> to vector<32x1xf32>
      %c62_i32 = arith.constant 62 : i32
      %514 = vector.broadcast %c62_i32 : i32 to vector<1x256xi32>
      %515 = arith.cmpi eq, %17, %514 : vector<1x256xi32>
      %cst_134 = arith.constant 0xFF800000 : f32
      %516 = vector.shape_cast %515 : vector<1x256xi1> to vector<1x256xi1>
      %517 = vector.broadcast %516 : vector<1x256xi1> to vector<32x256xi1>
      %518 = vector.broadcast %cst_134 : f32 to vector<32x256xf32>
      %519 = arith.select %517, %13, %518 : vector<32x256xi1>, vector<32x256xf32>
      %cst_135 = arith.constant dense<0xFF800000> : vector<32xf32>
      %520 = vector.multi_reduction <maximumf>, %519, %cst_135 [1] : vector<32x256xf32> to vector<32xf32>
      %521 = vector.shape_cast %520 : vector<32xf32> to vector<32x1xf32>
      %c63_i32 = arith.constant 63 : i32
      %522 = vector.broadcast %c63_i32 : i32 to vector<1x256xi32>
      %523 = arith.cmpi eq, %17, %522 : vector<1x256xi32>
      %cst_136 = arith.constant 0xFF800000 : f32
      %524 = vector.shape_cast %523 : vector<1x256xi1> to vector<1x256xi1>
      %525 = vector.broadcast %524 : vector<1x256xi1> to vector<32x256xi1>
      %526 = vector.broadcast %cst_136 : f32 to vector<32x256xf32>
      %527 = arith.select %525, %13, %526 : vector<32x256xi1>, vector<32x256xf32>
      %cst_137 = arith.constant dense<0xFF800000> : vector<32xf32>
      %528 = vector.multi_reduction <maximumf>, %527, %cst_137 [1] : vector<32x256xf32> to vector<32xf32>
      %529 = vector.shape_cast %528 : vector<32xf32> to vector<32x1xf32>
      %c64_i32 = arith.constant 64 : i32
      %530 = vector.broadcast %c64_i32 : i32 to vector<1x256xi32>
      %531 = arith.cmpi eq, %17, %530 : vector<1x256xi32>
      %cst_138 = arith.constant 0xFF800000 : f32
      %532 = vector.shape_cast %531 : vector<1x256xi1> to vector<1x256xi1>
      %533 = vector.broadcast %532 : vector<1x256xi1> to vector<32x256xi1>
      %534 = vector.broadcast %cst_138 : f32 to vector<32x256xf32>
      %535 = arith.select %533, %13, %534 : vector<32x256xi1>, vector<32x256xf32>
      %cst_139 = arith.constant dense<0xFF800000> : vector<32xf32>
      %536 = vector.multi_reduction <maximumf>, %535, %cst_139 [1] : vector<32x256xf32> to vector<32xf32>
      %537 = vector.shape_cast %536 : vector<32xf32> to vector<32x1xf32>
      %c65_i32 = arith.constant 65 : i32
      %538 = vector.broadcast %c65_i32 : i32 to vector<1x256xi32>
      %539 = arith.cmpi eq, %17, %538 : vector<1x256xi32>
      %cst_140 = arith.constant 0xFF800000 : f32
      %540 = vector.shape_cast %539 : vector<1x256xi1> to vector<1x256xi1>
      %541 = vector.broadcast %540 : vector<1x256xi1> to vector<32x256xi1>
      %542 = vector.broadcast %cst_140 : f32 to vector<32x256xf32>
      %543 = arith.select %541, %13, %542 : vector<32x256xi1>, vector<32x256xf32>
      %cst_141 = arith.constant dense<0xFF800000> : vector<32xf32>
      %544 = vector.multi_reduction <maximumf>, %543, %cst_141 [1] : vector<32x256xf32> to vector<32xf32>
      %545 = vector.shape_cast %544 : vector<32xf32> to vector<32x1xf32>
      %c66_i32 = arith.constant 66 : i32
      %546 = vector.broadcast %c66_i32 : i32 to vector<1x256xi32>
      %547 = arith.cmpi eq, %17, %546 : vector<1x256xi32>
      %cst_142 = arith.constant 0xFF800000 : f32
      %548 = vector.shape_cast %547 : vector<1x256xi1> to vector<1x256xi1>
      %549 = vector.broadcast %548 : vector<1x256xi1> to vector<32x256xi1>
      %550 = vector.broadcast %cst_142 : f32 to vector<32x256xf32>
      %551 = arith.select %549, %13, %550 : vector<32x256xi1>, vector<32x256xf32>
      %cst_143 = arith.constant dense<0xFF800000> : vector<32xf32>
      %552 = vector.multi_reduction <maximumf>, %551, %cst_143 [1] : vector<32x256xf32> to vector<32xf32>
      %553 = vector.shape_cast %552 : vector<32xf32> to vector<32x1xf32>
      %c67_i32 = arith.constant 67 : i32
      %554 = vector.broadcast %c67_i32 : i32 to vector<1x256xi32>
      %555 = arith.cmpi eq, %17, %554 : vector<1x256xi32>
      %cst_144 = arith.constant 0xFF800000 : f32
      %556 = vector.shape_cast %555 : vector<1x256xi1> to vector<1x256xi1>
      %557 = vector.broadcast %556 : vector<1x256xi1> to vector<32x256xi1>
      %558 = vector.broadcast %cst_144 : f32 to vector<32x256xf32>
      %559 = arith.select %557, %13, %558 : vector<32x256xi1>, vector<32x256xf32>
      %cst_145 = arith.constant dense<0xFF800000> : vector<32xf32>
      %560 = vector.multi_reduction <maximumf>, %559, %cst_145 [1] : vector<32x256xf32> to vector<32xf32>
      %561 = vector.shape_cast %560 : vector<32xf32> to vector<32x1xf32>
      %c68_i32 = arith.constant 68 : i32
      %562 = vector.broadcast %c68_i32 : i32 to vector<1x256xi32>
      %563 = arith.cmpi eq, %17, %562 : vector<1x256xi32>
      %cst_146 = arith.constant 0xFF800000 : f32
      %564 = vector.shape_cast %563 : vector<1x256xi1> to vector<1x256xi1>
      %565 = vector.broadcast %564 : vector<1x256xi1> to vector<32x256xi1>
      %566 = vector.broadcast %cst_146 : f32 to vector<32x256xf32>
      %567 = arith.select %565, %13, %566 : vector<32x256xi1>, vector<32x256xf32>
      %cst_147 = arith.constant dense<0xFF800000> : vector<32xf32>
      %568 = vector.multi_reduction <maximumf>, %567, %cst_147 [1] : vector<32x256xf32> to vector<32xf32>
      %569 = vector.shape_cast %568 : vector<32xf32> to vector<32x1xf32>
      %c69_i32 = arith.constant 69 : i32
      %570 = vector.broadcast %c69_i32 : i32 to vector<1x256xi32>
      %571 = arith.cmpi eq, %17, %570 : vector<1x256xi32>
      %cst_148 = arith.constant 0xFF800000 : f32
      %572 = vector.shape_cast %571 : vector<1x256xi1> to vector<1x256xi1>
      %573 = vector.broadcast %572 : vector<1x256xi1> to vector<32x256xi1>
      %574 = vector.broadcast %cst_148 : f32 to vector<32x256xf32>
      %575 = arith.select %573, %13, %574 : vector<32x256xi1>, vector<32x256xf32>
      %cst_149 = arith.constant dense<0xFF800000> : vector<32xf32>
      %576 = vector.multi_reduction <maximumf>, %575, %cst_149 [1] : vector<32x256xf32> to vector<32xf32>
      %577 = vector.shape_cast %576 : vector<32xf32> to vector<32x1xf32>
      %c70_i32 = arith.constant 70 : i32
      %578 = vector.broadcast %c70_i32 : i32 to vector<1x256xi32>
      %579 = arith.cmpi eq, %17, %578 : vector<1x256xi32>
      %cst_150 = arith.constant 0xFF800000 : f32
      %580 = vector.shape_cast %579 : vector<1x256xi1> to vector<1x256xi1>
      %581 = vector.broadcast %580 : vector<1x256xi1> to vector<32x256xi1>
      %582 = vector.broadcast %cst_150 : f32 to vector<32x256xf32>
      %583 = arith.select %581, %13, %582 : vector<32x256xi1>, vector<32x256xf32>
      %cst_151 = arith.constant dense<0xFF800000> : vector<32xf32>
      %584 = vector.multi_reduction <maximumf>, %583, %cst_151 [1] : vector<32x256xf32> to vector<32xf32>
      %585 = vector.shape_cast %584 : vector<32xf32> to vector<32x1xf32>
      %c71_i32 = arith.constant 71 : i32
      %586 = vector.broadcast %c71_i32 : i32 to vector<1x256xi32>
      %587 = arith.cmpi eq, %17, %586 : vector<1x256xi32>
      %cst_152 = arith.constant 0xFF800000 : f32
      %588 = vector.shape_cast %587 : vector<1x256xi1> to vector<1x256xi1>
      %589 = vector.broadcast %588 : vector<1x256xi1> to vector<32x256xi1>
      %590 = vector.broadcast %cst_152 : f32 to vector<32x256xf32>
      %591 = arith.select %589, %13, %590 : vector<32x256xi1>, vector<32x256xf32>
      %cst_153 = arith.constant dense<0xFF800000> : vector<32xf32>
      %592 = vector.multi_reduction <maximumf>, %591, %cst_153 [1] : vector<32x256xf32> to vector<32xf32>
      %593 = vector.shape_cast %592 : vector<32xf32> to vector<32x1xf32>
      %c72_i32 = arith.constant 72 : i32
      %594 = vector.broadcast %c72_i32 : i32 to vector<1x256xi32>
      %595 = arith.cmpi eq, %17, %594 : vector<1x256xi32>
      %cst_154 = arith.constant 0xFF800000 : f32
      %596 = vector.shape_cast %595 : vector<1x256xi1> to vector<1x256xi1>
      %597 = vector.broadcast %596 : vector<1x256xi1> to vector<32x256xi1>
      %598 = vector.broadcast %cst_154 : f32 to vector<32x256xf32>
      %599 = arith.select %597, %13, %598 : vector<32x256xi1>, vector<32x256xf32>
      %cst_155 = arith.constant dense<0xFF800000> : vector<32xf32>
      %600 = vector.multi_reduction <maximumf>, %599, %cst_155 [1] : vector<32x256xf32> to vector<32xf32>
      %601 = vector.shape_cast %600 : vector<32xf32> to vector<32x1xf32>
      %c73_i32 = arith.constant 73 : i32
      %602 = vector.broadcast %c73_i32 : i32 to vector<1x256xi32>
      %603 = arith.cmpi eq, %17, %602 : vector<1x256xi32>
      %cst_156 = arith.constant 0xFF800000 : f32
      %604 = vector.shape_cast %603 : vector<1x256xi1> to vector<1x256xi1>
      %605 = vector.broadcast %604 : vector<1x256xi1> to vector<32x256xi1>
      %606 = vector.broadcast %cst_156 : f32 to vector<32x256xf32>
      %607 = arith.select %605, %13, %606 : vector<32x256xi1>, vector<32x256xf32>
      %cst_157 = arith.constant dense<0xFF800000> : vector<32xf32>
      %608 = vector.multi_reduction <maximumf>, %607, %cst_157 [1] : vector<32x256xf32> to vector<32xf32>
      %609 = vector.shape_cast %608 : vector<32xf32> to vector<32x1xf32>
      %c74_i32 = arith.constant 74 : i32
      %610 = vector.broadcast %c74_i32 : i32 to vector<1x256xi32>
      %611 = arith.cmpi eq, %17, %610 : vector<1x256xi32>
      %cst_158 = arith.constant 0xFF800000 : f32
      %612 = vector.shape_cast %611 : vector<1x256xi1> to vector<1x256xi1>
      %613 = vector.broadcast %612 : vector<1x256xi1> to vector<32x256xi1>
      %614 = vector.broadcast %cst_158 : f32 to vector<32x256xf32>
      %615 = arith.select %613, %13, %614 : vector<32x256xi1>, vector<32x256xf32>
      %cst_159 = arith.constant dense<0xFF800000> : vector<32xf32>
      %616 = vector.multi_reduction <maximumf>, %615, %cst_159 [1] : vector<32x256xf32> to vector<32xf32>
      %617 = vector.shape_cast %616 : vector<32xf32> to vector<32x1xf32>
      %c75_i32 = arith.constant 75 : i32
      %618 = vector.broadcast %c75_i32 : i32 to vector<1x256xi32>
      %619 = arith.cmpi eq, %17, %618 : vector<1x256xi32>
      %cst_160 = arith.constant 0xFF800000 : f32
      %620 = vector.shape_cast %619 : vector<1x256xi1> to vector<1x256xi1>
      %621 = vector.broadcast %620 : vector<1x256xi1> to vector<32x256xi1>
      %622 = vector.broadcast %cst_160 : f32 to vector<32x256xf32>
      %623 = arith.select %621, %13, %622 : vector<32x256xi1>, vector<32x256xf32>
      %cst_161 = arith.constant dense<0xFF800000> : vector<32xf32>
      %624 = vector.multi_reduction <maximumf>, %623, %cst_161 [1] : vector<32x256xf32> to vector<32xf32>
      %625 = vector.shape_cast %624 : vector<32xf32> to vector<32x1xf32>
      %c76_i32 = arith.constant 76 : i32
      %626 = vector.broadcast %c76_i32 : i32 to vector<1x256xi32>
      %627 = arith.cmpi eq, %17, %626 : vector<1x256xi32>
      %cst_162 = arith.constant 0xFF800000 : f32
      %628 = vector.shape_cast %627 : vector<1x256xi1> to vector<1x256xi1>
      %629 = vector.broadcast %628 : vector<1x256xi1> to vector<32x256xi1>
      %630 = vector.broadcast %cst_162 : f32 to vector<32x256xf32>
      %631 = arith.select %629, %13, %630 : vector<32x256xi1>, vector<32x256xf32>
      %cst_163 = arith.constant dense<0xFF800000> : vector<32xf32>
      %632 = vector.multi_reduction <maximumf>, %631, %cst_163 [1] : vector<32x256xf32> to vector<32xf32>
      %633 = vector.shape_cast %632 : vector<32xf32> to vector<32x1xf32>
      %c77_i32 = arith.constant 77 : i32
      %634 = vector.broadcast %c77_i32 : i32 to vector<1x256xi32>
      %635 = arith.cmpi eq, %17, %634 : vector<1x256xi32>
      %cst_164 = arith.constant 0xFF800000 : f32
      %636 = vector.shape_cast %635 : vector<1x256xi1> to vector<1x256xi1>
      %637 = vector.broadcast %636 : vector<1x256xi1> to vector<32x256xi1>
      %638 = vector.broadcast %cst_164 : f32 to vector<32x256xf32>
      %639 = arith.select %637, %13, %638 : vector<32x256xi1>, vector<32x256xf32>
      %cst_165 = arith.constant dense<0xFF800000> : vector<32xf32>
      %640 = vector.multi_reduction <maximumf>, %639, %cst_165 [1] : vector<32x256xf32> to vector<32xf32>
      %641 = vector.shape_cast %640 : vector<32xf32> to vector<32x1xf32>
      %c78_i32 = arith.constant 78 : i32
      %642 = vector.broadcast %c78_i32 : i32 to vector<1x256xi32>
      %643 = arith.cmpi eq, %17, %642 : vector<1x256xi32>
      %cst_166 = arith.constant 0xFF800000 : f32
      %644 = vector.shape_cast %643 : vector<1x256xi1> to vector<1x256xi1>
      %645 = vector.broadcast %644 : vector<1x256xi1> to vector<32x256xi1>
      %646 = vector.broadcast %cst_166 : f32 to vector<32x256xf32>
      %647 = arith.select %645, %13, %646 : vector<32x256xi1>, vector<32x256xf32>
      %cst_167 = arith.constant dense<0xFF800000> : vector<32xf32>
      %648 = vector.multi_reduction <maximumf>, %647, %cst_167 [1] : vector<32x256xf32> to vector<32xf32>
      %649 = vector.shape_cast %648 : vector<32xf32> to vector<32x1xf32>
      %c79_i32 = arith.constant 79 : i32
      %650 = vector.broadcast %c79_i32 : i32 to vector<1x256xi32>
      %651 = arith.cmpi eq, %17, %650 : vector<1x256xi32>
      %cst_168 = arith.constant 0xFF800000 : f32
      %652 = vector.shape_cast %651 : vector<1x256xi1> to vector<1x256xi1>
      %653 = vector.broadcast %652 : vector<1x256xi1> to vector<32x256xi1>
      %654 = vector.broadcast %cst_168 : f32 to vector<32x256xf32>
      %655 = arith.select %653, %13, %654 : vector<32x256xi1>, vector<32x256xf32>
      %cst_169 = arith.constant dense<0xFF800000> : vector<32xf32>
      %656 = vector.multi_reduction <maximumf>, %655, %cst_169 [1] : vector<32x256xf32> to vector<32xf32>
      %657 = vector.shape_cast %656 : vector<32xf32> to vector<32x1xf32>
      %c80_i32 = arith.constant 80 : i32
      %658 = vector.broadcast %c80_i32 : i32 to vector<1x256xi32>
      %659 = arith.cmpi eq, %17, %658 : vector<1x256xi32>
      %cst_170 = arith.constant 0xFF800000 : f32
      %660 = vector.shape_cast %659 : vector<1x256xi1> to vector<1x256xi1>
      %661 = vector.broadcast %660 : vector<1x256xi1> to vector<32x256xi1>
      %662 = vector.broadcast %cst_170 : f32 to vector<32x256xf32>
      %663 = arith.select %661, %13, %662 : vector<32x256xi1>, vector<32x256xf32>
      %cst_171 = arith.constant dense<0xFF800000> : vector<32xf32>
      %664 = vector.multi_reduction <maximumf>, %663, %cst_171 [1] : vector<32x256xf32> to vector<32xf32>
      %665 = vector.shape_cast %664 : vector<32xf32> to vector<32x1xf32>
      %c81_i32 = arith.constant 81 : i32
      %666 = vector.broadcast %c81_i32 : i32 to vector<1x256xi32>
      %667 = arith.cmpi eq, %17, %666 : vector<1x256xi32>
      %cst_172 = arith.constant 0xFF800000 : f32
      %668 = vector.shape_cast %667 : vector<1x256xi1> to vector<1x256xi1>
      %669 = vector.broadcast %668 : vector<1x256xi1> to vector<32x256xi1>
      %670 = vector.broadcast %cst_172 : f32 to vector<32x256xf32>
      %671 = arith.select %669, %13, %670 : vector<32x256xi1>, vector<32x256xf32>
      %cst_173 = arith.constant dense<0xFF800000> : vector<32xf32>
      %672 = vector.multi_reduction <maximumf>, %671, %cst_173 [1] : vector<32x256xf32> to vector<32xf32>
      %673 = vector.shape_cast %672 : vector<32xf32> to vector<32x1xf32>
      %c82_i32 = arith.constant 82 : i32
      %674 = vector.broadcast %c82_i32 : i32 to vector<1x256xi32>
      %675 = arith.cmpi eq, %17, %674 : vector<1x256xi32>
      %cst_174 = arith.constant 0xFF800000 : f32
      %676 = vector.shape_cast %675 : vector<1x256xi1> to vector<1x256xi1>
      %677 = vector.broadcast %676 : vector<1x256xi1> to vector<32x256xi1>
      %678 = vector.broadcast %cst_174 : f32 to vector<32x256xf32>
      %679 = arith.select %677, %13, %678 : vector<32x256xi1>, vector<32x256xf32>
      %cst_175 = arith.constant dense<0xFF800000> : vector<32xf32>
      %680 = vector.multi_reduction <maximumf>, %679, %cst_175 [1] : vector<32x256xf32> to vector<32xf32>
      %681 = vector.shape_cast %680 : vector<32xf32> to vector<32x1xf32>
      %c83_i32 = arith.constant 83 : i32
      %682 = vector.broadcast %c83_i32 : i32 to vector<1x256xi32>
      %683 = arith.cmpi eq, %17, %682 : vector<1x256xi32>
      %cst_176 = arith.constant 0xFF800000 : f32
      %684 = vector.shape_cast %683 : vector<1x256xi1> to vector<1x256xi1>
      %685 = vector.broadcast %684 : vector<1x256xi1> to vector<32x256xi1>
      %686 = vector.broadcast %cst_176 : f32 to vector<32x256xf32>
      %687 = arith.select %685, %13, %686 : vector<32x256xi1>, vector<32x256xf32>
      %cst_177 = arith.constant dense<0xFF800000> : vector<32xf32>
      %688 = vector.multi_reduction <maximumf>, %687, %cst_177 [1] : vector<32x256xf32> to vector<32xf32>
      %689 = vector.shape_cast %688 : vector<32xf32> to vector<32x1xf32>
      %c84_i32 = arith.constant 84 : i32
      %690 = vector.broadcast %c84_i32 : i32 to vector<1x256xi32>
      %691 = arith.cmpi eq, %17, %690 : vector<1x256xi32>
      %cst_178 = arith.constant 0xFF800000 : f32
      %692 = vector.shape_cast %691 : vector<1x256xi1> to vector<1x256xi1>
      %693 = vector.broadcast %692 : vector<1x256xi1> to vector<32x256xi1>
      %694 = vector.broadcast %cst_178 : f32 to vector<32x256xf32>
      %695 = arith.select %693, %13, %694 : vector<32x256xi1>, vector<32x256xf32>
      %cst_179 = arith.constant dense<0xFF800000> : vector<32xf32>
      %696 = vector.multi_reduction <maximumf>, %695, %cst_179 [1] : vector<32x256xf32> to vector<32xf32>
      %697 = vector.shape_cast %696 : vector<32xf32> to vector<32x1xf32>
      %c85_i32 = arith.constant 85 : i32
      %698 = vector.broadcast %c85_i32 : i32 to vector<1x256xi32>
      %699 = arith.cmpi eq, %17, %698 : vector<1x256xi32>
      %cst_180 = arith.constant 0xFF800000 : f32
      %700 = vector.shape_cast %699 : vector<1x256xi1> to vector<1x256xi1>
      %701 = vector.broadcast %700 : vector<1x256xi1> to vector<32x256xi1>
      %702 = vector.broadcast %cst_180 : f32 to vector<32x256xf32>
      %703 = arith.select %701, %13, %702 : vector<32x256xi1>, vector<32x256xf32>
      %cst_181 = arith.constant dense<0xFF800000> : vector<32xf32>
      %704 = vector.multi_reduction <maximumf>, %703, %cst_181 [1] : vector<32x256xf32> to vector<32xf32>
      %705 = vector.shape_cast %704 : vector<32xf32> to vector<32x1xf32>
      %c86_i32 = arith.constant 86 : i32
      %706 = vector.broadcast %c86_i32 : i32 to vector<1x256xi32>
      %707 = arith.cmpi eq, %17, %706 : vector<1x256xi32>
      %cst_182 = arith.constant 0xFF800000 : f32
      %708 = vector.shape_cast %707 : vector<1x256xi1> to vector<1x256xi1>
      %709 = vector.broadcast %708 : vector<1x256xi1> to vector<32x256xi1>
      %710 = vector.broadcast %cst_182 : f32 to vector<32x256xf32>
      %711 = arith.select %709, %13, %710 : vector<32x256xi1>, vector<32x256xf32>
      %cst_183 = arith.constant dense<0xFF800000> : vector<32xf32>
      %712 = vector.multi_reduction <maximumf>, %711, %cst_183 [1] : vector<32x256xf32> to vector<32xf32>
      %713 = vector.shape_cast %712 : vector<32xf32> to vector<32x1xf32>
      %c87_i32 = arith.constant 87 : i32
      %714 = vector.broadcast %c87_i32 : i32 to vector<1x256xi32>
      %715 = arith.cmpi eq, %17, %714 : vector<1x256xi32>
      %cst_184 = arith.constant 0xFF800000 : f32
      %716 = vector.shape_cast %715 : vector<1x256xi1> to vector<1x256xi1>
      %717 = vector.broadcast %716 : vector<1x256xi1> to vector<32x256xi1>
      %718 = vector.broadcast %cst_184 : f32 to vector<32x256xf32>
      %719 = arith.select %717, %13, %718 : vector<32x256xi1>, vector<32x256xf32>
      %cst_185 = arith.constant dense<0xFF800000> : vector<32xf32>
      %720 = vector.multi_reduction <maximumf>, %719, %cst_185 [1] : vector<32x256xf32> to vector<32xf32>
      %721 = vector.shape_cast %720 : vector<32xf32> to vector<32x1xf32>
      %c88_i32 = arith.constant 88 : i32
      %722 = vector.broadcast %c88_i32 : i32 to vector<1x256xi32>
      %723 = arith.cmpi eq, %17, %722 : vector<1x256xi32>
      %cst_186 = arith.constant 0xFF800000 : f32
      %724 = vector.shape_cast %723 : vector<1x256xi1> to vector<1x256xi1>
      %725 = vector.broadcast %724 : vector<1x256xi1> to vector<32x256xi1>
      %726 = vector.broadcast %cst_186 : f32 to vector<32x256xf32>
      %727 = arith.select %725, %13, %726 : vector<32x256xi1>, vector<32x256xf32>
      %cst_187 = arith.constant dense<0xFF800000> : vector<32xf32>
      %728 = vector.multi_reduction <maximumf>, %727, %cst_187 [1] : vector<32x256xf32> to vector<32xf32>
      %729 = vector.shape_cast %728 : vector<32xf32> to vector<32x1xf32>
      %c89_i32 = arith.constant 89 : i32
      %730 = vector.broadcast %c89_i32 : i32 to vector<1x256xi32>
      %731 = arith.cmpi eq, %17, %730 : vector<1x256xi32>
      %cst_188 = arith.constant 0xFF800000 : f32
      %732 = vector.shape_cast %731 : vector<1x256xi1> to vector<1x256xi1>
      %733 = vector.broadcast %732 : vector<1x256xi1> to vector<32x256xi1>
      %734 = vector.broadcast %cst_188 : f32 to vector<32x256xf32>
      %735 = arith.select %733, %13, %734 : vector<32x256xi1>, vector<32x256xf32>
      %cst_189 = arith.constant dense<0xFF800000> : vector<32xf32>
      %736 = vector.multi_reduction <maximumf>, %735, %cst_189 [1] : vector<32x256xf32> to vector<32xf32>
      %737 = vector.shape_cast %736 : vector<32xf32> to vector<32x1xf32>
      %c90_i32 = arith.constant 90 : i32
      %738 = vector.broadcast %c90_i32 : i32 to vector<1x256xi32>
      %739 = arith.cmpi eq, %17, %738 : vector<1x256xi32>
      %cst_190 = arith.constant 0xFF800000 : f32
      %740 = vector.shape_cast %739 : vector<1x256xi1> to vector<1x256xi1>
      %741 = vector.broadcast %740 : vector<1x256xi1> to vector<32x256xi1>
      %742 = vector.broadcast %cst_190 : f32 to vector<32x256xf32>
      %743 = arith.select %741, %13, %742 : vector<32x256xi1>, vector<32x256xf32>
      %cst_191 = arith.constant dense<0xFF800000> : vector<32xf32>
      %744 = vector.multi_reduction <maximumf>, %743, %cst_191 [1] : vector<32x256xf32> to vector<32xf32>
      %745 = vector.shape_cast %744 : vector<32xf32> to vector<32x1xf32>
      %c91_i32 = arith.constant 91 : i32
      %746 = vector.broadcast %c91_i32 : i32 to vector<1x256xi32>
      %747 = arith.cmpi eq, %17, %746 : vector<1x256xi32>
      %cst_192 = arith.constant 0xFF800000 : f32
      %748 = vector.shape_cast %747 : vector<1x256xi1> to vector<1x256xi1>
      %749 = vector.broadcast %748 : vector<1x256xi1> to vector<32x256xi1>
      %750 = vector.broadcast %cst_192 : f32 to vector<32x256xf32>
      %751 = arith.select %749, %13, %750 : vector<32x256xi1>, vector<32x256xf32>
      %cst_193 = arith.constant dense<0xFF800000> : vector<32xf32>
      %752 = vector.multi_reduction <maximumf>, %751, %cst_193 [1] : vector<32x256xf32> to vector<32xf32>
      %753 = vector.shape_cast %752 : vector<32xf32> to vector<32x1xf32>
      %c92_i32 = arith.constant 92 : i32
      %754 = vector.broadcast %c92_i32 : i32 to vector<1x256xi32>
      %755 = arith.cmpi eq, %17, %754 : vector<1x256xi32>
      %cst_194 = arith.constant 0xFF800000 : f32
      %756 = vector.shape_cast %755 : vector<1x256xi1> to vector<1x256xi1>
      %757 = vector.broadcast %756 : vector<1x256xi1> to vector<32x256xi1>
      %758 = vector.broadcast %cst_194 : f32 to vector<32x256xf32>
      %759 = arith.select %757, %13, %758 : vector<32x256xi1>, vector<32x256xf32>
      %cst_195 = arith.constant dense<0xFF800000> : vector<32xf32>
      %760 = vector.multi_reduction <maximumf>, %759, %cst_195 [1] : vector<32x256xf32> to vector<32xf32>
      %761 = vector.shape_cast %760 : vector<32xf32> to vector<32x1xf32>
      %c93_i32 = arith.constant 93 : i32
      %762 = vector.broadcast %c93_i32 : i32 to vector<1x256xi32>
      %763 = arith.cmpi eq, %17, %762 : vector<1x256xi32>
      %cst_196 = arith.constant 0xFF800000 : f32
      %764 = vector.shape_cast %763 : vector<1x256xi1> to vector<1x256xi1>
      %765 = vector.broadcast %764 : vector<1x256xi1> to vector<32x256xi1>
      %766 = vector.broadcast %cst_196 : f32 to vector<32x256xf32>
      %767 = arith.select %765, %13, %766 : vector<32x256xi1>, vector<32x256xf32>
      %cst_197 = arith.constant dense<0xFF800000> : vector<32xf32>
      %768 = vector.multi_reduction <maximumf>, %767, %cst_197 [1] : vector<32x256xf32> to vector<32xf32>
      %769 = vector.shape_cast %768 : vector<32xf32> to vector<32x1xf32>
      %c94_i32 = arith.constant 94 : i32
      %770 = vector.broadcast %c94_i32 : i32 to vector<1x256xi32>
      %771 = arith.cmpi eq, %17, %770 : vector<1x256xi32>
      %cst_198 = arith.constant 0xFF800000 : f32
      %772 = vector.shape_cast %771 : vector<1x256xi1> to vector<1x256xi1>
      %773 = vector.broadcast %772 : vector<1x256xi1> to vector<32x256xi1>
      %774 = vector.broadcast %cst_198 : f32 to vector<32x256xf32>
      %775 = arith.select %773, %13, %774 : vector<32x256xi1>, vector<32x256xf32>
      %cst_199 = arith.constant dense<0xFF800000> : vector<32xf32>
      %776 = vector.multi_reduction <maximumf>, %775, %cst_199 [1] : vector<32x256xf32> to vector<32xf32>
      %777 = vector.shape_cast %776 : vector<32xf32> to vector<32x1xf32>
      %c95_i32 = arith.constant 95 : i32
      %778 = vector.broadcast %c95_i32 : i32 to vector<1x256xi32>
      %779 = arith.cmpi eq, %17, %778 : vector<1x256xi32>
      %cst_200 = arith.constant 0xFF800000 : f32
      %780 = vector.shape_cast %779 : vector<1x256xi1> to vector<1x256xi1>
      %781 = vector.broadcast %780 : vector<1x256xi1> to vector<32x256xi1>
      %782 = vector.broadcast %cst_200 : f32 to vector<32x256xf32>
      %783 = arith.select %781, %13, %782 : vector<32x256xi1>, vector<32x256xf32>
      %cst_201 = arith.constant dense<0xFF800000> : vector<32xf32>
      %784 = vector.multi_reduction <maximumf>, %783, %cst_201 [1] : vector<32x256xf32> to vector<32xf32>
      %785 = vector.shape_cast %784 : vector<32xf32> to vector<32x1xf32>
      %c96_i32 = arith.constant 96 : i32
      %786 = vector.broadcast %c96_i32 : i32 to vector<1x256xi32>
      %787 = arith.cmpi eq, %17, %786 : vector<1x256xi32>
      %cst_202 = arith.constant 0xFF800000 : f32
      %788 = vector.shape_cast %787 : vector<1x256xi1> to vector<1x256xi1>
      %789 = vector.broadcast %788 : vector<1x256xi1> to vector<32x256xi1>
      %790 = vector.broadcast %cst_202 : f32 to vector<32x256xf32>
      %791 = arith.select %789, %13, %790 : vector<32x256xi1>, vector<32x256xf32>
      %cst_203 = arith.constant dense<0xFF800000> : vector<32xf32>
      %792 = vector.multi_reduction <maximumf>, %791, %cst_203 [1] : vector<32x256xf32> to vector<32xf32>
      %793 = vector.shape_cast %792 : vector<32xf32> to vector<32x1xf32>
      %c97_i32 = arith.constant 97 : i32
      %794 = vector.broadcast %c97_i32 : i32 to vector<1x256xi32>
      %795 = arith.cmpi eq, %17, %794 : vector<1x256xi32>
      %cst_204 = arith.constant 0xFF800000 : f32
      %796 = vector.shape_cast %795 : vector<1x256xi1> to vector<1x256xi1>
      %797 = vector.broadcast %796 : vector<1x256xi1> to vector<32x256xi1>
      %798 = vector.broadcast %cst_204 : f32 to vector<32x256xf32>
      %799 = arith.select %797, %13, %798 : vector<32x256xi1>, vector<32x256xf32>
      %cst_205 = arith.constant dense<0xFF800000> : vector<32xf32>
      %800 = vector.multi_reduction <maximumf>, %799, %cst_205 [1] : vector<32x256xf32> to vector<32xf32>
      %801 = vector.shape_cast %800 : vector<32xf32> to vector<32x1xf32>
      %c98_i32 = arith.constant 98 : i32
      %802 = vector.broadcast %c98_i32 : i32 to vector<1x256xi32>
      %803 = arith.cmpi eq, %17, %802 : vector<1x256xi32>
      %cst_206 = arith.constant 0xFF800000 : f32
      %804 = vector.shape_cast %803 : vector<1x256xi1> to vector<1x256xi1>
      %805 = vector.broadcast %804 : vector<1x256xi1> to vector<32x256xi1>
      %806 = vector.broadcast %cst_206 : f32 to vector<32x256xf32>
      %807 = arith.select %805, %13, %806 : vector<32x256xi1>, vector<32x256xf32>
      %cst_207 = arith.constant dense<0xFF800000> : vector<32xf32>
      %808 = vector.multi_reduction <maximumf>, %807, %cst_207 [1] : vector<32x256xf32> to vector<32xf32>
      %809 = vector.shape_cast %808 : vector<32xf32> to vector<32x1xf32>
      %c99_i32 = arith.constant 99 : i32
      %810 = vector.broadcast %c99_i32 : i32 to vector<1x256xi32>
      %811 = arith.cmpi eq, %17, %810 : vector<1x256xi32>
      %cst_208 = arith.constant 0xFF800000 : f32
      %812 = vector.shape_cast %811 : vector<1x256xi1> to vector<1x256xi1>
      %813 = vector.broadcast %812 : vector<1x256xi1> to vector<32x256xi1>
      %814 = vector.broadcast %cst_208 : f32 to vector<32x256xf32>
      %815 = arith.select %813, %13, %814 : vector<32x256xi1>, vector<32x256xf32>
      %cst_209 = arith.constant dense<0xFF800000> : vector<32xf32>
      %816 = vector.multi_reduction <maximumf>, %815, %cst_209 [1] : vector<32x256xf32> to vector<32xf32>
      %817 = vector.shape_cast %816 : vector<32xf32> to vector<32x1xf32>
      %c100_i32 = arith.constant 100 : i32
      %818 = vector.broadcast %c100_i32 : i32 to vector<1x256xi32>
      %819 = arith.cmpi eq, %17, %818 : vector<1x256xi32>
      %cst_210 = arith.constant 0xFF800000 : f32
      %820 = vector.shape_cast %819 : vector<1x256xi1> to vector<1x256xi1>
      %821 = vector.broadcast %820 : vector<1x256xi1> to vector<32x256xi1>
      %822 = vector.broadcast %cst_210 : f32 to vector<32x256xf32>
      %823 = arith.select %821, %13, %822 : vector<32x256xi1>, vector<32x256xf32>
      %cst_211 = arith.constant dense<0xFF800000> : vector<32xf32>
      %824 = vector.multi_reduction <maximumf>, %823, %cst_211 [1] : vector<32x256xf32> to vector<32xf32>
      %825 = vector.shape_cast %824 : vector<32xf32> to vector<32x1xf32>
      %c101_i32 = arith.constant 101 : i32
      %826 = vector.broadcast %c101_i32 : i32 to vector<1x256xi32>
      %827 = arith.cmpi eq, %17, %826 : vector<1x256xi32>
      %cst_212 = arith.constant 0xFF800000 : f32
      %828 = vector.shape_cast %827 : vector<1x256xi1> to vector<1x256xi1>
      %829 = vector.broadcast %828 : vector<1x256xi1> to vector<32x256xi1>
      %830 = vector.broadcast %cst_212 : f32 to vector<32x256xf32>
      %831 = arith.select %829, %13, %830 : vector<32x256xi1>, vector<32x256xf32>
      %cst_213 = arith.constant dense<0xFF800000> : vector<32xf32>
      %832 = vector.multi_reduction <maximumf>, %831, %cst_213 [1] : vector<32x256xf32> to vector<32xf32>
      %833 = vector.shape_cast %832 : vector<32xf32> to vector<32x1xf32>
      %c102_i32 = arith.constant 102 : i32
      %834 = vector.broadcast %c102_i32 : i32 to vector<1x256xi32>
      %835 = arith.cmpi eq, %17, %834 : vector<1x256xi32>
      %cst_214 = arith.constant 0xFF800000 : f32
      %836 = vector.shape_cast %835 : vector<1x256xi1> to vector<1x256xi1>
      %837 = vector.broadcast %836 : vector<1x256xi1> to vector<32x256xi1>
      %838 = vector.broadcast %cst_214 : f32 to vector<32x256xf32>
      %839 = arith.select %837, %13, %838 : vector<32x256xi1>, vector<32x256xf32>
      %cst_215 = arith.constant dense<0xFF800000> : vector<32xf32>
      %840 = vector.multi_reduction <maximumf>, %839, %cst_215 [1] : vector<32x256xf32> to vector<32xf32>
      %841 = vector.shape_cast %840 : vector<32xf32> to vector<32x1xf32>
      %c103_i32 = arith.constant 103 : i32
      %842 = vector.broadcast %c103_i32 : i32 to vector<1x256xi32>
      %843 = arith.cmpi eq, %17, %842 : vector<1x256xi32>
      %cst_216 = arith.constant 0xFF800000 : f32
      %844 = vector.shape_cast %843 : vector<1x256xi1> to vector<1x256xi1>
      %845 = vector.broadcast %844 : vector<1x256xi1> to vector<32x256xi1>
      %846 = vector.broadcast %cst_216 : f32 to vector<32x256xf32>
      %847 = arith.select %845, %13, %846 : vector<32x256xi1>, vector<32x256xf32>
      %cst_217 = arith.constant dense<0xFF800000> : vector<32xf32>
      %848 = vector.multi_reduction <maximumf>, %847, %cst_217 [1] : vector<32x256xf32> to vector<32xf32>
      %849 = vector.shape_cast %848 : vector<32xf32> to vector<32x1xf32>
      %c104_i32 = arith.constant 104 : i32
      %850 = vector.broadcast %c104_i32 : i32 to vector<1x256xi32>
      %851 = arith.cmpi eq, %17, %850 : vector<1x256xi32>
      %cst_218 = arith.constant 0xFF800000 : f32
      %852 = vector.shape_cast %851 : vector<1x256xi1> to vector<1x256xi1>
      %853 = vector.broadcast %852 : vector<1x256xi1> to vector<32x256xi1>
      %854 = vector.broadcast %cst_218 : f32 to vector<32x256xf32>
      %855 = arith.select %853, %13, %854 : vector<32x256xi1>, vector<32x256xf32>
      %cst_219 = arith.constant dense<0xFF800000> : vector<32xf32>
      %856 = vector.multi_reduction <maximumf>, %855, %cst_219 [1] : vector<32x256xf32> to vector<32xf32>
      %857 = vector.shape_cast %856 : vector<32xf32> to vector<32x1xf32>
      %c105_i32 = arith.constant 105 : i32
      %858 = vector.broadcast %c105_i32 : i32 to vector<1x256xi32>
      %859 = arith.cmpi eq, %17, %858 : vector<1x256xi32>
      %cst_220 = arith.constant 0xFF800000 : f32
      %860 = vector.shape_cast %859 : vector<1x256xi1> to vector<1x256xi1>
      %861 = vector.broadcast %860 : vector<1x256xi1> to vector<32x256xi1>
      %862 = vector.broadcast %cst_220 : f32 to vector<32x256xf32>
      %863 = arith.select %861, %13, %862 : vector<32x256xi1>, vector<32x256xf32>
      %cst_221 = arith.constant dense<0xFF800000> : vector<32xf32>
      %864 = vector.multi_reduction <maximumf>, %863, %cst_221 [1] : vector<32x256xf32> to vector<32xf32>
      %865 = vector.shape_cast %864 : vector<32xf32> to vector<32x1xf32>
      %c106_i32 = arith.constant 106 : i32
      %866 = vector.broadcast %c106_i32 : i32 to vector<1x256xi32>
      %867 = arith.cmpi eq, %17, %866 : vector<1x256xi32>
      %cst_222 = arith.constant 0xFF800000 : f32
      %868 = vector.shape_cast %867 : vector<1x256xi1> to vector<1x256xi1>
      %869 = vector.broadcast %868 : vector<1x256xi1> to vector<32x256xi1>
      %870 = vector.broadcast %cst_222 : f32 to vector<32x256xf32>
      %871 = arith.select %869, %13, %870 : vector<32x256xi1>, vector<32x256xf32>
      %cst_223 = arith.constant dense<0xFF800000> : vector<32xf32>
      %872 = vector.multi_reduction <maximumf>, %871, %cst_223 [1] : vector<32x256xf32> to vector<32xf32>
      %873 = vector.shape_cast %872 : vector<32xf32> to vector<32x1xf32>
      %c107_i32 = arith.constant 107 : i32
      %874 = vector.broadcast %c107_i32 : i32 to vector<1x256xi32>
      %875 = arith.cmpi eq, %17, %874 : vector<1x256xi32>
      %cst_224 = arith.constant 0xFF800000 : f32
      %876 = vector.shape_cast %875 : vector<1x256xi1> to vector<1x256xi1>
      %877 = vector.broadcast %876 : vector<1x256xi1> to vector<32x256xi1>
      %878 = vector.broadcast %cst_224 : f32 to vector<32x256xf32>
      %879 = arith.select %877, %13, %878 : vector<32x256xi1>, vector<32x256xf32>
      %cst_225 = arith.constant dense<0xFF800000> : vector<32xf32>
      %880 = vector.multi_reduction <maximumf>, %879, %cst_225 [1] : vector<32x256xf32> to vector<32xf32>
      %881 = vector.shape_cast %880 : vector<32xf32> to vector<32x1xf32>
      %c108_i32 = arith.constant 108 : i32
      %882 = vector.broadcast %c108_i32 : i32 to vector<1x256xi32>
      %883 = arith.cmpi eq, %17, %882 : vector<1x256xi32>
      %cst_226 = arith.constant 0xFF800000 : f32
      %884 = vector.shape_cast %883 : vector<1x256xi1> to vector<1x256xi1>
      %885 = vector.broadcast %884 : vector<1x256xi1> to vector<32x256xi1>
      %886 = vector.broadcast %cst_226 : f32 to vector<32x256xf32>
      %887 = arith.select %885, %13, %886 : vector<32x256xi1>, vector<32x256xf32>
      %cst_227 = arith.constant dense<0xFF800000> : vector<32xf32>
      %888 = vector.multi_reduction <maximumf>, %887, %cst_227 [1] : vector<32x256xf32> to vector<32xf32>
      %889 = vector.shape_cast %888 : vector<32xf32> to vector<32x1xf32>
      %c109_i32 = arith.constant 109 : i32
      %890 = vector.broadcast %c109_i32 : i32 to vector<1x256xi32>
      %891 = arith.cmpi eq, %17, %890 : vector<1x256xi32>
      %cst_228 = arith.constant 0xFF800000 : f32
      %892 = vector.shape_cast %891 : vector<1x256xi1> to vector<1x256xi1>
      %893 = vector.broadcast %892 : vector<1x256xi1> to vector<32x256xi1>
      %894 = vector.broadcast %cst_228 : f32 to vector<32x256xf32>
      %895 = arith.select %893, %13, %894 : vector<32x256xi1>, vector<32x256xf32>
      %cst_229 = arith.constant dense<0xFF800000> : vector<32xf32>
      %896 = vector.multi_reduction <maximumf>, %895, %cst_229 [1] : vector<32x256xf32> to vector<32xf32>
      %897 = vector.shape_cast %896 : vector<32xf32> to vector<32x1xf32>
      %c110_i32 = arith.constant 110 : i32
      %898 = vector.broadcast %c110_i32 : i32 to vector<1x256xi32>
      %899 = arith.cmpi eq, %17, %898 : vector<1x256xi32>
      %cst_230 = arith.constant 0xFF800000 : f32
      %900 = vector.shape_cast %899 : vector<1x256xi1> to vector<1x256xi1>
      %901 = vector.broadcast %900 : vector<1x256xi1> to vector<32x256xi1>
      %902 = vector.broadcast %cst_230 : f32 to vector<32x256xf32>
      %903 = arith.select %901, %13, %902 : vector<32x256xi1>, vector<32x256xf32>
      %cst_231 = arith.constant dense<0xFF800000> : vector<32xf32>
      %904 = vector.multi_reduction <maximumf>, %903, %cst_231 [1] : vector<32x256xf32> to vector<32xf32>
      %905 = vector.shape_cast %904 : vector<32xf32> to vector<32x1xf32>
      %c111_i32 = arith.constant 111 : i32
      %906 = vector.broadcast %c111_i32 : i32 to vector<1x256xi32>
      %907 = arith.cmpi eq, %17, %906 : vector<1x256xi32>
      %cst_232 = arith.constant 0xFF800000 : f32
      %908 = vector.shape_cast %907 : vector<1x256xi1> to vector<1x256xi1>
      %909 = vector.broadcast %908 : vector<1x256xi1> to vector<32x256xi1>
      %910 = vector.broadcast %cst_232 : f32 to vector<32x256xf32>
      %911 = arith.select %909, %13, %910 : vector<32x256xi1>, vector<32x256xf32>
      %cst_233 = arith.constant dense<0xFF800000> : vector<32xf32>
      %912 = vector.multi_reduction <maximumf>, %911, %cst_233 [1] : vector<32x256xf32> to vector<32xf32>
      %913 = vector.shape_cast %912 : vector<32xf32> to vector<32x1xf32>
      %c112_i32 = arith.constant 112 : i32
      %914 = vector.broadcast %c112_i32 : i32 to vector<1x256xi32>
      %915 = arith.cmpi eq, %17, %914 : vector<1x256xi32>
      %cst_234 = arith.constant 0xFF800000 : f32
      %916 = vector.shape_cast %915 : vector<1x256xi1> to vector<1x256xi1>
      %917 = vector.broadcast %916 : vector<1x256xi1> to vector<32x256xi1>
      %918 = vector.broadcast %cst_234 : f32 to vector<32x256xf32>
      %919 = arith.select %917, %13, %918 : vector<32x256xi1>, vector<32x256xf32>
      %cst_235 = arith.constant dense<0xFF800000> : vector<32xf32>
      %920 = vector.multi_reduction <maximumf>, %919, %cst_235 [1] : vector<32x256xf32> to vector<32xf32>
      %921 = vector.shape_cast %920 : vector<32xf32> to vector<32x1xf32>
      %c113_i32 = arith.constant 113 : i32
      %922 = vector.broadcast %c113_i32 : i32 to vector<1x256xi32>
      %923 = arith.cmpi eq, %17, %922 : vector<1x256xi32>
      %cst_236 = arith.constant 0xFF800000 : f32
      %924 = vector.shape_cast %923 : vector<1x256xi1> to vector<1x256xi1>
      %925 = vector.broadcast %924 : vector<1x256xi1> to vector<32x256xi1>
      %926 = vector.broadcast %cst_236 : f32 to vector<32x256xf32>
      %927 = arith.select %925, %13, %926 : vector<32x256xi1>, vector<32x256xf32>
      %cst_237 = arith.constant dense<0xFF800000> : vector<32xf32>
      %928 = vector.multi_reduction <maximumf>, %927, %cst_237 [1] : vector<32x256xf32> to vector<32xf32>
      %929 = vector.shape_cast %928 : vector<32xf32> to vector<32x1xf32>
      %c114_i32 = arith.constant 114 : i32
      %930 = vector.broadcast %c114_i32 : i32 to vector<1x256xi32>
      %931 = arith.cmpi eq, %17, %930 : vector<1x256xi32>
      %cst_238 = arith.constant 0xFF800000 : f32
      %932 = vector.shape_cast %931 : vector<1x256xi1> to vector<1x256xi1>
      %933 = vector.broadcast %932 : vector<1x256xi1> to vector<32x256xi1>
      %934 = vector.broadcast %cst_238 : f32 to vector<32x256xf32>
      %935 = arith.select %933, %13, %934 : vector<32x256xi1>, vector<32x256xf32>
      %cst_239 = arith.constant dense<0xFF800000> : vector<32xf32>
      %936 = vector.multi_reduction <maximumf>, %935, %cst_239 [1] : vector<32x256xf32> to vector<32xf32>
      %937 = vector.shape_cast %936 : vector<32xf32> to vector<32x1xf32>
      %c115_i32 = arith.constant 115 : i32
      %938 = vector.broadcast %c115_i32 : i32 to vector<1x256xi32>
      %939 = arith.cmpi eq, %17, %938 : vector<1x256xi32>
      %cst_240 = arith.constant 0xFF800000 : f32
      %940 = vector.shape_cast %939 : vector<1x256xi1> to vector<1x256xi1>
      %941 = vector.broadcast %940 : vector<1x256xi1> to vector<32x256xi1>
      %942 = vector.broadcast %cst_240 : f32 to vector<32x256xf32>
      %943 = arith.select %941, %13, %942 : vector<32x256xi1>, vector<32x256xf32>
      %cst_241 = arith.constant dense<0xFF800000> : vector<32xf32>
      %944 = vector.multi_reduction <maximumf>, %943, %cst_241 [1] : vector<32x256xf32> to vector<32xf32>
      %945 = vector.shape_cast %944 : vector<32xf32> to vector<32x1xf32>
      %c116_i32 = arith.constant 116 : i32
      %946 = vector.broadcast %c116_i32 : i32 to vector<1x256xi32>
      %947 = arith.cmpi eq, %17, %946 : vector<1x256xi32>
      %cst_242 = arith.constant 0xFF800000 : f32
      %948 = vector.shape_cast %947 : vector<1x256xi1> to vector<1x256xi1>
      %949 = vector.broadcast %948 : vector<1x256xi1> to vector<32x256xi1>
      %950 = vector.broadcast %cst_242 : f32 to vector<32x256xf32>
      %951 = arith.select %949, %13, %950 : vector<32x256xi1>, vector<32x256xf32>
      %cst_243 = arith.constant dense<0xFF800000> : vector<32xf32>
      %952 = vector.multi_reduction <maximumf>, %951, %cst_243 [1] : vector<32x256xf32> to vector<32xf32>
      %953 = vector.shape_cast %952 : vector<32xf32> to vector<32x1xf32>
      %c117_i32 = arith.constant 117 : i32
      %954 = vector.broadcast %c117_i32 : i32 to vector<1x256xi32>
      %955 = arith.cmpi eq, %17, %954 : vector<1x256xi32>
      %cst_244 = arith.constant 0xFF800000 : f32
      %956 = vector.shape_cast %955 : vector<1x256xi1> to vector<1x256xi1>
      %957 = vector.broadcast %956 : vector<1x256xi1> to vector<32x256xi1>
      %958 = vector.broadcast %cst_244 : f32 to vector<32x256xf32>
      %959 = arith.select %957, %13, %958 : vector<32x256xi1>, vector<32x256xf32>
      %cst_245 = arith.constant dense<0xFF800000> : vector<32xf32>
      %960 = vector.multi_reduction <maximumf>, %959, %cst_245 [1] : vector<32x256xf32> to vector<32xf32>
      %961 = vector.shape_cast %960 : vector<32xf32> to vector<32x1xf32>
      %c118_i32 = arith.constant 118 : i32
      %962 = vector.broadcast %c118_i32 : i32 to vector<1x256xi32>
      %963 = arith.cmpi eq, %17, %962 : vector<1x256xi32>
      %cst_246 = arith.constant 0xFF800000 : f32
      %964 = vector.shape_cast %963 : vector<1x256xi1> to vector<1x256xi1>
      %965 = vector.broadcast %964 : vector<1x256xi1> to vector<32x256xi1>
      %966 = vector.broadcast %cst_246 : f32 to vector<32x256xf32>
      %967 = arith.select %965, %13, %966 : vector<32x256xi1>, vector<32x256xf32>
      %cst_247 = arith.constant dense<0xFF800000> : vector<32xf32>
      %968 = vector.multi_reduction <maximumf>, %967, %cst_247 [1] : vector<32x256xf32> to vector<32xf32>
      %969 = vector.shape_cast %968 : vector<32xf32> to vector<32x1xf32>
      %c119_i32 = arith.constant 119 : i32
      %970 = vector.broadcast %c119_i32 : i32 to vector<1x256xi32>
      %971 = arith.cmpi eq, %17, %970 : vector<1x256xi32>
      %cst_248 = arith.constant 0xFF800000 : f32
      %972 = vector.shape_cast %971 : vector<1x256xi1> to vector<1x256xi1>
      %973 = vector.broadcast %972 : vector<1x256xi1> to vector<32x256xi1>
      %974 = vector.broadcast %cst_248 : f32 to vector<32x256xf32>
      %975 = arith.select %973, %13, %974 : vector<32x256xi1>, vector<32x256xf32>
      %cst_249 = arith.constant dense<0xFF800000> : vector<32xf32>
      %976 = vector.multi_reduction <maximumf>, %975, %cst_249 [1] : vector<32x256xf32> to vector<32xf32>
      %977 = vector.shape_cast %976 : vector<32xf32> to vector<32x1xf32>
      %c120_i32 = arith.constant 120 : i32
      %978 = vector.broadcast %c120_i32 : i32 to vector<1x256xi32>
      %979 = arith.cmpi eq, %17, %978 : vector<1x256xi32>
      %cst_250 = arith.constant 0xFF800000 : f32
      %980 = vector.shape_cast %979 : vector<1x256xi1> to vector<1x256xi1>
      %981 = vector.broadcast %980 : vector<1x256xi1> to vector<32x256xi1>
      %982 = vector.broadcast %cst_250 : f32 to vector<32x256xf32>
      %983 = arith.select %981, %13, %982 : vector<32x256xi1>, vector<32x256xf32>
      %cst_251 = arith.constant dense<0xFF800000> : vector<32xf32>
      %984 = vector.multi_reduction <maximumf>, %983, %cst_251 [1] : vector<32x256xf32> to vector<32xf32>
      %985 = vector.shape_cast %984 : vector<32xf32> to vector<32x1xf32>
      %c121_i32 = arith.constant 121 : i32
      %986 = vector.broadcast %c121_i32 : i32 to vector<1x256xi32>
      %987 = arith.cmpi eq, %17, %986 : vector<1x256xi32>
      %cst_252 = arith.constant 0xFF800000 : f32
      %988 = vector.shape_cast %987 : vector<1x256xi1> to vector<1x256xi1>
      %989 = vector.broadcast %988 : vector<1x256xi1> to vector<32x256xi1>
      %990 = vector.broadcast %cst_252 : f32 to vector<32x256xf32>
      %991 = arith.select %989, %13, %990 : vector<32x256xi1>, vector<32x256xf32>
      %cst_253 = arith.constant dense<0xFF800000> : vector<32xf32>
      %992 = vector.multi_reduction <maximumf>, %991, %cst_253 [1] : vector<32x256xf32> to vector<32xf32>
      %993 = vector.shape_cast %992 : vector<32xf32> to vector<32x1xf32>
      %c122_i32 = arith.constant 122 : i32
      %994 = vector.broadcast %c122_i32 : i32 to vector<1x256xi32>
      %995 = arith.cmpi eq, %17, %994 : vector<1x256xi32>
      %cst_254 = arith.constant 0xFF800000 : f32
      %996 = vector.shape_cast %995 : vector<1x256xi1> to vector<1x256xi1>
      %997 = vector.broadcast %996 : vector<1x256xi1> to vector<32x256xi1>
      %998 = vector.broadcast %cst_254 : f32 to vector<32x256xf32>
      %999 = arith.select %997, %13, %998 : vector<32x256xi1>, vector<32x256xf32>
      %cst_255 = arith.constant dense<0xFF800000> : vector<32xf32>
      %1000 = vector.multi_reduction <maximumf>, %999, %cst_255 [1] : vector<32x256xf32> to vector<32xf32>
      %1001 = vector.shape_cast %1000 : vector<32xf32> to vector<32x1xf32>
      %c123_i32 = arith.constant 123 : i32
      %1002 = vector.broadcast %c123_i32 : i32 to vector<1x256xi32>
      %1003 = arith.cmpi eq, %17, %1002 : vector<1x256xi32>
      %cst_256 = arith.constant 0xFF800000 : f32
      %1004 = vector.shape_cast %1003 : vector<1x256xi1> to vector<1x256xi1>
      %1005 = vector.broadcast %1004 : vector<1x256xi1> to vector<32x256xi1>
      %1006 = vector.broadcast %cst_256 : f32 to vector<32x256xf32>
      %1007 = arith.select %1005, %13, %1006 : vector<32x256xi1>, vector<32x256xf32>
      %cst_257 = arith.constant dense<0xFF800000> : vector<32xf32>
      %1008 = vector.multi_reduction <maximumf>, %1007, %cst_257 [1] : vector<32x256xf32> to vector<32xf32>
      %1009 = vector.shape_cast %1008 : vector<32xf32> to vector<32x1xf32>
      %c124_i32 = arith.constant 124 : i32
      %1010 = vector.broadcast %c124_i32 : i32 to vector<1x256xi32>
      %1011 = arith.cmpi eq, %17, %1010 : vector<1x256xi32>
      %cst_258 = arith.constant 0xFF800000 : f32
      %1012 = vector.shape_cast %1011 : vector<1x256xi1> to vector<1x256xi1>
      %1013 = vector.broadcast %1012 : vector<1x256xi1> to vector<32x256xi1>
      %1014 = vector.broadcast %cst_258 : f32 to vector<32x256xf32>
      %1015 = arith.select %1013, %13, %1014 : vector<32x256xi1>, vector<32x256xf32>
      %cst_259 = arith.constant dense<0xFF800000> : vector<32xf32>
      %1016 = vector.multi_reduction <maximumf>, %1015, %cst_259 [1] : vector<32x256xf32> to vector<32xf32>
      %1017 = vector.shape_cast %1016 : vector<32xf32> to vector<32x1xf32>
      %c125_i32 = arith.constant 125 : i32
      %1018 = vector.broadcast %c125_i32 : i32 to vector<1x256xi32>
      %1019 = arith.cmpi eq, %17, %1018 : vector<1x256xi32>
      %cst_260 = arith.constant 0xFF800000 : f32
      %1020 = vector.shape_cast %1019 : vector<1x256xi1> to vector<1x256xi1>
      %1021 = vector.broadcast %1020 : vector<1x256xi1> to vector<32x256xi1>
      %1022 = vector.broadcast %cst_260 : f32 to vector<32x256xf32>
      %1023 = arith.select %1021, %13, %1022 : vector<32x256xi1>, vector<32x256xf32>
      %cst_261 = arith.constant dense<0xFF800000> : vector<32xf32>
      %1024 = vector.multi_reduction <maximumf>, %1023, %cst_261 [1] : vector<32x256xf32> to vector<32xf32>
      %1025 = vector.shape_cast %1024 : vector<32xf32> to vector<32x1xf32>
      %c126_i32 = arith.constant 126 : i32
      %1026 = vector.broadcast %c126_i32 : i32 to vector<1x256xi32>
      %1027 = arith.cmpi eq, %17, %1026 : vector<1x256xi32>
      %cst_262 = arith.constant 0xFF800000 : f32
      %1028 = vector.shape_cast %1027 : vector<1x256xi1> to vector<1x256xi1>
      %1029 = vector.broadcast %1028 : vector<1x256xi1> to vector<32x256xi1>
      %1030 = vector.broadcast %cst_262 : f32 to vector<32x256xf32>
      %1031 = arith.select %1029, %13, %1030 : vector<32x256xi1>, vector<32x256xf32>
      %cst_263 = arith.constant dense<0xFF800000> : vector<32xf32>
      %1032 = vector.multi_reduction <maximumf>, %1031, %cst_263 [1] : vector<32x256xf32> to vector<32xf32>
      %1033 = vector.shape_cast %1032 : vector<32xf32> to vector<32x1xf32>
      %c127_i32 = arith.constant 127 : i32
      %1034 = vector.broadcast %c127_i32 : i32 to vector<1x256xi32>
      %1035 = arith.cmpi eq, %17, %1034 : vector<1x256xi32>
      %cst_264 = arith.constant 0xFF800000 : f32
      %1036 = vector.shape_cast %1035 : vector<1x256xi1> to vector<1x256xi1>
      %1037 = vector.broadcast %1036 : vector<1x256xi1> to vector<32x256xi1>
      %1038 = vector.broadcast %cst_264 : f32 to vector<32x256xf32>
      %1039 = arith.select %1037, %13, %1038 : vector<32x256xi1>, vector<32x256xf32>
      %cst_265 = arith.constant dense<0xFF800000> : vector<32xf32>
      %1040 = vector.multi_reduction <maximumf>, %1039, %cst_265 [1] : vector<32x256xf32> to vector<32xf32>
      %1041 = vector.shape_cast %1040 : vector<32xf32> to vector<32x1xf32>
      %1042 = tpu.concatenate %25, %33, %41, %49, %57, %65, %73, %81, %89, %97, %105, %113, %121, %129, %137, %145 in 1 : vector<32x1xf32>, vector<32x1xf32>, vector<32x1xf32>, vector<32x1xf32>, vector<32x1xf32>, vector<32x1xf32>, vector<32x1xf32>, vector<32x1xf32>, vector<32x1xf32>, vector<32x1xf32>, vector<32x1xf32>, vector<32x1xf32>, vector<32x1xf32>, vector<32x1xf32>, vector<32x1xf32>, vector<32x1xf32> -> vector<32x16xf32>
      %1043 = tpu.concatenate %153, %161, %169, %177, %185, %193, %201, %209, %217, %225, %233, %241, %249, %257, %265, %273 in 1 : vector<32x1xf32>, vector<32x1xf32>, vector<32x1xf32>, vector<32x1xf32>, vector<32x1xf32>, vector<32x1xf32>, vector<32x1xf32>, vector<32x1xf32>, vector<32x1xf32>, vector<32x1xf32>, vector<32x1xf32>, vector<32x1xf32>, vector<32x1xf32>, vector<32x1xf32>, vector<32x1xf32>, vector<32x1xf32> -> vector<32x16xf32>
      %1044 = tpu.concatenate %281, %289, %297, %305, %313, %321, %329, %337, %345, %353, %361, %369, %377, %385, %393, %401 in 1 : vector<32x1xf32>, vector<32x1xf32>, vector<32x1xf32>, vector<32x1xf32>, vector<32x1xf32>, vector<32x1xf32>, vector<32x1xf32>, vector<32x1xf32>, vector<32x1xf32>, vector<32x1xf32>, vector<32x1xf32>, vector<32x1xf32>, vector<32x1xf32>, vector<32x1xf32>, vector<32x1xf32>, vector<32x1xf32> -> vector<32x16xf32>
      %1045 = tpu.concatenate %409, %417, %425, %433, %441, %449, %457, %465, %473, %481, %489, %497, %505, %513, %521, %529 in 1 : vector<32x1xf32>, vector<32x1xf32>, vector<32x1xf32>, vector<32x1xf32>, vector<32x1xf32>, vector<32x1xf32>, vector<32x1xf32>, vector<32x1xf32>, vector<32x1xf32>, vector<32x1xf32>, vector<32x1xf32>, vector<32x1xf32>, vector<32x1xf32>, vector<32x1xf32>, vector<32x1xf32>, vector<32x1xf32> -> vector<32x16xf32>
      %1046 = tpu.concatenate %537, %545, %553, %561, %569, %577, %585, %593, %601, %609, %617, %625, %633, %641, %649, %657 in 1 : vector<32x1xf32>, vector<32x1xf32>, vector<32x1xf32>, vector<32x1xf32>, vector<32x1xf32>, vector<32x1xf32>, vector<32x1xf32>, vector<32x1xf32>, vector<32x1xf32>, vector<32x1xf32>, vector<32x1xf32>, vector<32x1xf32>, vector<32x1xf32>, vector<32x1xf32>, vector<32x1xf32>, vector<32x1xf32> -> vector<32x16xf32>
      %1047 = tpu.concatenate %665, %673, %681, %689, %697, %705, %713, %721, %729, %737, %745, %753, %761, %769, %777, %785 in 1 : vector<32x1xf32>, vector<32x1xf32>, vector<32x1xf32>, vector<32x1xf32>, vector<32x1xf32>, vector<32x1xf32>, vector<32x1xf32>, vector<32x1xf32>, vector<32x1xf32>, vector<32x1xf32>, vector<32x1xf32>, vector<32x1xf32>, vector<32x1xf32>, vector<32x1xf32>, vector<32x1xf32>, vector<32x1xf32> -> vector<32x16xf32>
      %1048 = tpu.concatenate %793, %801, %809, %817, %825, %833, %841, %849, %857, %865, %873, %881, %889, %897, %905, %913 in 1 : vector<32x1xf32>, vector<32x1xf32>, vector<32x1xf32>, vector<32x1xf32>, vector<32x1xf32>, vector<32x1xf32>, vector<32x1xf32>, vector<32x1xf32>, vector<32x1xf32>, vector<32x1xf32>, vector<32x1xf32>, vector<32x1xf32>, vector<32x1xf32>, vector<32x1xf32>, vector<32x1xf32>, vector<32x1xf32> -> vector<32x16xf32>
      %1049 = tpu.concatenate %921, %929, %937, %945, %953, %961, %969, %977, %985, %993, %1001, %1009, %1017, %1025, %1033, %1041 in 1 : vector<32x1xf32>, vector<32x1xf32>, vector<32x1xf32>, vector<32x1xf32>, vector<32x1xf32>, vector<32x1xf32>, vector<32x1xf32>, vector<32x1xf32>, vector<32x1xf32>, vector<32x1xf32>, vector<32x1xf32>, vector<32x1xf32>, vector<32x1xf32>, vector<32x1xf32>, vector<32x1xf32>, vector<32x1xf32> -> vector<32x16xf32>
      %1050 = tpu.concatenate %1042, %1043, %1044, %1045, %1046, %1047, %1048, %1049 in 1 : vector<32x16xf32>, vector<32x16xf32>, vector<32x16xf32>, vector<32x16xf32>, vector<32x16xf32>, vector<32x16xf32>, vector<32x16xf32>, vector<32x16xf32> -> vector<32x128xf32>
      %c0_266 = arith.constant 0 : index
      %c0_267 = arith.constant 0 : index
      %1051 = vector.load %arg10[%c0_266, %c0_267] : memref<32x128xf32, #tpu.memory_space<vmem>>, vector<32x128xf32>
      %1052 = arith.maximumf %1051, %1050 : vector<32x128xf32>
      %c0_268 = arith.constant 0 : index
      %c0_269 = arith.constant 0 : index
      %1053 = vector.load %arg10[%c0_268, %c0_269] : memref<32x128xf32, #tpu.memory_space<vmem>>, vector<32x128xf32>
      tpu.vector_store %arg10[%c0_268, %c0_269], %1052 {strides = array<i32>} : memref<32x128xf32, #tpu.memory_space<vmem>>, vector<32x128xf32>,
    } else {
    }
    %c0_i32_2 = arith.constant 0 : i32
    %8 = arith.cmpi eq, %arg1, %c0_i32_2 : i32
    %9 = arith.extui %8 : i1 to i32
    %c0_i32_3 = arith.constant 0 : i32
    %10 = arith.cmpi ne, %9, %c0_i32_3 : i32
    scf.if %10 {
      %c0 = arith.constant 0 : index
      %c0_4 = arith.constant 0 : index
      %11 = vector.load %arg10[%c0, %c0_4] : memref<32x128xf32, #tpu.memory_space<vmem>>, vector<32x128xf32>
      %cst = arith.constant 0xFF800000 : f32
      %12 = vector.broadcast %cst : f32 to vector<32x128xf32>
      %13 = arith.cmpf ogt, %11, %12 : vector<32x128xf32>
      %cst_5 = arith.constant 0.000000e+00 : f32
      %14 = vector.broadcast %cst_5 : f32 to vector<32x128xf32>
      %15 = arith.select %13, %11, %14 : vector<32x128xi1>, vector<32x128xf32>
      %c0_6 = arith.constant 0 : index
      %c0_7 = arith.constant 0 : index
      %16 = vector.load %arg7[%c0_6, %c0_7] : memref<32x1xf32, #tpu.memory_space<vmem>>, vector<32x1xf32>
      %17 = vector.broadcast %16 : vector<32x1xf32> to vector<32x128xf32>
      %18 = arith.mulf %15, %17 : vector<32x128xf32>
      %c0_8 = arith.constant 0 : index
      %c0_9 = arith.constant 0 : index
      %19 = vector.load %arg8[%c0_8, %c0_9] : memref<32x1xf32, #tpu.memory_space<vmem>>, vector<32x1xf32>
      %20 = vector.broadcast %19 : vector<32x1xf32> to vector<32x128xf32>
      %21 = arith.addf %18, %20 : vector<32x128xf32>
      %cst_10 = arith.constant 5.000000e-01 : f32
      %22 = vector.broadcast %cst_10 : f32 to vector<32x128xf32>
      %23 = arith.mulf %22, %21 : vector<32x128xf32>
      %cst_11 = arith.constant 0.707106769 : f32
      %24 = vector.broadcast %cst_11 : f32 to vector<32x128xf32>
      %25 = arith.mulf %21, %24 : vector<32x128xf32>
      %26 = math.erf %25 : vector<32x128xf32>
      %cst_12 = arith.constant 1.000000e+00 : f32
      %27 = vector.broadcast %cst_12 : f32 to vector<32x128xf32>
      %28 = arith.addf %27, %26 : vector<32x128xf32>
      %29 = arith.mulf %23, %28 : vector<32x128xf32>
      %cst_13 = arith.constant 0.000000e+00 : f32
      %30 = vector.broadcast %cst_13 : f32 to vector<32x128xf32>
      %31 = arith.select %13, %29, %30 : vector<32x128xi1>, vector<32x128xf32>
      %c0_14 = arith.constant 0 : index
      %c0_15 = arith.constant 0 : index
      %32 = vector.load %arg9[%c0_14, %c0_15] : memref<32x128xf32, #tpu.memory_space<vmem>>, vector<32x128xf32>
      tpu.vector_store %arg9[%c0_14, %c0_15], %31 {strides = array<i32>} : memref<32x128xf32, #tpu.memory_space<vmem>>, vector<32x128xf32>,
    } else {
    }
    return
  }
  func.func @transform_0(%arg0: i32, %arg1: i32, %arg2: memref<2xi32, #tpu.memory_space<smem>>, %arg3: memref<2xi32, #tpu.memory_space<smem>>) -> (i32, i32) {
    %0 = arith.index_cast %arg0 : i32 to index
    %1 = memref.load %arg2[%0] : memref<2xi32, #tpu.memory_space<smem>>
    %2 = arith.index_cast %arg0 : i32 to index
    %3 = memref.load %arg3[%2] : memref<2xi32, #tpu.memory_space<smem>>
    %c1_i32 = arith.constant 1 : i32
    %4 = arith.subi %3, %c1_i32 : i32
    %5 = arith.minsi %arg1, %4 : i32
    %6 = arith.addi %1, %5 : i32
    %c0_i32 = arith.constant 0 : i32
    %c0_i32_0 = arith.constant 0 : i32
    return %c0_i32, %6 : i32, i32
  }
  func.func @transform_1(%arg0: i32, %arg1: i32, %arg2: memref<2xi32, #tpu.memory_space<smem>>, %arg3: memref<2xi32, #tpu.memory_space<smem>>) -> (i32, i32) {
    %0 = arith.index_cast %arg0 : i32 to index
    %1 = memref.load %arg2[%0] : memref<2xi32, #tpu.memory_space<smem>>
    %2 = arith.index_cast %arg0 : i32 to index
    %3 = memref.load %arg3[%2] : memref<2xi32, #tpu.memory_space<smem>>
    %c1_i32 = arith.constant 1 : i32
    %4 = arith.subi %3, %c1_i32 : i32
    %5 = arith.minsi %arg1, %4 : i32
    %6 = arith.addi %1, %5 : i32
    %c0_i32 = arith.constant 0 : i32
    %c0_i32_0 = arith.constant 0 : i32
    return %6, %c0_i32 : i32, i32
  }
  func.func @transform_2(%arg0: i32, %arg1: i32, %arg2: memref<2xi32, #tpu.memory_space<smem>>, %arg3: memref<2xi32, #tpu.memory_space<smem>>) -> (i32, i32) {
    %c0_i32 = arith.constant 0 : i32
    %c0_i32_0 = arith.constant 0 : i32
    %c0_i32_1 = arith.constant 0 : i32
    return %c0_i32, %c0_i32_0 : i32, i32
  }
  func.func @transform_3(%arg0: i32, %arg1: i32, %arg2: memref<2xi32, #tpu.memory_space<smem>>, %arg3: memref<2xi32, #tpu.memory_space<smem>>) -> (i32, i32) {
    %c0_i32 = arith.constant 0 : i32
    %c0_i32_0 = arith.constant 0 : i32
    %c0_i32_1 = arith.constant 0 : i32
    return %c0_i32, %c0_i32_0 : i32, i32
  }
  func.func @transform_4(%arg0: i32, %arg1: i32, %arg2: memref<2xi32, #tpu.memory_space<smem>>, %arg3: memref<2xi32, #tpu.memory_space<smem>>) -> (i32, i32) {
    %c0_i32 = arith.constant 0 : i32
    %c0_i32_0 = arith.constant 0 : i32
    %c0_i32_1 = arith.constant 0 : i32
    return %c0_i32, %c0_i32_0 : i32, i32
  }
  func.func @transform_5(%arg0: i32, %arg1: i32, %arg2: memref<2xi32, #tpu.memory_space<smem>>, %arg3: memref<2xi32, #tpu.memory_space<smem>>) -> (i32, i32) {
    %c0_i32 = arith.constant 0 : i32
    %c0_i32_0 = arith.constant 0 : i32
    return %c0_i32, %arg0 : i32, i32
  }
}

</mosaic_0001>

<bundles_post_ra>
// kernel: tpu_custom_call.1
= control target key start
LH: loop header
LB: loop body
LE: loop exit
PB: predicated region body
PF: predicated region fallthrough
CT: control target
= control target key end

     0   :  { %s13521_s0 = inlined_call_operand.vmem [shape: s32[2], index: 0, kind: input, shape index: {}]   ;;  %s13522_s2 = inlined_call_operand.vmem [shape: s32[1,256], index: 2, kind: input, shape index: {}]   ;;  %s13523_s3 = inlined_call_operand.vmem [shape: f32[256,16], index: 3, kind: input, shape index: {}]   ;;  %s13524_s4 = inlined_call_operand.vmem [shape: f32[32,16], index: 4, kind: input, shape index: {}]   ;;  %s13525_s5 = inlined_call_operand.vmem [shape: f32[32,1], index: 5, kind: input, shape index: {}]   ;;  %s13526_s6 = inlined_call_operand.vmem [shape: f32[32,1], index: 6, kind: input, shape index: {}]   ;;  %s13527_s7 = inlined_call_operand.hbm [shape: f32[32,256], index: 7, kind: output, shape index: {}]   ;;  %s13528_s1 = inlined_call_operand.vmem [shape: s32[2], index: 1, kind: input, shape index: {}]  }
   0x1   :  { %s12_s26 = sshll.u32 %s13521_s0, 4  ;;  %s16_s29 = sshll.u32 %s13528_s1, 4  ;;  %s13_s26 = int_to_ptr.vmem [resolvable:$true] %s12_s26  ;;  %s17_s29 = int_to_ptr.vmem [resolvable:$true] %s16_s29 }
   0x2   :  { %s5791_s30 = scalar_lea.vmem %s13_s26, 16  ;;  %p5796_p1 = scmp.lt.s32.totalorder %s13_s26, %s13_s26 }
   0x3   :  { %p5792_p0 = scmp.ne.s32.totalorder %s13_s26, %s5791_s30  ;;  %p5797_p2 = scmp.lt.s32.totalorder %s5791_s30, %s5791_s30 }
   0x5   :  { %p5798_p3 = por %p5797_p2, %p5796_p1 }
   0x7   :  { %p5799_p4 = pnand %p5798_p3, %p5792_p0 }
   0x9   :  { %5802 = shalt.err (!%p5799_p4)  }
   0xa   :  { %s5897_s8 = smov [#allocation4]   ;;  %s5803_s9 = scalar_lea.vmem %s17_s29, 16 }
   0xb   :  { %15 = dma.vmem_to_smem %s13_s26, 16, %s5897_s8, [#allocation3] }
   0xc   :  { %p5804_p5 = scmp.ne.s32.totalorder %s17_s29, %s5803_s9  ;;  %p5808_p6 = scmp.lt.s32.totalorder %s17_s29, %s17_s29 }
   0xd   :  { %p5809_p7 = scmp.lt.s32.totalorder %s5803_s9, %s5803_s9 }
   0xf   :  { %p5810_p8 = por %p5809_p7, %p5808_p6 }
  0x11   :  { %p5811_p9 = pnand %p5810_p8, %p5804_p5 }
  0x13   :  { %5814 = shalt.err (!%p5811_p9)  }
  0x14   :  { %s5898_s0 = smov [#allocation5]  }
  0x15   :  { %19 = dma.vmem_to_smem %s17_s29, 16, %s5898_s0, [#allocation3] }
  0x16   :  { %5867 = dma.done.wait [#allocation3], 32 }
  0x17   :  { %5868 = vsyncadd [#allocation3], 4294967264 }
  0x18   :  { %21 = sfence }
  0x19   :  { %22 = vsyncpa [#allocation7], 0 }
  0x1a   :  { %24 = vsyncpa [#allocation7 + $0x1], 0  ;;  %s5959_s1 = smov 0   ;;  %s5961_s10 = smov 0  }
  0x1b   :  { %s5963_s11 = smov 0   ;;  %s5965_s12 = smov 0  }
  0x1c   :  { %s5967_s13 = smov 0   ;;  %s5969_s14 = smov 0  }
  0x1d LB: > { %13574 = sst [smem:[#allocation10_spill]] %s5891_s13  ;;  %s5543_s15 = sadd.s32 4294967295, %s5895_s14   ;;  %s5895_s14 = sphi %s5969_s14, %s30_s14   ;;  %s5891_s13 = sphi %s5967_s13, %s15171_s13   ;;  %s5887_s12 = sphi %s5965_s12, %s15170_s12   ;;  %s5883_s11 = sphi %s5963_s11, %s15174_s11   ;;  %s5879_s10 = sphi %s5961_s10, %s15173_s10   ;;  %s5875_s1 = sphi %s5959_s1, %s15172_s1  }
  0x1e   : > { %s5544_s16 = sadd.s32 4294967294, %s5895_s14   ;;  %s42_s17 = sadd.s32 1, %s5891_s13 }
  0x1f   : > { %s188_s18 = sadd.s32 1, %s5883_s11  ;;  %p44_p10 = scmp.ge.s32.totalorder %s42_s17, 2 }
  0x20   : > { %p198_p11 = scmp.ne.s32.totalorder %s5883_s11, %s5879_s10  ;;  %p199_p12 = scmp.eq.s32.totalorder %s5543_s15, 1 }
  0x21   : > { %p204_p13 = scmp.ne.s32.totalorder %s5879_s10, %s5875_s1  ;;  %s15176_s17 = smov (%p44_p10, %s42_s17), 0 }
  0x22   : > { %13575 = sst [smem:[#allocation11_spill]] %s15176_s17  ;;  %p5999_p0 = por %p199_p12, %p198_p11 }
  0x23   : > { %p205_p1 = scmp.eq.s32.totalorder %s5544_s16, 1  ;;  %s185_s20 = ssub.s32 %s5891_s13, %s15176_s17 }
  0x24   : > { %p5555_p2 = scmp.ge.s32.totalorder %s5895_s14, 1  ;;  %p186_p3 = scmp.eq.s32.totalorder %s185_s20, 0 }
  0x25   : > { %p6006_p4 = por %p205_p1, %p204_p13  ;;  %p273_p5 = scmp.lt.s32.totalorder %s5895_s14, 3 }
  0x26   : > { %s6012_s22 = scalar_select %p186_p3, %s5883_s11, %s188_s18  }
  0x27   : > { %p274_p6 = pnand %p5555_p2, %p273_p5 }
  0x28   : > { %s13529_s23 = sand.u32 (!%p274_p6), 1, %s5879_s10   ;;  %s318_s25 = sld [smem:[#allocation5 + %s5887_s12]] (!%p274_p6)  ;;  %v5899_v0 = vmov (!%p274_p6), -inf  }
  0x29   : > { %277 = sbr.rel (%p274_p6) target bundleno = 1852 (0x73c), region = 40  ;;  %s5556_s24 = sshll.u32 (!%p274_p6), %s13529_s23, 5  ;;  %356 = vst [vmem:[#allocation2] sm:$0xff] (!%p274_p6), %v5899_v0  ;;  %357 = vst [vmem:[#allocation2 + $0x8] sm:$0xff] (!%p274_p6), %v5899_v0 }
  0x2a   : > { %358 = vst [vmem:[#allocation2 + $0x10] sm:$0xff] (!%p274_p6), %v5899_v0  ;;  %359 = vst [vmem:[#allocation2 + $0x18] sm:$0xff] (!%p274_p6), %v5899_v0  ;;  %s335_s26 = sld [smem:[#allocation5 + %s5887_s12]] (!%p274_p6) }
  0x2b   : > { %s360_s27 = sld [smem:[#allocation5 + %s5887_s12]] (!%p274_p6) }
  0x2c   : > { %s317_s28 = sld [smem:[#allocation4 + %s5887_s12]] (!%p274_p6) }
  0x2d   : > { %s334_s30 = sld [smem:[#allocation4 + %s5887_s12]] (!%p274_p6) }
  0x2e   : > { %s5557_s29 = sadd.s32 (!%p274_p6), 4294967295, %s318_s25 }
  0x2f   : > { %p5558_p7 = scmp.gt.s32.totalorder (!%p274_p6), %s5557_s29, 0 }
  0x30   : > { %s5560_s8 = sadd.s32 4294967295, %s335_s26 }
  0x31   : > { %s15178_s29 = smov (%p5558_p7, %s5557_s29), 0  ;;  %p5561_p8 = scmp.gt.s32.totalorder %s5560_s8, 0 }
  0x32   : > { %s322_s9 = sadd.s32 %s15178_s29, %s317_s28  ;;  %s6033_s28 = scalar_lea.vmem [#allocation6], %s5556_s24 }
  0x33   : > { %s5559_s0 = sshll.u32 %s322_s9, 1  ;;  %s15180_s8 = smov (%p5561_p8, %s5560_s8), 0 }
  0x34   : > { %p324_p9 = scmp.lt.s32.totalorder %s5559_s0, 1  ;;  %s339_s15 = sadd.s32 %s15180_s8, %s334_s30 }
  0x35   : > { %s5562_s23 = sshll.u32 %s339_s15, 5  ;;  %p5565_p11 = scmp.le.s32.totalorder %s360_s27, 0 }
  0x36   : > { %s15182_s0 = smov (!%p324_p9, %s5559_s0), 1  ;;  %p341_p10 = scmp.lt.s32.totalorder %s5562_s23, 31 }
  0x37   : > { %s326_s20 = scalar_lea.vmem %s13522_s2, %s15182_s0  ;;  %364 = sbr.rel (%p5565_p11) target bundleno = 1673 (0x689), region = 48 }
  0x38   : > { %s15184_s23 = smov (!%p341_p10, %s5562_s23), 31 }
  0x39   : > { %s5563_s25 = sshll.u32 %s15184_s23, 3 }
  0x3a   : > { %s6031_s13 = scalar_lea.vmem %s13523_s3, %s5563_s25 }
  0x3e   : > { %v385_v1 = vld [vmem:[%s6031_s13 + $0x80] sm:$0xff]  ;;  %v386_v2 = vld [vmem:[%s6031_s13 + $0x88] sm:$0xff]  ;;  %vm13564_vm0 = vcmask 130048   ;;  %v387_v7 = vld [vmem:[%s6031_s13 + $0x90] sm:$0xff]  ;;  %v605_v56 = vlaneseq  ;;  %v13532_v60 = vmov 0   ;;  %s5901_s0 = smov 16  }
  0x3f   : > { %v369_v3 = vld [vmem:[%s6031_s13] sm:$0xff]  ;;  %v5647_v4 = vpack.c.bf16 %v386_v2, %v385_v1  ;;  %vm6040_vm1 = vmpackc.low %vm13564_vm0, %vm13564_vm0  ;;  %v370_v6 = vld [vmem:[%s6031_s13 + $0x8] sm:$0xff]  ;;  %s5902_s18 = smov 32   ;;  %s5904_s25 = smov 64  }
  0x40   : > { %v5650_v8 = vpack.c.bf16 %v370_v6, %v369_v3  ;;  %v388_v9 = vld [vmem:[%s6031_s13 + $0x98] sm:$0xff]  ;;  %v371_v11 = vld [vmem:[%s6031_s13 + $0x10] sm:$0xff]  ;;  %v389_v13 = vld [vmem:[%s6031_s13 + $0xa0] sm:$0xff]  ;;  %v606_v58 = vshrl.u32 %v605_v56, 7  ;;  %s5905_s26 = smov 80   ;;  %s5906_s17 = smov 96  }
  0x41   : > { %5649 = vmatprep.subr.msk.bf16.mxu0 %vm6040_vm1, %v5647_v4  ;;  %5695 = vmatprep.subr.msk.bf16.mxu1 %vm6040_vm1, %v5647_v4  ;;  %v5653_v10 = vpack.c.bf16 %v388_v9, %v387_v7  ;;  %v372_v12 = vld [vmem:[%s6031_s13 + $0x18] sm:$0xff]  ;;  %v390_v14 = vld [vmem:[%s6031_s13 + $0xa8] sm:$0xff]  ;;  %v6066_v17 = vld [vmem:[%s13524_s4] sm:$0xff]  ;;  %s5907_s23 = smov 112  }
  0x42   : > { %5652 = vmatpush3.bf16.xpose.msk.msra.mxu0 %vm6040_vm1, %v5650_v8  ;;  %5703 = vmatpush3.bf16.xpose.msk.msra.mxu1 %vm6040_vm1, %v5650_v8  ;;  %v5656_v15 = vpack.c.bf16 %v372_v12, %v371_v11  ;;  %v5659_v16 = vpack.c.bf16 %v390_v14, %v389_v13  ;;  %v6071_v18 = vld [vmem:[%s13524_s4 + $0x10] sm:$0xff]  ;;  %v373_v19 = vld [vmem:[%s6031_s13 + $0x20] sm:$0xff]  ;;  %v374_v20 = vld [vmem:[%s6031_s13 + $0x28] sm:$0xff]  ;;  %v6175_v59 = vsub.s32 0, %v606_v58  ;;  %v6181_v62 = vsub.s32 1, %v606_v58 }
  0x43   : > { %5655 = vmatprep.subr.msk.bf16.mxu0 %vm6040_vm1, %v5653_v10  ;;  %5696 = vmatprep.subr.msk.bf16.mxu1 %vm6040_vm1, %v5653_v10  ;;  %v391_v21 = vld [vmem:[%s6031_s13 + $0xb0] sm:$0xff]  ;;  %v392_v22 = vld [vmem:[%s6031_s13 + $0xb8] sm:$0xff]  ;;  %v5662_v23 = vpack.c.bf16 %v374_v20, %v373_v19  ;;  %v393_v27 = vld [vmem:[%s6031_s13 + $0xc0] sm:$0xff] }
  0x44   : > { %5639 = vmatprep.mubr.msk.f32.mxu0 %vm13564_vm0, %v6066_v17  ;;  %5643 = vmatprep.mubr.msk.f32.mxu1 %vm13564_vm0, %v6071_v18  ;;  %v5665_v24 = vpack.c.bf16 %v392_v22, %v391_v21  ;;  %v375_v25 = vld [vmem:[%s6031_s13 + $0x30] sm:$0xff]  ;;  %v376_v26 = vld [vmem:[%s6031_s13 + $0x38] sm:$0xff]  ;;  %v394_v28 = vld [vmem:[%s6031_s13 + $0xc8] sm:$0xff] }
  0x45   : > { %v5668_v29 = vpack.c.bf16 %v376_v26, %v375_v25  ;;  %v5671_v30 = vpack.c.bf16 %v394_v28, %v393_v27  ;;  %v377_v31 = vld [vmem:[%s6031_s13 + $0x40] sm:$0xff]  ;;  %v378_v32 = vld [vmem:[%s6031_s13 + $0x48] sm:$0xff]  ;;  %v395_v33 = vld [vmem:[%s6031_s13 + $0xd0] sm:$0xff] }
  0x46   : > { %v396_v34 = vld [vmem:[%s6031_s13 + $0xd8] sm:$0xff]  ;;  %v5674_v35 = vpack.c.bf16 %v378_v32, %v377_v31  ;;  %v379_v37 = vld [vmem:[%s6031_s13 + $0x50] sm:$0xff]  ;;  %v397_v39 = vld [vmem:[%s6031_s13 + $0xe0] sm:$0xff] }
  0x47   : > { %v5677_v36 = vpack.c.bf16 %v396_v34, %v395_v33  ;;  %v380_v38 = vld [vmem:[%s6031_s13 + $0x58] sm:$0xff]  ;;  %v398_v40 = vld [vmem:[%s6031_s13 + $0xe8] sm:$0xff]  ;;  %v381_v43 = vld [vmem:[%s6031_s13 + $0x60] sm:$0xff] }
  0x48   : > { %v5680_v41 = vpack.c.bf16 %v380_v38, %v379_v37  ;;  %v5683_v42 = vpack.c.bf16 %v398_v40, %v397_v39  ;;  %v382_v44 = vld [vmem:[%s6031_s13 + $0x68] sm:$0xff]  ;;  %v399_v45 = vld [vmem:[%s6031_s13 + $0xf0] sm:$0xff]  ;;  %v400_v46 = vld [vmem:[%s6031_s13 + $0xf8] sm:$0xff] }
  0x49   : > { %v5686_v47 = vpack.c.bf16 %v382_v44, %v381_v43  ;;  %v5689_v48 = vpack.c.bf16 %v400_v46, %v399_v45  ;;  %v383_v49 = vld [vmem:[%s6031_s13 + $0x70] sm:$0xff]  ;;  %v384_v50 = vld [vmem:[%s6031_s13 + $0x78] sm:$0xff]  ;;  %v366_v53 = vld [vmem:[%s13524_s4 + $0x8] sm:$0xff]  ;;  %s5602_s13 = sshll.u32 %s5887_s12, 7  ;;  %v13584_v46 = vmov 0 }
  0x4a   : > { %5658 = vmatpush3.bf16.xpose.msk.msra.mxu0 %vm6040_vm1, %v5656_v15  ;;  %5704 = vmatpush3.bf16.xpose.msk.msra.mxu1 %vm6040_vm1, %v5656_v15  ;;  %v5692_v51 = vpack.c.bf16 %v384_v50, %v383_v49  ;;  %v368_v52 = vld [vmem:[%s13524_s4 + $0x18] sm:$0xff]  ;;  %v599_v54 = vld [vmem:[%s326_s20] sm:$0x3]  ;;  %v601_v55 = vstv %s5602_s13  ;;  %s5903_s20 = smov 48  }
  0x4b   : > { %5661 = vmatprep.subr.msk.bf16.mxu0 %vm6040_vm1, %v5659_v16  ;;  %5697 = vmatprep.subr.msk.bf16.mxu1 %vm6040_vm1, %v5659_v16  ;;  %v6171_v57 = vsub.s32 %v599_v54, %v601_v55 }
  0x4d   : > { %vm603_vm2 = vcmp.eq.s32.totalorder %v6171_v57, 0  ;;  %vm635_vm3 = vcmp.eq.s32.totalorder %v6171_v57, 1  ;;  %vm667_vm4 = vcmp.eq.s32.totalorder %v6171_v57, 2  ;;  %vm699_vm5 = vcmp.eq.s32.totalorder %v6171_v57, 3 }
  0x4e   : > { %v6179_v61 = vsel %vm603_vm2, 1, %v13532_v60  ;;  %v6185_v63 = vsel %vm635_vm3, 1, %v13532_v60  ;;  %vm731_vm6 = vcmp.eq.s32.totalorder %v6171_v57, 4  ;;  %v6189_v0 = vsel %vm667_vm4, 1, %v13532_v60 }
  0x4f   : > { %vm763_vm7 = vcmp.eq.s32.totalorder %v6171_v57, 5  ;;  %v608_v1 = vrot.slane %v6179_v61, %v6175_v59  ;;  %v6195_v2 = vsel %vm699_vm5, 1, %v13532_v60  ;;  %vm795_vm8 = vcmp.eq.s32.totalorder %v6171_v57, 6 }
  0x50   : > { %v612_v3 = vrot.slane %v6179_v61, %v6181_v62  ;;  %v640_v4 = vrot.slane %v6185_v63, %v6175_v59  ;;  %v6203_v5 = vsel %vm731_vm6, 1, %v13532_v60  ;;  %vm827_vm9 = vcmp.eq.s32.totalorder %v6171_v57, 7 }
  0x51   : > { %v644_v6 = vrot.slane %v6185_v63, %v6181_v62  ;;  %v672_v7 = vrot.slane %v6189_v0, %v6175_v59  ;;  %v6211_v8 = vsel %vm763_vm7, 1, %v13532_v60  ;;  %vm859_vm10 = vcmp.eq.s32.totalorder %v6171_v57, 8 }
  0x52   : > { %5664 = vmatpush3.bf16.xpose.msk.msra.mxu0 %vm6040_vm1, %v5662_v23  ;;  %5705 = vmatpush3.bf16.xpose.msk.msra.mxu1 %vm6040_vm1, %v5662_v23  ;;  %v676_v9 = vrot.slane %v6189_v0, %v6181_v62  ;;  %v704_v10 = vrot.slane %v6195_v2, %v6175_v59  ;;  %v6219_v11 = vsel %vm795_vm8, 1, %v13532_v60  ;;  %vm891_vm11 = vcmp.eq.s32.totalorder %v6171_v57, 9 }
  0x53   : > { %5667 = vmatprep.subr.msk.bf16.mxu0 %vm6040_vm1, %v5665_v24  ;;  %5698 = vmatprep.subr.msk.bf16.mxu1 %vm6040_vm1, %v5665_v24  ;;  %v708_v12 = vrot.slane %v6195_v2, %v6181_v62  ;;  %v736_v13 = vrot.slane %v6203_v5, %v6175_v59  ;;  %v6227_v14 = vsel %vm827_vm9, 1, %v13532_v60  ;;  %vm923_vm12 = vcmp.eq.s32.totalorder %v6171_v57, 10 }
  0x54   : > { %v740_v15 = vrot.slane %v6203_v5, %v6181_v62  ;;  %vm955_vm13 = vcmp.eq.s32.totalorder %v6171_v57, 11  ;;  %v6243_v20 = vsel %vm891_vm11, 1, %v13532_v60  ;;  %vm987_vm14 = vcmp.eq.s32.totalorder %v6171_v57, 12 }
  0x55   : > { %v6251_v23 = vsel %vm923_vm12, 1, %v13532_v60  ;;  %vm1019_vm15 = vcmp.eq.s32.totalorder %v6171_v57, 13  ;;  %v6259_v26 = vsel %vm955_vm13, 1, %v13532_v60  ;;  %vm1083_vm2 = vcmp.eq.s32.totalorder %v6171_v57, 15 }
  0x56   : > { %v6275_v32 = vsel %vm1019_vm15, 1, %v13532_v60  ;;  %vm1115_vm3 = vcmp.eq.s32.totalorder %v6171_v57, 16  ;;  %vm1147_vm4 = vcmp.eq.s32.totalorder %v6171_v57, 17  ;;  %v6291_v38 = vsel %vm1083_vm2, 1, %v13532_v60 }
  0x57   : > { %vm1179_vm5 = vcmp.eq.s32.totalorder %v6171_v57, 18  ;;  %vm1211_vm6 = vcmp.eq.s32.totalorder %v6171_v57, 19  ;;  %v6307_v44 = vsel %vm1147_vm4, 1, %v13532_v60  ;;  %vm1243_vm7 = vcmp.eq.s32.totalorder %v6171_v57, 20 }
  0x58   : > { %vm1275_vm8 = vcmp.eq.s32.totalorder %v6171_v57, 21  ;;  %vm1307_vm9 = vcmp.eq.s32.totalorder %v6171_v57, 22  ;;  %vm1371_vm11 = vcmp.eq.s32.totalorder %v6171_v57, 24  ;;  %vm1403_vm12 = vcmp.eq.s32.totalorder %v6171_v57, 25 }
  0x59   : > { %v6339_v56 = vsel %vm1275_vm8, 1, %v13532_v60  ;;  %v6352_v55 = vsel %vm1307_vm9, 1, %v13532_v60  ;;  %vm1435_vm13 = vcmp.eq.s32.totalorder %v6171_v57, 26  ;;  %v6363_v50 = vsel %vm1371_vm11, 1, %v13532_v60 }
  0x5a   : > { %5670 = vmatpush3.bf16.xpose.msk.msra.mxu0 %vm6040_vm1, %v5668_v29  ;;  %5706 = vmatpush3.bf16.xpose.msk.msra.mxu1 %vm6040_vm1, %v5668_v29  ;;  %v6267_v29 = vsel %vm987_vm14, 1, %v13532_v60  ;;  %vm1467_vm14 = vcmp.eq.s32.totalorder %v6171_v57, 27  ;;  %vm1499_vm15 = vcmp.eq.s32.totalorder %v6171_v57, 28  ;;  %v6380_v45 = vsel %vm1435_vm13, 1, %v13532_v60 }
  0x5b   : > { %5673 = vmatprep.subr.msk.bf16.mxu0 %vm6040_vm1, %v5671_v30  ;;  %5699 = vmatprep.subr.msk.bf16.mxu1 %vm6040_vm1, %v5671_v30  ;;  %13580 = vst [vmem:[#allocation12_spill] sm:$0xff] %v6380_v45  ;;  %vm1563_vm2 = vcmp.eq.s32.totalorder %v6171_v57, 30  ;;  %v6395_v58 = vsel %vm1499_vm15, 1, %v13532_v60  ;;  %vm6410_vm4 = vcmp.eq.s32.totalorder %v608_v1, 1  ;;  %v13590_v1 = vmov 0 }
  0x5c   : > { %13582 = vst [vmem:[#allocation14_spill] sm:$0xff] %v6395_v58  ;;  %v13585_v46 = vsel %vm6410_vm4, 4294967295, %v13584_v46  ;;  %vm6439_vm8 = vcmp.eq.s32.totalorder %v644_v6, 1  ;;  %vm1659_vm9 = vcmp.eq.s32.totalorder %v6171_v57, 33  ;;  %vm1723_vm11 = vcmp.eq.s32.totalorder %v6171_v57, 35 }
  0x5d   : > { %13586 = vst [vmem:[#allocation16_spill] sm:$0xff] %v13585_v46  ;;  %vm6467_vm13 = vcmp.eq.s32.totalorder %v676_v9, 1  ;;  %vm1787_vm15 = vcmp.eq.s32.totalorder %v6171_v57, 37  ;;  %v6481_v39 = vsel %vm1659_vm9, 1, %v13532_v60  ;;  %v6493_v37 = vsel %vm1723_vm11, 1, %v13532_v60 }
  0x5e   : > { %13601 = vst [vmem:[#allocation21_spill] sm:$0xff] %v6481_v39  ;;  %13603 = vst [vmem:[#allocation23_spill] sm:$0xff] %v6493_v37  ;;  %v6503_v0 = vsel %vm1787_vm15, 1, %v13532_v60  ;;  %vm6552_vm9 = vcmp.eq.s32.totalorder %v736_v13, 1 }
  0x5f   : > { %13605 = vst [vmem:[#allocation25_spill] sm:$0xff] %v6503_v0  ;;  %v13619_v0 = vrot.slane %v6211_v8, %v6181_v62 }
  0x62   : > { %5676 = vmatpush3.bf16.xpose.msk.msra.mxu0 %vm6040_vm1, %v5674_v35  ;;  %5707 = vmatpush3.bf16.xpose.msk.msra.mxu1 %vm6040_vm1, %v5674_v35 }
  0x63   : > { %5679 = vmatprep.subr.msk.bf16.mxu0 %vm6040_vm1, %v5677_v36  ;;  %5700 = vmatprep.subr.msk.bf16.mxu1 %vm6040_vm1, %v5677_v36 }
  0x6a   : > { %5682 = vmatpush3.bf16.xpose.msk.msra.mxu0 %vm6040_vm1, %v5680_v41  ;;  %5708 = vmatpush3.bf16.xpose.msk.msra.mxu1 %vm6040_vm1, %v5680_v41  ;;  %v6299_v41 = vsel %vm1115_vm3, 1, %v13532_v60  ;;  %vm1595_vm3 = vcmp.eq.s32.totalorder %v6171_v57, 31 }
  0x6b   : > { %5685 = vmatprep.subr.msk.bf16.mxu0 %vm6040_vm1, %v5683_v42  ;;  %5701 = vmatprep.subr.msk.bf16.mxu1 %vm6040_vm1, %v5683_v42  ;;  %v6387_v42 = vsel %vm1467_vm14, 1, %v13532_v60  ;;  %v6453_v63 = vsel %vm1595_vm3, 1, %v13532_v60  ;;  %vm1755_vm14 = vcmp.eq.s32.totalorder %v6171_v57, 36  ;;  %vm6508_vm3 = vcmp.eq.s32.totalorder %v704_v10, 1 }
  0x6c   : > { %13581 = vst [vmem:[#allocation13_spill] sm:$0xff] %v6387_v42  ;;  %13595 = vst [vmem:[#allocation19_spill] sm:$0xff] %v6453_v63  ;;  %v6500_v34 = vsel %vm1755_vm14, 1, %v13532_v60  ;;  %vm6609_vm14 = vcmp.eq.s32.totalorder %v13619_v0, 1 }
  0x6d   : > { %13604 = vst [vmem:[#allocation24_spill] sm:$0xff] %v6500_v34 }
  0x72   : > { %5688 = vmatpush3.bf16.xpose.msk.msra.mxu0 %vm6040_vm1, %v5686_v47  ;;  %5709 = vmatpush3.bf16.xpose.msk.msra.mxu1 %vm6040_vm1, %v5686_v47  ;;  %v6315_v47 = vsel %vm1179_vm5, 1, %v13532_v60  ;;  %vm6417_vm5 = vcmp.eq.s32.totalorder %v640_v4, 1 }
  0x73   : > { %5691 = vmatprep.subr.msk.bf16.mxu0 %vm6040_vm1, %v5689_v48  ;;  %5702 = vmatprep.subr.msk.bf16.mxu1 %vm6040_vm1, %v5689_v48  ;;  %v6369_v48 = vsel %vm1403_vm12, 1, %v13532_v60  ;;  %vm6460_vm12 = vcmp.eq.s32.totalorder %v672_v7, 1 }
  0x7a   : > { %5694 = vmatpush3.bf16.xpose.msk.msra.mxu0 %vm6040_vm1, %v5692_v51  ;;  %5710 = vmatpush3.bf16.xpose.msk.msra.mxu1 %vm6040_vm1, %v5692_v51  ;;  %vm1051_vm1 = vcmp.eq.s32.totalorder %v6171_v57, 14  ;;  %v6325_v51 = vsel %vm1211_vm6, 1, %v13532_v60  ;;  %vm1627_vm6 = vcmp.eq.s32.totalorder %v6171_v57, 32 }
  0x7b   : > { %v6283_v35 = vsel %vm1051_vm1, 1, %v13532_v60  ;;  %vm1531_vm1 = vcmp.eq.s32.totalorder %v6171_v57, 29  ;;  %v6474_v54 = vsel %vm1627_vm6, 1, %v13532_v60  ;;  %vm6515_vm6 = vcmp.eq.s32.totalorder %v708_v12, 1 }
  0x7c   : > { %v6398_v40 = vsel %vm1531_vm1, 1, %v13532_v60  ;;  %13600 = vst [vmem:[#allocation20_spill] sm:$0xff] %v6474_v54  ;;  %vm1819_vm1 = vcmp.eq.s32.totalorder %v6171_v57, 38 }
  0x7d   : > { %13583 = vst [vmem:[#allocation15_spill] sm:$0xff] %v6398_v40  ;;  %v6524_v31 = vsel %vm1819_vm1, 1, %v13532_v60 }
  0x7e   : > { %13610 = vst [vmem:[#allocation26_spill] sm:$0xff] %v6524_v31 }
  0x81   : > { %5640 = vmatmul.mubr.msk.f32.vlgmr.msra.gmra.mrb[0].mxu0 %vm13564_vm0, %v6066_v17  ;;  %5644 = vmatmul.mubr.msk.f32.vlgmr.msra.gmra.mrb[0].mxu1 %vm13564_vm0, %v6071_v18  ;;  %v6235_v17 = vsel %vm859_vm10, 1, %v13532_v60  ;;  %vm1339_vm10 = vcmp.eq.s32.totalorder %v6171_v57, 23 }
  0x82   : > { %5645 = vmatprep.mubr.msk.f32.mxu1 %vm13564_vm0, %v368_v52  ;;  %5641 = vmatprep.mubr.msk.f32.mxu0 %vm13564_vm0, %v366_v53  ;;  %v6355_v49 = vsel %vm1339_vm10, 1, %v13532_v60  ;;  %vm1691_vm10 = vcmp.eq.s32.totalorder %v6171_v57, 34 }
  0x85   : > { %5646 = vmatmul.mubr.msk.f32.gmra.mrb[2].mxu1 %vm13564_vm0, %v368_v52  ;;  %5642 = vmatmul.mubr.msk.f32.gmra.mrb[2].mxu0 %vm13564_vm0, %v366_v53  ;;  %v6330_v53 = vsel %vm1243_vm7, 1, %v13532_v60  ;;  %v6426_v52 = vsel %vm1563_vm2, 1, %v13532_v60  ;;  %vm6432_vm7 = vcmp.eq.s32.totalorder %v612_v3, 1  ;;  %vm1851_vm2 = vcmp.eq.s32.totalorder %v6171_v57, 39 }
  0x86   : > { %13589 = vst [vmem:[#allocation17_spill] sm:$0xff] %v6426_v52  ;;  %v13591_v1 = vsel %vm6432_vm7, 4294967295, %v13590_v1  ;;  %v6490_v3 = vsel %vm1691_vm10, 1, %v13532_v60  ;;  %v6527_v10 = vsel %vm1851_vm2, 1, %v13532_v60  ;;  %vm6559_vm10 = vcmp.eq.s32.totalorder %v740_v15, 1 }
  0x87   : > { %13592 = vst [vmem:[#allocation18_spill] sm:$0xff] %v13591_v1  ;;  %13602 = vst [vmem:[#allocation22_spill] sm:$0xff] %v6490_v3 }
  0x88   : > { %13611 = vst [vmem:[#allocation27_spill] sm:$0xff] %v6527_v10  ;;  %v13616_v10 = vrot.slane %v6211_v8, %v6175_v59 }
  0x8a   : > { %vm6602_vm11 = vcmp.eq.s32.totalorder %v13616_v10, 1 }
 0x154   : > { %v6545_v27 = vpop.f32.mrb[0].mxu0  ;;  %v6547_v2 = vpop.f32.mrb[0].mxu1 }
 0x155   : > { %v6571_v12 = vpop.f32.mrb[1].mxu0  ;;  %v6573_v25 = vpop.f32.mrb[1].mxu1  ;;  %v619_v5 = vsel %vm6410_vm4, %v6547_v2, -inf  ;;  %v615_v15 = vsel %vm6410_vm4, %v6545_v27, -inf  ;;  %v647_v60 = vsel %vm6417_vm5, %v6545_v27, -inf  ;;  %v651_v13 = vsel %vm6417_vm5, %v6547_v2, -inf }
 0x156   : > { %v620_v33 = vsel %vm6432_vm7, %v6573_v25, -inf  ;;  %v616_v30 = vsel %vm6432_vm7, %v6571_v12, -inf  ;;  %v648_v24 = vsel %vm6439_vm8, %v6571_v12, -inf  ;;  %v652_v22 = vsel %vm6439_vm8, %v6573_v25, -inf }
 0x157   : > { %v629_v21 = vmax.f32 %v619_v5, %v620_v33  ;;  %v623_v19 = vmax.f32 %v615_v15, %v616_v30  ;;  %v655_v18 = vmax.f32 %v647_v60, %v648_v24  ;;  %v661_v16 = vmax.f32 %v651_v13, %v652_v22 }
 0x158   : > { %v6613_v37 = vpop.f32.mrb[2].mxu1  ;;  %v6615_v33 = vpop.f32.mrb[2].mxu0  ;;  %v679_v60 = vsel %vm6460_vm12, %v6545_v27, -inf  ;;  %v680_v22 = vsel %vm6467_vm13, %v6571_v12, -inf  ;;  %v683_v8 = vsel %vm6460_vm12, %v6547_v2, -inf  ;;  %v684_v24 = vsel %vm6467_vm13, %v6573_v25, -inf }
 0x159   : > { %630 = vmax.xlane.f32.xlu1 %v629_v21  ;;  %v6629_v30 = vpop.f32.mrb[3].mxu1  ;;  %624 = vmax.xlane.f32.xlu0 %v623_v19  ;;  %v6631_v0 = vpop.f32.mrb[3].mxu0  ;;  %v621_v10 = vsel %vm6410_vm4, %v6613_v37, -inf  ;;  %v649_v13 = vsel %vm6417_vm5, %v6615_v33, -inf  ;;  %v687_v5 = vmax.f32 %v679_v60, %v680_v22  ;;  %v653_v15 = vsel %vm6417_vm5, %v6613_v37, -inf }
 0x15a   : > { %v622_v21 = vsel %vm6432_vm7, %v6629_v30, -inf  ;;  %v650_v19 = vsel %vm6439_vm8, %v6631_v0, -inf  ;;  %v654_v46 = vsel %vm6439_vm8, %v6629_v30, -inf  ;;  %v6651_v3 = vmax.f32 %v683_v8, %v684_v24 }
 0x15b   : > { %v13622_v60 = vrot.slane %v6219_v11, %v6175_v59  ;;  %v13625_v22 = vrot.slane %v6219_v11, %v6181_v62  ;;  %v632_v39 = vmax.f32 %v621_v10, %v622_v21  ;;  %v658_v54 = vmax.f32 %v649_v13, %v650_v19 }
 0x15c   : > { %v664_v4 = vmax.f32 %v653_v15, %v654_v46  ;;  %v681_v8 = vsel %vm6460_vm12, %v6615_v33, -inf  ;;  %v682_v24 = vsel %vm6467_vm13, %v6631_v0, -inf  ;;  %v712_v11 = vsel %vm6515_vm6, %v6571_v12, -inf }
 0x15d   : > { %vm6656_vm15 = vcmp.eq.s32.totalorder %v13622_v60, 1  ;;  %vm6663_vm5 = vcmp.eq.s32.totalorder %v13625_v22, 1  ;;  %v711_v60 = vsel %vm6508_vm3, %v6545_v27, -inf  ;;  %v685_v46 = vsel %vm6460_vm12, %v6613_v37, -inf  ;;  %633 = vmax.xlane.f32.xlu1 %v632_v39  ;;  %656 = vmax.xlane.f32.xlu0 %v655_v18 }
 0x15e   : > { %v690_v10 = vmax.f32 %v681_v8, %v682_v24  ;;  %v6682_v13 = vmax.f32 %v711_v60, %v712_v11  ;;  %v686_v15 = vsel %vm6467_vm13, %v6629_v30, -inf  ;;  %v715_v21 = vsel %vm6508_vm3, %v6547_v2, -inf }
 0x15f   : > { %v13628_v19 = vrot.slane %v6227_v14, %v6175_v59  ;;  %v13631_v18 = vrot.slane %v6227_v14, %v6181_v62  ;;  %v6704_v61 = vmax.f32 %v685_v46, %v686_v15  ;;  %v716_v6 = vsel %vm6515_vm6, %v6573_v25, -inf }
 0x160   : > { %v713_v8 = vsel %vm6508_vm3, %v6615_v33, -inf  ;;  %v714_v24 = vsel %vm6515_vm6, %v6631_v0, -inf  ;;  %v6715_v60 = vmax.f32 %v715_v21, %v716_v6  ;;  %v743_v11 = vsel %vm6552_vm9, %v6545_v27, -inf }
 0x161   : > { %vm6693_vm8 = vcmp.eq.s32.totalorder %v13628_v19, 1  ;;  %vm6700_vm12 = vcmp.eq.s32.totalorder %v13631_v18, 1  ;;  %v6717_v14 = vmax.f32 %v713_v8, %v714_v24  ;;  %v744_v46 = vsel %vm6559_vm10, %v6571_v12, -inf  ;;  %662 = vmax.xlane.f32.xlu0 %v661_v16  ;;  %659 = vmax.xlane.f32.xlu1 %v658_v54 }
 0x162   : > { %v6725_v15 = vmax.f32 %v743_v11, %v744_v46  ;;  %v717_v19 = vsel %vm6508_vm3, %v6613_v37, -inf  ;;  %v718_v21 = vsel %vm6515_vm6, %v6629_v30, -inf  ;;  %v747_v18 = vsel %vm6552_vm9, %v6547_v2, -inf }
 0x163   : > { %v13634_v6 = vrot.slane %v6235_v17, %v6175_v59  ;;  %v13637_v24 = vrot.slane %v6235_v17, %v6181_v62  ;;  %v6750_v7 = vmax.f32 %v717_v19, %v718_v21  ;;  %v748_v11 = vsel %vm6559_vm10, %v6573_v25, -inf }
 0x164   : > { %v745_v46 = vsel %vm6552_vm9, %v6615_v33, -inf  ;;  %v746_v17 = vsel %vm6559_vm10, %v6631_v0, -inf  ;;  %v775_v16 = vsel %vm6602_vm11, %v6545_v27, -inf  ;;  %v776_v54 = vsel %vm6609_vm14, %v6571_v12, -inf }
 0x165   : > { %vm6739_vm13 = vcmp.eq.s32.totalorder %v13634_v6, 1  ;;  %vm6746_vm1 = vcmp.eq.s32.totalorder %v13637_v24, 1  ;;  %v6761_v6 = vmax.f32 %v747_v18, %v748_v11  ;;  %v6763_v24 = vmax.f32 %v745_v46, %v746_v17  ;;  %688 = vmax.xlane.f32.xlu0 %v687_v5  ;;  %665 = vmax.xlane.f32.xlu1 %v664_v4 }
 0x166   : > { %v6771_v19 = vmax.f32 %v775_v16, %v776_v54  ;;  %v749_v21 = vsel %vm6552_vm9, %v6613_v37, -inf  ;;  %v750_v18 = vsel %vm6559_vm10, %v6629_v30, -inf  ;;  %v779_v11 = vsel %vm6602_vm11, %v6547_v2, -inf }
 0x167   : > { %v13640_v46 = vrot.slane %v6243_v20, %v6175_v59  ;;  %v13643_v16 = vrot.slane %v6243_v20, %v6181_v62  ;;  %v6796_v28 = vmax.f32 %v749_v21, %v750_v18  ;;  %v780_v54 = vsel %vm6609_vm14, %v6573_v25, -inf }
 0x168   : > { %v778_v63 = vsel %vm6609_vm14, %v6631_v0, -inf  ;;  %v6807_v20 = vmax.f32 %v779_v11, %v780_v54  ;;  %v807_v21 = vsel %vm6656_vm15, %v6545_v27, -inf  ;;  %v808_v18 = vsel %vm6663_vm5, %v6571_v12, -inf }
 0x169   : > { %vm6785_vm2 = vcmp.eq.s32.totalorder %v13640_v46, 1  ;;  %vm6792_vm3 = vcmp.eq.s32.totalorder %v13643_v16, 1  ;;  %v777_v46 = vsel %vm6602_vm11, %v6615_v33, -inf  ;;  %v6817_v52 = vmax.f32 %v807_v21, %v808_v18  ;;  %694 = vmax.xlane.f32.xlu0 %v6651_v3  ;;  %691 = vmax.xlane.f32.xlu1 %v690_v10 }
 0x16a   : > { %v6809_v16 = vmax.f32 %v777_v46, %v778_v63  ;;  %v781_v40 = vsel %vm6602_vm11, %v6613_v37, -inf  ;;  %v782_v5 = vsel %vm6609_vm14, %v6629_v30, -inf  ;;  %v811_v63 = vsel %vm6656_vm15, %v6547_v2, -inf }
 0x16b   : > { %v13646_v4 = vrot.slane %v6251_v23, %v6175_v59  ;;  %v13649_v54 = vrot.slane %v6251_v23, %v6181_v62  ;;  %v6842_v34 = vmax.f32 %v781_v40, %v782_v5  ;;  %v812_v46 = vsel %vm6663_vm5, %v6573_v25, -inf }
 0x16c   : > { %v809_v21 = vsel %vm6656_vm15, %v6615_v33, -inf  ;;  %v810_v18 = vsel %vm6663_vm5, %v6631_v0, -inf  ;;  %v839_v40 = vsel %vm6693_vm8, %v6545_v27, -inf  ;;  %v840_v5 = vsel %vm6700_vm12, %v6571_v12, -inf }
 0x16d   : > { %vm6831_vm6 = vcmp.eq.s32.totalorder %v13646_v4, 1  ;;  %vm6838_vm9 = vcmp.eq.s32.totalorder %v13649_v54, 1  ;;  %v6853_v4 = vmax.f32 %v811_v63, %v812_v46  ;;  %v6855_v23 = vmax.f32 %v809_v21, %v810_v18  ;;  %720 = vmax.xlane.f32.xlu0 %v6682_v13  ;;  %697 = vmax.xlane.f32.xlu1 %v6704_v61 }
 0x16e   : > { %v6864_v54 = vmax.f32 %v839_v40, %v840_v5  ;;  %v813_v63 = vsel %vm6656_vm15, %v6613_v37, -inf  ;;  %v814_v46 = vsel %vm6663_vm5, %v6629_v30, -inf  ;;  %v843_v21 = vsel %vm6693_vm8, %v6547_v2, -inf }
 0x16f   : > { %v13652_v18 = vrot.slane %v6259_v26, %v6175_v59  ;;  %v13655_v10 = vrot.slane %v6259_v26, %v6181_v62  ;;  %v6889_v1 = vmax.f32 %v813_v63, %v814_v46  ;;  %v844_v40 = vsel %vm6700_vm12, %v6573_v25, -inf }
 0x170   : > { %v841_v5 = vsel %vm6693_vm8, %v6615_v33, -inf  ;;  %v6900_v58 = vmax.f32 %v843_v21, %v844_v40  ;;  %v871_v63 = vsel %vm6739_vm13, %v6545_v27, -inf  ;;  %v872_v46 = vsel %vm6746_vm1, %v6571_v12, -inf }
 0x171   : > { %vm6878_vm10 = vcmp.eq.s32.totalorder %v13652_v18, 1  ;;  %vm6885_vm11 = vcmp.eq.s32.totalorder %v13655_v10, 1  ;;  %v842_v18 = vsel %vm6700_vm12, %v6631_v0, -inf  ;;  %v6910_v10 = vmax.f32 %v871_v63, %v872_v46  ;;  %726 = vmax.xlane.f32.xlu0 %v6715_v60  ;;  %723 = vmax.xlane.f32.xlu1 %v6717_v14 }
 0x172   : > { %v6902_v26 = vmax.f32 %v841_v5, %v842_v18  ;;  %v845_v42 = vsel %vm6693_vm8, %v6613_v37, -inf  ;;  %v846_v21 = vsel %vm6700_vm12, %v6629_v30, -inf  ;;  %v875_v40 = vsel %vm6739_vm13, %v6547_v2, -inf }
 0x173   : > { %v13658_v5 = vrot.slane %v6267_v29, %v6175_v59  ;;  %v13661_v63 = vrot.slane %v6267_v29, %v6181_v62  ;;  %v6937_v39 = vmax.f32 %v845_v42, %v846_v21  ;;  %v876_v46 = vsel %vm6746_vm1, %v6573_v25, -inf }
 0x174   : > { %v874_v29 = vsel %vm6746_vm1, %v6631_v0, -inf  ;;  %v903_v42 = vsel %vm6785_vm2, %v6545_v27, -inf  ;;  %v904_v13 = vsel %vm6792_vm3, %v6571_v12, -inf  ;;  %v877_v21 = vsel %vm6739_vm13, %v6613_v37, -inf }
 0x175   : > { %vm6924_vm14 = vcmp.eq.s32.totalorder %v13658_v5, 1  ;;  %vm6931_vm15 = vcmp.eq.s32.totalorder %v13661_v63, 1  ;;  %v873_v5 = vsel %vm6739_vm13, %v6615_v33, -inf  ;;  %v6948_v63 = vmax.f32 %v875_v40, %v876_v46  ;;  %752 = vmax.xlane.f32.xlu0 %v6725_v15  ;;  %729 = vmax.xlane.f32.xlu1 %v6750_v7 }
 0x176   : > { %v6950_v45 = vmax.f32 %v873_v5, %v874_v29  ;;  %v6958_v61 = vmax.f32 %v903_v42, %v904_v13  ;;  %v878_v40 = vsel %vm6746_vm1, %v6629_v30, -inf  ;;  %v907_v46 = vsel %vm6785_vm2, %v6547_v2, -inf }
 0x177   : > { %v13665_v5 = vrot.slane %v6275_v32, %v6175_v59  ;;  %v13668_v42 = vrot.slane %v6275_v32, %v6181_v62  ;;  %v6983_v9 = vmax.f32 %v877_v21, %v878_v40  ;;  %v908_v13 = vsel %vm6792_vm3, %v6573_v25, -inf }
 0x178   : > { %13664 = vst [vmem:[#allocation28_spill] sm:$0xff] %v6958_v61  ;;  %v906_v61 = vsel %vm6792_vm3, %v6631_v0, -inf  ;;  %v6996_v32 = vmax.f32 %v907_v46, %v908_v13  ;;  %v935_v40 = vsel %vm6831_vm6, %v6545_v27, -inf  ;;  %v909_v60 = vsel %vm6785_vm2, %v6613_v37, -inf }
 0x179   : > { %vm6972_vm5 = vcmp.eq.s32.totalorder %v13665_v5, 1  ;;  %vm6979_vm8 = vcmp.eq.s32.totalorder %v13668_v42, 1  ;;  %13671 = vst [vmem:[#allocation29_spill] sm:$0xff] %v6983_v9  ;;  %v905_v5 = vsel %vm6785_vm2, %v6615_v33, -inf  ;;  %v936_v42 = vsel %vm6838_vm9, %v6571_v12, -inf  ;;  %758 = vmax.xlane.f32.xlu0 %v6761_v6  ;;  %755 = vmax.xlane.f32.xlu1 %v6763_v24 }
 0x17a   : > { %v6998_v21 = vmax.f32 %v905_v5, %v906_v61  ;;  %v7006_v9 = vmax.f32 %v935_v40, %v936_v42  ;;  %v910_v14 = vsel %vm6792_vm3, %v6629_v30, -inf  ;;  %v939_v61 = vsel %vm6831_vm6, %v6547_v2, -inf }
 0x17b   : > { %v13673_v46 = vrot.slane %v6283_v35, %v6175_v59  ;;  %v13676_v5 = vrot.slane %v6283_v35, %v6181_v62  ;;  %v7031_v36 = vmax.f32 %v909_v60, %v910_v14  ;;  %v940_v40 = vsel %vm6838_vm9, %v6573_v25, -inf }
 0x17c   : > { %13672 = vst [vmem:[#allocation30_spill] sm:$0xff] %v7006_v9  ;;  %v937_v42 = vsel %vm6831_vm6, %v6615_v33, -inf  ;;  %v7042_v9 = vmax.f32 %v939_v61, %v940_v40  ;;  %v967_v60 = vsel %vm6878_vm10, %v6545_v27, -inf  ;;  %v968_v14 = vsel %vm6885_vm11, %v6571_v12, -inf }
 0x17d   : > { %vm7020_vm12 = vcmp.eq.s32.totalorder %v13673_v46, 1  ;;  %vm7027_vm13 = vcmp.eq.s32.totalorder %v13676_v5, 1  ;;  %v938_v46 = vsel %vm6838_vm9, %v6631_v0, -inf  ;;  %v7054_v5 = vmax.f32 %v967_v60, %v968_v14  ;;  %784 = vmax.xlane.f32.xlu0 %v6771_v19  ;;  %761 = vmax.xlane.f32.xlu1 %v6796_v28 }
 0x17e   : > { %v7044_v35 = vmax.f32 %v937_v42, %v938_v46  ;;  %v941_v61 = vsel %vm6831_vm6, %v6613_v37, -inf  ;;  %v942_v40 = vsel %vm6838_vm9, %v6629_v30, -inf  ;;  %v971_v42 = vsel %vm6878_vm10, %v6547_v2, -inf }
 0x17f   : > { %13679 = vst [vmem:[#allocation31_spill] sm:$0xff] %v7054_v5  ;;  %v13680_v46 = vrot.slane %v6291_v38, %v6175_v59  ;;  %v13683_v7 = vrot.slane %v6291_v38, %v6181_v62  ;;  %v7079_v31 = vmax.f32 %v941_v61, %v942_v40  ;;  %v972_v60 = vsel %vm6885_vm11, %v6573_v25, -inf }
 0x180   : > { %v969_v14 = vsel %vm6878_vm10, %v6615_v33, -inf  ;;  %v7090_v5 = vmax.f32 %v971_v42, %v972_v60  ;;  %v999_v61 = vsel %vm6924_vm14, %v6545_v27, -inf  ;;  %v1000_v40 = vsel %vm6931_vm15, %v6571_v12, -inf }
 0x181   : > { %vm7068_vm1 = vcmp.eq.s32.totalorder %v13680_v46, 1  ;;  %vm7075_vm2 = vcmp.eq.s32.totalorder %v13683_v7, 1  ;;  %13686 = vst [vmem:[#allocation32_spill] sm:$0xff] %v7079_v31  ;;  %v970_v46 = vsel %vm6885_vm11, %v6631_v0, -inf  ;;  %v7100_v7 = vmax.f32 %v999_v61, %v1000_v40  ;;  %790 = vmax.xlane.f32.xlu0 %v6807_v20  ;;  %787 = vmax.xlane.f32.xlu1 %v6809_v16 }
 0x182   : > { %v7092_v38 = vmax.f32 %v969_v14, %v970_v46  ;;  %v973_v31 = vsel %vm6878_vm10, %v6613_v37, -inf  ;;  %v974_v42 = vsel %vm6885_vm11, %v6629_v30, -inf  ;;  %v1003_v60 = vsel %vm6924_vm14, %v6547_v2, -inf }
 0x183   : > { %13687 = vst [vmem:[#allocation33_spill] sm:$0xff] %v7100_v7  ;;  %v13688_v14 = vrot.slane %v6299_v41, %v6175_v59  ;;  %v13691_v61 = vrot.slane %v6299_v41, %v6181_v62  ;;  %v7127_v43 = vmax.f32 %v973_v31, %v974_v42  ;;  %v1004_v40 = vsel %vm6931_vm15, %v6573_v25, -inf }
 0x184   : > { %v1002_v41 = vsel %vm6931_vm15, %v6631_v0, -inf  ;;  %v1031_v6 = vsel %vm6972_vm5, %v6545_v27, -inf  ;;  %v1032_v24 = vsel %vm6979_vm8, %v6571_v12, -inf  ;;  %v1005_v42 = vsel %vm6924_vm14, %v6613_v37, -inf }
 0x185   : > { %vm7114_vm3 = vcmp.eq.s32.totalorder %v13688_v14, 1  ;;  %vm7121_vm6 = vcmp.eq.s32.totalorder %v13691_v61, 1  ;;  %v1001_v14 = vsel %vm6924_vm14, %v6615_v33, -inf  ;;  %v7138_v61 = vmax.f32 %v1003_v60, %v1004_v40  ;;  %816 = vmax.xlane.f32.xlu0 %v6817_v52  ;;  %793 = vmax.xlane.f32.xlu1 %v6842_v34 }
 0x186   : > { %v7140_v7 = vmax.f32 %v1001_v14, %v1002_v41  ;;  %v7148_v31 = vmax.f32 %v1031_v6, %v1032_v24  ;;  %v1006_v60 = vsel %vm6931_vm15, %v6629_v30, -inf  ;;  %v1035_v40 = vsel %vm6972_vm5, %v6547_v2, -inf }
 0x187   : > { %v13695_v14 = vrot.slane %v6307_v44, %v6175_v59  ;;  %v13698_v6 = vrot.slane %v6307_v44, %v6181_v62  ;;  %v7173_v22 = vmax.f32 %v1005_v42, %v1006_v60  ;;  %v1036_v24 = vsel %vm6979_vm8, %v6573_v25, -inf }
 0x188   : > { %13694 = vst [vmem:[#allocation34_spill] sm:$0xff] %v7148_v31  ;;  %v1034_v31 = vsel %vm6979_vm8, %v6631_v0, -inf  ;;  %v7186_v44 = vmax.f32 %v1035_v40, %v1036_v24  ;;  %v1063_v60 = vsel %vm7020_vm12, %v6545_v27, -inf  ;;  %v1037_v19 = vsel %vm6972_vm5, %v6613_v37, -inf }
 0x189   : > { %vm7162_vm9 = vcmp.eq.s32.totalorder %v13695_v14, 1  ;;  %vm7169_vm10 = vcmp.eq.s32.totalorder %v13698_v6, 1  ;;  %13701 = vst [vmem:[#allocation35_spill] sm:$0xff] %v7173_v22  ;;  %v1033_v14 = vsel %vm6972_vm5, %v6615_v33, -inf  ;;  %v1064_v6 = vsel %vm7027_vm13, %v6571_v12, -inf  ;;  %822 = vmax.xlane.f32.xlu0 %v6853_v4  ;;  %819 = vmax.xlane.f32.xlu1 %v6855_v23 }
 0x18a   : > { %v7188_v42 = vmax.f32 %v1033_v14, %v1034_v31  ;;  %v7196_v22 = vmax.f32 %v1063_v60, %v1064_v6  ;;  %v1038_v28 = vsel %vm6979_vm8, %v6629_v30, -inf  ;;  %v1067_v31 = vsel %vm7020_vm12, %v6547_v2, -inf }
 0x18b   : > { %v13703_v40 = vrot.slane %v6315_v47, %v6175_v59  ;;  %v13706_v14 = vrot.slane %v6315_v47, %v6181_v62  ;;  %v7221_v8 = vmax.f32 %v1037_v19, %v1038_v28  ;;  %v1068_v60 = vsel %vm7027_vm13, %v6573_v25, -inf }
 0x18c   : > { %13702 = vst [vmem:[#allocation36_spill] sm:$0xff] %v7196_v22  ;;  %v1065_v6 = vsel %vm7020_vm12, %v6615_v33, -inf  ;;  %v7232_v22 = vmax.f32 %v1067_v31, %v1068_v60  ;;  %v1095_v19 = vsel %vm7068_vm1, %v6545_v27, -inf  ;;  %v1096_v28 = vsel %vm7075_vm2, %v6571_v12, -inf }
 0x18d   : > { %vm7210_vm11 = vcmp.eq.s32.totalorder %v13703_v40, 1  ;;  %vm7217_vm14 = vcmp.eq.s32.totalorder %v13706_v14, 1  ;;  %v1066_v40 = vsel %vm7027_vm13, %v6631_v0, -inf  ;;  %v7244_v14 = vmax.f32 %v1095_v19, %v1096_v28  ;;  %848 = vmax.xlane.f32.xlu0 %v6864_v54  ;;  %825 = vmax.xlane.f32.xlu1 %v6889_v1 }
 0x18e   : > { %v7234_v47 = vmax.f32 %v1065_v6, %v1066_v40  ;;  %v1069_v31 = vsel %vm7020_vm12, %v6613_v37, -inf  ;;  %v1070_v60 = vsel %vm7027_vm13, %v6629_v30, -inf  ;;  %v1099_v6 = vsel %vm7068_vm1, %v6547_v2, -inf }
 0x18f   : > { %13710 = vst [vmem:[#allocation38_spill] sm:$0xff] %v7244_v14  ;;  %v13711_v40 = vrot.slane %v6325_v51, %v6175_v59  ;;  %v7262_v16 = vmax.f32 %v1069_v31, %v1070_v60  ;;  %v1100_v13 = vsel %vm7075_vm2, %v6573_v25, -inf  ;;  %v1097_v17 = vsel %vm7068_vm1, %v6615_v33, -inf }
 0x190   : > { %13709 = vst [vmem:[#allocation37_spill] sm:$0xff] %v7234_v47  ;;  %v1098_v19 = vsel %vm7075_vm2, %v6631_v0, -inf  ;;  %v13715_v28 = vrot.slane %v6325_v51, %v6181_v62  ;;  %v7280_v31 = vmax.f32 %v1099_v6, %v1100_v13  ;;  %v1128_v14 = vsel %vm7121_vm6, %v6571_v12, -inf }
 0x191   : > { %vm7258_vm15 = vcmp.eq.s32.totalorder %v13711_v40, 1  ;;  %13714 = vst [vmem:[#allocation39_spill] sm:$0xff] %v7262_v16  ;;  %v7282_v60 = vmax.f32 %v1097_v17, %v1098_v19  ;;  %v1127_v16 = vsel %vm7114_vm3, %v6545_v27, -inf  ;;  %v1101_v51 = vsel %vm7068_vm1, %v6613_v37, -inf  ;;  %854 = vmax.xlane.f32.xlu0 %v6900_v58  ;;  %851 = vmax.xlane.f32.xlu1 %v6902_v26 }
 0x192   : > { %vm7276_vm5 = vcmp.eq.s32.totalorder %v13715_v28, 1  ;;  %v7290_v47 = vmax.f32 %v1127_v16, %v1128_v14  ;;  %v1102_v6 = vsel %vm7075_vm2, %v6629_v30, -inf  ;;  %v1131_v13 = vsel %vm7114_vm3, %v6547_v2, -inf }
 0x193   : > { %v13718_v17 = vrot.slane %v6330_v53, %v6175_v59  ;;  %v7310_v15 = vmax.f32 %v1101_v51, %v1102_v6  ;;  %v1132_v11 = vsel %vm7121_vm6, %v6573_v25, -inf  ;;  %v1129_v14 = vsel %vm7114_vm3, %v6615_v33, -inf }
 0x194   : > { %v1130_v16 = vsel %vm7121_vm6, %v6631_v0, -inf  ;;  %v13722_v28 = vrot.slane %v6330_v53, %v6181_v62  ;;  %v7328_v34 = vmax.f32 %v1131_v13, %v1132_v11  ;;  %v1159_v6 = vsel %vm7162_vm9, %v6545_v27, -inf }
 0x195   : > { %vm7304_vm8 = vcmp.eq.s32.totalorder %v13718_v17, 1  ;;  %13721 = vst [vmem:[#allocation40_spill] sm:$0xff] %v7310_v15  ;;  %v7330_v51 = vmax.f32 %v1129_v14, %v1130_v16  ;;  %v1160_v17 = vsel %vm7169_vm10, %v6571_v12, -inf  ;;  %v1133_v53 = vsel %vm7114_vm3, %v6613_v37, -inf  ;;  %880 = vmax.xlane.f32.xlu0 %v6910_v10  ;;  %857 = vmax.xlane.f32.xlu1 %v6937_v39  ;;  %v13817_v39 = vld [vmem:[#allocation30_spill] sm:$0xff] }
 0x196   : > { %vm7324_vm12 = vcmp.eq.s32.totalorder %v13722_v28, 1  ;;  %v7338_v15 = vmax.f32 %v1159_v6, %v1160_v17  ;;  %v1134_v13 = vsel %vm7121_vm6, %v6629_v30, -inf  ;;  %v1163_v11 = vsel %vm7162_vm9, %v6547_v2, -inf }
 0x197   : > { %v7349_v14 = vmax.f32 %v1133_v53, %v1134_v13  ;;  %v1164_v16 = vsel %vm7169_vm10, %v6573_v25, -inf  ;;  %v1161_v28 = vsel %vm7162_vm9, %v6615_v33, -inf  ;;  %v1162_v46 = vsel %vm7169_vm10, %v6631_v0, -inf  ;;  %v13768_v53 = vld [vmem:[#allocation12_spill] sm:$0xff] }
 0x198   : > { %v13726_v3 = vrot.slane %v6339_v56, %v6175_v59  ;;  %v13729_v17 = vrot.slane %v6339_v56, %v6181_v62  ;;  %v7376_v13 = vmax.f32 %v1163_v11, %v1164_v16  ;;  %v1192_v56 = vsel %vm7217_vm14, %v6571_v12, -inf }
 0x199   : > { %13725 = vst [vmem:[#allocation41_spill] sm:$0xff] %v7349_v14  ;;  %v7378_v14 = vmax.f32 %v1161_v28, %v1162_v46  ;;  %v1165_v4 = vsel %vm7162_vm9, %v6613_v37, -inf  ;;  %v1166_v23 = vsel %vm7169_vm10, %v6629_v30, -inf  ;;  %v1195_v11 = vsel %vm7210_vm11, %v6547_v2, -inf  ;;  %886 = vmax.xlane.f32.xlu0 %v6948_v63  ;;  %883 = vmax.xlane.f32.xlu1 %v6950_v45 }
 0x19a   : > { %vm7363_vm13 = vcmp.eq.s32.totalorder %v13726_v3, 1  ;;  %vm7370_vm1 = vcmp.eq.s32.totalorder %v13729_v17, 1  ;;  %v1191_v3 = vsel %vm7210_vm11, %v6545_v27, -inf  ;;  %v7397_v16 = vmax.f32 %v1165_v4, %v1166_v23 }
 0x19b   : > { %v7386_v17 = vmax.f32 %v1191_v3, %v1192_v56  ;;  %v1196_v28 = vsel %vm7217_vm14, %v6573_v25, -inf  ;;  %v1193_v46 = vsel %vm7210_vm11, %v6615_v33, -inf  ;;  %v1194_v41 = vsel %vm7217_vm14, %v6631_v0, -inf }
 0x19c   : > { %13733 = vst [vmem:[#allocation43_spill] sm:$0xff] %v7397_v16  ;;  %v13734_v18 = vrot.slane %v6352_v55, %v6175_v59  ;;  %v13737_v56 = vrot.slane %v6352_v55, %v6181_v62  ;;  %v7422_v23 = vmax.f32 %v1195_v11, %v1196_v28  ;;  %v7424_v16 = vmax.f32 %v1193_v46, %v1194_v41 }
 0x19d   : > { %13732 = vst [vmem:[#allocation42_spill] sm:$0xff] %v7386_v17  ;;  %v1223_v17 = vsel %vm7258_vm15, %v6545_v27, -inf  ;;  %vm1883_vm6 = vcmp.eq.s32.totalorder %v6171_v57, 40  ;;  %v1224_v55 = vsel %vm7276_vm5, %v6571_v12, -inf  ;;  %v1197_v11 = vsel %vm7210_vm11, %v6613_v37, -inf }
 0x19e   : > { %vm7411_vm2 = vcmp.eq.s32.totalorder %v13734_v18, 1  ;;  %vm7418_vm3 = vcmp.eq.s32.totalorder %v13737_v56, 1  ;;  %v1198_v28 = vsel %vm7217_vm14, %v6629_v30, -inf  ;;  %v1227_v46 = vsel %vm7258_vm15, %v6547_v2, -inf }
 0x19f   : > { %v7444_v41 = vmax.f32 %v1223_v17, %v1224_v55  ;;  %v7446_v54 = vmax.f32 %v1197_v11, %v1198_v28  ;;  %v1228_v1 = vsel %vm7276_vm5, %v6573_v25, -inf  ;;  %v1225_v24 = vsel %vm7258_vm15, %v6615_v33, -inf }
 0x1a0   : > { %v13741_v29 = vrot.slane %v6355_v49, %v6175_v59  ;;  %v7461_v56 = vmax.f32 %v1227_v46, %v1228_v1  ;;  %v1226_v17 = vsel %vm7276_vm5, %v6631_v0, -inf  ;;  %v1255_v55 = vsel %vm7304_vm8, %v6545_v27, -inf }
 0x1a1   : > { %13740 = vst [vmem:[#allocation44_spill] sm:$0xff] %v7446_v54  ;;  %v13745_v11 = vrot.slane %v6355_v49, %v6181_v62  ;;  %v7481_v1 = vmax.f32 %v1225_v24, %v1226_v17  ;;  %v1229_v54 = vsel %vm7258_vm15, %v6613_v37, -inf  ;;  %v1230_v49 = vsel %vm7276_vm5, %v6629_v30, -inf }
 0x1a2   : > { %vm7457_vm9 = vcmp.eq.s32.totalorder %v13741_v29, 1  ;;  %13744 = vst [vmem:[#allocation45_spill] sm:$0xff] %v7461_v56  ;;  %v13748_v29 = vmov 0   ;;  %v1256_v56 = vsel %vm7324_vm12, %v6571_v12, -inf  ;;  %v7496_v24 = vmax.f32 %v1229_v54, %v1230_v49 }
 0x1a3   : > { %vm7472_vm10 = vcmp.eq.s32.totalorder %v13745_v11, 1  ;;  %v7479_v46 = vsel %vm1883_vm6, 1, %v13748_v29  ;;  %13749 = vst [vmem:[#allocation46_spill] sm:$0xff] %v7481_v1  ;;  %v7494_v11 = vmax.f32 %v1255_v55, %v1256_v56  ;;  %v1259_v17 = vsel %vm7304_vm8, %v6547_v2, -inf  ;;  %v13800_v1 = vld [vmem:[#allocation15_spill] sm:$0xff] }
 0x1a4   : > { %v1260_v20 = vsel %vm7324_vm12, %v6573_v25, -inf  ;;  %v13750_v40 = vrot.slane %v6363_v50, %v6175_v59  ;;  %v1257_v26 = vsel %vm7304_vm8, %v6615_v33, -inf  ;;  %v1258_v54 = vsel %vm7324_vm12, %v6631_v0, -inf }
 0x1a5   : > { %v7511_v58 = vmax.f32 %v1259_v17, %v1260_v20  ;;  %v13753_v56 = vrot.slane %v6363_v50, %v6181_v62  ;;  %v7528_v17 = vmax.f32 %v1257_v26, %v1258_v54  ;;  %v1287_v20 = vsel %vm7363_vm13, %v6545_v27, -inf }
 0x1a6   : > { %vm7507_vm11 = vcmp.eq.s32.totalorder %v13750_v40, 1  ;;  %v1288_v40 = vsel %vm7370_vm1, %v6571_v12, -inf  ;;  %v1261_v50 = vsel %vm7304_vm8, %v6613_v37, -inf  ;;  %v1262_v49 = vsel %vm7324_vm12, %v6629_v30, -inf }
 0x1a7   : > { %vm7522_vm14 = vcmp.eq.s32.totalorder %v13753_v56, 1  ;;  %13756 = vst [vmem:[#allocation47_spill] sm:$0xff] %v7528_v17  ;;  %v7539_v56 = vmax.f32 %v1287_v20, %v1288_v40  ;;  %v1291_v26 = vsel %vm7363_vm13, %v6547_v2, -inf  ;;  %v1292_v54 = vsel %vm7370_vm1, %v6573_v25, -inf }
 0x1a8   : > { %v7552_v19 = vmax.f32 %v1261_v50, %v1262_v49  ;;  %v7554_v20 = vmax.f32 %v1291_v26, %v1292_v54  ;;  %v1289_v52 = vsel %vm7363_vm13, %v6615_v33, -inf  ;;  %v1290_v40 = vsel %vm7370_vm1, %v6631_v0, -inf }
 0x1a9   : > { %13757 = vst [vmem:[#allocation48_spill] sm:$0xff] %v7539_v56  ;;  %v13759_v56 = vrot.slane %v6369_v48, %v6175_v59  ;;  %v13762_v10 = vrot.slane %v6369_v48, %v6181_v62  ;;  %v7576_v49 = vmax.f32 %v1289_v52, %v1290_v40  ;;  %v1319_v50 = vsel %vm7411_vm2, %v6545_v27, -inf }
 0x1aa   : > { %13758 = vst [vmem:[#allocation49_spill] sm:$0xff] %v7554_v20  ;;  %v1293_v48 = vsel %vm7363_vm13, %v6613_v37, -inf  ;;  %v1294_v52 = vsel %vm7370_vm1, %v6629_v30, -inf  ;;  %v1323_v40 = vsel %vm7411_vm2, %v6547_v2, -inf  ;;  %v1324_v26 = vsel %vm7418_vm3, %v6573_v25, -inf }
 0x1ab   : > { %vm7565_vm15 = vcmp.eq.s32.totalorder %v13759_v56, 1  ;;  %vm7572_vm5 = vcmp.eq.s32.totalorder %v13762_v10, 1  ;;  %13765 = vst [vmem:[#allocation50_spill] sm:$0xff] %v7576_v49  ;;  %v1320_v56 = vsel %vm7418_vm3, %v6571_v12, -inf  ;;  %v7597_v10 = vmax.f32 %v1293_v48, %v1294_v52 }
 0x1ac   : > { %v7586_v54 = vmax.f32 %v1319_v50, %v1320_v56  ;;  %v1321_v50 = vsel %vm7411_vm2, %v6615_v33, -inf  ;;  %v1322_v6 = vsel %vm7418_vm3, %v6631_v0, -inf  ;;  %v13769_v56 = vrot.slane %v13768_v53, %v6175_v59 }
 0x1ad   : > { %13767 = vst [vmem:[#allocation52_spill] sm:$0xff] %v7597_v10  ;;  %v13772_v48 = vrot.slane %v13768_v53, %v6181_v62  ;;  %v7624_v10 = vmax.f32 %v1323_v40, %v1324_v26  ;;  %v7626_v49 = vmax.f32 %v1321_v50, %v1322_v6  ;;  %vm1915_vm13 = vcmp.eq.s32.totalorder %v6171_v57, 41 }
 0x1ae   : > { %13766 = vst [vmem:[#allocation51_spill] sm:$0xff] %v7586_v54  ;;  %vm7611_vm8 = vcmp.eq.s32.totalorder %v13769_v56, 1  ;;  %v1351_v56 = vsel %vm7457_vm9, %v6545_v27, -inf  ;;  %v1352_v53 = vsel %vm7472_vm10, %v6571_v12, -inf  ;;  %v1325_v63 = vsel %vm7411_vm2, %v6613_v37, -inf }
 0x1af   : > { %vm7618_vm12 = vcmp.eq.s32.totalorder %v13772_v48, 1  ;;  %13775 = vst [vmem:[#allocation12_spill] sm:$0xff] %v7624_v10  ;;  %13776 = vst [vmem:[#allocation53_spill] sm:$0xff] %v7626_v49  ;;  %v1326_v45 = vsel %vm7418_vm3, %v6629_v30, -inf  ;;  %v1355_v26 = vsel %vm7457_vm9, %v6547_v2, -inf  ;;  %v7644_v40 = vmax.f32 %v1351_v56, %v1352_v53  ;;  %v13779_v48 = vld [vmem:[#allocation13_spill] sm:$0xff] }
 0x1b0   : > { %v7646_v50 = vmax.f32 %v1325_v63, %v1326_v45  ;;  %v1356_v6 = vsel %vm7472_vm10, %v6573_v25, -inf  ;;  %v1353_v3 = vsel %vm7457_vm9, %v6615_v33, -inf  ;;  %v13780_v4 = vrot.slane %v13779_v48, %v6175_v59 }
 0x1b1   : > { %13777 = vst [vmem:[#allocation54_spill] sm:$0xff] %v7644_v40  ;;  %v13783_v56 = vrot.slane %v13779_v48, %v6181_v62  ;;  %v7668_v63 = vmax.f32 %v1355_v26, %v1356_v6  ;;  %v1354_v45 = vsel %vm7472_vm10, %v6631_v0, -inf  ;;  %v13787_v40 = vld [vmem:[#allocation28_spill] sm:$0xff]  ;;  %v13788_v48 = vld [vmem:[#allocation29_spill] sm:$0xff]  ;;  %v1384_v26 = vsel %vm7522_vm14, %v6571_v12, -inf }
 0x1b2   : > { %13778 = vst [vmem:[#allocation55_spill] sm:$0xff] %v7646_v50  ;;  %vm7657_vm1 = vcmp.eq.s32.totalorder %v13780_v4, 1  ;;  %v1383_v4 = vsel %vm7507_vm11, %v6545_v27, -inf  ;;  %v7677_v50 = vsel %vm1915_vm13, 1, %v13748_v29  ;;  %912 = vmax.xlane.f32.xlu0 %v13787_v40  ;;  %889 = vmax.xlane.f32.xlu1 %v13788_v48  ;;  %v1357_v6 = vsel %vm7457_vm9, %v6613_v37, -inf }
 0x1b3   : > { %vm7664_vm2 = vcmp.eq.s32.totalorder %v13783_v56, 1  ;;  %13786 = vst [vmem:[#allocation13_spill] sm:$0xff] %v7668_v63  ;;  %v7681_v56 = vmax.f32 %v1353_v3, %v1354_v45  ;;  %v1358_v63 = vsel %vm7472_vm10, %v6629_v30, -inf  ;;  %v7692_v10 = vmax.f32 %v1383_v4, %v1384_v26  ;;  %v13790_v45 = vld [vmem:[#allocation14_spill] sm:$0xff] }
 0x1b4   : > { %v7694_v20 = vmax.f32 %v1357_v6, %v1358_v63  ;;  %v1387_v40 = vsel %vm7507_vm11, %v6547_v2, -inf  ;;  %v1388_v3 = vsel %vm7522_vm14, %v6573_v25, -inf  ;;  %v13791_v18 = vrot.slane %v13790_v45, %v6175_v59 }
 0x1b5   : > { %v7709_v28 = vmax.f32 %v1387_v40, %v1388_v3  ;;  %v1385_v63 = vsel %vm7507_vm11, %v6615_v33, -inf  ;;  %v1386_v4 = vsel %vm7522_vm14, %v6631_v0, -inf  ;;  %v13795_v26 = vrot.slane %v13790_v45, %v6181_v62 }
 0x1b6   : > { %13789 = vst [vmem:[#allocation28_spill] sm:$0xff] %v7694_v20  ;;  %vm7705_vm3 = vcmp.eq.s32.totalorder %v13791_v18, 1  ;;  %v7726_v40 = vmax.f32 %v1385_v63, %v1386_v4  ;;  %v1415_v3 = vsel %vm7565_vm15, %v6545_v27, -inf  ;;  %v1389_v45 = vsel %vm7507_vm11, %v6613_v37, -inf  ;;  %918 = vmax.xlane.f32.xlu0 %v6996_v32  ;;  %915 = vmax.xlane.f32.xlu1 %v6998_v21  ;;  %v13854_v32 = vld [vmem:[#allocation22_spill] sm:$0xff] }
 0x1b7   : > { %13794 = vst [vmem:[#allocation29_spill] sm:$0xff] %v7709_v28  ;;  %vm7720_vm6 = vcmp.eq.s32.totalorder %v13795_v26, 1  ;;  %v1416_v28 = vsel %vm7572_vm5, %v6571_v12, -inf  ;;  %v1390_v63 = vsel %vm7522_vm14, %v6629_v30, -inf  ;;  %v1419_v4 = vsel %vm7565_vm15, %v6547_v2, -inf }
 0x1b8   : > { %13798 = vst [vmem:[#allocation14_spill] sm:$0xff] %v7726_v40  ;;  %v7739_v26 = vmax.f32 %v1415_v3, %v1416_v28  ;;  %v1420_v18 = vsel %vm7572_vm5, %v6573_v25, -inf  ;;  %v13801_v40 = vrot.slane %v13800_v1, %v6175_v59  ;;  %v13804_v21 = vrot.slane %v13800_v1, %v6181_v62 }
 0x1b9   : > { %v7764_v28 = vmax.f32 %v1389_v45, %v1390_v63  ;;  %v7766_v3 = vmax.f32 %v1419_v4, %v1420_v18  ;;  %v1447_v1 = vsel %vm7611_vm8, %v6545_v27, -inf  ;;  %v1448_v45 = vsel %vm7618_vm12, %v6571_v12, -inf }
 0x1ba   : > { %13799 = vst [vmem:[#allocation56_spill] sm:$0xff] %v7739_v26  ;;  %vm7753_vm9 = vcmp.eq.s32.totalorder %v13801_v40, 1  ;;  %vm7760_vm10 = vcmp.eq.s32.totalorder %v13804_v21, 1  ;;  %v1417_v26 = vsel %vm7565_vm15, %v6615_v33, -inf  ;;  %v1418_v40 = vsel %vm7572_vm5, %v6631_v0, -inf  ;;  %944 = vmax.xlane.f32.xlu0 %v13817_v39  ;;  %921 = vmax.xlane.f32.xlu1 %v7031_v36 }
 0x1bb   : > { %13807 = vst [vmem:[#allocation15_spill] sm:$0xff] %v7766_v3  ;;  %v7774_v20 = vmax.f32 %v1417_v26, %v1418_v40  ;;  %v7784_v63 = vmax.f32 %v1447_v1, %v1448_v45  ;;  %v1421_v4 = vsel %vm7565_vm15, %v6613_v37, -inf  ;;  %v1422_v26 = vsel %vm7572_vm5, %v6629_v30, -inf  ;;  %v13810_v40 = vld [vmem:[#allocation17_spill] sm:$0xff] }
 0x1bc   : > { %v1451_v21 = vsel %vm7611_vm8, %v6547_v2, -inf  ;;  %v13814_v1 = vrot.slane %v13810_v40, %v6181_v62  ;;  %v7811_v45 = vmax.f32 %v1421_v4, %v1422_v26  ;;  %v1449_v18 = vsel %vm7611_vm8, %v6615_v33, -inf }
 0x1bd   : > { %13808 = vst [vmem:[#allocation57_spill] sm:$0xff] %v7774_v20  ;;  %13809 = vst [vmem:[#allocation58_spill] sm:$0xff] %v7784_v63  ;;  %v13811_v20 = vrot.slane %v13810_v40, %v6175_v59  ;;  %v1450_v40 = vsel %vm7618_vm12, %v6631_v0, -inf  ;;  %v1479_v36 = vsel %vm7657_vm1, %v6545_v27, -inf  ;;  %v1480_v4 = vsel %vm7664_vm2, %v6571_v12, -inf }
 0x1be   : > { %vm7805_vm14 = vcmp.eq.s32.totalorder %v13814_v1, 1  ;;  %13818 = vst [vmem:[#allocation17_spill] sm:$0xff] %v7811_v45  ;;  %v7824_v63 = vmax.f32 %v1449_v18, %v1450_v40  ;;  %v7832_v26 = vmax.f32 %v1479_v36, %v1480_v4  ;;  %v1453_v39 = vsel %vm7611_vm8, %v6613_v37, -inf  ;;  %950 = vmax.xlane.f32.xlu0 %v7042_v9  ;;  %947 = vmax.xlane.f32.xlu1 %v7044_v35 }
 0x1bf   : > { %vm7798_vm11 = vcmp.eq.s32.totalorder %v13811_v20, 1  ;;  %v1452_v20 = vsel %vm7618_vm12, %v6573_v25, -inf  ;;  %v1483_v18 = vsel %vm7657_vm1, %v6547_v2, -inf  ;;  %v1484_v54 = vsel %vm7664_vm2, %v6573_v25, -inf }
 0x1c0   : > { %v7822_v1 = vmax.f32 %v1451_v21, %v1452_v20  ;;  %13820 = vst [vmem:[#allocation59_spill] sm:$0xff] %v7824_v63  ;;  %13821 = vst [vmem:[#allocation60_spill] sm:$0xff] %v7832_v26  ;;  %v1454_v21 = vsel %vm7618_vm12, %v6629_v30, -inf  ;;  %v13822_v20 = vld [vmem:[#allocation19_spill] sm:$0xff]  ;;  %v1481_v52 = vsel %vm7657_vm1, %v6615_v33, -inf  ;;  %v1482_v4 = vsel %vm7664_vm2, %v6631_v0, -inf }
 0x1c1   : > { %v13823_v40 = vrot.slane %v13822_v20, %v6175_v59  ;;  %v7850_v36 = vmax.f32 %v1453_v39, %v1454_v21  ;;  %v7870_v39 = vmax.f32 %v1483_v18, %v1484_v54  ;;  %v7872_v21 = vmax.f32 %v1481_v52, %v1482_v4  ;;  %v13832_v54 = vld [vmem:[#allocation20_spill] sm:$0xff] }
 0x1c2   : > { %13819 = vst [vmem:[#allocation30_spill] sm:$0xff] %v7822_v1  ;;  %vm1947_vm8 = vcmp.eq.s32.totalorder %v6171_v57, 42  ;;  %v1485_v9 = vsel %vm7657_vm1, %v6613_v37, -inf  ;;  %v1486_v35 = vsel %vm7664_vm2, %v6629_v30, -inf  ;;  %v1515_v18 = vsel %vm7705_vm3, %v6547_v2, -inf }
 0x1c3   : > { %vm7846_vm15 = vcmp.eq.s32.totalorder %v13823_v40, 1  ;;  %13826 = vst [vmem:[#allocation19_spill] sm:$0xff] %v7850_v36  ;;  %v13827_v40 = vrot.slane %v13822_v20, %v6181_v62  ;;  %13830 = vst [vmem:[#allocation61_spill] sm:$0xff] %v7870_v39  ;;  %v1511_v36 = vsel %vm7705_vm3, %v6545_v27, -inf  ;;  %v1512_v20 = vsel %vm7720_vm6, %v6571_v12, -inf }
 0x1c4   : > { %13831 = vst [vmem:[#allocation62_spill] sm:$0xff] %v7872_v21  ;;  %v13833_v52 = vrot.slane %v13832_v54, %v6175_v59  ;;  %v7899_v21 = vmax.f32 %v1485_v9, %v1486_v35  ;;  %v1516_v49 = vsel %vm7720_vm6, %v6573_v25, -inf  ;;  %v1513_v53 = vsel %vm7705_vm3, %v6615_v33, -inf  ;;  %v13842_v35 = vld [vmem:[#allocation31_spill] sm:$0xff] }
 0x1c5   : > { %vm7864_vm5 = vcmp.eq.s32.totalorder %v13827_v40, 1  ;;  %v7897_v40 = vmax.f32 %v1511_v36, %v1512_v20  ;;  %v13838_v39 = vrot.slane %v13832_v54, %v6181_v62  ;;  %v7914_v1 = vmax.f32 %v1515_v18, %v1516_v49  ;;  %976 = vmax.xlane.f32.xlu0 %v13842_v35 }
 0x1c6   : > { %vm7893_vm12 = vcmp.eq.s32.totalorder %v13833_v52, 1  ;;  %13837 = vst [vmem:[#allocation63_spill] sm:$0xff] %v7899_v21  ;;  %v1514_v36 = vsel %vm7720_vm6, %v6631_v0, -inf  ;;  %v1543_v20 = vsel %vm7753_vm9, %v6545_v27, -inf  ;;  %v1544_v9 = vsel %vm7760_vm10, %v6571_v12, -inf  ;;  %v13844_v21 = vld [vmem:[#allocation21_spill] sm:$0xff] }
 0x1c7   : > { %13836 = vst [vmem:[#allocation20_spill] sm:$0xff] %v7897_v40  ;;  %vm7910_vm13 = vcmp.eq.s32.totalorder %v13838_v39, 1  ;;  %13841 = vst [vmem:[#allocation64_spill] sm:$0xff] %v7914_v1  ;;  %v13843_v39 = vld [vmem:[#allocation32_spill] sm:$0xff]  ;;  %v7927_v54 = vmax.f32 %v1513_v53, %v1514_v36  ;;  %v7929_v18 = vmax.f32 %v1543_v20, %v1544_v9  ;;  %v1517_v49 = vsel %vm7705_vm3, %v6613_v37, -inf }
 0x1c8   : > { %953 = vmax.xlane.f32.xlu1 %v13843_v39  ;;  %v1518_v1 = vsel %vm7720_vm6, %v6629_v30, -inf  ;;  %v13845_v40 = vrot.slane %v13844_v21, %v6175_v59  ;;  %v1547_v53 = vsel %vm7753_vm9, %v6547_v2, -inf  ;;  %v1548_v48 = vsel %vm7760_vm10, %v6573_v25, -inf }
 0x1c9   : > { %v7944_v35 = vmax.f32 %v1517_v49, %v1518_v1  ;;  %v1545_v6 = vsel %vm7753_vm9, %v6615_v33, -inf  ;;  %v7962_v1 = vmax.f32 %v1547_v53, %v1548_v48  ;;  %v1546_v20 = vsel %vm7760_vm10, %v6631_v0, -inf  ;;  %982 = vmax.xlane.f32.xlu0 %v7090_v5 }
 0x1ca   : > { %vm7940_vm1 = vcmp.eq.s32.totalorder %v13845_v40, 1  ;;  %v13848_v40 = vrot.slane %v13844_v21, %v6181_v62  ;;  %v1575_v9 = vsel %vm7798_vm11, %v6545_v27, -inf  ;;  %v1576_v39 = vsel %vm7805_vm14, %v6571_v12, -inf }
 0x1cb   : > { %v7973_v49 = vmax.f32 %v1545_v6, %v1546_v20  ;;  %v7975_v21 = vmax.f32 %v1575_v9, %v1576_v39  ;;  %v1549_v53 = vsel %vm7753_vm9, %v6613_v37, -inf  ;;  %v1550_v48 = vsel %vm7760_vm10, %v6629_v30, -inf }
 0x1cc   : > { %vm7958_vm2 = vcmp.eq.s32.totalorder %v13848_v40, 1  ;;  %979 = vmax.xlane.f32.xlu1 %v7092_v38  ;;  %v7985_v40 = vmax.f32 %v1549_v53, %v1550_v48  ;;  %v1579_v6 = vsel %vm7798_vm11, %v6547_v2, -inf  ;;  %v1580_v20 = vsel %vm7805_vm14, %v6573_v25, -inf }
 0x1cd   : > { %13851 = vst [vmem:[#allocation31_spill] sm:$0xff] %v7973_v49  ;;  %13852 = vst [vmem:[#allocation32_spill] sm:$0xff] %v7975_v21  ;;  %v13855_v9 = vrot.slane %v13854_v32, %v6175_v59  ;;  %v13858_v5 = vrot.slane %v13854_v32, %v6181_v62  ;;  %v8010_v39 = vsel %vm1947_vm8, 1, %v13748_v29  ;;  %v8012_v53 = vmax.f32 %v1579_v6, %v1580_v20 }
 0x1ce   : > { %13853 = vst [vmem:[#allocation21_spill] sm:$0xff] %v7985_v40  ;;  %v1577_v48 = vsel %vm7798_vm11, %v6615_v33, -inf  ;;  %v1607_v32 = vsel %vm7846_vm15, %v6545_v27, -inf  ;;  %v1608_v40 = vsel %vm7864_vm5, %v6571_v12, -inf  ;;  %v1581_v6 = vsel %vm7798_vm11, %v6613_v37, -inf }
 0x1cf   : > { %vm7996_vm3 = vcmp.eq.s32.totalorder %v13855_v9, 1  ;;  %vm8003_vm6 = vcmp.eq.s32.totalorder %v13858_v5, 1  ;;  %13861 = vst [vmem:[#allocation22_spill] sm:$0xff] %v8012_v53  ;;  %v1578_v9 = vsel %vm7805_vm14, %v6631_v0, -inf  ;;  %v1582_v20 = vsel %vm7805_vm14, %v6629_v30, -inf }
 0x1d0   : > { %v8023_v5 = vmax.f32 %v1577_v48, %v1578_v9  ;;  %v8034_v53 = vmax.f32 %v1607_v32, %v1608_v40  ;;  %v8036_v21 = vmax.f32 %v1581_v6, %v1582_v20  ;;  %v1611_v48 = vsel %vm7846_vm15, %v6547_v2, -inf  ;;  %v13870_v32 = vld [vmem:[#allocation33_spill] sm:$0xff]  ;;  %985 = vmax.xlane.f32.xlu1 %v7127_v43 }
 0x1d1   : > { %v1612_v9 = vsel %vm7864_vm5, %v6573_v25, -inf  ;;  %1008 = vmax.xlane.f32.xlu0 %v13870_v32  ;;  %v1609_v20 = vsel %vm7846_vm15, %v6615_v33, -inf  ;;  %v1640_v43 = vsel %vm7910_vm13, %v6571_v12, -inf  ;;  %v1641_v63 = vsel %vm7893_vm12, %v6615_v33, -inf }
 0x1d2   : > { %13862 = vst [vmem:[#allocation65_spill] sm:$0xff] %v8023_v5  ;;  %v13863_v5 = vld [vmem:[#allocation23_spill] sm:$0xff]  ;;  %v8060_v6 = vmax.f32 %v1611_v48, %v1612_v9  ;;  %v1613_v48 = vsel %vm7846_vm15, %v6613_v37, -inf  ;;  %v1614_v9 = vsel %vm7864_vm5, %v6629_v30, -inf  ;;  %v1642_v26 = vsel %vm7910_vm13, %v6631_v0, -inf }
 0x1d3   : > { %v13864_v3 = vrot.slane %v13863_v5, %v6175_v59  ;;  %v13867_v17 = vrot.slane %v13863_v5, %v6181_v62  ;;  %v1639_v5 = vsel %vm7893_vm12, %v6545_v27, -inf  ;;  %v1646_v4 = vsel %vm7910_vm13, %v6629_v30, -inf }
 0x1d4   : > { %13871 = vst [vmem:[#allocation23_spill] sm:$0xff] %v8060_v6  ;;  %v8082_v32 = vmax.f32 %v1639_v5, %v1640_v43  ;;  %v8084_v6 = vmax.f32 %v1613_v48, %v1614_v9  ;;  %v1671_v5 = vsel %vm7940_vm1, %v6545_v27, -inf  ;;  %1011 = vmax.xlane.f32.xlu1 %v7140_v7  ;;  %v8105_v43 = vmax.f32 %v1641_v63, %v1642_v26 }
 0x1d5   : > { %vm8047_vm9 = vcmp.eq.s32.totalorder %v13864_v3, 1  ;;  %vm8054_vm10 = vcmp.eq.s32.totalorder %v13867_v17, 1  ;;  %v1610_v3 = vsel %vm7864_vm5, %v6631_v0, -inf  ;;  %1014 = vmax.xlane.f32.xlu0 %v7138_v61  ;;  %v1672_v48 = vsel %vm7958_vm2, %v6571_v12, -inf }
 0x1d6   : > { %v8071_v17 = vmax.f32 %v1609_v20, %v1610_v3  ;;  %13873 = vst [vmem:[#allocation66_spill] sm:$0xff] %v8084_v6  ;;  %v1643_v20 = vsel %vm7893_vm12, %v6547_v2, -inf  ;;  %v1644_v3 = vsel %vm7910_vm13, %v6573_v25, -inf  ;;  %13875 = vst [vmem:[#allocation68_spill] sm:$0xff] %v8105_v43  ;;  %v1645_v9 = vsel %vm7893_vm12, %v6613_v37, -inf }
 0x1d7   : > { %v8129_v26 = vmax.f32 %v1671_v5, %v1672_v48  ;;  %v1673_v5 = vsel %vm7940_vm1, %v6615_v33, -inf  ;;  %v1674_v52 = vsel %vm7958_vm2, %v6631_v0, -inf  ;;  %v1703_v63 = vsel %vm7996_vm3, %v6545_v27, -inf }
 0x1d8   : > { %13872 = vst [vmem:[#allocation33_spill] sm:$0xff] %v8071_v17  ;;  %v8092_v17 = vmax.f32 %v1643_v20, %v1644_v3  ;;  %v13876_v20 = vld [vmem:[#allocation24_spill] sm:$0xff]  ;;  %v8150_v48 = vmax.f32 %v1673_v5, %v1674_v52  ;;  %v1706_v36 = vsel %vm8003_vm6, %v6631_v0, -inf  ;;  %v1740_v55 = vsel %vm8054_vm10, %v6573_v25, -inf }
 0x1d9   : > { %v13877_v3 = vrot.slane %v13876_v20, %v6175_v59  ;;  %v13880_v7 = vrot.slane %v13876_v20, %v6181_v62  ;;  %13883 = vst [vmem:[#allocation24_spill] sm:$0xff] %v8129_v26  ;;  %v1676_v20 = vsel %vm7958_vm2, %v6573_v25, -inf  ;;  %v1707_v26 = vsel %vm7996_vm3, %v6547_v2, -inf }
 0x1da   : > { %13874 = vst [vmem:[#allocation67_spill] sm:$0xff] %v8092_v17  ;;  %13886 = vst [vmem:[#allocation71_spill] sm:$0xff] %v8150_v48  ;;  %v13894_v48 = vld [vmem:[#allocation34_spill] sm:$0xff]  ;;  %v618_v40 = vsel %vm6432_vm7, %v6631_v0, -inf }
 0x1db   : > { %vm8116_vm11 = vcmp.eq.s32.totalorder %v13877_v3, 1  ;;  %vm8123_vm14 = vcmp.eq.s32.totalorder %v13880_v7, 1  ;;  %v1675_v3 = vsel %vm7940_vm1, %v6547_v2, -inf  ;;  %v8140_v7 = vmax.f32 %v1645_v9, %v1646_v4  ;;  %1040 = vmax.xlane.f32.xlu0 %v13894_v48 }
 0x1dc   : > { %v8142_v43 = vmax.f32 %v1675_v3, %v1676_v20  ;;  %v1704_v9 = vsel %vm8003_vm6, %v6571_v12, -inf  ;;  %v1677_v4 = vsel %vm7940_vm1, %v6613_v37, -inf  ;;  %v13887_v3 = vld [vmem:[#allocation25_spill] sm:$0xff]  ;;  %v1735_v48 = vsel %vm8047_vm9, %v6545_v27, -inf }
 0x1dd   : > { %13884 = vst [vmem:[#allocation69_spill] sm:$0xff] %v8140_v7  ;;  %v13888_v20 = vrot.slane %v13887_v3, %v6175_v59  ;;  %v13891_v5 = vrot.slane %v13887_v3, %v6181_v62  ;;  %v13895_v7 = vld [vmem:[#allocation35_spill] sm:$0xff]  ;;  %v8177_v45 = vmax.f32 %v1703_v63, %v1704_v9  ;;  %v1708_v3 = vsel %vm8003_vm6, %v6573_v25, -inf }
 0x1de   : > { %13885 = vst [vmem:[#allocation70_spill] sm:$0xff] %v8142_v43  ;;  %1017 = vmax.xlane.f32.xlu1 %v13895_v7  ;;  %v8190_v6 = vmax.f32 %v1707_v26, %v1708_v3  ;;  %v1705_v63 = vsel %vm7996_vm3, %v6615_v33, -inf  ;;  %v1736_v9 = vsel %vm8054_vm10, %v6571_v12, -inf  ;;  %v1709_v26 = vsel %vm7996_vm3, %v6613_v37, -inf }
 0x1df   : > { %vm8164_vm15 = vcmp.eq.s32.totalorder %v13888_v20, 1  ;;  %vm8171_vm5 = vcmp.eq.s32.totalorder %v13891_v5, 1  ;;  %v1678_v20 = vsel %vm7958_vm2, %v6629_v30, -inf  ;;  %v8198_v7 = vmax.f32 %v1705_v63, %v1706_v36  ;;  %1046 = vmax.xlane.f32.xlu0 %v7186_v44 }
 0x1e0   : > { %v8188_v5 = vmax.f32 %v1677_v4, %v1678_v20  ;;  %13897 = vst [vmem:[#allocation34_spill] sm:$0xff] %v8190_v6  ;;  %v13899_v4 = vld [vmem:[#allocation26_spill] sm:$0xff]  ;;  %v8216_v63 = vmax.f32 %v1735_v48, %v1736_v9  ;;  %v1710_v36 = vsel %vm8003_vm6, %v6629_v30, -inf  ;;  %v1737_v9 = vsel %vm8047_vm9, %v6615_v33, -inf }
 0x1e1   : > { %13898 = vst [vmem:[#allocation35_spill] sm:$0xff] %v8198_v7  ;;  %v13900_v20 = vrot.slane %v13899_v4, %v6175_v59  ;;  %v1739_v7 = vsel %vm8047_vm9, %v6547_v2, -inf  ;;  %v8236_v38 = vmax.f32 %v1709_v26, %v1710_v36  ;;  %v1741_v44 = vsel %vm8047_vm9, %v6613_v37, -inf  ;;  %v13910_v36 = vld [vmem:[#allocation27_spill] sm:$0xff] }
 0x1e2   : > { %13896 = vst [vmem:[#allocation25_spill] sm:$0xff] %v8188_v5  ;;  %13903 = vst [vmem:[#allocation26_spill] sm:$0xff] %v8216_v63  ;;  %1043 = vmax.xlane.f32.xlu1 %v7188_v42  ;;  %v8238_v48 = vmax.f32 %v1739_v7, %v1740_v55  ;;  %v1742_v42 = vsel %vm8054_vm10, %v6629_v30, -inf  ;;  %v617_v26 = vsel %vm6410_vm4, %v6615_v33, -inf  ;;  %v13911_v55 = vrot.slane %v13910_v36, %v6175_v59 }
 0x1e3   : > { %vm8212_vm8 = vcmp.eq.s32.totalorder %v13900_v20, 1  ;;  %v13904_v20 = vrot.slane %v13899_v4, %v6181_v62  ;;  %13907 = vst [vmem:[#allocation72_spill] sm:$0xff] %v8236_v38  ;;  %v1738_v4 = vsel %vm8054_vm10, %v6631_v0, -inf  ;;  %v1769_v7 = vsel %vm8116_vm11, %v6615_v33, -inf }
 0x1e4   : > { %13908 = vst [vmem:[#allocation73_spill] sm:$0xff] %v8238_v48  ;;  %vm8260_vm13 = vcmp.eq.s32.totalorder %v13911_v55, 1  ;;  %v8264_v63 = vmax.f32 %v1737_v9, %v1738_v4  ;;  %v8266_v48 = vmax.f32 %v1741_v44, %v1742_v42  ;;  %v13915_v38 = vrot.slane %v13910_v36, %v6181_v62  ;;  %v13919_v42 = vld [vmem:[#allocation36_spill] sm:$0xff] }
 0x1e5   : > { %vm8230_vm12 = vcmp.eq.s32.totalorder %v13904_v20, 1  ;;  %v8281_v5 = vmax.f32 %v617_v26, %v618_v40  ;;  %v1770_v9 = vsel %vm8123_vm14, %v6631_v0, -inf  ;;  %v1767_v4 = vsel %vm8116_vm11, %v6545_v27, -inf  ;;  %1072 = vmax.xlane.f32.xlu0 %v13919_v42 }
 0x1e6   : > { %vm8277_vm4 = vcmp.eq.s32.totalorder %v13915_v38, 1  ;;  %v1768_v44 = vsel %vm8123_vm14, %v6571_v12, -inf  ;;  %1049 = vmax.xlane.f32.xlu1 %v7221_v8  ;;  %v8294_v38 = vmax.f32 %v1769_v7, %v1770_v9  ;;  %v1773_v36 = vsel %vm8116_vm11, %v6613_v37, -inf }
 0x1e7   : > { %13918 = vst [vmem:[#allocation16_spill] sm:$0xff] %v8281_v5  ;;  %v8296_v26 = vmax.f32 %v1767_v4, %v1768_v44  ;;  %v1774_v49 = vsel %vm8123_vm14, %v6629_v30, -inf  ;;  %v13920_v40 = vrot.slane %v7479_v46, %v6175_v59  ;;  %v1771_v7 = vsel %vm8116_vm11, %v6547_v2, -inf }
 0x1e8   : > { %v8311_v8 = vmax.f32 %v1773_v36, %v1774_v49  ;;  %v1772_v9 = vsel %vm8123_vm14, %v6573_v25, -inf  ;;  %v1801_v4 = vsel %vm8164_vm15, %v6615_v33, -inf  ;;  %v13923_v44 = vrot.slane %v7479_v46, %v6181_v62 }
 0x1e9   : > { %vm8307_vm7 = vcmp.eq.s32.totalorder %v13920_v40, 1  ;;  %v8329_v36 = vmax.f32 %v1771_v7, %v1772_v9  ;;  %v1802_v17 = vsel %vm8171_vm5, %v6631_v0, -inf  ;;  %v1799_v61 = vsel %vm8164_vm15, %v6545_v27, -inf  ;;  %1078 = vmax.xlane.f32.xlu0 %v7232_v22 }
 0x1ea   : > { %vm8325_vm1 = vcmp.eq.s32.totalorder %v13923_v44, 1  ;;  %v1800_v49 = vsel %vm8171_vm5, %v6571_v12, -inf  ;;  %v8340_v40 = vmax.f32 %v1801_v4, %v1802_v17  ;;  %v1805_v7 = vsel %vm8164_vm15, %v6613_v37, -inf  ;;  %v13928_v44 = vld [vmem:[#allocation37_spill] sm:$0xff] }
 0x1eb   : > { %13926 = vst [vmem:[#allocation27_spill] sm:$0xff] %v8329_v36  ;;  %v8342_v46 = vmax.f32 %v1799_v61, %v1800_v49  ;;  %v1806_v9 = vsel %vm8171_vm5, %v6629_v30, -inf  ;;  %1075 = vmax.xlane.f32.xlu1 %v13928_v44  ;;  %v1803_v4 = vsel %vm8164_vm15, %v6547_v2, -inf  ;;  %v1804_v17 = vsel %vm8171_vm5, %v6573_v25, -inf }
 0x1ec   : > { %v8352_v36 = vmax.f32 %v1805_v7, %v1806_v9  ;;  %v13930_v61 = vrot.slane %v7677_v50, %v6175_v59  ;;  %v13933_v22 = vrot.slane %v7677_v50, %v6181_v62  ;;  %vm1979_vm6 = vcmp.eq.s32.totalorder %v6171_v57, 43 }
 0x1ed   : > { %13927 = vst [vmem:[#allocation18_spill] sm:$0xff] %v8342_v46  ;;  %v8375_v43 = vmax.f32 %v1803_v4, %v1804_v17  ;;  %v1833_v52 = vsel %vm8212_vm8, %v6615_v33, -inf  ;;  %v1834_v9 = vsel %vm8230_vm12, %v6631_v0, -inf  ;;  %v1831_v50 = vsel %vm8212_vm8, %v6545_v27, -inf  ;;  %v13941_v46 = vld [vmem:[#allocation38_spill] sm:$0xff] }
 0x1ee   : > { %13929 = vst [vmem:[#allocation36_spill] sm:$0xff] %v8352_v36  ;;  %vm8363_vm2 = vcmp.eq.s32.totalorder %v13930_v61, 1  ;;  %vm8370_vm3 = vcmp.eq.s32.totalorder %v13933_v22, 1  ;;  %v8386_v44 = vmax.f32 %v1833_v52, %v1834_v9  ;;  %v1832_v61 = vsel %vm8230_vm12, %v6571_v12, -inf  ;;  %1104 = vmax.xlane.f32.xlu0 %v13941_v46 }
 0x1ef   : > { %13936 = vst [vmem:[#allocation37_spill] sm:$0xff] %v8375_v43  ;;  %v1837_v4 = vsel %vm8212_vm8, %v6613_v37, -inf  ;;  %v1838_v17 = vsel %vm8230_vm12, %v6629_v30, -inf  ;;  %v8397_v22 = vmax.f32 %v1831_v50, %v1832_v61  ;;  %v1835_v52 = vsel %vm8212_vm8, %v6547_v2, -inf  ;;  %v13942_v50 = vld [vmem:[#allocation39_spill] sm:$0xff] }
 0x1f0   : > { %13937 = vst [vmem:[#allocation74_spill] sm:$0xff] %v8386_v44  ;;  %v8399_v43 = vmax.f32 %v1837_v4, %v1838_v17  ;;  %v1836_v9 = vsel %vm8230_vm12, %v6573_v25, -inf  ;;  %v13938_v44 = vrot.slane %v8010_v39, %v6175_v59  ;;  %1081 = vmax.xlane.f32.xlu1 %v13942_v50  ;;  %v1865_v3 = vsel %vm8260_vm13, %v6615_v33, -inf }
 0x1f1   : > { %v8416_v61 = vmax.f32 %v1835_v52, %v1836_v9  ;;  %v1866_v6 = vsel %vm8277_vm4, %v6631_v0, -inf  ;;  %v1864_v46 = vsel %vm8277_vm4, %v6571_v12, -inf  ;;  %v1869_v17 = vsel %vm8260_vm13, %v6613_v37, -inf }
 0x1f2   : > { %vm8410_vm9 = vcmp.eq.s32.totalorder %v13938_v44, 1  ;;  %v1863_v44 = vsel %vm8260_vm13, %v6545_v27, -inf  ;;  %v8427_v4 = vmax.f32 %v1865_v3, %v1866_v6  ;;  %v1870_v52 = vsel %vm8277_vm4, %v6629_v30, -inf  ;;  %1110 = vmax.xlane.f32.xlu0 %v7280_v31 }
 0x1f3   : > { %13943 = vst [vmem:[#allocation38_spill] sm:$0xff] %v8416_v61  ;;  %v8438_v9 = vmax.f32 %v1863_v44, %v1864_v46  ;;  %v8440_v50 = vmax.f32 %v1869_v17, %v1870_v52  ;;  %v1867_v3 = vsel %vm8260_vm13, %v6547_v2, -inf  ;;  %v1868_v6 = vsel %vm8277_vm4, %v6573_v25, -inf }
 0x1f4   : > { %13944 = vst [vmem:[#allocation39_spill] sm:$0xff] %v8427_v4  ;;  %v8448_v4 = vmax.f32 %v1867_v3, %v1868_v6  ;;  %v1897_v61 = vsel %vm8307_vm7, %v6615_v33, -inf  ;;  %v1898_v44 = vsel %vm8325_vm1, %v6631_v0, -inf  ;;  %v1895_v46 = vsel %vm8307_vm7, %v6545_v27, -inf  ;;  %1107 = vmax.xlane.f32.xlu1 %v7282_v60 }
 0x1f5   : > { %v8461_v20 = vmax.f32 %v1897_v61, %v1898_v44  ;;  %v1896_v55 = vsel %vm8325_vm1, %v6571_v12, -inf  ;;  %v1901_v17 = vsel %vm8307_vm7, %v6613_v37, -inf  ;;  %v1980_v52 = vsel %vm1979_vm6, 1, %v13748_v29 }
 0x1f6   : > { %v8472_v3 = vmax.f32 %v1895_v46, %v1896_v55  ;;  %v1902_v31 = vsel %vm8325_vm1, %v6629_v30, -inf  ;;  %v1899_v60 = vsel %vm8307_vm7, %v6547_v2, -inf  ;;  %v1900_v61 = vsel %vm8325_vm1, %v6573_v25, -inf  ;;  %1136 = vmax.xlane.f32.xlu0 %v7290_v47 }
 0x1f7   : > { %v8483_v6 = vmax.f32 %v1901_v17, %v1902_v31  ;;  %v8485_v44 = vmax.f32 %v1899_v60, %v1900_v61  ;;  %v1929_v46 = vsel %vm8363_vm2, %v6615_v33, -inf  ;;  %v1930_v55 = vsel %vm8370_vm3, %v6631_v0, -inf  ;;  %v13948_v31 = vld [vmem:[#allocation40_spill] sm:$0xff] }
 0x1f8   : > { %13945 = vst [vmem:[#allocation75_spill] sm:$0xff] %v8472_v3  ;;  %v8493_v3 = vmax.f32 %v1929_v46, %v1930_v55  ;;  %v1927_v5 = vsel %vm8363_vm2, %v6545_v27, -inf  ;;  %v1928_v42 = vsel %vm8370_vm3, %v6571_v12, -inf  ;;  %v1933_v17 = vsel %vm8363_vm2, %v6613_v37, -inf  ;;  %1113 = vmax.xlane.f32.xlu1 %v13948_v31 }
 0x1f9   : > { %13946 = vst [vmem:[#allocation76_spill] sm:$0xff] %v8485_v44  ;;  %v8506_v60 = vmax.f32 %v1927_v5, %v1928_v42  ;;  %v1934_v61 = vsel %vm8370_vm3, %v6629_v30, -inf  ;;  %v1931_v46 = vsel %vm8363_vm2, %v6547_v2, -inf  ;;  %v1932_v55 = vsel %vm8370_vm3, %v6573_v25, -inf }
 0x1fa   : > { %13947 = vst [vmem:[#allocation77_spill] sm:$0xff] %v8493_v3  ;;  %v8517_v3 = vmax.f32 %v1933_v17, %v1934_v61  ;;  %v8519_v44 = vmax.f32 %v1931_v46, %v1932_v55  ;;  %v13951_v47 = vrot.slane %v8010_v39, %v6181_v62  ;;  %v1961_v5 = vsel %vm8410_vm9, %v6615_v33, -inf  ;;  %1142 = vmax.xlane.f32.xlu0 %v7328_v34 }
 0x1fb   : > { %v1959_v49 = vsel %vm8410_vm9, %v6545_v27, -inf  ;;  %v1965_v17 = vsel %vm8410_vm9, %v6613_v37, -inf  ;;  %v1963_v46 = vsel %vm8410_vm9, %v6547_v2, -inf  ;;  %vm2011_vm11 = vcmp.eq.s32.totalorder %v6171_v57, 44 }
 0x1fc   : > { %13949 = vst [vmem:[#allocation40_spill] sm:$0xff] %v8517_v3  ;;  %13950 = vst [vmem:[#allocation78_spill] sm:$0xff] %v8519_v44  ;;  %vm1958_vm10 = vcmp.eq.s32.totalorder %v13951_v47, 1  ;;  %1139 = vmax.xlane.f32.xlu1 %v7330_v51  ;;  %v1984_v44 = vrot.slane %v1980_v52, %v6175_v59  ;;  %vm2043_vm14 = vcmp.eq.s32.totalorder %v6171_v57, 45  ;;  %v2012_v34 = vsel %vm2011_vm11, 1, %v13748_v29 }
 0x1fd   : > { %v1962_v42 = vsel %vm1958_vm10, %v6631_v0, -inf  ;;  %v1960_v7 = vsel %vm1958_vm10, %v6571_v12, -inf  ;;  %v1966_v61 = vsel %vm1958_vm10, %v6629_v30, -inf  ;;  %v1964_v47 = vsel %vm1958_vm10, %v6573_v25, -inf }
 0x1fe   : > { %v8535_v31 = vmax.f32 %v1961_v5, %v1962_v42  ;;  %v8537_v39 = vmax.f32 %v1959_v49, %v1960_v7  ;;  %v8545_v55 = vmax.f32 %v1965_v17, %v1966_v61  ;;  %v8549_v5 = vmax.f32 %v1963_v46, %v1964_v47  ;;  %1168 = vmax.xlane.f32.xlu0 %v7338_v15  ;;  %v13958_v7 = vld [vmem:[#allocation41_spill] sm:$0xff] }
 0x1ff   : > { %v1988_v42 = vrot.slane %v1980_v52, %v6181_v62  ;;  %vm8554_vm15 = vcmp.eq.s32.totalorder %v1984_v44, 1  ;;  %v2044_v51 = vsel %vm2043_vm14, 1, %v13748_v29  ;;  %vm2075_vm5 = vcmp.eq.s32.totalorder %v6171_v57, 46 }
 0x200   : > { %13952 = vst [vmem:[#allocation79_spill] sm:$0xff] %v8535_v31  ;;  %13953 = vst [vmem:[#allocation80_spill] sm:$0xff] %v8537_v39  ;;  %v1993_v49 = vsel %vm8554_vm15, %v6615_v33, -inf  ;;  %v1991_v52 = vsel %vm8554_vm15, %v6545_v27, -inf  ;;  %v1997_v44 = vsel %vm8554_vm15, %v6613_v37, -inf  ;;  %1145 = vmax.xlane.f32.xlu1 %v13958_v7  ;;  %v1995_v47 = vsel %vm8554_vm15, %v6547_v2, -inf }
 0x201   : > { %13954 = vst [vmem:[#allocation81_spill] sm:$0xff] %v8545_v55  ;;  %13955 = vst [vmem:[#allocation82_spill] sm:$0xff] %v8549_v5  ;;  %vm1990_vm8 = vcmp.eq.s32.totalorder %v1988_v42, 1  ;;  %v2016_v7 = vrot.slane %v2012_v34, %v6175_v59  ;;  %v2020_v31 = vrot.slane %v2012_v34, %v6181_v62  ;;  %v2048_v3 = vrot.slane %v2044_v51, %v6175_v59  ;;  %v631_v34 = vpop.xlane.xlu1 %630 }
 0x202   : > { %v1994_v17 = vsel %vm1990_vm8, %v6631_v0, -inf  ;;  %v1992_v61 = vsel %vm1990_vm8, %v6571_v12, -inf  ;;  %v1998_v46 = vsel %vm1990_vm8, %v6629_v30, -inf  ;;  %v1996_v15 = vsel %vm1990_vm8, %v6573_v25, -inf  ;;  %1174 = vmax.xlane.f32.xlu0 %v7376_v13 }
 0x203   : > { %v8578_v42 = vmax.f32 %v1993_v49, %v1994_v17  ;;  %v8580_v5 = vmax.f32 %v1991_v52, %v1992_v61  ;;  %v8582_v55 = vmax.f32 %v1997_v44, %v1998_v46  ;;  %v8585_v39 = vmax.f32 %v1995_v47, %v1996_v15 }
 0x204   : > { %vm4699_vm12 = vcmask 7168   ;;  %v2052_v36 = vrot.slane %v2044_v51, %v6181_v62  ;;  %v2076_v49 = vsel %vm2075_vm5, 1, %v13748_v29  ;;  %vm2107_vm13 = vcmp.eq.s32.totalorder %v6171_v57, 47  ;;  %1171 = vmax.xlane.f32.xlu1 %v7378_v14 }
 0x205   : > { %13959 = vst [vmem:[#allocation41_spill] sm:$0xff] %v8580_v5  ;;  %13960 = vst [vmem:[#allocation83_spill] sm:$0xff] %v8582_v55  ;;  %vm2139_vm4 = vcmp.eq.s32.totalorder %v6171_v57, 48  ;;  %vm8598_vm7 = vcmp.eq.s32.totalorder %v2016_v7, 1  ;;  %vm8602_vm1 = vcmp.eq.s32.totalorder %v2020_v31, 1  ;;  %vm8606_vm2 = vcmp.eq.s32.totalorder %v2048_v3, 1 }
 0x206   : > { %13961 = vst [vmem:[#allocation84_spill] sm:$0xff] %v8585_v39  ;;  %v2080_v44 = vrot.slane %v2076_v49, %v6175_v59  ;;  %v2025_v13 = vsel %vm8598_vm7, %v6615_v33, -inf  ;;  %v2026_v14 = vsel %vm8602_vm1, %v6631_v0, -inf  ;;  %v2023_v31 = vsel %vm8598_vm7, %v6545_v27, -inf  ;;  %v13982_v55 = vld [vmem:[#allocation44_spill] sm:$0xff] }
 0x207   : > { %v2024_v3 = vsel %vm8602_vm1, %v6571_v12, -inf  ;;  %v8623_v17 = vmax.f32 %v2025_v13, %v2026_v14  ;;  %v2029_v46 = vsel %vm8598_vm7, %v6613_v37, -inf  ;;  %v2030_v47 = vsel %vm8602_vm1, %v6629_v30, -inf }
 0x208   : > { %v8625_v61 = vmax.f32 %v2023_v31, %v2024_v3  ;;  %v8633_v15 = vmax.f32 %v2029_v46, %v2030_v47  ;;  %v2027_v7 = vsel %vm8598_vm7, %v6547_v2, -inf  ;;  %v2028_v13 = vsel %vm8602_vm1, %v6573_v25, -inf  ;;  %v13973_v31 = vld [vmem:[#allocation42_spill] sm:$0xff]  ;;  %v13974_v3 = vld [vmem:[#allocation43_spill] sm:$0xff]  ;;  %v625_v47 = vpop.xlane.xlu0 %624 }
 0x209   : > { %13968 = vst [vmem:[#allocation85_spill] sm:$0xff] %v8623_v17  ;;  %vm8641_vm3 = vcmp.eq.s32.totalorder %v2052_v36, 1  ;;  %1200 = vmax.xlane.f32.xlu0 %v13973_v31  ;;  %1177 = vmax.xlane.f32.xlu1 %v13974_v3  ;;  %v2057_v46 = vsel %vm8606_vm2, %v6615_v33, -inf  ;;  %v2055_v36 = vsel %vm8606_vm2, %v6545_v27, -inf  ;;  %vm4704_vm6 = vcmask 15360  }
 0x20a   : > { %13969 = vst [vmem:[#allocation86_spill] sm:$0xff] %v8625_v61  ;;  %13970 = vst [vmem:[#allocation87_spill] sm:$0xff] %v8633_v15  ;;  %v8647_v61 = vmax.f32 %v2027_v7, %v2028_v13  ;;  %v2058_v52 = vsel %vm8641_vm3, %v6631_v0, -inf  ;;  %v2056_v7 = vsel %vm8641_vm3, %v6571_v12, -inf  ;;  %v2061_v13 = vsel %vm8606_vm2, %v6613_v37, -inf }
 0x20b   : > { %v8658_v15 = vmax.f32 %v2057_v46, %v2058_v52  ;;  %v2062_v31 = vsel %vm8641_vm3, %v6629_v30, -inf  ;;  %v8669_v3 = vmax.f32 %v2055_v36, %v2056_v7  ;;  %v2059_v46 = vsel %vm8606_vm2, %v6547_v2, -inf  ;;  %v634_v7 = vpop.xlane.xlu1 %633 }
 0x20c   : > { %13975 = vst [vmem:[#allocation42_spill] sm:$0xff] %v8647_v61  ;;  %v8671_v61 = vmax.f32 %v2061_v13, %v2062_v31  ;;  %v2060_v52 = vsel %vm8641_vm3, %v6573_v25, -inf  ;;  %v2084_v17 = vrot.slane %v2076_v49, %v6181_v62  ;;  %vm8682_vm9 = vcmp.eq.s32.totalorder %v2080_v44, 1 }
 0x20d   : > { %13976 = vst [vmem:[#allocation43_spill] sm:$0xff] %v8658_v15  ;;  %13977 = vst [vmem:[#allocation88_spill] sm:$0xff] %v8669_v3  ;;  %v8679_v15 = vmax.f32 %v2059_v46, %v2060_v52  ;;  %v2108_v36 = vsel %vm2107_vm13, 1, %v13748_v29  ;;  %1206 = vmax.xlane.f32.xlu0 %v7422_v23  ;;  %1203 = vmax.xlane.f32.xlu1 %v7424_v16  ;;  %v2089_v51 = vsel %vm8682_vm9, %v6615_v33, -inf  ;;  %v2087_v49 = vsel %vm8682_vm9, %v6545_v27, -inf  ;;  %v657_v23 = vpop.xlane.xlu0 %656 }
 0x20e   : > { %13978 = vst [vmem:[#allocation89_spill] sm:$0xff] %v8671_v61  ;;  %v2093_v44 = vsel %vm8682_vm9, %v6613_v37, -inf  ;;  %v2091_v14 = vsel %vm8682_vm9, %v6547_v2, -inf  ;;  %vm2086_vm10 = vcmp.eq.s32.totalorder %v2084_v17, 1  ;;  %v2112_v16 = vrot.slane %v2108_v36, %v6175_v59 }
 0x20f   : > { %13979 = vst [vmem:[#allocation90_spill] sm:$0xff] %v8679_v15  ;;  %v2116_v13 = vrot.slane %v2108_v36, %v6181_v62  ;;  %v2140_v31 = vsel %vm2139_vm4, 1, %v13748_v29  ;;  %v4700_v46 = vsel %vm4699_vm12, %v625_v47, %v657_v23  ;;  %v2090_v52 = vsel %vm2086_vm10, %v6631_v0, -inf }
 0x210   : > { %v2088_v15 = vsel %vm2086_vm10, %v6571_v12, -inf  ;;  %v2094_v39 = vsel %vm2086_vm10, %v6629_v30, -inf  ;;  %v8712_v61 = vmax.f32 %v2089_v51, %v2090_v52  ;;  %v2092_v36 = vsel %vm2086_vm10, %v6573_v25, -inf }
 0x211   : > { %v8714_v3 = vmax.f32 %v2087_v49, %v2088_v15  ;;  %v8716_v17 = vmax.f32 %v2093_v44, %v2094_v39  ;;  %1232 = vmax.xlane.f32.xlu0 %v7444_v41  ;;  %1209 = vmax.xlane.f32.xlu1 %v13982_v55  ;;  %v8721_v5 = vmax.f32 %v2091_v14, %v2092_v36  ;;  %vm8723_vm11 = vcmp.eq.s32.totalorder %v2112_v16, 1  ;;  %v663_v51 = vpop.xlane.xlu0 %662  ;;  %v8732_v49 = vpop.xlane.xlu1 %659 }
 0x212   : > { %vm8727_vm14 = vcmp.eq.s32.totalorder %v2116_v13, 1  ;;  %v2144_v15 = vrot.slane %v2140_v31, %v6175_v59  ;;  %13987 = vst [vmem:[#allocation44_spill] sm:$0xff] %v8732_v49  ;;  %v2121_v41 = vsel %vm8723_vm11, %v6615_v33, -inf  ;;  %v2119_v44 = vsel %vm8723_vm11, %v6545_v27, -inf }
 0x213   : > { %v2122_v55 = vsel %vm8727_vm14, %v6631_v0, -inf  ;;  %v2120_v14 = vsel %vm8727_vm14, %v6571_v12, -inf  ;;  %v4702_v16 = vsel %vm4699_vm12, %v631_v34, %v663_v51  ;;  %v2125_v39 = vsel %vm8723_vm11, %v6613_v37, -inf }
 0x214   : > { %v8747_v13 = vmax.f32 %v2121_v41, %v2122_v55  ;;  %v8749_v52 = vmax.f32 %v2119_v44, %v2120_v14  ;;  %vm4709_vm15 = vcmask 23552   ;;  %v2126_v36 = vsel %vm8727_vm14, %v6629_v30, -inf  ;;  %v13990_v41 = vld [vmem:[#allocation45_spill] sm:$0xff]  ;;  %v13991_v55 = vld [vmem:[#allocation46_spill] sm:$0xff] }
 0x215   : > { %v2123_v49 = vsel %vm8723_vm11, %v6547_v2, -inf  ;;  %v2124_v34 = vsel %vm8727_vm14, %v6573_v25, -inf  ;;  %v2148_v51 = vrot.slane %v2140_v31, %v6181_v62  ;;  %1238 = vmax.xlane.f32.xlu0 %v13990_v41  ;;  %1235 = vmax.xlane.f32.xlu1 %v13991_v55  ;;  %v8766_v44 = vmax.f32 %v2125_v39, %v2126_v36  ;;  %v689_v47 = vpop.xlane.xlu0 %688 }
 0x216   : > { %13988 = vst [vmem:[#allocation91_spill] sm:$0xff] %v8747_v13  ;;  %13989 = vst [vmem:[#allocation92_spill] sm:$0xff] %v8749_v52  ;;  %v8768_v14 = vmax.f32 %v2123_v49, %v2124_v34  ;;  %vm8770_vm5 = vcmp.eq.s32.totalorder %v2144_v15, 1  ;;  %vm2171_vm8 = vcmp.eq.s32.totalorder %v6171_v57, 49  ;;  %v666_v13 = vpop.xlane.xlu1 %665  ;;  %v4705_v39 = vsel %vm4704_vm6, %v4700_v46, %v689_v47 }
 0x217   : > { %13992 = vst [vmem:[#allocation45_spill] sm:$0xff] %v8766_v44  ;;  %vm8775_vm13 = vcmp.eq.s32.totalorder %v2148_v51, 1  ;;  %v2153_v31 = vsel %vm8770_vm5, %v6615_v33, -inf  ;;  %v2151_v49 = vsel %vm8770_vm5, %v6545_v27, -inf  ;;  %v2157_v15 = vsel %vm8770_vm5, %v6613_v37, -inf }
 0x218   : > { %13993 = vst [vmem:[#allocation46_spill] sm:$0xff] %v8768_v14  ;;  %v4703_v36 = vsel %vm4699_vm12, %v634_v7, %v666_v13  ;;  %v2154_v34 = vsel %vm8775_vm13, %v6631_v0, -inf  ;;  %v2152_v51 = vsel %vm8775_vm13, %v6571_v12, -inf  ;;  %v2158_v14 = vsel %vm8775_vm13, %v6629_v30, -inf }
 0x219   : > { %v8796_v41 = vmax.f32 %v2153_v31, %v2154_v34  ;;  %v8798_v55 = vmax.f32 %v2151_v49, %v2152_v51  ;;  %v2155_v7 = vsel %vm8770_vm5, %v6547_v2, -inf  ;;  %1264 = vmax.xlane.f32.xlu0 %v7494_v11  ;;  %1241 = vmax.xlane.f32.xlu1 %v7496_v24  ;;  %v8808_v46 = vmax.f32 %v2157_v15, %v2158_v14  ;;  %v695_v31 = vpop.xlane.xlu0 %694 }
 0x21a   : > { %v2156_v13 = vsel %vm8775_vm13, %v6573_v25, -inf  ;;  %v2172_v47 = vsel %vm2171_vm8, 1, %v13748_v29  ;;  %vm2203_vm4 = vcmp.eq.s32.totalorder %v6171_v57, 50  ;;  %v8817_v49 = vpop.xlane.xlu1 %691  ;;  %v4707_v23 = vsel %vm4704_vm6, %v4702_v16, %v695_v31  ;;  %v14007_v16 = vld [vmem:[#allocation47_spill] sm:$0xff] }
 0x21b   : > { %13998 = vst [vmem:[#allocation93_spill] sm:$0xff] %v8796_v41  ;;  %13999 = vst [vmem:[#allocation94_spill] sm:$0xff] %v8798_v55  ;;  %v8819_v52 = vmax.f32 %v2155_v7, %v2156_v13  ;;  %v2176_v11 = vrot.slane %v2172_v47, %v6175_v59  ;;  %v2180_v24 = vrot.slane %v2172_v47, %v6181_v62  ;;  %v2204_v14 = vsel %vm2203_vm4, 1, %v13748_v29 }
 0x21c   : > { %14000 = vst [vmem:[#allocation95_spill] sm:$0xff] %v8808_v46  ;;  %14001 = vst [vmem:[#allocation96_spill] sm:$0xff] %v8817_v49  ;;  %v2208_v15 = vrot.slane %v2204_v14, %v6175_v59  ;;  %v2212_v34 = vrot.slane %v2204_v14, %v6181_v62  ;;  %vm2235_vm7 = vcmp.eq.s32.totalorder %v6171_v57, 51  ;;  %vm13573_vm1 = vcmask 31744  }
 0x21d   : > { %14002 = vst [vmem:[#allocation97_spill] sm:$0xff] %v8819_v52  ;;  %vm8828_vm2 = vcmp.eq.s32.totalorder %v2176_v11, 1  ;;  %vm8832_vm3 = vcmp.eq.s32.totalorder %v2180_v24, 1  ;;  %v2236_v13 = vsel %vm2235_vm7, 1, %v13748_v29  ;;  %vm2267_vm9 = vcmp.eq.s32.totalorder %v6171_v57, 52  ;;  %1270 = vmax.xlane.f32.xlu0 %v7511_v58  ;;  %1267 = vmax.xlane.f32.xlu1 %v14007_v16  ;;  %v721_v14 = vpop.xlane.xlu0 %720 }
 0x21e   : > { %v2185_v47 = vsel %vm8828_vm2, %v6615_v33, -inf  ;;  %v2186_v31 = vsel %vm8832_vm3, %v6631_v0, -inf  ;;  %v2183_v11 = vsel %vm8828_vm2, %v6545_v27, -inf  ;;  %v2184_v24 = vsel %vm8832_vm3, %v6571_v12, -inf  ;;  %v698_v58 = vpop.xlane.xlu1 %697 }
 0x21f   : > { %v8852_v49 = vmax.f32 %v2185_v47, %v2186_v31  ;;  %v8854_v16 = vmax.f32 %v2183_v11, %v2184_v24  ;;  %v2189_v52 = vsel %vm8828_vm2, %v6613_v37, -inf  ;;  %v2190_v46 = vsel %vm8832_vm3, %v6629_v30, -inf }
 0x220   : > { %v4710_v55 = vsel %vm4709_vm15, %v4705_v39, %v721_v14  ;;  %v4708_v41 = vsel %vm4704_vm6, %v4703_v36, %v698_v58  ;;  %v8864_v44 = vmax.f32 %v2189_v52, %v2190_v46  ;;  %v2187_v47 = vsel %vm8828_vm2, %v6547_v2, -inf  ;;  %v14015_v36 = vld [vmem:[#allocation48_spill] sm:$0xff] }
 0x221   : > { %14008 = vst [vmem:[#allocation47_spill] sm:$0xff] %v8852_v49  ;;  %14009 = vst [vmem:[#allocation98_spill] sm:$0xff] %v8854_v16  ;;  %v2188_v31 = vsel %vm8832_vm3, %v6573_v25, -inf  ;;  %vm8872_vm10 = vcmp.eq.s32.totalorder %v2208_v15, 1  ;;  %vm8876_vm11 = vcmp.eq.s32.totalorder %v2212_v34, 1  ;;  %v2240_v39 = vrot.slane %v2236_v13, %v6175_v59  ;;  %1296 = vmax.xlane.f32.xlu0 %v14015_v36  ;;  %1273 = vmax.xlane.f32.xlu1 %v7552_v19  ;;  %v727_v51 = vpop.xlane.xlu0 %726  ;;  %v14026_v16 = vld [vmem:[#allocation51_spill] sm:$0xff] }
 0x222   : > { %14010 = vst [vmem:[#allocation99_spill] sm:$0xff] %v8864_v44  ;;  %v8883_v46 = vmax.f32 %v2187_v47, %v2188_v31  ;;  %v2217_v52 = vsel %vm8872_vm10, %v6615_v33, -inf  ;;  %v2218_v15 = vsel %vm8876_vm11, %v6631_v0, -inf  ;;  %v2215_v34 = vsel %vm8872_vm10, %v6545_v27, -inf  ;;  %v8894_v7 = vpop.xlane.xlu1 %723  ;;  %v14027_v49 = vld [vmem:[#allocation52_spill] sm:$0xff] }
 0x223   : > { %14017 = vst [vmem:[#allocation100_spill] sm:$0xff] %v8894_v7  ;;  %v8896_v14 = vmax.f32 %v2217_v52, %v2218_v15  ;;  %v2216_v19 = vsel %vm8876_vm11, %v6571_v12, -inf  ;;  %v2221_v58 = vsel %vm8872_vm10, %v6613_v37, -inf  ;;  %v2222_v47 = vsel %vm8876_vm11, %v6629_v30, -inf }
 0x224   : > { %14016 = vst [vmem:[#allocation48_spill] sm:$0xff] %v8883_v46  ;;  %v4712_v31 = vsel %vm4709_vm15, %v4707_v23, %v727_v51  ;;  %v8908_v36 = vmax.f32 %v2215_v34, %v2216_v19  ;;  %v8910_v46 = vmax.f32 %v2221_v58, %v2222_v47  ;;  %v2219_v52 = vsel %vm8872_vm10, %v6547_v2, -inf  ;;  %v14023_v34 = vld [vmem:[#allocation49_spill] sm:$0xff]  ;;  %v14024_v51 = vld [vmem:[#allocation50_spill] sm:$0xff] }
 0x225   : > { %14018 = vst [vmem:[#allocation101_spill] sm:$0xff] %v8896_v14  ;;  %vm13572_vm14 = vcmask 39936   ;;  %v2220_v15 = vsel %vm8876_vm11, %v6573_v25, -inf  ;;  %v2244_v7 = vrot.slane %v2236_v13, %v6181_v62  ;;  %vm8919_vm5 = vcmp.eq.s32.totalorder %v2240_v39, 1  ;;  %1302 = vmax.xlane.f32.xlu0 %v14023_v34  ;;  %1299 = vmax.xlane.f32.xlu1 %v14024_v51  ;;  %v753_v19 = vpop.xlane.xlu0 %752 }
 0x226   : > { %14019 = vst [vmem:[#allocation102_spill] sm:$0xff] %v8908_v36  ;;  %14020 = vst [vmem:[#allocation103_spill] sm:$0xff] %v8910_v46  ;;  %v2268_v23 = vsel %vm2267_vm9, 1, %v13748_v29  ;;  %v8928_v11 = vmax.f32 %v2219_v52, %v2220_v15  ;;  %v2249_v24 = vsel %vm8919_vm5, %v6615_v33, -inf  ;;  %v2247_v13 = vsel %vm8919_vm5, %v6545_v27, -inf  ;;  %v730_v58 = vpop.xlane.xlu1 %729 }
 0x227   : > { %v2253_v39 = vsel %vm8919_vm5, %v6613_v37, -inf  ;;  %vm2246_vm8 = vcmp.eq.s32.totalorder %v2244_v7, 1  ;;  %v2251_v47 = vsel %vm8919_vm5, %v6547_v2, -inf  ;;  %v2272_v52 = vrot.slane %v2268_v23, %v6175_v59 }
 0x228   : > { %14025 = vst [vmem:[#allocation49_spill] sm:$0xff] %v8928_v11  ;;  %v2276_v15 = vrot.slane %v2268_v23, %v6181_v62  ;;  %v4715_v34 = vsel %vm13573_vm1, %v4710_v55, %v753_v19  ;;  %v4713_v51 = vsel %vm4709_vm15, %v4708_v41, %v730_v58  ;;  %v2250_v11 = vsel %vm2246_vm8, %v6631_v0, -inf }
 0x229   : > { %v2248_v46 = vsel %vm2246_vm8, %v6571_v12, -inf  ;;  %v8948_v36 = vmax.f32 %v2249_v24, %v2250_v11  ;;  %v2254_v7 = vsel %vm2246_vm8, %v6629_v30, -inf  ;;  %v2252_v14 = vsel %vm2246_vm8, %v6573_v25, -inf  ;;  %1328 = vmax.xlane.f32.xlu0 %v14026_v16  ;;  %1305 = vmax.xlane.f32.xlu1 %v14027_v49 }
 0x22a   : > { %v8950_v44 = vmax.f32 %v2247_v13, %v2248_v46  ;;  %v8956_v23 = vmax.f32 %v2253_v39, %v2254_v7  ;;  %v8958_v55 = vmax.f32 %v2251_v47, %v2252_v14  ;;  %vm8960_vm13 = vcmp.eq.s32.totalorder %v2272_v52, 1  ;;  %v759_v46 = vpop.xlane.xlu0 %758  ;;  %v8968_v24 = vpop.xlane.xlu1 %755  ;;  %v14037_v14 = vld [vmem:[#allocation12_spill] sm:$0xff] }
 0x22b   : > { %vm8964_vm4 = vcmp.eq.s32.totalorder %v2276_v15, 1  ;;  %14034 = vst [vmem:[#allocation52_spill] sm:$0xff] %v8968_v24  ;;  %v2281_v16 = vsel %vm8960_vm13, %v6615_v33, -inf  ;;  %v2279_v13 = vsel %vm8960_vm13, %v6545_v27, -inf  ;;  %v4717_v19 = vsel %vm13573_vm1, %v4712_v31, %v759_v46  ;;  %v14038_v46 = vld [vmem:[#allocation53_spill] sm:$0xff] }
 0x22c   : > { %14028 = vst [vmem:[#allocation50_spill] sm:$0xff] %v8956_v23  ;;  %14029 = vst [vmem:[#allocation51_spill] sm:$0xff] %v8958_v55  ;;  %v2282_v49 = vsel %vm8964_vm4, %v6631_v0, -inf  ;;  %v2280_v39 = vsel %vm8964_vm4, %v6571_v12, -inf  ;;  %v2285_v52 = vsel %vm8960_vm13, %v6613_v37, -inf  ;;  %vm13571_vm7 = vcmask 48128  }
 0x22d   : > { %v8983_v58 = vmax.f32 %v2281_v16, %v2282_v49  ;;  %v8985_v47 = vmax.f32 %v2279_v13, %v2280_v39  ;;  %v2286_v15 = vsel %vm8964_vm4, %v6629_v30, -inf  ;;  %v2283_v7 = vsel %vm8960_vm13, %v6547_v2, -inf  ;;  %1334 = vmax.xlane.f32.xlu0 %v14037_v14  ;;  %1331 = vmax.xlane.f32.xlu1 %v14038_v46 }
 0x22e   : > { %v2284_v31 = vsel %vm8964_vm4, %v6573_v25, -inf  ;;  %vm2299_vm2 = vcmp.eq.s32.totalorder %v6171_v57, 53  ;;  %v9002_v16 = vmax.f32 %v2285_v52, %v2286_v15  ;;  %vm2331_vm3 = vcmp.eq.s32.totalorder %v6171_v57, 54  ;;  %v785_v41 = vpop.xlane.xlu0 %784  ;;  %v762_v39 = vpop.xlane.xlu1 %761 }
 0x22f   : > { %14035 = vst [vmem:[#allocation104_spill] sm:$0xff] %v8983_v58  ;;  %14036 = vst [vmem:[#allocation105_spill] sm:$0xff] %v8985_v47  ;;  %v9004_v49 = vmax.f32 %v2283_v7, %v2284_v31  ;;  %v2300_v13 = vsel %vm2299_vm2, 1, %v13748_v29  ;;  %v2332_v47 = vsel %vm2331_vm3, 1, %v13748_v29  ;;  %vm2363_vm9 = vcmp.eq.s32.totalorder %v6171_v57, 55 }
 0x230   : > { %14039 = vst [vmem:[#allocation12_spill] sm:$0xff] %v9002_v16  ;;  %v2304_v24 = vrot.slane %v2300_v13, %v6175_v59  ;;  %v2308_v11 = vrot.slane %v2300_v13, %v6181_v62  ;;  %v4720_v14 = vsel %vm13572_vm14, %v4715_v34, %v785_v41  ;;  %v4718_v52 = vsel %vm13573_vm1, %v4713_v51, %v762_v39  ;;  %v14046_v34 = vld [vmem:[#allocation55_spill] sm:$0xff] }
 0x231   : > { %14040 = vst [vmem:[#allocation53_spill] sm:$0xff] %v9004_v49  ;;  %v2336_v15 = vrot.slane %v2332_v47, %v6175_v59  ;;  %v2340_v7 = vrot.slane %v2332_v47, %v6181_v62  ;;  %v2364_v13 = vsel %vm2363_vm9, 1, %v13748_v29  ;;  %vm2395_vm5 = vcmp.eq.s32.totalorder %v6171_v57, 56  ;;  %v14045_v49 = vld [vmem:[#allocation54_spill] sm:$0xff]  ;;  %1337 = vmax.xlane.f32.xlu1 %v14046_v34 }
 0x232   : > { %vm9016_vm10 = vcmp.eq.s32.totalorder %v2304_v24, 1  ;;  %vm9020_vm11 = vcmp.eq.s32.totalorder %v2308_v11, 1  ;;  %1360 = vmax.xlane.f32.xlu0 %v14045_v49  ;;  %v791_v39 = vpop.xlane.xlu0 %790  ;;  %v9040_v49 = vpop.xlane.xlu1 %787  ;;  %vm13570_vm8 = vcmask 56320   ;;  %vm13569_vm9 = vcmask 64512  }
 0x233   : > { %v2313_v51 = vsel %vm9016_vm10, %v6615_v33, -inf  ;;  %v2314_v24 = vsel %vm9020_vm11, %v6631_v0, -inf  ;;  %v2311_v47 = vsel %vm9016_vm10, %v6545_v27, -inf  ;;  %v2312_v41 = vsel %vm9020_vm11, %v6571_v12, -inf  ;;  %14047 = vst [vmem:[#allocation54_spill] sm:$0xff] %v9040_v49 }
 0x234   : > { %v9042_v11 = vmax.f32 %v2313_v51, %v2314_v24  ;;  %v9044_v34 = vmax.f32 %v2311_v47, %v2312_v41  ;;  %v2317_v16 = vsel %vm9016_vm10, %v6613_v37, -inf  ;;  %v2318_v58 = vsel %vm9020_vm11, %v6629_v30, -inf }
 0x235   : > { %v4722_v55 = vsel %vm13572_vm14, %v4717_v19, %v791_v39  ;;  %v9053_v23 = vmax.f32 %v2317_v16, %v2318_v58  ;;  %v2315_v49 = vsel %vm9016_vm10, %v6547_v2, -inf  ;;  %v2316_v51 = vsel %vm9020_vm11, %v6573_v25, -inf  ;;  %v14056_v58 = vld [vmem:[#allocation13_spill] sm:$0xff]  ;;  %1363 = vmax.xlane.f32.xlu1 %v7681_v56 }
 0x236   : > { %14048 = vst [vmem:[#allocation55_spill] sm:$0xff] %v9042_v11  ;;  %14049 = vst [vmem:[#allocation106_spill] sm:$0xff] %v9044_v34  ;;  %v9061_v24 = vmax.f32 %v2315_v49, %v2316_v51  ;;  %vm9063_vm13 = vcmp.eq.s32.totalorder %v2336_v15, 1  ;;  %vm9067_vm4 = vcmp.eq.s32.totalorder %v2340_v7, 1  ;;  %v2368_v19 = vrot.slane %v2364_v13, %v6175_v59  ;;  %1366 = vmax.xlane.f32.xlu0 %v14056_v58  ;;  %v817_v46 = vpop.xlane.xlu0 %816  ;;  %v794_v39 = vpop.xlane.xlu1 %793 }
 0x237   : > { %14050 = vst [vmem:[#allocation107_spill] sm:$0xff] %v9053_v23  ;;  %v2345_v16 = vsel %vm9063_vm13, %v6615_v33, -inf  ;;  %v2346_v15 = vsel %vm9067_vm4, %v6631_v0, -inf  ;;  %v2343_v7 = vsel %vm9063_vm13, %v6545_v27, -inf  ;;  %v2344_v31 = vsel %vm9067_vm4, %v6571_v12, -inf }
 0x238   : > { %14051 = vst [vmem:[#allocation108_spill] sm:$0xff] %v9061_v24  ;;  %v9086_v49 = vmax.f32 %v2345_v16, %v2346_v15  ;;  %v9088_v56 = vmax.f32 %v2343_v7, %v2344_v31  ;;  %v2349_v51 = vsel %vm9063_vm13, %v6613_v37, -inf  ;;  %v2350_v58 = vsel %vm9067_vm4, %v6629_v30, -inf }
 0x239   : > { %v4725_v24 = vsel %vm13571_vm7, %v4720_v14, %v817_v46  ;;  %v4723_v23 = vsel %vm13572_vm14, %v4718_v52, %v794_v39  ;;  %v9098_v34 = vmax.f32 %v2349_v51, %v2350_v58  ;;  %v2347_v16 = vsel %vm9063_vm13, %v6547_v2, -inf  ;;  %v14062_v52 = vld [vmem:[#allocation28_spill] sm:$0xff] }
 0x23a   : > { %14057 = vst [vmem:[#allocation13_spill] sm:$0xff] %v9086_v49  ;;  %14058 = vst [vmem:[#allocation109_spill] sm:$0xff] %v9088_v56  ;;  %v2348_v15 = vsel %vm9067_vm4, %v6573_v25, -inf  ;;  %v2372_v7 = vrot.slane %v2364_v13, %v6181_v62  ;;  %vm9107_vm2 = vcmp.eq.s32.totalorder %v2368_v19, 1  ;;  %v2396_v14 = vsel %vm2395_vm5, 1, %v13748_v29  ;;  %1392 = vmax.xlane.f32.xlu0 %v7692_v10  ;;  %1369 = vmax.xlane.f32.xlu1 %v14062_v52  ;;  %v823_v46 = vpop.xlane.xlu0 %822  ;;  %v9127_v39 = vpop.xlane.xlu1 %819  ;;  %v14068_v56 = vld [vmem:[#allocation29_spill] sm:$0xff] }
 0x23b   : > { %14059 = vst [vmem:[#allocation110_spill] sm:$0xff] %v9098_v34  ;;  %v9116_v47 = vmax.f32 %v2347_v16, %v2348_v15  ;;  %v2377_v41 = vsel %vm9107_vm2, %v6615_v33, -inf  ;;  %v2375_v13 = vsel %vm9107_vm2, %v6545_v27, -inf  ;;  %v2381_v19 = vsel %vm9107_vm2, %v6613_v37, -inf  ;;  %14064 = vst [vmem:[#allocation111_spill] sm:$0xff] %v9127_v39 }
 0x23c   : > { %vm2374_vm3 = vcmp.eq.s32.totalorder %v2372_v7, 1  ;;  %v2379_v10 = vsel %vm9107_vm2, %v6547_v2, -inf  ;;  %v2400_v51 = vrot.slane %v2396_v14, %v6175_v59  ;;  %v2404_v58 = vrot.slane %v2396_v14, %v6181_v62  ;;  %v14069_v14 = vld [vmem:[#allocation14_spill] sm:$0xff] }
 0x23d   : > { %14063 = vst [vmem:[#allocation28_spill] sm:$0xff] %v9116_v47  ;;  %v4727_v16 = vsel %vm13571_vm7, %v4722_v55, %v823_v46  ;;  %v2378_v15 = vsel %vm2374_vm3, %v6631_v0, -inf  ;;  %v2376_v52 = vsel %vm2374_vm3, %v6571_v12, -inf  ;;  %v2382_v47 = vsel %vm2374_vm3, %v6629_v30, -inf }
 0x23e   : > { %v9138_v34 = vmax.f32 %v2377_v41, %v2378_v15  ;;  %v9140_v7 = vmax.f32 %v2375_v13, %v2376_v52  ;;  %v9142_v39 = vmax.f32 %v2381_v19, %v2382_v47  ;;  %v2380_v31 = vsel %vm2374_vm3, %v6573_v25, -inf  ;;  %1398 = vmax.xlane.f32.xlu0 %v14068_v56  ;;  %1395 = vmax.xlane.f32.xlu1 %v14069_v14  ;;  %v849_v47 = vpop.xlane.xlu0 %848  ;;  %v826_v41 = vpop.xlane.xlu1 %825 }
 0x23f   : > { %v9147_v55 = vmax.f32 %v2379_v10, %v2380_v31  ;;  %vm9149_vm10 = vcmp.eq.s32.totalorder %v2400_v51, 1  ;;  %vm9153_vm11 = vcmp.eq.s32.totalorder %v2404_v58, 1  ;;  %vm2427_vm5 = vcmp.eq.s32.totalorder %v6171_v57, 57 }
 0x240   : > { %14065 = vst [vmem:[#allocation112_spill] sm:$0xff] %v9138_v34  ;;  %14066 = vst [vmem:[#allocation113_spill] sm:$0xff] %v9140_v7  ;;  %v2409_v56 = vsel %vm9149_vm10, %v6615_v33, -inf  ;;  %v2410_v13 = vsel %vm9153_vm11, %v6631_v0, -inf  ;;  %v2407_v19 = vsel %vm9149_vm10, %v6545_v27, -inf  ;;  %v2408_v10 = vsel %vm9153_vm11, %v6571_v12, -inf }
 0x241   : > { %14067 = vst [vmem:[#allocation114_spill] sm:$0xff] %v9142_v39  ;;  %14070 = vst [vmem:[#allocation29_spill] sm:$0xff] %v9147_v55  ;;  %v4730_v51 = vsel %vm13570_vm8, %v4725_v24, %v849_v47  ;;  %v4728_v58 = vsel %vm13571_vm7, %v4723_v23, %v826_v41  ;;  %v9172_v15 = vmax.f32 %v2409_v56, %v2410_v13  ;;  %v2413_v31 = vsel %vm9149_vm10, %v6613_v37, -inf  ;;  %v14077_v24 = vld [vmem:[#allocation56_spill] sm:$0xff] }
 0x242   : > { %v9174_v52 = vmax.f32 %v2407_v19, %v2408_v10  ;;  %v2414_v14 = vsel %vm9153_vm11, %v6629_v30, -inf  ;;  %v2411_v55 = vsel %vm9149_vm10, %v6547_v2, -inf  ;;  %v2412_v23 = vsel %vm9153_vm11, %v6573_v25, -inf  ;;  %1424 = vmax.xlane.f32.xlu0 %v14077_v24  ;;  %1401 = vmax.xlane.f32.xlu1 %v7764_v28  ;;  %v855_v46 = vpop.xlane.xlu0 %854  ;;  %v9198_v13 = vpop.xlane.xlu1 %851 }
 0x243   : > { %14075 = vst [vmem:[#allocation14_spill] sm:$0xff] %v9172_v15  ;;  %v9190_v47 = vmax.f32 %v2413_v31, %v2414_v14  ;;  %v9192_v41 = vmax.f32 %v2411_v55, %v2412_v23  ;;  %v2428_v56 = vsel %vm2427_vm5, 1, %v13748_v29  ;;  %vm2459_vm13 = vcmp.eq.s32.totalorder %v6171_v57, 58  ;;  %14080 = vst [vmem:[#allocation117_spill] sm:$0xff] %v9198_v13 }
 0x244   : > { %14076 = vst [vmem:[#allocation115_spill] sm:$0xff] %v9174_v52  ;;  %v2432_v49 = vrot.slane %v2428_v56, %v6175_v59  ;;  %v2436_v19 = vrot.slane %v2428_v56, %v6181_v62  ;;  %v2460_v10 = vsel %vm2459_vm13, 1, %v13748_v29  ;;  %vm2491_vm4 = vcmp.eq.s32.totalorder %v6171_v57, 59 }
 0x245   : > { %14078 = vst [vmem:[#allocation56_spill] sm:$0xff] %v9190_v47  ;;  %14079 = vst [vmem:[#allocation116_spill] sm:$0xff] %v9192_v41  ;;  %v4732_v28 = vsel %vm13570_vm8, %v4727_v16, %v855_v46  ;;  %v2464_v55 = vrot.slane %v2460_v10, %v6175_v59  ;;  %v2468_v31 = vrot.slane %v2460_v10, %v6181_v62  ;;  %v2492_v14 = vsel %vm2491_vm4, 1, %v13748_v29  ;;  %v14085_v16 = vld [vmem:[#allocation15_spill] sm:$0xff]  ;;  %v14086_v46 = vld [vmem:[#allocation57_spill] sm:$0xff] }
 0x246   : > { %vm13568_vm2 = vcmask 72704   ;;  %vm9208_vm3 = vcmp.eq.s32.totalorder %v2432_v49, 1  ;;  %vm9212_vm10 = vcmp.eq.s32.totalorder %v2436_v19, 1  ;;  %v2496_v56 = vrot.slane %v2492_v14, %v6175_v59  ;;  %1430 = vmax.xlane.f32.xlu0 %v14085_v16  ;;  %1427 = vmax.xlane.f32.xlu1 %v14086_v46  ;;  %v881_v41 = vpop.xlane.xlu0 %880  ;;  %v858_v16 = vpop.xlane.xlu1 %857 }
 0x247   : > { %v2500_v13 = vrot.slane %v2492_v14, %v6181_v62  ;;  %v2441_v10 = vsel %vm9208_vm3, %v6615_v33, -inf  ;;  %v2442_v49 = vsel %vm9212_vm10, %v6631_v0, -inf  ;;  %v2439_v19 = vsel %vm9208_vm3, %v6545_v27, -inf }
 0x248   : > { %v2440_v14 = vsel %vm9212_vm10, %v6571_v12, -inf  ;;  %v9232_v47 = vmax.f32 %v2441_v10, %v2442_v49  ;;  %v2445_v52 = vsel %vm9208_vm3, %v6613_v37, -inf  ;;  %v2446_v15 = vsel %vm9212_vm10, %v6629_v30, -inf }
 0x249   : > { %v9234_v46 = vmax.f32 %v2439_v19, %v2440_v14  ;;  %v4735_v39 = vsel %vm13569_vm9, %v4730_v51, %v881_v41  ;;  %v4733_v7 = vsel %vm13570_vm8, %v4728_v58, %v858_v16  ;;  %v9244_v34 = vmax.f32 %v2445_v52, %v2446_v15  ;;  %v14096_v58 = vld [vmem:[#allocation58_spill] sm:$0xff]  ;;  %v14097_v15 = vld [vmem:[#allocation17_spill] sm:$0xff]  ;;  %v14106_v19 = vld [vmem:[#allocation59_spill] sm:$0xff] }
 0x24a   : > { %14087 = vst [vmem:[#allocation15_spill] sm:$0xff] %v9232_v47  ;;  %v2443_v10 = vsel %vm9208_vm3, %v6547_v2, -inf  ;;  %v2444_v49 = vsel %vm9212_vm10, %v6573_v25, -inf  ;;  %vm9252_vm11 = vcmp.eq.s32.totalorder %v2464_v55, 1  ;;  %vm9256_vm5 = vcmp.eq.s32.totalorder %v2468_v31, 1  ;;  %1456 = vmax.xlane.f32.xlu0 %v14096_v58  ;;  %1433 = vmax.xlane.f32.xlu1 %v14097_v15  ;;  %v887_v23 = vpop.xlane.xlu0 %886  ;;  %v9277_v24 = vpop.xlane.xlu1 %883  ;;  %v14112_v51 = vld [vmem:[#allocation60_spill] sm:$0xff] }
 0x24b   : > { %14088 = vst [vmem:[#allocation57_spill] sm:$0xff] %v9234_v46  ;;  %14089 = vst [vmem:[#allocation118_spill] sm:$0xff] %v9244_v34  ;;  %vm9260_vm13 = vcmp.eq.s32.totalorder %v2496_v56, 1  ;;  %v9266_v52 = vmax.f32 %v2443_v10, %v2444_v49  ;;  %v2473_v41 = vsel %vm9252_vm11, %v6615_v33, -inf  ;;  %v2474_v55 = vsel %vm9256_vm5, %v6631_v0, -inf }
 0x24c   : > { %v2471_v31 = vsel %vm9252_vm11, %v6545_v27, -inf  ;;  %14099 = vst [vmem:[#allocation17_spill] sm:$0xff] %v9277_v24  ;;  %v9279_v56 = vmax.f32 %v2473_v41, %v2474_v55  ;;  %v2472_v16 = vsel %vm9256_vm5, %v6571_v12, -inf  ;;  %v2477_v10 = vsel %vm9252_vm11, %v6613_v37, -inf }
 0x24d   : > { %14098 = vst [vmem:[#allocation58_spill] sm:$0xff] %v9266_v52  ;;  %v2478_v49 = vsel %vm9256_vm5, %v6629_v30, -inf  ;;  %v4737_v58 = vsel %vm13569_vm9, %v4732_v28, %v887_v23  ;;  %v9291_v15 = vmax.f32 %v2471_v31, %v2472_v16  ;;  %v2475_v41 = vsel %vm9252_vm11, %v6547_v2, -inf  ;;  %v14105_v23 = vld [vmem:[#allocation30_spill] sm:$0xff] }
 0x24e   : > { %14100 = vst [vmem:[#allocation119_spill] sm:$0xff] %v9279_v56  ;;  %v9293_v52 = vmax.f32 %v2477_v10, %v2478_v49  ;;  %vm13565_vm4 = vcmask 80896   ;;  %v2476_v55 = vsel %vm9256_vm5, %v6573_v25, -inf  ;;  %vm9301_vm3 = vcmp.eq.s32.totalorder %v2500_v13, 1  ;;  %1462 = vmax.xlane.f32.xlu0 %v14105_v23  ;;  %1459 = vmax.xlane.f32.xlu1 %v14106_v19  ;;  %v913_v49 = vpop.xlane.xlu0 %912 }
 0x24f   : > { %14101 = vst [vmem:[#allocation120_spill] sm:$0xff] %v9291_v15  ;;  %v2505_v28 = vsel %vm9260_vm13, %v6615_v33, -inf  ;;  %v2503_v31 = vsel %vm9260_vm13, %v6545_v27, -inf  ;;  %v9313_v16 = vmax.f32 %v2475_v41, %v2476_v55  ;;  %v2506_v13 = vsel %vm9301_vm3, %v6631_v0, -inf }
 0x250   : > { %14102 = vst [vmem:[#allocation121_spill] sm:$0xff] %v9293_v52  ;;  %v2504_v14 = vsel %vm9301_vm3, %v6571_v12, -inf  ;;  %v2509_v10 = vsel %vm9260_vm13, %v6613_v37, -inf  ;;  %v890_v52 = vpop.xlane.xlu1 %889  ;;  %v9324_v15 = vmax.f32 %v2505_v28, %v2506_v13  ;;  %v2510_v41 = vsel %vm9301_vm3, %v6629_v30, -inf  ;;  %v14113_v13 = vld [vmem:[#allocation19_spill] sm:$0xff] }
 0x251   : > { %14107 = vst [vmem:[#allocation30_spill] sm:$0xff] %v9313_v16  ;;  %v9326_v23 = vmax.f32 %v2503_v31, %v2504_v14  ;;  %v2507_v55 = vsel %vm9260_vm13, %v6547_v2, -inf  ;;  %v4740_v19 = vsel %vm13568_vm2, %v4735_v39, %v913_v49  ;;  %v4738_v16 = vsel %vm13569_vm9, %v4733_v7, %v890_v52 }
 0x252   : > { %14108 = vst [vmem:[#allocation59_spill] sm:$0xff] %v9324_v15  ;;  %v9336_v56 = vmax.f32 %v2509_v10, %v2510_v41  ;;  %v2508_v28 = vsel %vm9301_vm3, %v6573_v25, -inf  ;;  %vm2523_vm10 = vcmp.eq.s32.totalorder %v6171_v57, 60  ;;  %vm2555_vm11 = vcmp.eq.s32.totalorder %v6171_v57, 61  ;;  %1488 = vmax.xlane.f32.xlu0 %v14112_v51  ;;  %1465 = vmax.xlane.f32.xlu1 %v14113_v13  ;;  %v919_v24 = vpop.xlane.xlu0 %918 }
 0x253   : > { %14109 = vst [vmem:[#allocation122_spill] sm:$0xff] %v9326_v23  ;;  %v9341_v31 = vmax.f32 %v2507_v55, %v2508_v28  ;;  %vm2587_vm5 = vcmp.eq.s32.totalorder %v6171_v57, 62  ;;  %v2524_v39 = vsel %vm2523_vm10, 1, %v13748_v29  ;;  %v2556_v7 = vsel %vm2555_vm11, 1, %v13748_v29 }
 0x254   : > { %14110 = vst [vmem:[#allocation123_spill] sm:$0xff] %v9336_v56  ;;  %v2588_v52 = vsel %vm2587_vm5, 1, %v13748_v29  ;;  %vm2619_vm13 = vcmp.eq.s32.totalorder %v6171_v57, 63  ;;  %v9352_v14 = vpop.xlane.xlu1 %915  ;;  %v2528_v10 = vrot.slane %v2524_v39, %v6175_v59  ;;  %v2532_v49 = vrot.slane %v2524_v39, %v6181_v62 }
 0x255   : > { %14111 = vst [vmem:[#allocation124_spill] sm:$0xff] %v9341_v31  ;;  %14114 = vst [vmem:[#allocation60_spill] sm:$0xff] %v9352_v14  ;;  %v2560_v41 = vrot.slane %v2556_v7, %v6175_v59  ;;  %v2564_v55 = vrot.slane %v2556_v7, %v6181_v62  ;;  %v4742_v28 = vsel %vm13568_vm2, %v4737_v58, %v919_v24  ;;  %v9362_v31 = vsel %vm2619_vm13, 1, %v13748_v29  ;;  %v14124_v24 = vld [vmem:[#allocation62_spill] sm:$0xff]  ;;  %v14138_v58 = vld [vmem:[#allocation64_spill] sm:$0xff] }
 0x256   : > { %v2592_v51 = vrot.slane %v2588_v52, %v6175_v59  ;;  %v2596_v13 = vrot.slane %v2588_v52, %v6181_v62  ;;  %vm13566_vm3 = vcmask 89088   ;;  %vm9364_vm10 = vcmp.eq.s32.totalorder %v2528_v10, 1  ;;  %v14123_v52 = vld [vmem:[#allocation61_spill] sm:$0xff]  ;;  %1491 = vmax.xlane.f32.xlu1 %v14124_v24  ;;  %v945_v56 = vpop.xlane.xlu0 %944 }
 0x257   : > { %vm9368_vm11 = vcmp.eq.s32.totalorder %v2532_v49, 1  ;;  %vm9372_vm5 = vcmp.eq.s32.totalorder %v2560_v41, 1  ;;  %vm9376_vm0 = vcmp.eq.s32.totalorder %v2564_v55, 1  ;;  %1494 = vmax.xlane.f32.xlu0 %v14123_v52  ;;  %v2537_v10 = vsel %vm9364_vm10, %v6615_v33, -inf }
 0x258   : > { %v2538_v49 = vsel %vm9368_vm11, %v6631_v0, -inf  ;;  %v2535_v41 = vsel %vm9364_vm10, %v6545_v27, -inf  ;;  %v2536_v55 = vsel %vm9368_vm11, %v6571_v12, -inf  ;;  %v922_v52 = vpop.xlane.xlu1 %921  ;;  %v2541_v15 = vsel %vm9364_vm10, %v6613_v37, -inf }
 0x259   : > { %v9394_v23 = vmax.f32 %v2537_v10, %v2538_v49  ;;  %v9396_v24 = vmax.f32 %v2535_v41, %v2536_v55  ;;  %v2542_v34 = vsel %vm9368_vm11, %v6629_v30, -inf  ;;  %v4745_v46 = vsel %vm13565_vm4, %v4740_v19, %v945_v56 }
 0x25a   : > { %v4743_v47 = vsel %vm13568_vm2, %v4738_v16, %v922_v52  ;;  %v9406_v11 = vmax.f32 %v2541_v15, %v2542_v34  ;;  %v2539_v10 = vsel %vm9364_vm10, %v6547_v2, -inf  ;;  %v2540_v49 = vsel %vm9368_vm11, %v6573_v25, -inf  ;;  %v14127_v15 = vld [vmem:[#allocation20_spill] sm:$0xff]  ;;  %v14128_v16 = vld [vmem:[#allocation63_spill] sm:$0xff]  ;;  %v951_v52 = vpop.xlane.xlu0 %950 }
 0x25b   : > { %14125 = vst [vmem:[#allocation19_spill] sm:$0xff] %v9396_v24  ;;  %v2569_v41 = vsel %vm9372_vm5, %v6615_v33, -inf  ;;  %v2570_v56 = vsel %vm9376_vm0, %v6631_v0, -inf  ;;  %v2567_v34 = vsel %vm9372_vm5, %v6545_v27, -inf  ;;  %1520 = vmax.xlane.f32.xlu0 %v14127_v15  ;;  %1497 = vmax.xlane.f32.xlu1 %v14128_v16  ;;  %v9425_v19 = vmax.f32 %v2539_v10, %v2540_v49 }
 0x25c   : > { %14126 = vst [vmem:[#allocation61_spill] sm:$0xff] %v9406_v11  ;;  %v9427_v14 = vmax.f32 %v2569_v41, %v2570_v56  ;;  %v2568_v39 = vsel %vm9376_vm0, %v6571_v12, -inf  ;;  %v2573_v55 = vsel %vm9372_vm5, %v6613_v37, -inf  ;;  %v9435_v11 = vpop.xlane.xlu1 %947  ;;  %v2574_v10 = vsel %vm9376_vm0, %v6629_v30, -inf }
 0x25d   : > { %14130 = vst [vmem:[#allocation20_spill] sm:$0xff] %v9435_v11  ;;  %v9437_v24 = vmax.f32 %v2567_v34, %v2568_v39  ;;  %v2571_v49 = vsel %vm9372_vm5, %v6547_v2, -inf  ;;  %v2572_v41 = vsel %vm9376_vm0, %v6573_v25, -inf  ;;  %v4747_v56 = vsel %vm13565_vm4, %v4742_v28, %v951_v52 }
 0x25e   : > { %14129 = vst [vmem:[#allocation62_spill] sm:$0xff] %v9427_v14  ;;  %v9449_v15 = vmax.f32 %v2573_v55, %v2574_v10  ;;  %v9451_v16 = vmax.f32 %v2571_v49, %v2572_v41  ;;  %vm9453_vm13 = vcmp.eq.s32.totalorder %v2592_v51, 1  ;;  %vm13567_vm10 = vcmask 97280   ;;  %v977_v49 = vpop.xlane.xlu0 %976 }
 0x25f   : > { %14131 = vst [vmem:[#allocation63_spill] sm:$0xff] %v9437_v24  ;;  %vm9457_vm11 = vcmp.eq.s32.totalorder %v2596_v13, 1  ;;  %v2601_v7 = vsel %vm9453_vm13, %v6615_v33, -inf  ;;  %v2599_v28 = vsel %vm9453_vm13, %v6545_v27, -inf  ;;  %v2605_v51 = vsel %vm9453_vm13, %v6613_v37, -inf  ;;  %1526 = vmax.xlane.f32.xlu0 %v14138_v58  ;;  %1523 = vmax.xlane.f32.xlu1 %v7927_v54 }
 0x260   : > { %14132 = vst [vmem:[#allocation125_spill] sm:$0xff] %v9449_v15  ;;  %14133 = vst [vmem:[#allocation126_spill] sm:$0xff] %v9451_v16  ;;  %v2602_v13 = vsel %vm9457_vm11, %v6631_v0, -inf  ;;  %v2600_v55 = vsel %vm9457_vm11, %v6571_v12, -inf  ;;  %v2606_v52 = vsel %vm9457_vm11, %v6629_v30, -inf  ;;  %v2603_v10 = vsel %vm9453_vm13, %v6547_v2, -inf  ;;  %v954_v41 = vpop.xlane.xlu1 %953 }
 0x261   : > { %v9484_v58 = vmax.f32 %v2601_v7, %v2602_v13  ;;  %v9486_v54 = vmax.f32 %v2599_v28, %v2600_v55  ;;  %v9488_v11 = vmax.f32 %v2605_v51, %v2606_v52  ;;  %v2604_v16 = vsel %vm9457_vm11, %v6573_v25, -inf }
 0x262   : > { %v4750_v15 = vsel %vm13566_vm3, %v4745_v46, %v977_v49  ;;  %v4748_v24 = vsel %vm13565_vm4, %v4743_v47, %v954_v41  ;;  %v9495_v14 = vmax.f32 %v2603_v10, %v2604_v16  ;;  %v2624_v34 = vrot.slane %v9362_v31, %v6175_v59  ;;  %v983_v39 = vpop.xlane.xlu0 %982 }
 0x263   : > { %v2628_v7 = vrot.slane %v9362_v31, %v6181_v62  ;;  %vm2651_vm0 = vcmp.eq.s32.totalorder %v6171_v57, 64  ;;  %vm2683_vm5 = vcmp.eq.s32.totalorder %v6171_v57, 65  ;;  %vm2715_vm13 = vcmp.eq.s32.totalorder %v6171_v57, 66  ;;  %1552 = vmax.xlane.f32.xlu0 %v7929_v18  ;;  %1529 = vmax.xlane.f32.xlu1 %v7944_v35 }
 0x264   : > { %14139 = vst [vmem:[#allocation64_spill] sm:$0xff] %v9495_v14  ;;  %vm9506_vm11 = vcmp.eq.s32.totalorder %v2624_v34, 1  ;;  %v2652_v46 = vsel %vm2651_vm0, 1, %v13748_v29  ;;  %v2684_v16 = vsel %vm2683_vm5, 1, %v13748_v29  ;;  %v9513_v31 = vsel %vm2715_vm13, 1, %v13748_v29  ;;  %v9515_v28 = vpop.xlane.xlu1 %979 }
 0x265   : > { %14142 = vst [vmem:[#allocation127_spill] sm:$0xff] %v9515_v28  ;;  %vm9517_vm4 = vcmp.eq.s32.totalorder %v2628_v7, 1  ;;  %v2633_v18 = vsel %vm9506_vm11, %v6615_v33, -inf  ;;  %v2631_v35 = vsel %vm9506_vm11, %v6545_v27, -inf  ;;  %v2637_v13 = vsel %vm9506_vm11, %v6613_v37, -inf }
 0x266   : > { %v4752_v55 = vsel %vm13566_vm3, %v4747_v56, %v983_v39  ;;  %v2634_v52 = vsel %vm9517_vm4, %v6631_v0, -inf  ;;  %v2632_v10 = vsel %vm9517_vm4, %v6571_v12, -inf  ;;  %v2638_v49 = vsel %vm9517_vm4, %v6629_v30, -inf  ;;  %v14148_v39 = vld [vmem:[#allocation31_spill] sm:$0xff] }
 0x267   : > { %vm4759_vm0 = vcmask 105472   ;;  %v9540_v41 = vmax.f32 %v2633_v18, %v2634_v52  ;;  %v9542_v34 = vmax.f32 %v2631_v35, %v2632_v10  ;;  %v9544_v7 = vmax.f32 %v2637_v13, %v2638_v49  ;;  %1558 = vmax.xlane.f32.xlu0 %v7962_v1  ;;  %1555 = vmax.xlane.f32.xlu1 %v14148_v39  ;;  %v1009_v13 = vpop.xlane.xlu0 %1008 }
 0x268   : > { %v2635_v56 = vsel %vm9506_vm11, %v6547_v2, -inf  ;;  %v2636_v28 = vsel %vm9517_vm4, %v6573_v25, -inf  ;;  %v2656_v14 = vrot.slane %v2652_v46, %v6175_v59  ;;  %v2660_v18 = vrot.slane %v2652_v46, %v6181_v62  ;;  %v986_v52 = vpop.xlane.xlu1 %985 }
 0x269   : > { %14145 = vst [vmem:[#allocation128_spill] sm:$0xff] %v9540_v41  ;;  %14146 = vst [vmem:[#allocation129_spill] sm:$0xff] %v9542_v34  ;;  %v2688_v35 = vrot.slane %v2684_v16, %v6175_v59  ;;  %v9557_v10 = vmax.f32 %v2635_v56, %v2636_v28  ;;  %v2692_v47 = vrot.slane %v2684_v16, %v6181_v62  ;;  %v14155_v28 = vld [vmem:[#allocation21_spill] sm:$0xff] }
 0x26a   : > { %14147 = vst [vmem:[#allocation130_spill] sm:$0xff] %v9544_v7  ;;  %v2720_v1 = vrot.slane %v9513_v31, %v6175_v59  ;;  %v2724_v49 = vrot.slane %v9513_v31, %v6181_v62  ;;  %v4755_v51 = vsel %vm13567_vm10, %v4750_v15, %v1009_v13  ;;  %v4753_v39 = vsel %vm13566_vm3, %v4748_v24, %v986_v52  ;;  %v14154_v15 = vld [vmem:[#allocation32_spill] sm:$0xff] }
 0x26b   : > { %14149 = vst [vmem:[#allocation31_spill] sm:$0xff] %v9557_v10  ;;  %vm9566_vm4 = vcmp.eq.s32.totalorder %v2656_v14, 1  ;;  %vm9570_vm5 = vcmp.eq.s32.totalorder %v2660_v18, 1  ;;  %1584 = vmax.xlane.f32.xlu0 %v14154_v15  ;;  %1561 = vmax.xlane.f32.xlu1 %v14155_v28  ;;  %v1015_v10 = vpop.xlane.xlu0 %1014  ;;  %vm9608_vm13 = vcmp.eq.s32.totalorder %v2688_v35, 1  ;;  %vm9615_vm11 = vcmp.eq.s32.totalorder %v2692_v47, 1  ;;  %v14164_v47 = vld [vmem:[#allocation22_spill] sm:$0xff] }
 0x26c   : > { %v2665_v16 = vsel %vm9566_vm4, %v6615_v33, -inf  ;;  %v2666_v31 = vsel %vm9570_vm5, %v6631_v0, -inf  ;;  %v2663_v24 = vsel %vm9566_vm4, %v6545_v27, -inf  ;;  %v2664_v14 = vsel %vm9570_vm5, %v6571_v12, -inf  ;;  %v9598_v34 = vpop.xlane.xlu1 %1011 }
 0x26d   : > { %v9588_v56 = vmax.f32 %v2665_v16, %v2666_v31  ;;  %v9590_v18 = vmax.f32 %v2663_v24, %v2664_v14  ;;  %v2669_v13 = vsel %vm9566_vm4, %v6613_v37, -inf  ;;  %v2670_v52 = vsel %vm9570_vm5, %v6629_v30, -inf  ;;  %14157 = vst [vmem:[#allocation21_spill] sm:$0xff] %v9598_v34 }
 0x26e   : > { %v9600_v41 = vmax.f32 %v2669_v13, %v2670_v52  ;;  %v2667_v16 = vsel %vm9566_vm4, %v6547_v2, -inf  ;;  %v2668_v31 = vsel %vm9570_vm5, %v6573_v25, -inf  ;;  %v4757_v14 = vsel %vm13567_vm10, %v4752_v55, %v1015_v10  ;;  %v14165_v13 = vld [vmem:[#allocation65_spill] sm:$0xff] }
 0x26f   : > { %14156 = vst [vmem:[#allocation32_spill] sm:$0xff] %v9590_v18  ;;  %v9613_v15 = vmax.f32 %v2667_v16, %v2668_v31  ;;  %v2697_v46 = vsel %vm9608_vm13, %v6615_v33, -inf  ;;  %vm4764_vm4 = vcmask 113664   ;;  %v2698_v7 = vsel %vm9615_vm11, %v6631_v0, -inf  ;;  %1590 = vmax.xlane.f32.xlu0 %v14164_v47  ;;  %1587 = vmax.xlane.f32.xlu1 %v14165_v13 }
 0x270   : > { %14158 = vst [vmem:[#allocation131_spill] sm:$0xff] %v9600_v41  ;;  %v2695_v35 = vsel %vm9608_vm13, %v6545_v27, -inf  ;;  %v2696_v55 = vsel %vm9615_vm11, %v6571_v12, -inf  ;;  %v2701_v10 = vsel %vm9608_vm13, %v6613_v37, -inf  ;;  %v9636_v52 = vmax.f32 %v2697_v46, %v2698_v7  ;;  %v1018_v41 = vpop.xlane.xlu1 %1017 }
 0x271   : > { %14161 = vst [vmem:[#allocation132_spill] sm:$0xff] %v9613_v15  ;;  %v9638_v16 = vmax.f32 %v2695_v35, %v2696_v55  ;;  %v2702_v31 = vsel %vm9615_vm11, %v6629_v30, -inf  ;;  %v2699_v34 = vsel %vm9608_vm13, %v6547_v2, -inf  ;;  %v1041_v15 = vpop.xlane.xlu0 %1040  ;;  %v2700_v47 = vsel %vm9615_vm11, %v6573_v25, -inf }
 0x272   : > { %v9646_v18 = vmax.f32 %v2701_v10, %v2702_v31  ;;  %vm9651_vm5 = vcmp.eq.s32.totalorder %v2720_v1, 1  ;;  %vm9655_vm3 = vcmp.eq.s32.totalorder %v2724_v49, 1  ;;  %v4760_v35 = vsel %vm4759_vm0, %v4755_v51, %v1041_v15 }
 0x273   : > { %v4758_v24 = vsel %vm13567_vm10, %v4753_v39, %v1018_v41  ;;  %v9661_v55 = vmax.f32 %v2699_v34, %v2700_v47  ;;  %v2729_v10 = vsel %vm9651_vm5, %v6615_v33, -inf  ;;  %v2730_v1 = vsel %vm9655_vm3, %v6631_v0, -inf  ;;  %1616 = vmax.xlane.f32.xlu0 %v8034_v53  ;;  %1593 = vmax.xlane.f32.xlu1 %v8036_v21 }
 0x274   : > { %14166 = vst [vmem:[#allocation22_spill] sm:$0xff] %v9646_v18  ;;  %v2727_v49 = vsel %vm9651_vm5, %v6545_v27, -inf  ;;  %v2728_v51 = vsel %vm9655_vm3, %v6571_v12, -inf  ;;  %v2733_v41 = vsel %vm9651_vm5, %v6613_v37, -inf  ;;  %v9680_v34 = vmax.f32 %v2729_v10, %v2730_v1  ;;  %v9690_v31 = vpop.xlane.xlu1 %1043 }
 0x275   : > { %14171 = vst [vmem:[#allocation65_spill] sm:$0xff] %v9661_v55  ;;  %v9682_v39 = vmax.f32 %v2727_v49, %v2728_v51  ;;  %v2734_v15 = vsel %vm9655_vm3, %v6629_v30, -inf  ;;  %v2731_v28 = vsel %vm9651_vm5, %v6547_v2, -inf  ;;  %v1047_v13 = vpop.xlane.xlu0 %1046  ;;  %14174 = vst [vmem:[#allocation135_spill] sm:$0xff] %v9690_v31  ;;  %v2732_v21 = vsel %vm9655_vm3, %v6573_v25, -inf  ;;  %v14178_v31 = vld [vmem:[#allocation33_spill] sm:$0xff] }
 0x276   : > { %14172 = vst [vmem:[#allocation133_spill] sm:$0xff] %v9680_v34  ;;  %v9692_v47 = vmax.f32 %v2733_v41, %v2734_v15  ;;  %vm2747_vm13 = vcmp.eq.s32.totalorder %v6171_v57, 67  ;;  %vm2779_vm11 = vcmp.eq.s32.totalorder %v6171_v57, 68  ;;  %v4762_v53 = vsel %vm4759_vm0, %v4757_v14, %v1047_v13  ;;  %v14177_v15 = vld [vmem:[#allocation23_spill] sm:$0xff] }
 0x277   : > { %14173 = vst [vmem:[#allocation134_spill] sm:$0xff] %v9682_v39  ;;  %v9700_v10 = vmax.f32 %v2731_v28, %v2732_v21  ;;  %v2748_v46 = vsel %vm2747_vm13, 1, %v13748_v29  ;;  %v2780_v1 = vsel %vm2779_vm11, 1, %v13748_v29  ;;  %1622 = vmax.xlane.f32.xlu0 %v14177_v15  ;;  %1619 = vmax.xlane.f32.xlu1 %v14178_v31  ;;  %vm4769_vm3 = vcmask 121856  }
 0x278   : > { %14175 = vst [vmem:[#allocation136_spill] sm:$0xff] %v9692_v47  ;;  %v2752_v49 = vrot.slane %v2748_v46, %v6175_v59  ;;  %v2756_v51 = vrot.slane %v2748_v46, %v6181_v62  ;;  %v2784_v41 = vrot.slane %v2780_v1, %v6175_v59  ;;  %v2788_v7 = vrot.slane %v2780_v1, %v6181_v62  ;;  %v1050_v28 = vpop.xlane.xlu1 %1049 }
 0x279   : > { %14176 = vst [vmem:[#allocation137_spill] sm:$0xff] %v9700_v10  ;;  %vm2811_vm5 = vcmp.eq.s32.totalorder %v6171_v57, 69  ;;  %vm2843_vm10 = vcmp.eq.s32.totalorder %v6171_v57, 70  ;;  %vm2875_vm13 = vcmp.eq.s32.totalorder %v6171_v57, 71  ;;  %v1073_v14 = vpop.xlane.xlu0 %1072  ;;  %v4763_v15 = vsel %vm4759_vm0, %v4758_v24, %v1050_v28 }
 0x27a   : > { %vm9713_vm11 = vcmp.eq.s32.totalorder %v2752_v49, 1  ;;  %vm9717_vm2 = vcmp.eq.s32.totalorder %v2756_v51, 1  ;;  %vm9721_vm9 = vcmp.eq.s32.totalorder %v2784_v41, 1  ;;  %vm9725_vm8 = vcmp.eq.s32.totalorder %v2788_v7, 1 }
 0x27b   : > { %v4765_v1 = vsel %vm4764_vm4, %v4760_v35, %v1073_v14  ;;  %v2761_v49 = vsel %vm9713_vm11, %v6615_v33, -inf  ;;  %v2762_v51 = vsel %vm9717_vm2, %v6631_v0, -inf  ;;  %v2759_v7 = vsel %vm9713_vm11, %v6545_v27, -inf  ;;  %1648 = vmax.xlane.f32.xlu0 %v8082_v32  ;;  %v14188_v14 = vld [vmem:[#allocation66_spill] sm:$0xff] }
 0x27c   : > { %v9737_v41 = vmax.f32 %v2761_v49, %v2762_v51  ;;  %v2760_v35 = vsel %vm9717_vm2, %v6571_v12, -inf  ;;  %v2765_v24 = vsel %vm9713_vm11, %v6613_v37, -inf  ;;  %1625 = vmax.xlane.f32.xlu1 %v14188_v14  ;;  %v2766_v49 = vsel %vm9717_vm2, %v6629_v30, -inf  ;;  %v9761_v47 = vpop.xlane.xlu1 %1075 }
 0x27d   : > { %v9750_v28 = vmax.f32 %v2759_v7, %v2760_v35  ;;  %v2763_v51 = vsel %vm9713_vm11, %v6547_v2, -inf  ;;  %v1079_v10 = vpop.xlane.xlu0 %1078  ;;  %14190 = vst [vmem:[#allocation66_spill] sm:$0xff] %v9761_v47  ;;  %v9763_v32 = vmax.f32 %v2765_v24, %v2766_v49  ;;  %v2793_v7 = vsel %vm9721_vm9, %v6615_v33, -inf }
 0x27e   : > { %14187 = vst [vmem:[#allocation23_spill] sm:$0xff] %v9737_v41  ;;  %v2764_v41 = vsel %vm9717_vm2, %v6573_v25, -inf  ;;  %v2794_v13 = vsel %vm9725_vm8, %v6631_v0, -inf  ;;  %v4767_v35 = vsel %vm4764_vm4, %v4762_v53, %v1079_v10  ;;  %v2791_v21 = vsel %vm9721_vm9, %v6545_v27, -inf }
 0x27f   : > { %14189 = vst [vmem:[#allocation33_spill] sm:$0xff] %v9750_v28  ;;  %14191 = vst [vmem:[#allocation138_spill] sm:$0xff] %v9763_v32  ;;  %v9765_v14 = vmax.f32 %v2763_v51, %v2764_v41  ;;  %v9774_v28 = vmax.f32 %v2793_v7, %v2794_v13  ;;  %v2792_v41 = vsel %vm9725_vm8, %v6571_v12, -inf  ;;  %v2797_v49 = vsel %vm9721_vm9, %v6613_v37, -inf  ;;  %v14195_v51 = vld [vmem:[#allocation67_spill] sm:$0xff]  ;;  %v14196_v7 = vld [vmem:[#allocation68_spill] sm:$0xff] }
 0x280   : > { %v9782_v24 = vmax.f32 %v2791_v21, %v2792_v41  ;;  %v2798_v53 = vsel %vm9725_vm8, %v6629_v30, -inf  ;;  %v2795_v10 = vsel %vm9721_vm9, %v6547_v2, -inf  ;;  %1654 = vmax.xlane.f32.xlu0 %v14195_v51  ;;  %1651 = vmax.xlane.f32.xlu1 %v14196_v7  ;;  %v2796_v21 = vsel %vm9725_vm8, %v6573_v25, -inf }
 0x281   : > { %14192 = vst [vmem:[#allocation139_spill] sm:$0xff] %v9765_v14  ;;  %14193 = vst [vmem:[#allocation140_spill] sm:$0xff] %v9774_v28  ;;  %v9795_v13 = vmax.f32 %v2797_v49, %v2798_v53  ;;  %v2812_v41 = vsel %vm2811_vm5, 1, %v13748_v29  ;;  %v2844_v47 = vsel %vm2843_vm10, 1, %v13748_v29  ;;  %v1105_v46 = vpop.xlane.xlu0 %1104  ;;  %v9806_v28 = vmax.f32 %v2795_v10, %v2796_v21  ;;  %v14217_v21 = vld [vmem:[#allocation71_spill] sm:$0xff] }
 0x282   : > { %14194 = vst [vmem:[#allocation141_spill] sm:$0xff] %v9782_v24  ;;  %v1082_v24 = vpop.xlane.xlu1 %1081  ;;  %v2816_v51 = vrot.slane %v2812_v41, %v6175_v59  ;;  %v2820_v49 = vrot.slane %v2812_v41, %v6181_v62  ;;  %v2848_v53 = vrot.slane %v2844_v47, %v6175_v59  ;;  %vm2907_vm8 = vcmp.eq.s32.totalorder %v6171_v57, 72 }
 0x283   : > { %14197 = vst [vmem:[#allocation67_spill] sm:$0xff] %v9795_v13  ;;  %14198 = vst [vmem:[#allocation68_spill] sm:$0xff] %v9806_v28  ;;  %v9813_v31 = vsel %vm4769_vm3, %v4765_v1, %v1105_v46  ;;  %v4768_v7 = vsel %vm4764_vm4, %v4763_v15, %v1082_v24  ;;  %v2852_v13 = vrot.slane %v2844_v47, %v6181_v62  ;;  %v2876_v10 = vsel %vm2875_vm13, 1, %v13748_v29  ;;  %v14206_v15 = vld [vmem:[#allocation24_spill] sm:$0xff]  ;;  %v14207_v47 = vld [vmem:[#allocation69_spill] sm:$0xff] }
 0x284   : > { %14199 = vst [vmem:[#allocation142_spill] sm:$0xff] %v9813_v31  ;;  %vm9820_vm9 = vcmp.eq.s32.totalorder %v2816_v51, 1  ;;  %vm9824_vm2 = vcmp.eq.s32.totalorder %v2820_v49, 1  ;;  %vm9828_vm10 = vcmp.eq.s32.totalorder %v2848_v53, 1  ;;  %v2880_v1 = vrot.slane %v2876_v10, %v6175_v59  ;;  %1680 = vmax.xlane.f32.xlu0 %v14206_v15  ;;  %1657 = vmax.xlane.f32.xlu1 %v14207_v47 }
 0x285   : > { %v2825_v24 = vsel %vm9820_vm9, %v6615_v33, -inf  ;;  %v2826_v46 = vsel %vm9824_vm2, %v6631_v0, -inf  ;;  %v2823_v51 = vsel %vm9820_vm9, %v6545_v27, -inf  ;;  %v2824_v49 = vsel %vm9824_vm2, %v6571_v12, -inf  ;;  %v1111_v53 = vpop.xlane.xlu0 %1110 }
 0x286   : > { %v9847_v15 = vpop.xlane.xlu1 %1107  ;;  %v9849_v47 = vmax.f32 %v2825_v24, %v2826_v46  ;;  %v9851_v31 = vmax.f32 %v2823_v51, %v2824_v49  ;;  %v2829_v14 = vsel %vm9820_vm9, %v6613_v37, -inf  ;;  %v2830_v32 = vsel %vm9824_vm2, %v6629_v30, -inf }
 0x287   : > { %14208 = vst [vmem:[#allocation24_spill] sm:$0xff] %v9847_v15  ;;  %v9860_v39 = vsel %vm4769_vm3, %v4767_v35, %v1111_v53  ;;  %v9862_v34 = vmax.f32 %v2829_v14, %v2830_v32  ;;  %v2827_v24 = vsel %vm9820_vm9, %v6547_v2, -inf  ;;  %v2828_v46 = vsel %vm9824_vm2, %v6573_v25, -inf  ;;  %v14216_v14 = vld [vmem:[#allocation70_spill] sm:$0xff] }
 0x288   : > { %14209 = vst [vmem:[#allocation69_spill] sm:$0xff] %v9849_v47  ;;  %14210 = vst [vmem:[#allocation143_spill] sm:$0xff] %v9851_v31  ;;  %v9870_v51 = vmax.f32 %v2827_v24, %v2828_v46  ;;  %vm9872_vm5 = vcmp.eq.s32.totalorder %v2852_v13, 1  ;;  %v2857_v35 = vsel %vm9828_vm10, %v6615_v33, -inf  ;;  %v2855_v32 = vsel %vm9828_vm10, %v6545_v27, -inf  ;;  %1686 = vmax.xlane.f32.xlu0 %v14216_v14  ;;  %1683 = vmax.xlane.f32.xlu1 %v14217_v21 }
 0x289   : > { %14211 = vst [vmem:[#allocation144_spill] sm:$0xff] %v9860_v39  ;;  %14212 = vst [vmem:[#allocation145_spill] sm:$0xff] %v9862_v34  ;;  %v2858_v41 = vsel %vm9872_vm5, %v6631_v0, -inf  ;;  %v2856_v13 = vsel %vm9872_vm5, %v6571_v12, -inf  ;;  %v2861_v53 = vsel %vm9828_vm10, %v6613_v37, -inf  ;;  %v2862_v24 = vsel %vm9872_vm5, %v6629_v30, -inf  ;;  %v1137_v46 = vpop.xlane.xlu0 %1136 }
 0x28a   : > { %14213 = vst [vmem:[#allocation146_spill] sm:$0xff] %v9870_v51  ;;  %v1114_v14 = vpop.xlane.xlu1 %1113  ;;  %v9896_v39 = vmax.f32 %v2857_v35, %v2858_v41  ;;  %v9898_v21 = vmax.f32 %v2855_v32, %v2856_v13  ;;  %v9900_v15 = vmax.f32 %v2861_v53, %v2862_v24  ;;  %v2859_v51 = vsel %vm9828_vm10, %v6547_v2, -inf }
 0x28b   : > { %v9906_v34 = vsel %vm4769_vm3, %v4768_v7, %v1114_v14  ;;  %v2860_v31 = vsel %vm9872_vm5, %v6573_v25, -inf  ;;  %v2884_v47 = vrot.slane %v2876_v10, %v6181_v62  ;;  %vm9912_vm13 = vcmp.eq.s32.totalorder %v2880_v1, 1  ;;  %v14225_v10 = vld [vmem:[#allocation25_spill] sm:$0xff] }
 0x28c   : > { %14218 = vst [vmem:[#allocation70_spill] sm:$0xff] %v9896_v39  ;;  %14219 = vst [vmem:[#allocation71_spill] sm:$0xff] %v9898_v21  ;;  %v9916_v32 = vmax.f32 %v2859_v51, %v2860_v31  ;;  %v2889_v28 = vsel %vm9912_vm13, %v6615_v33, -inf  ;;  %v2887_v7 = vsel %vm9912_vm13, %v6545_v27, -inf  ;;  %v2893_v49 = vsel %vm9912_vm13, %v6613_v37, -inf  ;;  %1712 = vmax.xlane.f32.xlu0 %v8177_v45  ;;  %1689 = vmax.xlane.f32.xlu1 %v14225_v10  ;;  %v14230_v21 = vld [vmem:[#allocation34_spill] sm:$0xff] }
 0x28d   : > { %14220 = vst [vmem:[#allocation147_spill] sm:$0xff] %v9900_v15  ;;  %14221 = vst [vmem:[#allocation148_spill] sm:$0xff] %v9906_v34  ;;  %vm2886_vm11 = vcmp.eq.s32.totalorder %v2884_v47, 1  ;;  %v2891_v31 = vsel %vm9912_vm13, %v6547_v2, -inf  ;;  %v2908_v1 = vsel %vm2907_vm8, 1, %v13748_v29  ;;  %vm2939_vm9 = vcmp.eq.s32.totalorder %v6171_v57, 73  ;;  %v1143_v51 = vpop.xlane.xlu0 %1142 }
 0x28e   : > { %14224 = vst [vmem:[#allocation149_spill] sm:$0xff] %v9916_v32  ;;  %v1140_v41 = vpop.xlane.xlu1 %1139  ;;  %v2890_v13 = vsel %vm2886_vm11, %v6631_v0, -inf  ;;  %v2888_v53 = vsel %vm2886_vm11, %v6571_v12, -inf  ;;  %v2894_v45 = vsel %vm2886_vm11, %v6629_v30, -inf  ;;  %v2892_v47 = vsel %vm2886_vm11, %v6573_v25, -inf  ;;  %v14231_v39 = vld [vmem:[#allocation35_spill] sm:$0xff] }
 0x28f   : > { %v9940_v24 = vmax.f32 %v2889_v28, %v2890_v13  ;;  %v9942_v14 = vmax.f32 %v2887_v7, %v2888_v53  ;;  %v9944_v35 = vmax.f32 %v2893_v49, %v2894_v45  ;;  %v9946_v10 = vmax.f32 %v2891_v31, %v2892_v47 }
 0x290   : > { %v2912_v34 = vrot.slane %v2908_v1, %v6175_v59  ;;  %v2916_v32 = vrot.slane %v2908_v1, %v6181_v62  ;;  %v2940_v15 = vsel %vm2939_vm9, 1, %v13748_v29  ;;  %vm2971_vm8 = vcmp.eq.s32.totalorder %v6171_v57, 74  ;;  %1718 = vmax.xlane.f32.xlu0 %v14230_v21  ;;  %1715 = vmax.xlane.f32.xlu1 %v14231_v39 }
 0x291   : > { %14226 = vst [vmem:[#allocation25_spill] sm:$0xff] %v9940_v24  ;;  %14227 = vst [vmem:[#allocation150_spill] sm:$0xff] %v9942_v14  ;;  %v2944_v28 = vrot.slane %v2940_v15, %v6175_v59  ;;  %v2948_v7 = vrot.slane %v2940_v15, %v6181_v62  ;;  %v2972_v49 = vsel %vm2971_vm8, 1, %v13748_v29  ;;  %v1169_v31 = vpop.xlane.xlu0 %1168  ;;  %vm3003_vm5 = vcmp.eq.s32.totalorder %v6171_v57, 75 }
 0x292   : > { %14228 = vst [vmem:[#allocation151_spill] sm:$0xff] %v9944_v35  ;;  %14229 = vst [vmem:[#allocation152_spill] sm:$0xff] %v9946_v10  ;;  %v1146_v13 = vpop.xlane.xlu1 %1145  ;;  %vm9957_vm2 = vcmp.eq.s32.totalorder %v2912_v34, 1  ;;  %vm9961_vm10 = vcmp.eq.s32.totalorder %v2916_v32, 1  ;;  %v2976_v21 = vrot.slane %v2972_v49, %v6175_v59  ;;  %v2980_v39 = vrot.slane %v2972_v49, %v6181_v62  ;;  %v14237_v10 = vld [vmem:[#allocation26_spill] sm:$0xff]  ;;  %v14238_v35 = vld [vmem:[#allocation72_spill] sm:$0xff] }
 0x293   : > { %v4774_v45 = vsel %vm4699_vm12, %v1137_v46, %v1169_v31  ;;  %v2921_v15 = vsel %vm9957_vm2, %v6615_v33, -inf  ;;  %v2922_v34 = vsel %vm9961_vm10, %v6631_v0, -inf  ;;  %v2919_v32 = vsel %vm9957_vm2, %v6545_v27, -inf }
 0x294   : > { %v9978_v47 = vmax.f32 %v2921_v15, %v2922_v34  ;;  %v2920_v46 = vsel %vm9961_vm10, %v6571_v12, -inf  ;;  %v2925_v49 = vsel %vm9957_vm2, %v6613_v37, -inf  ;;  %v2926_v31 = vsel %vm9961_vm10, %v6629_v30, -inf  ;;  %1744 = vmax.xlane.f32.xlu0 %v14237_v10  ;;  %1721 = vmax.xlane.f32.xlu1 %v14238_v35 }
 0x295   : > { %v9991_v14 = vmax.f32 %v2919_v32, %v2920_v46  ;;  %v9993_v15 = vmax.f32 %v2925_v49, %v2926_v31  ;;  %v2923_v34 = vsel %vm9957_vm2, %v6547_v2, -inf  ;;  %v1175_v24 = vpop.xlane.xlu0 %1174  ;;  %vm10003_vm13 = vcmp.eq.s32.totalorder %v2944_v28, 1 }
 0x296   : > { %14236 = vst [vmem:[#allocation34_spill] sm:$0xff] %v9978_v47  ;;  %v2924_v47 = vsel %vm9961_vm10, %v6573_v25, -inf  ;;  %v1172_v55 = vpop.xlane.xlu1 %1171  ;;  %vm10007_vm11 = vcmp.eq.s32.totalorder %v2948_v7, 1  ;;  %vm10011_vm9 = vcmp.eq.s32.totalorder %v2976_v21, 1  ;;  %v4776_v53 = vsel %vm4699_vm12, %v1143_v51, %v1175_v24 }
 0x297   : > { %v10001_v18 = vmax.f32 %v2923_v34, %v2924_v47  ;;  %v4775_v1 = vsel %vm4699_vm12, %v1140_v41, %v1172_v55  ;;  %v2953_v47 = vsel %vm10003_vm13, %v6615_v33, -inf  ;;  %v2954_v28 = vsel %vm10007_vm11, %v6631_v0, -inf  ;;  %v14246_v41 = vld [vmem:[#allocation73_spill] sm:$0xff] }
 0x298   : > { %v10023_v7 = vmax.f32 %v2953_v47, %v2954_v28  ;;  %v2951_v21 = vsel %vm10003_vm13, %v6545_v27, -inf  ;;  %v2952_v51 = vsel %vm10007_vm11, %v6571_v12, -inf  ;;  %v2957_v55 = vsel %vm10003_vm13, %v6613_v37, -inf  ;;  %1750 = vmax.xlane.f32.xlu0 %v14246_v41  ;;  %1747 = vmax.xlane.f32.xlu1 %v8264_v63 }
 0x299   : > { %v10036_v24 = vmax.f32 %v2951_v21, %v2952_v51  ;;  %v2958_v46 = vsel %vm10007_vm11, %v6629_v30, -inf  ;;  %v2955_v49 = vsel %vm10003_vm13, %v6547_v2, -inf  ;;  %v2956_v31 = vsel %vm10007_vm11, %v6573_v25, -inf  ;;  %v1201_v34 = vpop.xlane.xlu0 %1200 }
 0x29a   : > { %14245 = vst [vmem:[#allocation35_spill] sm:$0xff] %v10023_v7  ;;  %v1178_v47 = vpop.xlane.xlu1 %1177  ;;  %v10047_v28 = vmax.f32 %v2957_v55, %v2958_v46  ;;  %v10049_v41 = vmax.f32 %v2955_v49, %v2956_v31  ;;  %vm10051_vm8 = vcmp.eq.s32.totalorder %v2980_v39, 1  ;;  %v2985_v21 = vsel %vm10011_vm9, %v6615_v33, -inf  ;;  %v14253_v49 = vld [vmem:[#allocation16_spill] sm:$0xff] }
 0x29b   : > { %14247 = vst [vmem:[#allocation26_spill] sm:$0xff] %v10036_v24  ;;  %v4778_v10 = vsel %vm4704_vm6, %v4774_v45, %v1201_v34  ;;  %v4777_v51 = vsel %vm4699_vm12, %v1146_v13, %v1178_v47  ;;  %v2986_v35 = vsel %vm10051_vm8, %v6631_v0, -inf  ;;  %v2983_v55 = vsel %vm10011_vm9, %v6545_v27, -inf }
 0x29c   : > { %14248 = vst [vmem:[#allocation72_spill] sm:$0xff] %v10047_v28  ;;  %14249 = vst [vmem:[#allocation73_spill] sm:$0xff] %v10049_v41  ;;  %v10066_v39 = vmax.f32 %v2985_v21, %v2986_v35  ;;  %v2984_v46 = vsel %vm10051_vm8, %v6571_v12, -inf  ;;  %v2989_v45 = vsel %vm10011_vm9, %v6613_v37, -inf  ;;  %v2990_v13 = vsel %vm10051_vm8, %v6629_v30, -inf  ;;  %1753 = vmax.xlane.f32.xlu1 %v8266_v48  ;;  %627 = vmax.xlane.f32.xlu0 %v14253_v49 }
 0x29d   : > { %v10079_v31 = vmax.f32 %v2983_v55, %v2984_v46  ;;  %v10081_v34 = vmax.f32 %v2989_v45, %v2990_v13  ;;  %v2987_v47 = vsel %vm10011_vm9, %v6547_v2, -inf  ;;  %v2988_v21 = vsel %vm10051_vm8, %v6573_v25, -inf  ;;  %v1207_v35 = vpop.xlane.xlu0 %1206 }
 0x29e   : > { %14252 = vst [vmem:[#allocation153_spill] sm:$0xff] %v10066_v39  ;;  %v1204_v39 = vpop.xlane.xlu1 %1203  ;;  %v10089_v41 = vmax.f32 %v2987_v47, %v2988_v21  ;;  %v3004_v48 = vsel %vm3003_vm5, 1, %v13748_v29  ;;  %vm3035_vm2 = vcmp.eq.s32.totalorder %v6171_v57, 76  ;;  %vm3067_vm10 = vcmp.eq.s32.totalorder %v6171_v57, 77 }
 0x29f   : > { %14254 = vst [vmem:[#allocation16_spill] sm:$0xff] %v10079_v31  ;;  %14255 = vst [vmem:[#allocation154_spill] sm:$0xff] %v10081_v34  ;;  %v4780_v55 = vsel %vm4704_vm6, %v4776_v53, %v1207_v35  ;;  %v4779_v32 = vsel %vm4704_vm6, %v4775_v1, %v1204_v39  ;;  %v3008_v46 = vrot.slane %v3004_v48, %v6175_v59  ;;  %v3036_v45 = vsel %vm3035_vm2, 1, %v13748_v29 }
 0x2a0   : > { %14256 = vst [vmem:[#allocation155_spill] sm:$0xff] %v10089_v41  ;;  %v3012_v63 = vrot.slane %v3004_v48, %v6181_v62  ;;  %v3068_v13 = vsel %vm3067_vm10, 1, %v13748_v29  ;;  %vm3099_vm13 = vcmp.eq.s32.totalorder %v6171_v57, 78  ;;  %vm3131_vm5 = vcmp.eq.s32.totalorder %v6171_v57, 79  ;;  %1779 = vmax.xlane.f32.xlu1 %v8294_v38  ;;  %1776 = vmax.xlane.f32.xlu0 %v8296_v26 }
 0x2a1   : > { %vm10106_vm11 = vcmp.eq.s32.totalorder %v3008_v46, 1  ;;  %v3040_v39 = vrot.slane %v3036_v45, %v6175_v59  ;;  %v3044_v49 = vrot.slane %v3036_v45, %v6181_v62  ;;  %v1233_v47 = vpop.xlane.xlu0 %1232 }
 0x2a2   : > { %vm10110_vm9 = vcmp.eq.s32.totalorder %v3012_v63, 1  ;;  %v1210_v21 = vpop.xlane.xlu1 %1209  ;;  %v3017_v38 = vsel %vm10106_vm11, %v6615_v33, -inf  ;;  %v3015_v35 = vsel %vm10106_vm11, %v6545_v27, -inf  ;;  %v4782_v46 = vsel %vm4709_vm15, %v4778_v10, %v1233_v47 }
 0x2a3   : > { %v3018_v26 = vsel %vm10110_vm9, %v6631_v0, -inf  ;;  %v3016_v48 = vsel %vm10110_vm9, %v6571_v12, -inf  ;;  %v4781_v63 = vsel %vm4704_vm6, %v4777_v51, %v1210_v21  ;;  %v3021_v34 = vsel %vm10106_vm11, %v6613_v37, -inf  ;;  %v14263_v51 = vld [vmem:[#allocation27_spill] sm:$0xff] }
 0x2a4   : > { %v10130_v45 = vmax.f32 %v3017_v38, %v3018_v26  ;;  %v10132_v41 = vmax.f32 %v3015_v35, %v3016_v48  ;;  %v3022_v31 = vsel %vm10110_vm9, %v6629_v30, -inf  ;;  %v3019_v28 = vsel %vm10106_vm11, %v6547_v2, -inf  ;;  %1785 = vmax.xlane.f32.xlu1 %v8311_v8  ;;  %1782 = vmax.xlane.f32.xlu0 %v14263_v51 }
 0x2a5   : > { %v3020_v10 = vsel %vm10110_vm9, %v6573_v25, -inf  ;;  %v10148_v47 = vmax.f32 %v3021_v34, %v3022_v31  ;;  %vm10152_vm8 = vcmp.eq.s32.totalorder %v3040_v39, 1  ;;  %vm10156_vm2 = vcmp.eq.s32.totalorder %v3044_v49, 1  ;;  %v1239_v53 = vpop.xlane.xlu0 %1238 }
 0x2a6   : > { %14261 = vst [vmem:[#allocation156_spill] sm:$0xff] %v10130_v45  ;;  %14262 = vst [vmem:[#allocation157_spill] sm:$0xff] %v10132_v41  ;;  %v10150_v21 = vmax.f32 %v3019_v28, %v3020_v10  ;;  %v1236_v35 = vpop.xlane.xlu1 %1235  ;;  %v3049_v8 = vsel %vm10152_vm8, %v6615_v33, -inf  ;;  %v3050_v31 = vsel %vm10156_vm2, %v6631_v0, -inf  ;;  %v3047_v28 = vsel %vm10152_vm8, %v6545_v27, -inf }
 0x2a7   : > { %14264 = vst [vmem:[#allocation27_spill] sm:$0xff] %v10148_v47  ;;  %v3048_v34 = vsel %vm10156_vm2, %v6571_v12, -inf  ;;  %v4784_v1 = vsel %vm4709_vm15, %v4780_v55, %v1239_v53  ;;  %v4783_v39 = vsel %vm4709_vm15, %v4779_v32, %v1236_v35  ;;  %v10174_v49 = vmax.f32 %v3049_v8, %v3050_v31  ;;  %v14272_v32 = vld [vmem:[#allocation18_spill] sm:$0xff] }
 0x2a8   : > { %14265 = vst [vmem:[#allocation158_spill] sm:$0xff] %v10150_v21  ;;  %v10176_v48 = vmax.f32 %v3047_v28, %v3048_v34  ;;  %v3053_v10 = vsel %vm10152_vm8, %v6613_v37, -inf  ;;  %v3054_v51 = vsel %vm10156_vm2, %v6629_v30, -inf  ;;  %v3051_v21 = vsel %vm10152_vm8, %v6547_v2, -inf  ;;  %1811 = vmax.xlane.f32.xlu1 %v8340_v40  ;;  %1808 = vmax.xlane.f32.xlu0 %v14272_v32 }
 0x2a9   : > { %14270 = vst [vmem:[#allocation159_spill] sm:$0xff] %v10174_v49  ;;  %v3052_v55 = vsel %vm10156_vm2, %v6573_v25, -inf  ;;  %v10192_v53 = vmax.f32 %v3053_v10, %v3054_v51  ;;  %v3072_v8 = vrot.slane %v3068_v13, %v6175_v59  ;;  %v3100_v31 = vsel %vm3099_vm13, 1, %v13748_v29  ;;  %v1265_v38 = vpop.xlane.xlu0 %1264 }
 0x2aa   : > { %14271 = vst [vmem:[#allocation160_spill] sm:$0xff] %v10176_v48  ;;  %v10194_v35 = vmax.f32 %v3051_v21, %v3052_v55  ;;  %v1242_v28 = vpop.xlane.xlu1 %1241  ;;  %v3076_v34 = vrot.slane %v3068_v13, %v6181_v62  ;;  %v3104_v26 = vrot.slane %v3100_v31, %v6175_v59  ;;  %v3108_v40 = vrot.slane %v3100_v31, %v6181_v62 }
 0x2ab   : > { %14273 = vst [vmem:[#allocation18_spill] sm:$0xff] %v10192_v53  ;;  %v3132_v10 = vsel %vm3131_vm5, 1, %v13748_v29  ;;  %v4786_v21 = vsel %vm13573_vm1, %v4782_v46, %v1265_v38  ;;  %v4785_v51 = vsel %vm4709_vm15, %v4781_v63, %v1242_v28  ;;  %vm10208_vm10 = vcmp.eq.s32.totalorder %v3072_v8, 1  ;;  %v14279_v8 = vld [vmem:[#allocation36_spill] sm:$0xff]  ;;  %v14280_v38 = vld [vmem:[#allocation37_spill] sm:$0xff] }
 0x2ac   : > { %14274 = vst [vmem:[#allocation161_spill] sm:$0xff] %v10194_v35  ;;  %v3136_v32 = vrot.slane %v3132_v10, %v6175_v59  ;;  %vm10213_vm13 = vcmp.eq.s32.totalorder %v3076_v34, 1  ;;  %v3081_v31 = vsel %vm10208_vm10, %v6615_v33, -inf  ;;  %v3079_v46 = vsel %vm10208_vm10, %v6545_v27, -inf  ;;  %1817 = vmax.xlane.f32.xlu1 %v14279_v8  ;;  %1814 = vmax.xlane.f32.xlu0 %v14280_v38 }
 0x2ad   : > { %v3085_v63 = vsel %vm10208_vm10, %v6613_v37, -inf  ;;  %v3082_v28 = vsel %vm10213_vm13, %v6631_v0, -inf  ;;  %v3080_v34 = vsel %vm10213_vm13, %v6571_v12, -inf  ;;  %v3086_v35 = vsel %vm10213_vm13, %v6629_v30, -inf  ;;  %v1271_v48 = vpop.xlane.xlu0 %1270 }
 0x2ae   : > { %v3083_v53 = vsel %vm10208_vm10, %v6547_v2, -inf  ;;  %v1268_v8 = vpop.xlane.xlu1 %1267  ;;  %v10240_v49 = vmax.f32 %v3081_v31, %v3082_v28  ;;  %v10242_v38 = vmax.f32 %v3079_v46, %v3080_v34  ;;  %v10244_v47 = vmax.f32 %v3085_v63, %v3086_v35  ;;  %v14290_v31 = vld [vmem:[#allocation38_spill] sm:$0xff] }
 0x2af   : > { %v3084_v41 = vsel %vm10213_vm13, %v6573_v25, -inf  ;;  %v4788_v45 = vsel %vm13573_vm1, %v4784_v1, %v1271_v48  ;;  %v4787_v24 = vsel %vm13573_vm1, %v4783_v39, %v1268_v8  ;;  %vm10253_vm5 = vcmp.eq.s32.totalorder %v3104_v26, 1  ;;  %v14287_v39 = vld [vmem:[#allocation74_spill] sm:$0xff] }
 0x2b0   : > { %14281 = vst [vmem:[#allocation36_spill] sm:$0xff] %v10244_v47  ;;  %v10251_v7 = vmax.f32 %v3083_v53, %v3084_v41  ;;  %vm10257_vm11 = vcmp.eq.s32.totalorder %v3108_v40, 1  ;;  %v3113_v35 = vsel %vm10253_vm5, %v6615_v33, -inf  ;;  %v3111_v1 = vsel %vm10253_vm5, %v6545_v27, -inf  ;;  %1843 = vmax.xlane.f32.xlu1 %v14287_v39  ;;  %1840 = vmax.xlane.f32.xlu0 %v8397_v22  ;;  %v14294_v47 = vld [vmem:[#allocation39_spill] sm:$0xff] }
 0x2b1   : > { %v3117_v41 = vsel %vm10253_vm5, %v6613_v37, -inf  ;;  %v3114_v48 = vsel %vm10257_vm11, %v6631_v0, -inf  ;;  %v3112_v53 = vsel %vm10257_vm11, %v6571_v12, -inf  ;;  %v3118_v26 = vsel %vm10257_vm11, %v6629_v30, -inf  ;;  %v1297_v13 = vpop.xlane.xlu0 %1296 }
 0x2b2   : > { %14282 = vst [vmem:[#allocation37_spill] sm:$0xff] %v10251_v7  ;;  %v3115_v40 = vsel %vm10253_vm5, %v6547_v2, -inf  ;;  %v1274_v46 = vpop.xlane.xlu1 %1273  ;;  %v10284_v63 = vmax.f32 %v3113_v35, %v3114_v48  ;;  %v10286_v22 = vmax.f32 %v3111_v1, %v3112_v53  ;;  %v10288_v28 = vmax.f32 %v3117_v41, %v3118_v26 }
 0x2b3   : > { %v3116_v34 = vsel %vm10257_vm11, %v6573_v25, -inf  ;;  %v4790_v8 = vsel %vm13572_vm14, %v4786_v21, %v1297_v13  ;;  %v4789_v39 = vsel %vm13573_vm1, %v4785_v51, %v1274_v46  ;;  %v3140_v55 = vrot.slane %v3132_v10, %v6181_v62 }
 0x2b4   : > { %v10295_v7 = vmax.f32 %v3115_v40, %v3116_v34  ;;  %vm10298_vm9 = vcmp.eq.s32.totalorder %v3136_v32, 1  ;;  %vm3163_vm8 = vcmp.eq.s32.totalorder %v6171_v57, 80  ;;  %vm3195_vm2 = vcmp.eq.s32.totalorder %v6171_v57, 81  ;;  %1849 = vmax.xlane.f32.xlu1 %v8399_v43  ;;  %1846 = vmax.xlane.f32.xlu0 %v14290_v31 }
 0x2b5   : > { %vm3227_vm10 = vcmp.eq.s32.totalorder %v6171_v57, 82  ;;  %vm10307_vm13 = vcmp.eq.s32.totalorder %v3140_v55, 1  ;;  %v3145_v10 = vsel %vm10298_vm9, %v6615_v33, -inf  ;;  %v3143_v51 = vsel %vm10298_vm9, %v6545_v27, -inf  ;;  %v1303_v35 = vpop.xlane.xlu0 %1302 }
 0x2b6   : > { %v3149_v32 = vsel %vm10298_vm9, %v6613_v37, -inf  ;;  %v1300_v43 = vpop.xlane.xlu1 %1299  ;;  %v3146_v1 = vsel %vm10307_vm13, %v6631_v0, -inf  ;;  %v3144_v41 = vsel %vm10307_vm13, %v6571_v12, -inf  ;;  %v3150_v48 = vsel %vm10307_vm13, %v6629_v30, -inf }
 0x2b7   : > { %v3147_v53 = vsel %vm10298_vm9, %v6547_v2, -inf  ;;  %v4792_v26 = vsel %vm13572_vm14, %v4788_v45, %v1303_v35  ;;  %v4791_v40 = vsel %vm13572_vm14, %v4787_v24, %v1300_v43  ;;  %v10334_v13 = vmax.f32 %v3145_v10, %v3146_v1 }
 0x2b8   : > { %v10336_v46 = vmax.f32 %v3143_v51, %v3144_v41  ;;  %v10338_v34 = vmax.f32 %v3149_v32, %v3150_v48  ;;  %v3148_v55 = vsel %vm10307_vm13, %v6573_v25, -inf  ;;  %v3164_v31 = vsel %vm3163_vm8, 1, %v13748_v29  ;;  %1875 = vmax.xlane.f32.xlu1 %v14294_v47  ;;  %1872 = vmax.xlane.f32.xlu0 %v8438_v9 }
 0x2b9   : > { %v3196_v45 = vsel %vm3195_vm2, 1, %v13748_v29  ;;  %v10351_v24 = vmax.f32 %v3147_v53, %v3148_v55  ;;  %v3168_v10 = vrot.slane %v3164_v31, %v6175_v59  ;;  %v3172_v51 = vrot.slane %v3164_v31, %v6181_v62  ;;  %v1329_v32 = vpop.xlane.xlu0 %1328 }
 0x2ba   : > { %14293 = vst [vmem:[#allocation74_spill] sm:$0xff] %v10338_v34  ;;  %v3228_v21 = vsel %vm3227_vm10, 1, %v13748_v29  ;;  %v1306_v35 = vpop.xlane.xlu1 %1305  ;;  %v3200_v43 = vrot.slane %v3196_v45, %v6175_v59  ;;  %v3204_v1 = vrot.slane %v3196_v45, %v6181_v62  ;;  %v4794_v48 = vsel %vm13571_vm7, %v4790_v8, %v1329_v32 }
 0x2bb   : > { %14295 = vst [vmem:[#allocation38_spill] sm:$0xff] %v10351_v24  ;;  %v3232_v41 = vrot.slane %v3228_v21, %v6175_v59  ;;  %v3236_v9 = vrot.slane %v3228_v21, %v6181_v62  ;;  %v4793_v53 = vsel %vm13572_vm14, %v4789_v39, %v1306_v35  ;;  %vm10364_vm5 = vcmp.eq.s32.totalorder %v3168_v10, 1 }
 0x2bc   : > { %vm10368_vm11 = vcmp.eq.s32.totalorder %v3172_v51, 1  ;;  %v3177_v45 = vsel %vm10364_vm5, %v6615_v33, -inf  ;;  %v3175_v8 = vsel %vm10364_vm5, %v6545_v27, -inf  ;;  %1881 = vmax.xlane.f32.xlu1 %v8440_v50  ;;  %1878 = vmax.xlane.f32.xlu0 %v8448_v4  ;;  %v3181_v21 = vsel %vm10364_vm5, %v6613_v37, -inf }
 0x2bd   : > { %v3178_v47 = vsel %vm10368_vm11, %v6631_v0, -inf  ;;  %v3176_v39 = vsel %vm10368_vm11, %v6571_v12, -inf  ;;  %v3182_v32 = vsel %vm10368_vm11, %v6629_v30, -inf  ;;  %v1335_v35 = vpop.xlane.xlu0 %1334  ;;  %v3179_v4 = vsel %vm10364_vm5, %v6547_v2, -inf }
 0x2be   : > { %v10386_v10 = vmax.f32 %v3177_v45, %v3178_v47  ;;  %v10388_v51 = vmax.f32 %v3175_v8, %v3176_v39  ;;  %v1332_v24 = vpop.xlane.xlu1 %1331  ;;  %v10396_v34 = vmax.f32 %v3181_v21, %v3182_v32  ;;  %v3180_v50 = vsel %vm10368_vm11, %v6573_v25, -inf }
 0x2bf   : > { %vm10404_vm9 = vcmp.eq.s32.totalorder %v3200_v43, 1  ;;  %v4796_v47 = vsel %vm13571_vm7, %v4792_v26, %v1335_v35  ;;  %v4795_v8 = vsel %vm13571_vm7, %v4791_v40, %v1332_v24  ;;  %v10410_v39 = vmax.f32 %v3179_v4, %v3180_v50  ;;  %v14305_v24 = vld [vmem:[#allocation75_spill] sm:$0xff] }
 0x2c0   : > { %vm10412_vm8 = vcmp.eq.s32.totalorder %v3204_v1, 1  ;;  %v3209_v55 = vsel %vm10404_vm9, %v6615_v33, -inf  ;;  %v3207_v26 = vsel %vm10404_vm9, %v6545_v27, -inf  ;;  %1907 = vmax.xlane.f32.xlu1 %v8461_v20  ;;  %1904 = vmax.xlane.f32.xlu0 %v14305_v24  ;;  %v3213_v32 = vsel %vm10404_vm9, %v6613_v37, -inf }
 0x2c1   : > { %14302 = vst [vmem:[#allocation39_spill] sm:$0xff] %v10410_v39  ;;  %v3210_v43 = vsel %vm10412_vm8, %v6631_v0, -inf  ;;  %v3208_v40 = vsel %vm10412_vm8, %v6571_v12, -inf  ;;  %v3214_v35 = vsel %vm10412_vm8, %v6629_v30, -inf  ;;  %v1361_v4 = vpop.xlane.xlu0 %1360  ;;  %v3211_v20 = vsel %vm10404_vm9, %v6547_v2, -inf }
 0x2c2   : > { %v10430_v1 = vmax.f32 %v3209_v55, %v3210_v43  ;;  %v10432_v31 = vmax.f32 %v3207_v26, %v3208_v40  ;;  %v1338_v50 = vpop.xlane.xlu1 %1337  ;;  %v10440_v39 = vmax.f32 %v3213_v32, %v3214_v35  ;;  %v3212_v55 = vsel %vm10412_vm8, %v6573_v25, -inf  ;;  %v14321_v43 = vld [vmem:[#allocation77_spill] sm:$0xff] }
 0x2c3   : > { %vm10448_vm2 = vcmp.eq.s32.totalorder %v3232_v41, 1  ;;  %vm14310_vm10 = vcmask 56320   ;;  %v4797_v40 = vsel %vm13571_vm7, %v4793_v53, %v1338_v50  ;;  %v10454_v24 = vmax.f32 %v3211_v20, %v3212_v55 }
 0x2c4   : > { %14306 = vst [vmem:[#allocation75_spill] sm:$0xff] %v10432_v31  ;;  %14307 = vst [vmem:[#allocation162_spill] sm:$0xff] %v10440_v39  ;;  %v4798_v26 = vsel %vm14310_vm10, %v4794_v48, %v1361_v4  ;;  %vm10456_vm13 = vcmp.eq.s32.totalorder %v3236_v9, 1  ;;  %v3241_v45 = vsel %vm10448_vm2, %v6615_v33, -inf  ;;  %v3239_v48 = vsel %vm10448_vm2, %v6545_v27, -inf  ;;  %1913 = vmax.xlane.f32.xlu1 %v8483_v6  ;;  %v14314_v9 = vld [vmem:[#allocation76_spill] sm:$0xff] }
 0x2c5   : > { %14311 = vst [vmem:[#allocation163_spill] sm:$0xff] %v10454_v24  ;;  %v3242_v41 = vsel %vm10456_vm13, %v6631_v0, -inf  ;;  %v3240_v53 = vsel %vm10456_vm13, %v6571_v12, -inf  ;;  %1910 = vmax.xlane.f32.xlu0 %v14314_v9  ;;  %v3245_v4 = vsel %vm10448_vm2, %v6613_v37, -inf  ;;  %v3246_v50 = vsel %vm10456_vm13, %v6629_v30, -inf  ;;  %v1367_v20 = vpop.xlane.xlu0 %1366  ;;  %vm14318_vm11 = vmmov %vm14310_vm10 }
 0x2c6   : > { %v10474_v21 = vmax.f32 %v3241_v45, %v3242_v41  ;;  %v10476_v35 = vmax.f32 %v3239_v48, %v3240_v53  ;;  %v1364_v55 = vpop.xlane.xlu1 %1363  ;;  %v10484_v24 = vmax.f32 %v3245_v4, %v3246_v50  ;;  %v3243_v6 = vsel %vm10448_vm2, %v6547_v2, -inf  ;;  %vm14319_vm9 = vmmov %vm14310_vm10 }
 0x2c7   : > { %v3244_v45 = vsel %vm10456_vm13, %v6573_v25, -inf  ;;  %vm3259_vm5 = vcmp.eq.s32.totalorder %v6171_v57, 83  ;;  %v4800_v41 = vsel %vm14318_vm11, %v4796_v47, %v1367_v20  ;;  %v4799_v48 = vsel %vm14319_vm9, %v4795_v8, %v1364_v55 }
 0x2c8   : > { %14315 = vst [vmem:[#allocation76_spill] sm:$0xff] %v10474_v21  ;;  %14316 = vst [vmem:[#allocation164_spill] sm:$0xff] %v10476_v35  ;;  %v10495_v53 = vmax.f32 %v3243_v6, %v3244_v45  ;;  %v3260_v9 = vsel %vm3259_vm5, 1, %v13748_v29  ;;  %vm3291_vm8 = vcmp.eq.s32.totalorder %v6171_v57, 84  ;;  %vm3323_vm2 = vcmp.eq.s32.totalorder %v6171_v57, 85  ;;  %1939 = vmax.xlane.f32.xlu1 %v14321_v43 }
 0x2c9   : > { %14317 = vst [vmem:[#allocation165_spill] sm:$0xff] %v10484_v24  ;;  %v3264_v4 = vrot.slane %v3260_v9, %v6175_v59  ;;  %v3268_v50 = vrot.slane %v3260_v9, %v6181_v62  ;;  %1936 = vmax.xlane.f32.xlu0 %v8506_v60  ;;  %v3292_v47 = vsel %vm3291_vm8, 1, %v13748_v29  ;;  %v3324_v8 = vsel %vm3323_vm2, 1, %v13748_v29  ;;  %v1393_v32 = vpop.xlane.xlu0 %1392 }
 0x2ca   : > { %14320 = vst [vmem:[#allocation166_spill] sm:$0xff] %v10495_v53  ;;  %vm3355_vm10 = vcmp.eq.s32.totalorder %v6171_v57, 86  ;;  %vm3387_vm13 = vcmp.eq.s32.totalorder %v6171_v57, 87  ;;  %v1370_v20 = vpop.xlane.xlu1 %1369  ;;  %v3296_v60 = vrot.slane %v3292_v47, %v6175_v59  ;;  %v3300_v45 = vrot.slane %v3292_v47, %v6181_v62  ;;  %v14329_v47 = vld [vmem:[#allocation40_spill] sm:$0xff] }
 0x2cb   : > { %vm10508_vm5 = vcmp.eq.s32.totalorder %v3264_v4, 1  ;;  %vm10512_vm11 = vcmp.eq.s32.totalorder %v3268_v50, 1  ;;  %vm14326_vm9 = vcmask 64512   ;;  %vm14327_vm8 = vcmask 56320  }
 0x2cc   : > { %v4802_v9 = vsel %vm14326_vm9, %v4798_v26, %v1393_v32  ;;  %v4801_v43 = vsel %vm14327_vm8, %v4797_v40, %v1370_v20  ;;  %v3273_v53 = vsel %vm10508_vm5, %v6615_v33, -inf  ;;  %v3274_v4 = vsel %vm10512_vm11, %v6631_v0, -inf  ;;  %1945 = vmax.xlane.f32.xlu1 %v14329_v47  ;;  %v14330_v32 = vld [vmem:[#allocation78_spill] sm:$0xff] }
 0x2cd   : > { %v10526_v50 = vmax.f32 %v3273_v53, %v3274_v4  ;;  %v3271_v24 = vsel %vm10508_vm5, %v6545_v27, -inf  ;;  %v3272_v26 = vsel %vm10512_vm11, %v6571_v12, -inf  ;;  %v3277_v40 = vsel %vm10508_vm5, %v6613_v37, -inf  ;;  %1942 = vmax.xlane.f32.xlu0 %v14330_v32  ;;  %v1399_v35 = vpop.xlane.xlu0 %1398 }
 0x2ce   : > { %v10539_v20 = vmax.f32 %v3271_v24, %v3272_v26  ;;  %v3278_v53 = vsel %vm10512_vm11, %v6629_v30, -inf  ;;  %v3275_v4 = vsel %vm10508_vm5, %v6547_v2, -inf  ;;  %v1396_v21 = vpop.xlane.xlu1 %1395  ;;  %vm10554_vm2 = vcmp.eq.s32.totalorder %v3296_v60, 1 }
 0x2cf   : > { %14328 = vst [vmem:[#allocation77_spill] sm:$0xff] %v10526_v50  ;;  %v3276_v50 = vsel %vm10512_vm11, %v6573_v25, -inf  ;;  %v10550_v39 = vmax.f32 %v3277_v40, %v3278_v53  ;;  %vm10558_vm9 = vcmp.eq.s32.totalorder %v3300_v45, 1  ;;  %vm14338_vm8 = vcmask 64512  }
 0x2d0   : > { %14331 = vst [vmem:[#allocation40_spill] sm:$0xff] %v10539_v20  ;;  %v10552_v47 = vmax.f32 %v3275_v4, %v3276_v50  ;;  %v4804_v55 = vsel %vm14338_vm8, %v4800_v41, %v1399_v35  ;;  %vm14339_vm5 = vmmov %vm14338_vm8  ;;  %v3305_v6 = vsel %vm10554_vm2, %v6615_v33, -inf  ;;  %v3306_v50 = vsel %vm10558_vm9, %v6631_v0, -inf  ;;  %v14341_v41 = vld [vmem:[#allocation79_spill] sm:$0xff] }
 0x2d1   : > { %14332 = vst [vmem:[#allocation78_spill] sm:$0xff] %v10550_v39  ;;  %v4803_v32 = vsel %vm14339_vm5, %v4799_v48, %v1396_v21  ;;  %v10570_v60 = vmax.f32 %v3305_v6, %v3306_v50  ;;  %v3303_v45 = vsel %vm10554_vm2, %v6545_v27, -inf  ;;  %v3304_v35 = vsel %vm10558_vm9, %v6571_v12, -inf  ;;  %1971 = vmax.xlane.f32.xlu1 %v14341_v41  ;;  %v14342_v48 = vld [vmem:[#allocation80_spill] sm:$0xff]  ;;  %v1425_v50 = vpop.xlane.xlu0 %1424  ;;  %vm14347_vm8 = vmmov %vm14339_vm5 }
 0x2d2   : > { %14333 = vst [vmem:[#allocation167_spill] sm:$0xff] %v10552_v47  ;;  %v3309_v21 = vsel %vm10554_vm2, %v6613_v37, -inf  ;;  %1968 = vmax.xlane.f32.xlu0 %v14342_v48  ;;  %v10583_v40 = vmax.f32 %v3303_v45, %v3304_v35  ;;  %v3310_v53 = vsel %vm10558_vm9, %v6629_v30, -inf  ;;  %v3307_v4 = vsel %vm10554_vm2, %v6547_v2, -inf }
 0x2d3   : > { %14340 = vst [vmem:[#allocation168_spill] sm:$0xff] %v10570_v60  ;;  %v3308_v6 = vsel %vm10558_vm9, %v6573_v25, -inf  ;;  %v1402_v60 = vpop.xlane.xlu1 %1401  ;;  %v10594_v47 = vmax.f32 %v3309_v21, %v3310_v53  ;;  %v3328_v45 = vrot.slane %v3324_v8, %v6175_v59  ;;  %v3332_v35 = vrot.slane %v3324_v8, %v6181_v62 }
 0x2d4   : > { %14343 = vst [vmem:[#allocation79_spill] sm:$0xff] %v10583_v40  ;;  %v10596_v41 = vmax.f32 %v3307_v4, %v3308_v6  ;;  %vm14346_vm11 = vcmask 72704   ;;  %v4805_v40 = vsel %vm14347_vm8, %v4801_v43, %v1402_v60  ;;  %v3356_v24 = vsel %vm3355_vm10, 1, %v13748_v29  ;;  %v14352_v43 = vld [vmem:[#allocation81_spill] sm:$0xff]  ;;  %v14353_v60 = vld [vmem:[#allocation82_spill] sm:$0xff] }
 0x2d5   : > { %14344 = vst [vmem:[#allocation80_spill] sm:$0xff] %v10594_v47  ;;  %v4806_v48 = vsel %vm14346_vm11, %v4802_v9, %v1425_v50  ;;  %v3388_v26 = vsel %vm3387_vm13, 1, %v13748_v29  ;;  %vm10608_vm2 = vcmp.eq.s32.totalorder %v3328_v45, 1  ;;  %vm10612_vm9 = vcmp.eq.s32.totalorder %v3332_v35, 1  ;;  %1977 = vmax.xlane.f32.xlu1 %v14352_v43  ;;  %v1431_v35 = vpop.xlane.xlu0 %1430  ;;  %vm14355_vm10 = vmmov %vm14346_vm11 }
 0x2d6   : > { %14345 = vst [vmem:[#allocation169_spill] sm:$0xff] %v10596_v41  ;;  %v3360_v8 = vrot.slane %v3356_v24, %v6175_v59  ;;  %v3364_v9 = vrot.slane %v3356_v24, %v6181_v62  ;;  %1974 = vmax.xlane.f32.xlu0 %v14353_v60  ;;  %v3337_v4 = vsel %vm10608_vm2, %v6615_v33, -inf  ;;  %v3338_v6 = vsel %vm10612_vm9, %v6631_v0, -inf  ;;  %vm14356_vm13 = vmmov %vm14355_vm10 }
 0x2d7   : > { %v3335_v50 = vsel %vm10608_vm2, %v6545_v27, -inf  ;;  %v3336_v45 = vsel %vm10612_vm9, %v6571_v12, -inf  ;;  %v1428_v24 = vpop.xlane.xlu1 %1427  ;;  %v10632_v43 = vmax.f32 %v3337_v4, %v3338_v6  ;;  %v3341_v41 = vsel %vm10608_vm2, %v6613_v37, -inf }
 0x2d8   : > { %v10634_v60 = vmax.f32 %v3335_v50, %v3336_v45  ;;  %v3342_v47 = vsel %vm10612_vm9, %v6629_v30, -inf  ;;  %v4808_v39 = vsel %vm14355_vm10, %v4804_v55, %v1431_v35  ;;  %v4807_v20 = vsel %vm14356_vm13, %v4803_v32, %v1428_v24 }
 0x2d9   : > { %v10644_v31 = vmax.f32 %v3341_v41, %v3342_v47  ;;  %v3339_v4 = vsel %vm10608_vm2, %v6547_v2, -inf  ;;  %v3340_v6 = vsel %vm10612_vm9, %v6573_v25, -inf  ;;  %vm10652_vm5 = vcmp.eq.s32.totalorder %v3360_v8, 1  ;;  %2003 = vmax.xlane.f32.xlu1 %v8578_v42  ;;  %v14362_v47 = vld [vmem:[#allocation41_spill] sm:$0xff]  ;;  %v1457_v8 = vpop.xlane.xlu0 %1456  ;;  %vm14366_vm2 = vmmov %vm14355_vm10 }
 0x2da   : > { %14354 = vst [vmem:[#allocation81_spill] sm:$0xff] %v10634_v60  ;;  %vm10656_vm11 = vcmp.eq.s32.totalorder %v3364_v9, 1  ;;  %v3392_v55 = vrot.slane %v3388_v26, %v6175_v59  ;;  %2000 = vmax.xlane.f32.xlu0 %v14362_v47  ;;  %v10663_v32 = vmax.f32 %v3339_v4, %v3340_v6  ;;  %v3369_v41 = vsel %vm10652_vm5, %v6615_v33, -inf }
 0x2db   : > { %14357 = vst [vmem:[#allocation82_spill] sm:$0xff] %v10644_v31  ;;  %v3370_v21 = vsel %vm10656_vm11, %v6631_v0, -inf  ;;  %v3367_v53 = vsel %vm10652_vm5, %v6545_v27, -inf  ;;  %v1434_v9 = vpop.xlane.xlu1 %1433  ;;  %v3368_v42 = vsel %vm10656_vm11, %v6571_v12, -inf  ;;  %v3373_v24 = vsel %vm10652_vm5, %v6613_v37, -inf }
 0x2dc   : > { %14363 = vst [vmem:[#allocation41_spill] sm:$0xff] %v10663_v32  ;;  %v10674_v35 = vmax.f32 %v3369_v41, %v3370_v21  ;;  %v3374_v4 = vsel %vm10656_vm11, %v6629_v30, -inf  ;;  %vm14365_vm8 = vcmask 80896   ;;  %v4809_v47 = vsel %vm14366_vm2, %v4805_v40, %v1434_v9  ;;  %v14372_v40 = vld [vmem:[#allocation84_spill] sm:$0xff] }
 0x2dd   : > { %v4810_v6 = vsel %vm14365_vm8, %v4806_v48, %v1457_v8  ;;  %v10687_v32 = vmax.f32 %v3367_v53, %v3368_v42  ;;  %v10689_v41 = vmax.f32 %v3373_v24, %v3374_v4  ;;  %v3371_v21 = vsel %vm10652_vm5, %v6547_v2, -inf  ;;  %v14371_v48 = vld [vmem:[#allocation83_spill] sm:$0xff] }
 0x2de   : > { %14364 = vst [vmem:[#allocation170_spill] sm:$0xff] %v10674_v35  ;;  %v3372_v35 = vsel %vm10656_vm11, %v6573_v25, -inf  ;;  %v3396_v31 = vrot.slane %v3388_v26, %v6181_v62  ;;  %vm10698_vm9 = vcmp.eq.s32.totalorder %v3392_v55, 1  ;;  %2009 = vmax.xlane.f32.xlu1 %v14371_v48  ;;  %2006 = vmax.xlane.f32.xlu0 %v14372_v40  ;;  %v1463_v55 = vpop.xlane.xlu0 %1462  ;;  %vm3419_vm13 = vcmp.eq.s32.totalorder %v6171_v57, 88  ;;  %vm14374_vm11 = vmmov %vm14365_vm8  ;;  %v14377_v40 = vld [vmem:[#allocation85_spill] sm:$0xff] }
 0x2df   : > { %14367 = vst [vmem:[#allocation171_spill] sm:$0xff] %v10687_v32  ;;  %14368 = vst [vmem:[#allocation172_spill] sm:$0xff] %v10689_v41  ;;  %v10704_v53 = vmax.f32 %v3371_v21, %v3372_v35  ;;  %v3401_v50 = vsel %vm10698_vm9, %v6615_v33, -inf  ;;  %v3399_v45 = vsel %vm10698_vm9, %v6545_v27, -inf  ;;  %v3405_v26 = vsel %vm10698_vm9, %v6613_v37, -inf  ;;  %v1460_v8 = vpop.xlane.xlu1 %1459 }
 0x2e0   : > { %vm3398_vm10 = vcmp.eq.s32.totalorder %v3396_v31, 1  ;;  %v3403_v9 = vsel %vm10698_vm9, %v6547_v2, -inf  ;;  %vm3451_vm5 = vcmp.eq.s32.totalorder %v6171_v57, 89  ;;  %v4812_v35 = vsel %vm14374_vm11, %v4808_v39, %v1463_v55  ;;  %vm14382_vm9 = vmmov %vm14365_vm8 }
 0x2e1   : > { %14373 = vst [vmem:[#allocation83_spill] sm:$0xff] %v10704_v53  ;;  %v4811_v42 = vsel %vm14365_vm8, %v4807_v20, %v1460_v8  ;;  %v3402_v24 = vsel %vm3398_vm10, %v6631_v0, -inf  ;;  %v3400_v4 = vsel %vm3398_vm10, %v6571_v12, -inf  ;;  %v3406_v31 = vsel %vm3398_vm10, %v6629_v30, -inf  ;;  %v14378_v53 = vld [vmem:[#allocation86_spill] sm:$0xff] }
 0x2e2   : > { %v10724_v21 = vmax.f32 %v3401_v50, %v3402_v24  ;;  %v10726_v48 = vmax.f32 %v3399_v45, %v3400_v4  ;;  %v3404_v60 = vsel %vm3398_vm10, %v6573_v25, -inf  ;;  %2035 = vmax.xlane.f32.xlu1 %v14377_v40  ;;  %2032 = vmax.xlane.f32.xlu0 %v14378_v53  ;;  %v10732_v41 = vmax.f32 %v3405_v26, %v3406_v31  ;;  %v1489_v50 = vpop.xlane.xlu0 %1488 }
 0x2e3   : > { %v10734_v39 = vmax.f32 %v3403_v9, %v3404_v60  ;;  %v3420_v20 = vsel %vm3419_vm13, 1, %v13748_v29  ;;  %v3452_v55 = vsel %vm3451_vm5, 1, %v13748_v29  ;;  %v1466_v8 = vpop.xlane.xlu1 %1465  ;;  %vm14381_vm2 = vcmask 89088   ;;  %v14398_v9 = vld [vmem:[#allocation88_spill] sm:$0xff] }
 0x2e4   : > { %14375 = vst [vmem:[#allocation84_spill] sm:$0xff] %v10724_v21  ;;  %14376 = vst [vmem:[#allocation173_spill] sm:$0xff] %v10726_v48  ;;  %v3424_v45 = vrot.slane %v3420_v20, %v6175_v59  ;;  %v3428_v24 = vrot.slane %v3420_v20, %v6181_v62  ;;  %v3456_v4 = vrot.slane %v3452_v55, %v6175_v59  ;;  %vm3483_vm10 = vcmp.eq.s32.totalorder %v6171_v57, 90  ;;  %v14392_v20 = vld [vmem:[#allocation42_spill] sm:$0xff] }
 0x2e5   : > { %14379 = vst [vmem:[#allocation85_spill] sm:$0xff] %v10732_v41  ;;  %14380 = vst [vmem:[#allocation86_spill] sm:$0xff] %v10734_v39  ;;  %v3460_v40 = vrot.slane %v3452_v55, %v6181_v62  ;;  %v4814_v53 = vsel %vm14381_vm2, %v4810_v6, %v1489_v50  ;;  %v4813_v26 = vsel %vm14382_vm9, %v4809_v47, %v1466_v8  ;;  %vm3515_vm13 = vcmp.eq.s32.totalorder %v6171_v57, 91  ;;  %v14391_v47 = vld [vmem:[#allocation87_spill] sm:$0xff]  ;;  %v14406_v6 = vld [vmem:[#allocation89_spill] sm:$0xff] }
 0x2e6   : > { %vm10746_vm11 = vcmp.eq.s32.totalorder %v3424_v45, 1  ;;  %vm10750_vm5 = vcmp.eq.s32.totalorder %v3428_v24, 1  ;;  %vm10754_vm8 = vcmp.eq.s32.totalorder %v3456_v4, 1  ;;  %2041 = vmax.xlane.f32.xlu1 %v14391_v47  ;;  %2038 = vmax.xlane.f32.xlu0 %v14392_v20  ;;  %v1495_v24 = vpop.xlane.xlu0 %1494  ;;  %vm14395_vm9 = vmmov %vm14381_vm2  ;;  %v3516_v60 = vsel %vm3515_vm13, 1, %v13748_v29 }
 0x2e7   : > { %vm10758_vm7 = vcmp.eq.s32.totalorder %v3460_v40, 1  ;;  %v3433_v55 = vsel %vm10746_vm11, %v6615_v33, -inf  ;;  %v3434_v50 = vsel %vm10750_vm5, %v6631_v0, -inf  ;;  %v3431_v8 = vsel %vm10746_vm11, %v6545_v27, -inf  ;;  %v1492_v4 = vpop.xlane.xlu1 %1491 }
 0x2e8   : > { %v3432_v45 = vsel %vm10750_vm5, %v6571_v12, -inf  ;;  %v10776_v40 = vmax.f32 %v3433_v55, %v3434_v50  ;;  %v3437_v20 = vsel %vm10746_vm11, %v6613_v37, -inf  ;;  %v3438_v39 = vsel %vm10750_vm5, %v6629_v30, -inf }
 0x2e9   : > { %v10778_v47 = vmax.f32 %v3431_v8, %v3432_v45  ;;  %v4816_v41 = vsel %vm14381_vm2, %v4812_v35, %v1495_v24  ;;  %v4815_v48 = vsel %vm14395_vm9, %v4811_v42, %v1492_v4  ;;  %v10788_v21 = vmax.f32 %v3437_v20, %v3438_v39  ;;  %v14397_v39 = vld [vmem:[#allocation43_spill] sm:$0xff] }
 0x2ea   : > { %14393 = vst [vmem:[#allocation87_spill] sm:$0xff] %v10776_v40  ;;  %v3435_v55 = vsel %vm10746_vm11, %v6547_v2, -inf  ;;  %v3436_v50 = vsel %vm10750_vm5, %v6573_v25, -inf  ;;  %v3465_v8 = vsel %vm10754_vm8, %v6615_v33, -inf  ;;  %v3466_v35 = vsel %vm10758_vm7, %v6631_v0, -inf  ;;  %2067 = vmax.xlane.f32.xlu1 %v14397_v39  ;;  %2064 = vmax.xlane.f32.xlu0 %v14398_v9  ;;  %v1521_v20 = vpop.xlane.xlu0 %1520  ;;  %vm14403_vm5 = vmmov %vm14381_vm2 }
 0x2eb   : > { %14394 = vst [vmem:[#allocation42_spill] sm:$0xff] %v10778_v47  ;;  %14396 = vst [vmem:[#allocation174_spill] sm:$0xff] %v10788_v21  ;;  %v3463_v42 = vsel %vm10754_vm8, %v6545_v27, -inf  ;;  %v10807_v45 = vmax.f32 %v3435_v55, %v3436_v50  ;;  %v10809_v31 = vmax.f32 %v3465_v8, %v3466_v35  ;;  %v3464_v24 = vsel %vm10758_vm7, %v6571_v12, -inf  ;;  %v1498_v21 = vpop.xlane.xlu1 %1497 }
 0x2ec   : > { %v3469_v4 = vsel %vm10754_vm8, %v6613_v37, -inf  ;;  %v10817_v47 = vmax.f32 %v3463_v42, %v3464_v24  ;;  %v3470_v39 = vsel %vm10758_vm7, %v6629_v30, -inf  ;;  %v3467_v55 = vsel %vm10754_vm8, %v6547_v2, -inf }
 0x2ed   : > { %14399 = vst [vmem:[#allocation43_spill] sm:$0xff] %v10807_v45  ;;  %14400 = vst [vmem:[#allocation88_spill] sm:$0xff] %v10809_v31  ;;  %v3468_v50 = vsel %vm10758_vm7, %v6573_v25, -inf  ;;  %vm14402_vm11 = vcmask 97280   ;;  %v4817_v35 = vsel %vm14403_vm5, %v4813_v26, %v1498_v21  ;;  %v10830_v9 = vmax.f32 %v3469_v4, %v3470_v39 }
 0x2ee   : > { %14401 = vst [vmem:[#allocation175_spill] sm:$0xff] %v10817_v47  ;;  %v4818_v8 = vsel %vm14402_vm11, %v4814_v53, %v1521_v20  ;;  %v10832_v42 = vmax.f32 %v3467_v55, %v3468_v50  ;;  %v3484_v24 = vsel %vm3483_vm10, 1, %v13748_v29  ;;  %vm3547_vm8 = vcmp.eq.s32.totalorder %v6171_v57, 92  ;;  %2073 = vmax.xlane.f32.xlu1 %v14406_v6  ;;  %v14407_v53 = vld [vmem:[#allocation90_spill] sm:$0xff]  ;;  %v1527_v39 = vpop.xlane.xlu0 %1526  ;;  %vm14408_vm10 = vmmov %vm14402_vm11 }
 0x2ef   : > { %14404 = vst [vmem:[#allocation176_spill] sm:$0xff] %v10830_v9  ;;  %vm3579_vm7 = vcmp.eq.s32.totalorder %v6171_v57, 93  ;;  %2070 = vmax.xlane.f32.xlu0 %v14407_v53  ;;  %v3488_v21 = vrot.slane %v3484_v24, %v6175_v59  ;;  %v3492_v26 = vrot.slane %v3484_v24, %v6181_v62  ;;  %v3520_v4 = vrot.slane %v3516_v60, %v6175_v59  ;;  %v1524_v55 = vpop.xlane.xlu1 %1523  ;;  %vm14409_vm13 = vmmov %vm14408_vm10 }
 0x2f0   : > { %14405 = vst [vmem:[#allocation177_spill] sm:$0xff] %v10832_v42  ;;  %v3548_v20 = vsel %vm3547_vm8, 1, %v13748_v29  ;;  %v3524_v50 = vrot.slane %v3516_v60, %v6181_v62  ;;  %v10852_v6 = vsel %vm3579_vm7, 1, %v13748_v29  ;;  %v4820_v53 = vsel %vm14408_vm10, %v4816_v41, %v1527_v39  ;;  %vm14417_vm5 = vmmov %vm14408_vm10 }
 0x2f1   : > { %v3552_v42 = vrot.slane %v3548_v20, %v6175_v59  ;;  %v3556_v9 = vrot.slane %v3548_v20, %v6181_v62  ;;  %v4819_v47 = vsel %vm14409_vm13, %v4815_v48, %v1524_v55  ;;  %vm10856_vm2 = vcmp.eq.s32.totalorder %v3488_v21, 1 }
 0x2f2   : > { %vm10860_vm9 = vcmp.eq.s32.totalorder %v3492_v26, 1  ;;  %v3497_v60 = vsel %vm10856_vm2, %v6615_v33, -inf  ;;  %v3495_v41 = vsel %vm10856_vm2, %v6545_v27, -inf  ;;  %2099 = vmax.xlane.f32.xlu1 %v8712_v61  ;;  %v3501_v39 = vsel %vm10856_vm2, %v6613_v37, -inf  ;;  %v1553_v45 = vpop.xlane.xlu0 %1552 }
 0x2f3   : > { %v3498_v20 = vsel %vm10860_vm9, %v6631_v0, -inf  ;;  %v3496_v48 = vsel %vm10860_vm9, %v6571_v12, -inf  ;;  %2096 = vmax.xlane.f32.xlu0 %v8714_v3  ;;  %v3502_v55 = vsel %vm10860_vm9, %v6629_v30, -inf  ;;  %v1530_v40 = vpop.xlane.xlu1 %1529  ;;  %v3499_v61 = vsel %vm10856_vm2, %v6547_v2, -inf }
 0x2f4   : > { %v10878_v21 = vmax.f32 %v3497_v60, %v3498_v20  ;;  %v10880_v26 = vmax.f32 %v3495_v41, %v3496_v48  ;;  %v10888_v32 = vmax.f32 %v3501_v39, %v3502_v55  ;;  %v3500_v3 = vsel %vm10860_vm9, %v6573_v25, -inf  ;;  %v14430_v39 = vld [vmem:[#allocation92_spill] sm:$0xff] }
 0x2f5   : > { %vm10896_vm11 = vcmp.eq.s32.totalorder %v3520_v4, 1  ;;  %v4822_v20 = vsel %vm4759_vm0, %v4818_v8, %v1553_v45  ;;  %v4821_v41 = vsel %vm14417_vm5, %v4817_v35, %v1530_v40  ;;  %v10902_v48 = vmax.f32 %v3499_v61, %v3500_v3 }
 0x2f6   : > { %14414 = vst [vmem:[#allocation89_spill] sm:$0xff] %v10888_v32  ;;  %vm10904_vm8 = vcmp.eq.s32.totalorder %v3524_v50, 1  ;;  %v3529_v24 = vsel %vm10896_vm11, %v6615_v33, -inf  ;;  %v3527_v45 = vsel %vm10896_vm11, %v6545_v27, -inf  ;;  %2105 = vmax.xlane.f32.xlu1 %v8716_v17  ;;  %v3533_v4 = vsel %vm10896_vm11, %v6613_v37, -inf  ;;  %v1559_v55 = vpop.xlane.xlu0 %1558 }
 0x2f7   : > { %14418 = vst [vmem:[#allocation90_spill] sm:$0xff] %v10902_v48  ;;  %v3530_v31 = vsel %vm10904_vm8, %v6631_v0, -inf  ;;  %v3528_v40 = vsel %vm10904_vm8, %v6571_v12, -inf  ;;  %2102 = vmax.xlane.f32.xlu0 %v8721_v5  ;;  %v3534_v50 = vsel %vm10904_vm8, %v6629_v30, -inf  ;;  %v1556_v61 = vpop.xlane.xlu1 %1555  ;;  %v3531_v5 = vsel %vm10896_vm11, %v6547_v2, -inf }
 0x2f8   : > { %v10922_v8 = vmax.f32 %v3529_v24, %v3530_v31  ;;  %v10924_v35 = vmax.f32 %v3527_v45, %v3528_v40  ;;  %v10932_v3 = vmax.f32 %v3533_v4, %v3534_v50  ;;  %v3532_v17 = vsel %vm10904_vm8, %v6573_v25, -inf  ;;  %v14437_v24 = vld [vmem:[#allocation45_spill] sm:$0xff] }
 0x2f9   : > { %vm10940_vm7 = vcmp.eq.s32.totalorder %v3552_v42, 1  ;;  %v4824_v31 = vsel %vm4759_vm0, %v4820_v53, %v1559_v55  ;;  %v4823_v45 = vsel %vm4759_vm0, %v4819_v47, %v1556_v61  ;;  %v10946_v40 = vmax.f32 %v3531_v5, %v3532_v17 }
 0x2fa   : > { %14421 = vst [vmem:[#allocation178_spill] sm:$0xff] %v10922_v8  ;;  %14422 = vst [vmem:[#allocation179_spill] sm:$0xff] %v10924_v35  ;;  %vm10948_vm10 = vcmp.eq.s32.totalorder %v3556_v9, 1  ;;  %v3561_v60 = vsel %vm10940_vm7, %v6615_v33, -inf  ;;  %v3559_v53 = vsel %vm10940_vm7, %v6545_v27, -inf  ;;  %v14429_v9 = vld [vmem:[#allocation91_spill] sm:$0xff]  ;;  %v1585_v17 = vpop.xlane.xlu0 %1584 }
 0x2fb   : > { %14423 = vst [vmem:[#allocation180_spill] sm:$0xff] %v10932_v3  ;;  %14426 = vst [vmem:[#allocation181_spill] sm:$0xff] %v10946_v40  ;;  %v3562_v42 = vsel %vm10948_vm10, %v6631_v0, -inf  ;;  %v3560_v47 = vsel %vm10948_vm10, %v6571_v12, -inf  ;;  %2131 = vmax.xlane.f32.xlu1 %v14429_v9  ;;  %2128 = vmax.xlane.f32.xlu0 %v14430_v39  ;;  %v3565_v61 = vsel %vm10940_vm7, %v6613_v37, -inf  ;;  %v3566_v5 = vsel %vm10948_vm10, %v6629_v30, -inf  ;;  %v1562_v40 = vpop.xlane.xlu1 %1561 }
 0x2fc   : > { %v10966_v50 = vmax.f32 %v3561_v60, %v3562_v42  ;;  %v10968_v55 = vmax.f32 %v3559_v53, %v3560_v47  ;;  %v10976_v3 = vmax.f32 %v3565_v61, %v3566_v5  ;;  %v3563_v9 = vsel %vm10940_vm7, %v6547_v2, -inf  ;;  %v14444_v5 = vld [vmem:[#allocation93_spill] sm:$0xff] }
 0x2fd   : > { %v3564_v60 = vsel %vm10948_vm10, %v6573_v25, -inf  ;;  %v3584_v42 = vrot.slane %v10852_v6, %v6175_v59  ;;  %v4826_v53 = vsel %vm4764_vm4, %v4822_v20, %v1585_v17  ;;  %v4825_v47 = vsel %vm4759_vm0, %v4821_v41, %v1562_v40  ;;  %v14438_v20 = vld [vmem:[#allocation46_spill] sm:$0xff] }
 0x2fe   : > { %14431 = vst [vmem:[#allocation91_spill] sm:$0xff] %v10966_v50  ;;  %14432 = vst [vmem:[#allocation92_spill] sm:$0xff] %v10968_v55  ;;  %v10988_v39 = vmax.f32 %v3563_v9, %v3564_v60  ;;  %v3588_v61 = vrot.slane %v10852_v6, %v6181_v62  ;;  %vm3611_vm2 = vcmp.eq.s32.totalorder %v6171_v57, 94  ;;  %vm3643_vm9 = vcmp.eq.s32.totalorder %v6171_v57, 95  ;;  %v1591_v17 = vpop.xlane.xlu0 %1590 }
 0x2ff   : > { %14433 = vst [vmem:[#allocation182_spill] sm:$0xff] %v10976_v3  ;;  %vm10992_vm13 = vcmp.eq.s32.totalorder %v3584_v42, 1  ;;  %vm3675_vm11 = vcmp.eq.s32.totalorder %v6171_v57, 96  ;;  %2137 = vmax.xlane.f32.xlu1 %v14437_v24  ;;  %2134 = vmax.xlane.f32.xlu0 %v14438_v20  ;;  %v1588_v9 = vpop.xlane.xlu1 %1587  ;;  %v4828_v20 = vsel %vm4764_vm4, %v4824_v31, %v1591_v17  ;;  %v3612_v8 = vsel %vm3611_vm2, 1, %v13748_v29 }
 0x300   : > { %14434 = vst [vmem:[#allocation183_spill] sm:$0xff] %v10988_v39  ;;  %vm11001_vm5 = vcmp.eq.s32.totalorder %v3588_v61, 1  ;;  %v3593_v6 = vsel %vm10992_vm13, %v6615_v33, -inf  ;;  %v3591_v40 = vsel %vm10992_vm13, %v6545_v27, -inf  ;;  %v3597_v4 = vsel %vm10992_vm13, %v6613_v37, -inf }
 0x301   : > { %v3594_v60 = vsel %vm11001_vm5, %v6631_v0, -inf  ;;  %v3592_v42 = vsel %vm11001_vm5, %v6571_v12, -inf  ;;  %v3598_v61 = vsel %vm11001_vm5, %v6629_v30, -inf  ;;  %v3595_v24 = vsel %vm10992_vm13, %v6547_v2, -inf }
 0x302   : > { %v4827_v39 = vsel %vm4764_vm4, %v4823_v45, %v1588_v9  ;;  %v11028_v3 = vmax.f32 %v3593_v6, %v3594_v60  ;;  %v11030_v55 = vmax.f32 %v3591_v40, %v3592_v42  ;;  %v11032_v50 = vmax.f32 %v3597_v4, %v3598_v61  ;;  %v14445_v45 = vld [vmem:[#allocation94_spill] sm:$0xff]  ;;  %v1617_v17 = vpop.xlane.xlu0 %1616 }
 0x303   : > { %v3596_v35 = vsel %vm11001_vm5, %v6573_v25, -inf  ;;  %v3644_v31 = vsel %vm3643_vm9, 1, %v13748_v29  ;;  %2163 = vmax.xlane.f32.xlu1 %v14444_v5  ;;  %2160 = vmax.xlane.f32.xlu0 %v14445_v45  ;;  %v3616_v40 = vrot.slane %v3612_v8, %v6175_v59  ;;  %v3620_v4 = vrot.slane %v3612_v8, %v6181_v62  ;;  %v1594_v9 = vpop.xlane.xlu1 %1593 }
 0x304   : > { %14441 = vst [vmem:[#allocation45_spill] sm:$0xff] %v11028_v3  ;;  %14442 = vst [vmem:[#allocation46_spill] sm:$0xff] %v11030_v55  ;;  %v11045_v6 = vmax.f32 %v3595_v24, %v3596_v35  ;;  %v3676_v41 = vsel %vm3675_vm11, 1, %v13748_v29  ;;  %v3648_v60 = vrot.slane %v3644_v31, %v6175_v59  ;;  %v3652_v42 = vrot.slane %v3644_v31, %v6181_v62 }
 0x305   : > { %14443 = vst [vmem:[#allocation184_spill] sm:$0xff] %v11032_v50  ;;  %v3680_v61 = vrot.slane %v3676_v41, %v6175_v59  ;;  %v3684_v5 = vrot.slane %v3676_v41, %v6181_v62  ;;  %v11057_v35 = vsel %vm4769_vm3, %v4826_v53, %v1617_v17  ;;  %v4829_v24 = vsel %vm4764_vm4, %v4825_v47, %v1594_v9 }
 0x306   : > { %14446 = vst [vmem:[#allocation93_spill] sm:$0xff] %v11045_v6  ;;  %14447 = vst [vmem:[#allocation94_spill] sm:$0xff] %v11057_v35  ;;  %vm11060_vm8 = vcmp.eq.s32.totalorder %v3616_v40, 1  ;;  %vm11064_vm7 = vcmp.eq.s32.totalorder %v3620_v4, 1  ;;  %v14452_v40 = vld [vmem:[#allocation95_spill] sm:$0xff]  ;;  %v14453_v4 = vld [vmem:[#allocation97_spill] sm:$0xff]  ;;  %v1623_v50 = vpop.xlane.xlu0 %1622 }
 0x307   : > { %v3625_v31 = vsel %vm11060_vm8, %v6615_v33, -inf  ;;  %v3626_v41 = vsel %vm11064_vm7, %v6631_v0, -inf  ;;  %v3623_v53 = vsel %vm11060_vm8, %v6545_v27, -inf  ;;  %v3624_v47 = vsel %vm11064_vm7, %v6571_v12, -inf  ;;  %2169 = vmax.xlane.f32.xlu1 %v14452_v40  ;;  %2166 = vmax.xlane.f32.xlu0 %v14453_v4  ;;  %v1620_v55 = vpop.xlane.xlu1 %1619 }
 0x308   : > { %v11082_v17 = vmax.f32 %v3625_v31, %v3626_v41  ;;  %v11084_v9 = vmax.f32 %v3623_v53, %v3624_v47  ;;  %v3629_v35 = vsel %vm11060_vm8, %v6613_v37, -inf  ;;  %v3630_v6 = vsel %vm11064_vm7, %v6629_v30, -inf }
 0x309   : > { %v11092_v3 = vmax.f32 %v3629_v35, %v3630_v6  ;;  %v3627_v40 = vsel %vm11060_vm8, %v6547_v2, -inf  ;;  %v3628_v31 = vsel %vm11064_vm7, %v6573_v25, -inf  ;;  %vm11100_vm10 = vcmp.eq.s32.totalorder %v3648_v60, 1 }
 0x30a   : > { %14454 = vst [vmem:[#allocation95_spill] sm:$0xff] %v11082_v17  ;;  %14455 = vst [vmem:[#allocation97_spill] sm:$0xff] %v11084_v9  ;;  %v11105_v53 = vsel %vm4769_vm3, %v4828_v20, %v1623_v50  ;;  %v11108_v47 = vsel %vm4769_vm3, %v4827_v39, %v1620_v55  ;;  %v11110_v6 = vmax.f32 %v3627_v40, %v3628_v31  ;;  %vm11112_vm13 = vcmp.eq.s32.totalorder %v3652_v42, 1  ;;  %v14464_v39 = vld [vmem:[#allocation47_spill] sm:$0xff]  ;;  %v14465_v20 = vld [vmem:[#allocation98_spill] sm:$0xff]  ;;  %v1649_v31 = vpop.xlane.xlu0 %1648 }
 0x30b   : > { %14456 = vst [vmem:[#allocation185_spill] sm:$0xff] %v11092_v3  ;;  %14459 = vst [vmem:[#allocation186_spill] sm:$0xff] %v11105_v53  ;;  %v3657_v8 = vsel %vm11100_vm10, %v6615_v33, -inf  ;;  %v3658_v60 = vsel %vm11112_vm13, %v6631_v0, -inf  ;;  %v3655_v50 = vsel %vm11100_vm10, %v6545_v27, -inf  ;;  %v3656_v55 = vsel %vm11112_vm13, %v6571_v12, -inf  ;;  %2195 = vmax.xlane.f32.xlu1 %v14464_v39  ;;  %2192 = vmax.xlane.f32.xlu0 %v14465_v20  ;;  %v1626_v53 = vpop.xlane.xlu1 %1625 }
 0x30c   : > { %14460 = vst [vmem:[#allocation187_spill] sm:$0xff] %v11108_v47  ;;  %14461 = vst [vmem:[#allocation188_spill] sm:$0xff] %v11110_v6  ;;  %v11130_v42 = vmax.f32 %v3657_v8, %v3658_v60  ;;  %v11132_v45 = vmax.f32 %v3655_v50, %v3656_v55  ;;  %v3661_v4 = vsel %vm11100_vm10, %v6613_v37, -inf  ;;  %v3662_v40 = vsel %vm11112_vm13, %v6629_v30, -inf }
 0x30d   : > { %v11140_v47 = vmax.f32 %v3661_v4, %v3662_v40  ;;  %v3659_v39 = vsel %vm11100_vm10, %v6547_v2, -inf  ;;  %v3660_v8 = vsel %vm11112_vm13, %v6573_v25, -inf  ;;  %vm11148_vm2 = vcmp.eq.s32.totalorder %v3680_v61, 1  ;;  %v14476_v4 = vld [vmem:[#allocation48_spill] sm:$0xff] }
 0x30e   : > { %14466 = vst [vmem:[#allocation47_spill] sm:$0xff] %v11130_v42  ;;  %14467 = vst [vmem:[#allocation98_spill] sm:$0xff] %v11132_v45  ;;  %v11153_v50 = vsel %vm4769_vm3, %v4829_v24, %v1626_v53  ;;  %v11155_v55 = vmax.f32 %v3659_v39, %v3660_v8  ;;  %vm11157_vm9 = vcmp.eq.s32.totalorder %v3684_v5, 1  ;;  %v3689_v41 = vsel %vm11148_vm2, %v6615_v33, -inf  ;;  %v14475_v53 = vld [vmem:[#allocation99_spill] sm:$0xff]  ;;  %v14493_v42 = vld [vmem:[#allocation49_spill] sm:$0xff] }
 0x30f   : > { %14468 = vst [vmem:[#allocation189_spill] sm:$0xff] %v11140_v47  ;;  %14471 = vst [vmem:[#allocation190_spill] sm:$0xff] %v11153_v50  ;;  %v3690_v61 = vsel %vm11157_vm9, %v6631_v0, -inf  ;;  %v3687_v35 = vsel %vm11148_vm2, %v6545_v27, -inf  ;;  %v3688_v24 = vsel %vm11157_vm9, %v6571_v12, -inf  ;;  %v3693_v5 = vsel %vm11148_vm2, %v6613_v37, -inf  ;;  %2201 = vmax.xlane.f32.xlu1 %v14475_v53  ;;  %2198 = vmax.xlane.f32.xlu0 %v14476_v4  ;;  %v1652_v47 = vpop.xlane.xlu1 %1651 }
 0x310   : > { %14472 = vst [vmem:[#allocation191_spill] sm:$0xff] %v11155_v55  ;;  %v11178_v40 = vmax.f32 %v3689_v41, %v3690_v61  ;;  %v11180_v39 = vmax.f32 %v3687_v35, %v3688_v24  ;;  %v3694_v8 = vsel %vm11157_vm9, %v6629_v30, -inf  ;;  %v3691_v50 = vsel %vm11148_vm2, %v6547_v2, -inf  ;;  %v1655_v55 = vpop.xlane.xlu0 %1654  ;;  %v14481_v4 = vld [vmem:[#allocation101_spill] sm:$0xff] }
 0x311   : > { %v11188_v45 = vmax.f32 %v3693_v5, %v3694_v8  ;;  %v3692_v53 = vsel %vm11157_vm9, %v6573_v25, -inf  ;;  %vm3707_vm11 = vcmp.eq.s32.totalorder %v6171_v57, 97  ;;  %vm3739_vm5 = vcmp.eq.s32.totalorder %v6171_v57, 98  ;;  %v14482_v8 = vld [vmem:[#allocation102_spill] sm:$0xff] }
 0x312   : > { %14477 = vst [vmem:[#allocation99_spill] sm:$0xff] %v11178_v40  ;;  %14478 = vst [vmem:[#allocation48_spill] sm:$0xff] %v11180_v39  ;;  %v11195_v41 = vmax.f32 %v3691_v50, %v3692_v53  ;;  %v3708_v61 = vsel %vm3707_vm11, 1, %v13748_v29  ;;  %v3740_v35 = vsel %vm3739_vm5, 1, %v13748_v29  ;;  %vm3771_vm8 = vcmp.eq.s32.totalorder %v6171_v57, 99  ;;  %v14492_v40 = vld [vmem:[#allocation103_spill] sm:$0xff] }
 0x313   : > { %14479 = vst [vmem:[#allocation192_spill] sm:$0xff] %v11188_v45  ;;  %v3712_v60 = vrot.slane %v3708_v61, %v6175_v59  ;;  %v3716_v24 = vrot.slane %v3708_v61, %v6181_v62  ;;  %v3744_v5 = vrot.slane %v3740_v35, %v6175_v59  ;;  %v3748_v20 = vrot.slane %v3740_v35, %v6181_v62 }
 0x314   : > { %14480 = vst [vmem:[#allocation193_spill] sm:$0xff] %v11195_v41  ;;  %2227 = vmax.xlane.f32.xlu1 %v14481_v4  ;;  %2224 = vmax.xlane.f32.xlu0 %v14482_v8  ;;  %v3772_v50 = vsel %vm3771_vm8, 1, %v13748_v29  ;;  %vm3803_vm7 = vcmp.eq.s32.totalorder %v6171_v57, 100  ;;  %vm3835_vm10 = vcmp.eq.s32.totalorder %v6171_v57, 101  ;;  %vm3867_vm13 = vcmp.eq.s32.totalorder %v6171_v57, 102  ;;  %v1681_v53 = vpop.xlane.xlu0 %1680  ;;  %v1658_v41 = vpop.xlane.xlu1 %1657 }
 0x315   : > { %vm11210_vm2 = vcmp.eq.s32.totalorder %v3712_v60, 1  ;;  %vm11214_vm9 = vcmp.eq.s32.totalorder %v3716_v24, 1  ;;  %vm11218_vm11 = vcmp.eq.s32.totalorder %v3744_v5, 1  ;;  %vm11222_vm5 = vcmp.eq.s32.totalorder %v3748_v20, 1 }
 0x316   : > { %v4834_v45 = vsel %vm4699_vm12, %v1649_v31, %v1681_v53  ;;  %v3721_v60 = vsel %vm11210_vm2, %v6615_v33, -inf  ;;  %v3722_v24 = vsel %vm11214_vm9, %v6631_v0, -inf  ;;  %v3719_v5 = vsel %vm11210_vm2, %v6545_v27, -inf }
 0x317   : > { %v11236_v39 = vmax.f32 %v3721_v60, %v3722_v24  ;;  %v3720_v20 = vsel %vm11214_vm9, %v6571_v12, -inf  ;;  %v3725_v31 = vsel %vm11210_vm2, %v6613_v37, -inf  ;;  %v3726_v53 = vsel %vm11214_vm9, %v6629_v30, -inf }
 0x318   : > { %2233 = vmax.xlane.f32.xlu1 %v14492_v40  ;;  %2230 = vmax.xlane.f32.xlu0 %v14493_v42  ;;  %v11249_v6 = vmax.f32 %v3719_v5, %v3720_v20  ;;  %v11251_v60 = vmax.f32 %v3725_v31, %v3726_v53  ;;  %v3723_v24 = vsel %vm11210_vm2, %v6547_v2, -inf  ;;  %v1687_v3 = vpop.xlane.xlu0 %1686  ;;  %v1684_v9 = vpop.xlane.xlu1 %1683  ;;  %v3753_v42 = vsel %vm11218_vm11, %v6615_v33, -inf }
 0x319   : > { %14491 = vst [vmem:[#allocation101_spill] sm:$0xff] %v11236_v39  ;;  %v3724_v39 = vsel %vm11214_vm9, %v6573_v25, -inf  ;;  %v3754_v40 = vsel %vm11222_vm5, %v6631_v0, -inf  ;;  %v3751_v61 = vsel %vm11218_vm11, %v6545_v27, -inf  ;;  %v4836_v5 = vsel %vm4699_vm12, %v1655_v55, %v1687_v3 }
 0x31a   : > { %14494 = vst [vmem:[#allocation102_spill] sm:$0xff] %v11249_v6  ;;  %14495 = vst [vmem:[#allocation103_spill] sm:$0xff] %v11251_v60  ;;  %v11259_v17 = vmax.f32 %v3723_v24, %v3724_v39  ;;  %v4835_v35 = vsel %vm4699_vm12, %v1652_v47, %v1684_v9  ;;  %v11272_v20 = vmax.f32 %v3753_v42, %v3754_v40  ;;  %v3752_v39 = vsel %vm11222_vm5, %v6571_v12, -inf }
 0x31b   : > { %v11277_v31 = vmax.f32 %v3751_v61, %v3752_v39  ;;  %v3757_v53 = vsel %vm11218_vm11, %v6613_v37, -inf  ;;  %v3758_v24 = vsel %vm11222_vm5, %v6629_v30, -inf  ;;  %v3755_v3 = vsel %vm11218_vm11, %v6547_v2, -inf }
 0x31c   : > { %14496 = vst [vmem:[#allocation49_spill] sm:$0xff] %v11259_v17  ;;  %14497 = vst [vmem:[#allocation194_spill] sm:$0xff] %v11272_v20  ;;  %2259 = vmax.xlane.f32.xlu1 %v8948_v36  ;;  %2256 = vmax.xlane.f32.xlu0 %v8950_v44  ;;  %v11290_v9 = vmax.f32 %v3757_v53, %v3758_v24  ;;  %v3756_v47 = vsel %vm11222_vm5, %v6573_v25, -inf  ;;  %v3776_v55 = vrot.slane %v3772_v50, %v6175_v59  ;;  %v1713_v40 = vpop.xlane.xlu0 %1712  ;;  %v1690_v61 = vpop.xlane.xlu1 %1689 }
 0x31d   : > { %14498 = vst [vmem:[#allocation195_spill] sm:$0xff] %v11277_v31  ;;  %v3780_v42 = vrot.slane %v3772_v50, %v6181_v62  ;;  %v11297_v39 = vmax.f32 %v3755_v3, %v3756_v47  ;;  %v3804_v36 = vsel %vm3803_vm7, 1, %v13748_v29  ;;  %v3836_v44 = vsel %vm3835_vm10, 1, %v13748_v29 }
 0x31e   : > { %14499 = vst [vmem:[#allocation196_spill] sm:$0xff] %v11290_v9  ;;  %v11308_v4 = vsel %vm3867_vm13, 1, %v13748_v29  ;;  %v4838_v8 = vsel %vm4704_vm6, %v4834_v45, %v1713_v40  ;;  %v4837_v50 = vsel %vm4699_vm12, %v1658_v41, %v1690_v61  ;;  %vm11312_vm8 = vcmp.eq.s32.totalorder %v3776_v55, 1  ;;  %v14505_v55 = vld [vmem:[#allocation50_spill] sm:$0xff] }
 0x31f   : > { %14500 = vst [vmem:[#allocation197_spill] sm:$0xff] %v11297_v39  ;;  %vm11316_vm2 = vcmp.eq.s32.totalorder %v3780_v42, 1  ;;  %v3785_v3 = vsel %vm11312_vm8, %v6615_v33, -inf  ;;  %v3783_v45 = vsel %vm11312_vm8, %v6545_v27, -inf  ;;  %v14506_v42 = vld [vmem:[#allocation51_spill] sm:$0xff]  ;;  %v3789_v39 = vsel %vm11312_vm8, %v6613_v37, -inf }
 0x320   : > { %v3786_v47 = vsel %vm11316_vm2, %v6631_v0, -inf  ;;  %v3784_v41 = vsel %vm11316_vm2, %v6571_v12, -inf  ;;  %2265 = vmax.xlane.f32.xlu1 %v14505_v55  ;;  %2262 = vmax.xlane.f32.xlu0 %v14506_v42  ;;  %v3790_v9 = vsel %vm11316_vm2, %v6629_v30, -inf  ;;  %v1719_v31 = vpop.xlane.xlu0 %1718  ;;  %v1716_v20 = vpop.xlane.xlu1 %1715  ;;  %v3787_v55 = vsel %vm11312_vm8, %v6547_v2, -inf }
 0x321   : > { %v11334_v40 = vmax.f32 %v3785_v3, %v3786_v47  ;;  %v11336_v61 = vmax.f32 %v3783_v45, %v3784_v41  ;;  %v11344_v17 = vmax.f32 %v3789_v39, %v3790_v9  ;;  %v3788_v3 = vsel %vm11316_vm2, %v6573_v25, -inf }
 0x322   : > { %v3808_v47 = vrot.slane %v3804_v36, %v6175_v59  ;;  %v4840_v45 = vsel %vm4704_vm6, %v4836_v5, %v1719_v31  ;;  %v4839_v41 = vsel %vm4704_vm6, %v4835_v35, %v1716_v20  ;;  %v11355_v42 = vmax.f32 %v3787_v55, %v3788_v3  ;;  %v14514_v5 = vld [vmem:[#allocation105_spill] sm:$0xff] }
 0x323   : > { %14507 = vst [vmem:[#allocation50_spill] sm:$0xff] %v11334_v40  ;;  %14508 = vst [vmem:[#allocation51_spill] sm:$0xff] %v11336_v61  ;;  %v3812_v61 = vrot.slane %v3804_v36, %v6181_v62  ;;  %v3840_v39 = vrot.slane %v3836_v44, %v6175_v59  ;;  %v3844_v53 = vrot.slane %v3836_v44, %v6181_v62  ;;  %vm3899_vm8 = vcmp.eq.s32.totalorder %v6171_v57, 103 }
 0x324   : > { %14509 = vst [vmem:[#allocation198_spill] sm:$0xff] %v11344_v17  ;;  %14510 = vst [vmem:[#allocation199_spill] sm:$0xff] %v11355_v42  ;;  %vm11358_vm7 = vcmp.eq.s32.totalorder %v3808_v47, 1  ;;  %v3872_v24 = vrot.slane %v11308_v4, %v6175_v59  ;;  %v14513_v17 = vld [vmem:[#allocation104_spill] sm:$0xff]  ;;  %2288 = vmax.xlane.f32.xlu0 %v14514_v5  ;;  %v1745_v44 = vpop.xlane.xlu0 %1744  ;;  %vm3931_vm2 = vcmp.eq.s32.totalorder %v6171_v57, 104 }
 0x325   : > { %2291 = vmax.xlane.f32.xlu1 %v14513_v17  ;;  %vm11368_vm10 = vcmp.eq.s32.totalorder %v3812_v61, 1  ;;  %v3817_v20 = vsel %vm11358_vm7, %v6615_v33, -inf  ;;  %v3815_v31 = vsel %vm11358_vm7, %v6545_v27, -inf  ;;  %v3821_v36 = vsel %vm11358_vm7, %v6613_v37, -inf  ;;  %v1722_v17 = vpop.xlane.xlu1 %1721 }
 0x326   : > { %v3818_v61 = vsel %vm11368_vm10, %v6631_v0, -inf  ;;  %v3816_v55 = vsel %vm11368_vm10, %v6571_v12, -inf  ;;  %v3822_v3 = vsel %vm11368_vm10, %v6629_v30, -inf  ;;  %v3819_v47 = vsel %vm11358_vm7, %v6547_v2, -inf }
 0x327   : > { %v4842_v5 = vsel %vm4709_vm15, %v4838_v8, %v1745_v44  ;;  %v4841_v42 = vsel %vm4704_vm6, %v4837_v50, %v1722_v17  ;;  %v11395_v40 = vmax.f32 %v3817_v20, %v3818_v61  ;;  %v11397_v60 = vmax.f32 %v3815_v31, %v3816_v55  ;;  %v14521_v8 = vld [vmem:[#allocation12_spill] sm:$0xff]  ;;  %v14522_v50 = vld [vmem:[#allocation53_spill] sm:$0xff] }
 0x328   : > { %v11399_v6 = vmax.f32 %v3821_v36, %v3822_v3  ;;  %v3820_v48 = vsel %vm11368_vm10, %v6573_v25, -inf  ;;  %vm11404_vm13 = vcmp.eq.s32.totalorder %v3840_v39, 1  ;;  %vm11408_vm9 = vcmp.eq.s32.totalorder %v3844_v53, 1  ;;  %2294 = vmax.xlane.f32.xlu0 %v14522_v50  ;;  %v1751_v35 = vpop.xlane.xlu0 %1750 }
 0x329   : > { %2297 = vmax.xlane.f32.xlu1 %v14521_v8  ;;  %v11414_v20 = vmax.f32 %v3819_v47, %v3820_v48  ;;  %v3849_v31 = vsel %vm11404_vm13, %v6615_v33, -inf  ;;  %v3850_v39 = vsel %vm11408_vm9, %v6631_v0, -inf  ;;  %v3847_v53 = vsel %vm11404_vm13, %v6545_v27, -inf  ;;  %v1748_v36 = vpop.xlane.xlu1 %1747 }
 0x32a   : > { %v11425_v44 = vmax.f32 %v3849_v31, %v3850_v39  ;;  %v3848_v48 = vsel %vm11408_vm9, %v6571_v12, -inf  ;;  %v3853_v17 = vsel %vm11404_vm13, %v6613_v37, -inf  ;;  %v3854_v61 = vsel %vm11408_vm9, %v6629_v30, -inf }
 0x32b   : > { %14523 = vst [vmem:[#allocation104_spill] sm:$0xff] %v11414_v20  ;;  %v4844_v55 = vsel %vm4709_vm15, %v4840_v45, %v1751_v35  ;;  %v4843_v3 = vsel %vm4709_vm15, %v4839_v41, %v1748_v36  ;;  %v11438_v47 = vmax.f32 %v3847_v53, %v3848_v48  ;;  %v11440_v8 = vmax.f32 %v3853_v17, %v3854_v61  ;;  %v14529_v45 = vld [vmem:[#allocation55_spill] sm:$0xff]  ;;  %v14530_v41 = vld [vmem:[#allocation106_spill] sm:$0xff] }
 0x32c   : > { %14524 = vst [vmem:[#allocation105_spill] sm:$0xff] %v11425_v44  ;;  %v3851_v50 = vsel %vm11404_vm13, %v6547_v2, -inf  ;;  %v3852_v31 = vsel %vm11408_vm9, %v6573_v25, -inf  ;;  %v3876_v39 = vrot.slane %v11308_v4, %v6181_v62  ;;  %vm11450_vm11 = vcmp.eq.s32.totalorder %v3872_v24, 1  ;;  %2320 = vmax.xlane.f32.xlu0 %v14530_v41  ;;  %v11464_v4 = vpop.xlane.xlu0 %627  ;;  %v14538_v41 = vld [vmem:[#allocation108_spill] sm:$0xff] }
 0x32d   : > { %14525 = vst [vmem:[#allocation12_spill] sm:$0xff] %v11438_v47  ;;  %14526 = vst [vmem:[#allocation53_spill] sm:$0xff] %v11440_v8  ;;  %2323 = vmax.xlane.f32.xlu1 %v14529_v45  ;;  %v11456_v53 = vmax.f32 %v3851_v50, %v3852_v31  ;;  %v3881_v32 = vsel %vm11450_vm11, %v6615_v33, -inf  ;;  %v3879_v9 = vsel %vm11450_vm11, %v6545_v27, -inf  ;;  %v1754_v35 = vpop.xlane.xlu1 %1753  ;;  %v3885_v36 = vsel %vm11450_vm11, %v6613_v37, -inf  ;;  %v14537_v45 = vld [vmem:[#allocation107_spill] sm:$0xff] }
 0x32e   : > { %14532 = vst [vmem:[#allocation106_spill] sm:$0xff] %v11464_v4  ;;  %vm11466_vm5 = vcmp.eq.s32.totalorder %v3876_v39, 1  ;;  %v4845_v48 = vsel %vm4709_vm15, %v4841_v42, %v1754_v35  ;;  %v3883_v50 = vsel %vm11450_vm11, %v6547_v2, -inf  ;;  %vm3963_vm9 = vcmp.eq.s32.totalorder %v6171_v57, 105 }
 0x32f   : > { %14531 = vst [vmem:[#allocation55_spill] sm:$0xff] %v11456_v53  ;;  %v3882_v17 = vsel %vm11466_vm5, %v6631_v0, -inf  ;;  %v3880_v61 = vsel %vm11466_vm5, %v6571_v12, -inf  ;;  %v3886_v42 = vsel %vm11466_vm5, %v6629_v30, -inf  ;;  %v3884_v44 = vsel %vm11466_vm5, %v6573_v25, -inf }
 0x330   : > { %v11484_v31 = vmax.f32 %v3881_v32, %v3882_v17  ;;  %v11486_v39 = vmax.f32 %v3879_v9, %v3880_v61  ;;  %2326 = vmax.xlane.f32.xlu0 %v14538_v41  ;;  %v11494_v35 = vmax.f32 %v3885_v36, %v3886_v42  ;;  %v3900_v32 = vsel %vm3899_vm8, 1, %v13748_v29  ;;  %v1777_v17 = vpop.xlane.xlu0 %1776 }
 0x331   : > { %2329 = vmax.xlane.f32.xlu1 %v14537_v45  ;;  %v1780_v9 = vpop.xlane.xlu1 %1779  ;;  %v11500_v61 = vmax.f32 %v3883_v50, %v3884_v44  ;;  %v3904_v4 = vrot.slane %v3900_v32, %v6175_v59  ;;  %v4846_v41 = vsel %vm13573_vm1, %v4842_v5, %v1777_v17  ;;  %v3932_v36 = vsel %vm3931_vm2, 1, %v13748_v29  ;;  %v14545_v50 = vld [vmem:[#allocation13_spill] sm:$0xff] }
 0x332   : > { %14535 = vst [vmem:[#allocation200_spill] sm:$0xff] %v11484_v31  ;;  %14536 = vst [vmem:[#allocation201_spill] sm:$0xff] %v11486_v39  ;;  %v3908_v39 = vrot.slane %v3900_v32, %v6181_v62  ;;  %v4847_v45 = vsel %vm13573_vm1, %v4843_v3, %v1780_v9  ;;  %v14546_v44 = vld [vmem:[#allocation109_spill] sm:$0xff]  ;;  %vm3995_vm11 = vcmp.eq.s32.totalorder %v6171_v57, 106  ;;  %vm4027_vm8 = vcmp.eq.s32.totalorder %v6171_v57, 107 }
 0x333   : > { %14539 = vst [vmem:[#allocation107_spill] sm:$0xff] %v11494_v35  ;;  %14540 = vst [vmem:[#allocation108_spill] sm:$0xff] %v11500_v61  ;;  %vm11507_vm7 = vcmp.eq.s32.totalorder %v3904_v4, 1 }
 0x334   : > { %vm11511_vm10 = vcmp.eq.s32.totalorder %v3908_v39, 1  ;;  %2352 = vmax.xlane.f32.xlu0 %v14546_v44  ;;  %v3913_v3 = vsel %vm11507_vm7, %v6615_v33, -inf  ;;  %v3911_v4 = vsel %vm11507_vm7, %v6545_v27, -inf  ;;  %v3936_v39 = vrot.slane %v3932_v36, %v6175_v59  ;;  %v1783_v9 = vpop.xlane.xlu0 %1782 }
 0x335   : > { %2355 = vmax.xlane.f32.xlu1 %v14545_v50  ;;  %v3914_v5 = vsel %vm11511_vm10, %v6631_v0, -inf  ;;  %v1786_v32 = vpop.xlane.xlu1 %1785  ;;  %v3912_v50 = vsel %vm11511_vm10, %v6571_v12, -inf  ;;  %v3917_v44 = vsel %vm11507_vm7, %v6613_v37, -inf  ;;  %v4848_v35 = vsel %vm13573_vm1, %v4844_v55, %v1783_v9  ;;  %v14551_v55 = vld [vmem:[#allocation28_spill] sm:$0xff] }
 0x336   : > { %v11527_v17 = vmax.f32 %v3913_v3, %v3914_v5  ;;  %v4849_v61 = vsel %vm13573_vm1, %v4845_v48, %v1786_v32  ;;  %v11537_v31 = vmax.f32 %v3911_v4, %v3912_v50  ;;  %v3918_v53 = vsel %vm11511_vm10, %v6629_v30, -inf  ;;  %v14550_v32 = vld [vmem:[#allocation110_spill] sm:$0xff] }
 0x337   : > { %v11542_v3 = vmax.f32 %v3917_v44, %v3918_v53  ;;  %v3915_v5 = vsel %vm11507_vm7, %v6547_v2, -inf  ;;  %v3940_v48 = vrot.slane %v3932_v36, %v6181_v62  ;;  %vm11555_vm13 = vcmp.eq.s32.totalorder %v3936_v39, 1 }
 0x338   : > { %14547 = vst [vmem:[#allocation13_spill] sm:$0xff] %v11527_v17  ;;  %14548 = vst [vmem:[#allocation109_spill] sm:$0xff] %v11537_v31  ;;  %v3916_v17 = vsel %vm11511_vm10, %v6573_v25, -inf  ;;  %2358 = vmax.xlane.f32.xlu0 %v14551_v55  ;;  %v1809_v42 = vpop.xlane.xlu0 %1808  ;;  %v3945_v36 = vsel %vm11555_vm13, %v6615_v33, -inf  ;;  %v3943_v39 = vsel %vm11555_vm13, %v6545_v27, -inf }
 0x339   : > { %14549 = vst [vmem:[#allocation202_spill] sm:$0xff] %v11542_v3  ;;  %2361 = vmax.xlane.f32.xlu1 %v14550_v32  ;;  %v11553_v4 = vmax.f32 %v3915_v5, %v3916_v17  ;;  %v1812_v53 = vpop.xlane.xlu1 %1811  ;;  %vm11561_vm5 = vcmp.eq.s32.totalorder %v3940_v48, 1  ;;  %v3949_v17 = vsel %vm11555_vm13, %v6613_v37, -inf  ;;  %v4850_v44 = vsel %vm13572_vm14, %v4846_v41, %v1809_v42  ;;  %v14559_v41 = vld [vmem:[#allocation112_spill] sm:$0xff] }
 0x33a   : > { %v4851_v50 = vsel %vm13572_vm14, %v4847_v45, %v1812_v53  ;;  %v3946_v5 = vsel %vm11561_vm5, %v6631_v0, -inf  ;;  %v3944_v48 = vsel %vm11561_vm5, %v6571_v12, -inf  ;;  %v3947_v45 = vsel %vm11555_vm13, %v6547_v2, -inf  ;;  %v14560_v53 = vld [vmem:[#allocation113_spill] sm:$0xff] }
 0x33b   : > { %14552 = vst [vmem:[#allocation110_spill] sm:$0xff] %v11553_v4  ;;  %v11582_v32 = vmax.f32 %v3945_v36, %v3946_v5  ;;  %v11584_v55 = vmax.f32 %v3943_v39, %v3944_v48  ;;  %v3950_v4 = vsel %vm11561_vm5, %v6629_v30, -inf  ;;  %v3948_v36 = vsel %vm11561_vm5, %v6573_v25, -inf }
 0x33c   : > { %2384 = vmax.xlane.f32.xlu0 %v14560_v53  ;;  %v11594_v42 = vmax.f32 %v3949_v17, %v3950_v4  ;;  %v3964_v39 = vsel %vm3963_vm9, 1, %v13748_v29  ;;  %v3996_v5 = vsel %vm3995_vm11, 1, %v13748_v29  ;;  %v1815_v48 = vpop.xlane.xlu0 %1814  ;;  %vm14573_vm13 = vcmask 48128  }
 0x33d   : > { %14557 = vst [vmem:[#allocation28_spill] sm:$0xff] %v11582_v32  ;;  %14558 = vst [vmem:[#allocation203_spill] sm:$0xff] %v11584_v55  ;;  %2387 = vmax.xlane.f32.xlu1 %v14559_v41  ;;  %v1818_v9 = vpop.xlane.xlu1 %1817  ;;  %v11605_v55 = vmax.f32 %v3947_v45, %v3948_v36  ;;  %v3968_v41 = vrot.slane %v3964_v39, %v6175_v59  ;;  %v3972_v4 = vrot.slane %v3964_v39, %v6181_v62  ;;  %v14569_v39 = vld [vmem:[#allocation114_spill] sm:$0xff]  ;;  %v14579_v32 = vld [vmem:[#allocation115_spill] sm:$0xff] }
 0x33e   : > { %14561 = vst [vmem:[#allocation112_spill] sm:$0xff] %v11594_v42  ;;  %v4000_v17 = vrot.slane %v3996_v5, %v6175_v59  ;;  %v4853_v24 = vsel %vm13572_vm14, %v4849_v61, %v1818_v9  ;;  %v4852_v53 = vsel %vm13572_vm14, %v4848_v35, %v1815_v48  ;;  %v4004_v42 = vrot.slane %v3996_v5, %v6181_v62  ;;  %v14570_v35 = vld [vmem:[#allocation29_spill] sm:$0xff]  ;;  %vm14574_vm9 = vmmov %vm14573_vm13  ;;  %v14587_v36 = vld [vmem:[#allocation56_spill] sm:$0xff] }
 0x33f   : > { %14562 = vst [vmem:[#allocation113_spill] sm:$0xff] %v11605_v55  ;;  %vm11614_vm2 = vcmp.eq.s32.totalorder %v3968_v41, 1  ;;  %vm11618_vm7 = vcmp.eq.s32.totalorder %v3972_v4, 1  ;;  %v4028_v61 = vsel %vm4027_vm8, 1, %v13748_v29  ;;  %vm14583_vm5 = vmmov %vm14574_vm9 }
 0x340   : > { %vm11622_vm10 = vcmp.eq.s32.totalorder %v4000_v17, 1  ;;  %2390 = vmax.xlane.f32.xlu0 %v14570_v35  ;;  %v3977_v5 = vsel %vm11614_vm2, %v6615_v33, -inf  ;;  %v3978_v9 = vsel %vm11618_vm7, %v6631_v0, -inf  ;;  %v3975_v48 = vsel %vm11614_vm2, %v6545_v27, -inf  ;;  %v1841_v17 = vpop.xlane.xlu0 %1840  ;;  %vm14584_vm8 = vmmov %vm14583_vm5 }
 0x341   : > { %2393 = vmax.xlane.f32.xlu1 %v14569_v39  ;;  %v3976_v41 = vsel %vm11618_vm7, %v6571_v12, -inf  ;;  %v1844_v4 = vpop.xlane.xlu1 %1843  ;;  %v11641_v39 = vmax.f32 %v3977_v5, %v3978_v9  ;;  %v3981_v55 = vsel %vm11614_vm2, %v6613_v37, -inf  ;;  %v3982_v3 = vsel %vm11618_vm7, %v6629_v30, -inf }
 0x342   : > { %v11643_v35 = vmax.f32 %v3975_v48, %v3976_v41  ;;  %v4855_v31 = vsel %vm14573_vm13, %v4851_v50, %v1844_v4  ;;  %v4854_v8 = vsel %vm14574_vm9, %v4850_v44, %v1841_v17  ;;  %v11653_v47 = vmax.f32 %v3981_v55, %v3982_v3  ;;  %v14578_v44 = vld [vmem:[#allocation14_spill] sm:$0xff] }
 0x343   : > { %14571 = vst [vmem:[#allocation114_spill] sm:$0xff] %v11641_v39  ;;  %v3979_v5 = vsel %vm11614_vm2, %v6547_v2, -inf  ;;  %v3980_v9 = vsel %vm11618_vm7, %v6573_v25, -inf  ;;  %vm11661_vm11 = vcmp.eq.s32.totalorder %v4004_v42, 1  ;;  %v4009_v50 = vsel %vm11622_vm10, %v6615_v33, -inf }
 0x344   : > { %14572 = vst [vmem:[#allocation29_spill] sm:$0xff] %v11643_v35  ;;  %14575 = vst [vmem:[#allocation204_spill] sm:$0xff] %v11653_v47  ;;  %v4007_v3 = vsel %vm11622_vm10, %v6545_v27, -inf  ;;  %2416 = vmax.xlane.f32.xlu0 %v14579_v32  ;;  %v11673_v55 = vmax.f32 %v3979_v5, %v3980_v9  ;;  %v4010_v42 = vsel %vm11661_vm11, %v6631_v0, -inf  ;;  %v4008_v45 = vsel %vm11661_vm11, %v6571_v12, -inf  ;;  %v1847_v17 = vpop.xlane.xlu0 %1846 }
 0x345   : > { %2419 = vmax.xlane.f32.xlu1 %v14578_v44  ;;  %v4013_v41 = vsel %vm11622_vm10, %v6613_v37, -inf  ;;  %v1850_v4 = vpop.xlane.xlu1 %1849  ;;  %v11684_v47 = vmax.f32 %v4009_v50, %v4010_v42  ;;  %v11686_v44 = vmax.f32 %v4007_v3, %v4008_v45  ;;  %v4014_v5 = vsel %vm11661_vm11, %v6629_v30, -inf }
 0x346   : > { %14580 = vst [vmem:[#allocation14_spill] sm:$0xff] %v11673_v55  ;;  %v4011_v9 = vsel %vm11622_vm10, %v6547_v2, -inf  ;;  %v4857_v32 = vsel %vm14583_vm5, %v4853_v24, %v1850_v4  ;;  %v4856_v55 = vsel %vm14584_vm8, %v4852_v53, %v1847_v17  ;;  %v11696_v35 = vmax.f32 %v4013_v41, %v4014_v5 }
 0x347   : > { %14581 = vst [vmem:[#allocation115_spill] sm:$0xff] %v11684_v47  ;;  %14582 = vst [vmem:[#allocation205_spill] sm:$0xff] %v11686_v44  ;;  %v4012_v50 = vsel %vm11661_vm11, %v6573_v25, -inf  ;;  %v4032_v42 = vrot.slane %v4028_v61, %v6175_v59  ;;  %v4036_v45 = vrot.slane %v4028_v61, %v6181_v62  ;;  %vm4059_vm2 = vcmp.eq.s32.totalorder %v6171_v57, 108  ;;  %v14588_v44 = vld [vmem:[#allocation116_spill] sm:$0xff] }
 0x348   : > { %14585 = vst [vmem:[#allocation206_spill] sm:$0xff] %v11696_v35  ;;  %v11701_v3 = vmax.f32 %v4011_v9, %v4012_v50  ;;  %2422 = vmax.xlane.f32.xlu0 %v14588_v44  ;;  %v4060_v24 = vsel %vm4059_vm2, 1, %v13748_v29  ;;  %vm4091_vm7 = vcmp.eq.s32.totalorder %v6171_v57, 109  ;;  %vm4123_vm10 = vcmp.eq.s32.totalorder %v6171_v57, 110  ;;  %v1873_v48 = vpop.xlane.xlu0 %1872 }
 0x349   : > { %2425 = vmax.xlane.f32.xlu1 %v14587_v36  ;;  %vm4155_vm13 = vcmp.eq.s32.totalorder %v6171_v57, 111  ;;  %v1876_v53 = vpop.xlane.xlu1 %1875  ;;  %vm11712_vm9 = vcmp.eq.s32.totalorder %v4032_v42, 1  ;;  %vm11716_vm11 = vcmp.eq.s32.totalorder %v4036_v45, 1  ;;  %v4064_v4 = vrot.slane %v4060_v24, %v6175_v59  ;;  %v14596_v36 = vld [vmem:[#allocation15_spill] sm:$0xff] }
 0x34a   : > { %14586 = vst [vmem:[#allocation207_spill] sm:$0xff] %v11701_v3  ;;  %v4068_v17 = vrot.slane %v4060_v24, %v6181_v62  ;;  %vm14593_vm5 = vcmask 56320   ;;  %v4041_v9 = vsel %vm11712_vm9, %v6615_v33, -inf  ;;  %v4042_v50 = vsel %vm11716_vm11, %v6631_v0, -inf  ;;  %v14597_v24 = vld [vmem:[#allocation57_spill] sm:$0xff] }
 0x34b   : > { %v4859_v44 = vsel %vm14593_vm5, %v4855_v31, %v1876_v53  ;;  %vm14594_vm8 = vmmov %vm14593_vm5  ;;  %v11730_v42 = vmax.f32 %v4041_v9, %v4042_v50  ;;  %v4039_v45 = vsel %vm11712_vm9, %v6545_v27, -inf  ;;  %v4040_v31 = vsel %vm11716_vm11, %v6571_v12, -inf }
 0x34c   : > { %v4858_v5 = vsel %vm14594_vm8, %v4854_v8, %v1873_v48  ;;  %v4045_v8 = vsel %vm11712_vm9, %v6613_v37, -inf  ;;  %2448 = vmax.xlane.f32.xlu0 %v14597_v24  ;;  %v11743_v53 = vmax.f32 %v4039_v45, %v4040_v31  ;;  %v4046_v48 = vsel %vm11716_vm11, %v6629_v30, -inf  ;;  %v1879_v3 = vpop.xlane.xlu0 %1878 }
 0x34d   : > { %14595 = vst [vmem:[#allocation56_spill] sm:$0xff] %v11730_v42  ;;  %2451 = vmax.xlane.f32.xlu1 %v14596_v36  ;;  %v4043_v9 = vsel %vm11712_vm9, %v6547_v2, -inf  ;;  %v4044_v50 = vsel %vm11716_vm11, %v6573_v25, -inf  ;;  %v1882_v42 = vpop.xlane.xlu1 %1881  ;;  %v11754_v35 = vmax.f32 %v4045_v8, %v4046_v48  ;;  %vm11758_vm2 = vcmp.eq.s32.totalorder %v4064_v4, 1  ;;  %vm14605_vm9 = vmmov %vm14594_vm8 }
 0x34e   : > { %14598 = vst [vmem:[#allocation116_spill] sm:$0xff] %v11743_v53  ;;  %v11756_v36 = vmax.f32 %v4043_v9, %v4044_v50  ;;  %vm11762_vm5 = vcmp.eq.s32.totalorder %v4068_v17, 1  ;;  %v4861_v41 = vsel %vm14594_vm8, %v4857_v32, %v1882_v42  ;;  %v4860_v24 = vsel %vm14605_vm9, %v4856_v55, %v1879_v3  ;;  %v14607_v3 = vld [vmem:[#allocation118_spill] sm:$0xff] }
 0x34f   : > { %14599 = vst [vmem:[#allocation15_spill] sm:$0xff] %v11754_v35  ;;  %v4073_v61 = vsel %vm11758_vm2, %v6615_v33, -inf  ;;  %v4074_v8 = vsel %vm11762_vm5, %v6631_v0, -inf  ;;  %v4071_v17 = vsel %vm11758_vm2, %v6545_v27, -inf  ;;  %v4072_v32 = vsel %vm11762_vm5, %v6571_v12, -inf  ;;  %v14608_v42 = vld [vmem:[#allocation58_spill] sm:$0xff] }
 0x350   : > { %14600 = vst [vmem:[#allocation57_spill] sm:$0xff] %v11756_v36  ;;  %v11774_v4 = vmax.f32 %v4073_v61, %v4074_v8  ;;  %v4077_v55 = vsel %vm11758_vm2, %v6613_v37, -inf  ;;  %2454 = vmax.xlane.f32.xlu0 %v14608_v42  ;;  %v11787_v48 = vmax.f32 %v4071_v17, %v4072_v32  ;;  %v4078_v9 = vsel %vm11762_vm5, %v6629_v30, -inf }
 0x351   : > { %2457 = vmax.xlane.f32.xlu1 %v14607_v3  ;;  %v4075_v50 = vsel %vm11758_vm2, %v6547_v2, -inf  ;;  %v4076_v61 = vsel %vm11762_vm5, %v6573_v25, -inf  ;;  %v1908_v8 = vpop.xlane.xlu1 %1907  ;;  %v11798_v36 = vmax.f32 %v4077_v55, %v4078_v9  ;;  %v4092_v17 = vsel %vm4091_vm7, 1, %v13748_v29 }
 0x352   : > { %14606 = vst [vmem:[#allocation208_spill] sm:$0xff] %v11774_v4  ;;  %14609 = vst [vmem:[#allocation118_spill] sm:$0xff] %v11787_v48  ;;  %v1905_v4 = vpop.xlane.xlu0 %1904  ;;  %v11800_v3 = vmax.f32 %v4075_v50, %v4076_v61  ;;  %v4124_v32 = vsel %vm4123_vm10, 1, %v13748_v29  ;;  %vm14612_vm11 = vcmask 64512   ;;  %v4096_v31 = vrot.slane %v4092_v17, %v6175_v59  ;;  %v14614_v61 = vld [vmem:[#allocation119_spill] sm:$0xff] }
 0x353   : > { %14610 = vst [vmem:[#allocation58_spill] sm:$0xff] %v11798_v36  ;;  %v4863_v45 = vsel %vm14612_vm11, %v4859_v44, %v1908_v8  ;;  %vm14613_vm2 = vmmov %vm14612_vm11  ;;  %v4100_v48 = vrot.slane %v4092_v17, %v6181_v62  ;;  %v4128_v55 = vrot.slane %v4124_v32, %v6175_v59  ;;  %v4132_v9 = vrot.slane %v4124_v32, %v6181_v62 }
 0x354   : > { %14611 = vst [vmem:[#allocation209_spill] sm:$0xff] %v11800_v3  ;;  %v4862_v42 = vsel %vm14613_vm2, %v4858_v5, %v1905_v4  ;;  %v4156_v50 = vsel %vm4155_vm13, 1, %v13748_v29  ;;  %v14615_v3 = vld [vmem:[#allocation120_spill] sm:$0xff]  ;;  %vm11819_vm7 = vcmp.eq.s32.totalorder %v4096_v31, 1  ;;  %vm4187_vm13 = vcmp.eq.s32.totalorder %v6171_v57, 112  ;;  %vm14620_vm5 = vmmov %vm14613_vm2 }
 0x355   : > { %2483 = vmax.xlane.f32.xlu1 %v14614_v61  ;;  %2480 = vmax.xlane.f32.xlu0 %v14615_v3  ;;  %vm11823_vm10 = vcmp.eq.s32.totalorder %v4100_v48, 1  ;;  %v4160_v4 = vrot.slane %v4156_v50, %v6175_v59  ;;  %v4164_v8 = vrot.slane %v4156_v50, %v6181_v62  ;;  %v1914_v17 = vpop.xlane.xlu1 %1913  ;;  %v4105_v61 = vsel %vm11819_vm7, %v6615_v33, -inf  ;;  %vm14621_vm8 = vmmov %vm14613_vm2 }
 0x356   : > { %v1911_v32 = vpop.xlane.xlu0 %1910  ;;  %v4106_v3 = vsel %vm11823_vm10, %v6631_v0, -inf  ;;  %v4103_v48 = vsel %vm11819_vm7, %v6545_v27, -inf  ;;  %v4104_v31 = vsel %vm11823_vm10, %v6571_v12, -inf  ;;  %v4865_v50 = vsel %vm14620_vm5, %v4861_v41, %v1914_v17  ;;  %v14623_v17 = vld [vmem:[#allocation30_spill] sm:$0xff] }
 0x357   : > { %v4864_v36 = vsel %vm14621_vm8, %v4860_v24, %v1911_v32  ;;  %v11844_v35 = vmax.f32 %v4105_v61, %v4106_v3  ;;  %v11846_v53 = vmax.f32 %v4103_v48, %v4104_v31  ;;  %v4109_v47 = vsel %vm11819_vm7, %v6613_v37, -inf  ;;  %v14622_v24 = vld [vmem:[#allocation121_spill] sm:$0xff] }
 0x358   : > { %v4110_v39 = vsel %vm11823_vm10, %v6629_v30, -inf  ;;  %v4107_v20 = vsel %vm11819_vm7, %v6547_v2, -inf  ;;  %v4108_v41 = vsel %vm11823_vm10, %v6573_v25, -inf  ;;  %vm11866_vm9 = vcmp.eq.s32.totalorder %v4128_v55, 1 }
 0x359   : > { %2489 = vmax.xlane.f32.xlu1 %v14622_v24  ;;  %2486 = vmax.xlane.f32.xlu0 %v14623_v17  ;;  %v11862_v32 = vmax.f32 %v4109_v47, %v4110_v39  ;;  %v11864_v61 = vmax.f32 %v4107_v20, %v4108_v41  ;;  %vm11870_vm11 = vcmp.eq.s32.totalorder %v4132_v9, 1  ;;  %v1940_v44 = vpop.xlane.xlu1 %1939  ;;  %v4137_v5 = vsel %vm11866_vm9, %v6615_v33, -inf }
 0x35a   : > { %v1937_v31 = vpop.xlane.xlu0 %1936  ;;  %v4138_v47 = vsel %vm11870_vm11, %v6631_v0, -inf  ;;  %v4135_v20 = vsel %vm11866_vm9, %v6545_v27, -inf  ;;  %v4136_v39 = vsel %vm11870_vm11, %v6571_v12, -inf  ;;  %vm14630_vm2 = vcmask 72704  }
 0x35b   : > { %14624 = vst [vmem:[#allocation119_spill] sm:$0xff] %v11862_v32  ;;  %14625 = vst [vmem:[#allocation120_spill] sm:$0xff] %v11864_v61  ;;  %v4867_v55 = vsel %vm14630_vm2, %v4863_v45, %v1940_v44  ;;  %v11888_v41 = vmax.f32 %v4137_v5, %v4138_v47  ;;  %v11890_v24 = vmax.f32 %v4135_v20, %v4136_v39  ;;  %v4141_v17 = vsel %vm11866_vm9, %v6613_v37, -inf  ;;  %v14635_v44 = vld [vmem:[#allocation122_spill] sm:$0xff] }
 0x35c   : > { %vm14631_vm7 = vmmov %vm14630_vm2  ;;  %v4142_v61 = vsel %vm11870_vm11, %v6629_v30, -inf  ;;  %v4139_v32 = vsel %vm11866_vm9, %v6547_v2, -inf  ;;  %v4140_v45 = vsel %vm11870_vm11, %v6573_v25, -inf  ;;  %vm11910_vm10 = vcmp.eq.s32.totalorder %v4160_v4, 1 }
 0x35d   : > { %v4866_v9 = vsel %vm14631_vm7, %v4862_v42, %v1937_v31  ;;  %14632 = vst [vmem:[#allocation121_spill] sm:$0xff] %v11888_v41  ;;  %14633 = vst [vmem:[#allocation30_spill] sm:$0xff] %v11890_v24  ;;  %v14634_v42 = vld [vmem:[#allocation59_spill] sm:$0xff]  ;;  %2512 = vmax.xlane.f32.xlu0 %v14635_v44  ;;  %v11906_v31 = vmax.f32 %v4141_v17, %v4142_v61  ;;  %v11908_v5 = vmax.f32 %v4139_v32, %v4140_v45  ;;  %v1946_v3 = vpop.xlane.xlu1 %1945  ;;  %vm14650_vm7 = vcmask 80896  }
 0x35e   : > { %2515 = vmax.xlane.f32.xlu1 %v14634_v42  ;;  %vm11914_vm5 = vcmp.eq.s32.totalorder %v4164_v8, 1  ;;  %v1943_v39 = vpop.xlane.xlu0 %1942  ;;  %v4169_v48 = vsel %vm11910_vm10, %v6615_v33, -inf  ;;  %v4167_v4 = vsel %vm11910_vm10, %v6545_v27, -inf  ;;  %vm14642_vm8 = vmmov %vm14630_vm2  ;;  %v4173_v44 = vsel %vm11910_vm10, %v6613_v37, -inf }
 0x35f   : > { %14636 = vst [vmem:[#allocation59_spill] sm:$0xff] %v11906_v31  ;;  %14637 = vst [vmem:[#allocation122_spill] sm:$0xff] %v11908_v5  ;;  %v4170_v61 = vsel %vm11914_vm5, %v6631_v0, -inf  ;;  %v4168_v8 = vsel %vm11914_vm5, %v6571_v12, -inf  ;;  %v4869_v32 = vsel %vm14642_vm8, %v4865_v50, %v1946_v3  ;;  %v4174_v5 = vsel %vm11914_vm5, %v6629_v30, -inf  ;;  %v14646_v50 = vld [vmem:[#allocation123_spill] sm:$0xff] }
 0x360   : > { %vm14643_vm9 = vmmov %vm14630_vm2  ;;  %v11932_v45 = vmax.f32 %v4169_v48, %v4170_v61  ;;  %v11934_v42 = vmax.f32 %v4167_v4, %v4168_v8  ;;  %v4171_v31 = vsel %vm11910_vm10, %v6547_v2, -inf  ;;  %v14647_v3 = vld [vmem:[#allocation124_spill] sm:$0xff]  ;;  %v4188_v61 = vsel %vm4187_vm13, 1, %v13748_v29 }
 0x361   : > { %v4868_v17 = vsel %vm14643_vm9, %v4864_v36, %v1943_v39  ;;  %v4172_v36 = vsel %vm11914_vm5, %v6573_v25, -inf  ;;  %2518 = vmax.xlane.f32.xlu0 %v14647_v3  ;;  %v11950_v39 = vmax.f32 %v4173_v44, %v4174_v5  ;;  %vm4219_vm11 = vcmp.eq.s32.totalorder %v6171_v57, 113  ;;  %v1972_v47 = vpop.xlane.xlu1 %1971  ;;  %vm14651_vm10 = vmmov %vm14650_vm7 }
 0x362   : > { %14644 = vst [vmem:[#allocation210_spill] sm:$0xff] %v11932_v45  ;;  %14645 = vst [vmem:[#allocation211_spill] sm:$0xff] %v11934_v42  ;;  %2521 = vmax.xlane.f32.xlu1 %v14646_v50  ;;  %v11952_v48 = vmax.f32 %v4171_v31, %v4172_v36  ;;  %v1969_v4 = vpop.xlane.xlu0 %1968  ;;  %v4192_v8 = vrot.slane %v4188_v61, %v6175_v59  ;;  %v4196_v20 = vrot.slane %v4188_v61, %v6181_v62 }
 0x363   : > { %14648 = vst [vmem:[#allocation123_spill] sm:$0xff] %v11950_v39  ;;  %v4220_v50 = vsel %vm4219_vm11, 1, %v13748_v29  ;;  %vm4251_vm2 = vcmp.eq.s32.totalorder %v6171_v57, 114  ;;  %v4871_v5 = vsel %vm14650_vm7, %v4867_v55, %v1972_v47  ;;  %v4870_v31 = vsel %vm14651_vm10, %v4866_v9, %v1969_v4  ;;  %v14656_v55 = vld [vmem:[#allocation19_spill] sm:$0xff]  ;;  %vm14659_vm9 = vmmov %vm14650_vm7 }
 0x364   : > { %14649 = vst [vmem:[#allocation124_spill] sm:$0xff] %v11952_v48  ;;  %v4224_v44 = vrot.slane %v4220_v50, %v6175_v59  ;;  %v4228_v36 = vrot.slane %v4220_v50, %v6181_v62  ;;  %vm11966_vm13 = vcmp.eq.s32.totalorder %v4192_v8, 1  ;;  %vm11970_vm5 = vcmp.eq.s32.totalorder %v4196_v20, 1  ;;  %vm14660_vm11 = vmmov %vm14650_vm7 }
 0x365   : > { %v4252_v61 = vsel %vm4251_vm2, 1, %v13748_v29  ;;  %vm4283_vm8 = vcmp.eq.s32.totalorder %v6171_v57, 115  ;;  %2544 = vmax.xlane.f32.xlu0 %v14656_v55  ;;  %v4201_v9 = vsel %vm11966_vm13, %v6615_v33, -inf  ;;  %v4202_v47 = vsel %vm11970_vm5, %v6631_v0, -inf  ;;  %v1978_v20 = vpop.xlane.xlu1 %1977 }
 0x366   : > { %2547 = vmax.xlane.f32.xlu1 %v9394_v23  ;;  %v4199_v4 = vsel %vm11966_vm13, %v6545_v27, -inf  ;;  %v4200_v8 = vsel %vm11970_vm5, %v6571_v12, -inf  ;;  %v1975_v23 = vpop.xlane.xlu0 %1974  ;;  %v11990_v50 = vmax.f32 %v4201_v9, %v4202_v47  ;;  %v4205_v39 = vsel %vm11966_vm13, %v6613_v37, -inf }
 0x367   : > { %v11992_v55 = vmax.f32 %v4199_v4, %v4200_v8  ;;  %v4206_v42 = vsel %vm11970_vm5, %v6629_v30, -inf  ;;  %v4873_v45 = vsel %vm14659_vm9, %v4869_v32, %v1978_v20  ;;  %v4872_v24 = vsel %vm14660_vm11, %v4868_v17, %v1975_v23  ;;  %v14666_v17 = vld [vmem:[#allocation61_spill] sm:$0xff] }
 0x368   : > { %14657 = vst [vmem:[#allocation19_spill] sm:$0xff] %v11990_v50  ;;  %v12002_v41 = vmax.f32 %v4205_v39, %v4206_v42  ;;  %v4203_v9 = vsel %vm11966_vm13, %v6547_v2, -inf  ;;  %v4204_v47 = vsel %vm11970_vm5, %v6573_v25, -inf  ;;  %vm12010_vm2 = vcmp.eq.s32.totalorder %v4224_v44, 1 }
 0x369   : > { %14658 = vst [vmem:[#allocation212_spill] sm:$0xff] %v11992_v55  ;;  %vm12014_vm7 = vcmp.eq.s32.totalorder %v4228_v36, 1  ;;  %v4256_v32 = vrot.slane %v4252_v61, %v6175_v59  ;;  %2550 = vmax.xlane.f32.xlu0 %v9425_v19  ;;  %v12021_v42 = vmax.f32 %v4203_v9, %v4204_v47  ;;  %v4233_v39 = vsel %vm12010_vm2, %v6615_v33, -inf  ;;  %v2004_v36 = vpop.xlane.xlu1 %2003 }
 0x36a   : > { %14661 = vst [vmem:[#allocation213_spill] sm:$0xff] %v12002_v41  ;;  %2553 = vmax.xlane.f32.xlu1 %v14666_v17  ;;  %v4234_v48 = vsel %vm12014_vm7, %v6631_v0, -inf  ;;  %v4231_v44 = vsel %vm12010_vm2, %v6545_v27, -inf  ;;  %v2001_v3 = vpop.xlane.xlu0 %2000  ;;  %v4232_v19 = vsel %vm12014_vm7, %v6571_v12, -inf  ;;  %v4237_v23 = vsel %vm12010_vm2, %v6613_v37, -inf }
 0x36b   : > { %14667 = vst [vmem:[#allocation61_spill] sm:$0xff] %v12021_v42  ;;  %v12032_v20 = vmax.f32 %v4233_v39, %v4234_v48  ;;  %v4238_v9 = vsel %vm12014_vm7, %v6629_v30, -inf  ;;  %vm14669_vm10 = vcmask 89088   ;;  %v12045_v42 = vmax.f32 %v4231_v44, %v4232_v19 }
 0x36c   : > { %v4875_v47 = vsel %vm14669_vm10, %v4871_v5, %v2004_v36  ;;  %vm14670_vm13 = vmmov %vm14669_vm10  ;;  %v12047_v39 = vmax.f32 %v4237_v23, %v4238_v9  ;;  %v4235_v48 = vsel %vm12010_vm2, %v6547_v2, -inf  ;;  %v4260_v41 = vrot.slane %v4252_v61, %v6181_v62  ;;  %v14675_v5 = vld [vmem:[#allocation62_spill] sm:$0xff] }
 0x36d   : > { %14668 = vst [vmem:[#allocation214_spill] sm:$0xff] %v12032_v20  ;;  %v4874_v17 = vsel %vm14670_vm13, %v4870_v31, %v2001_v3  ;;  %14671 = vst [vmem:[#allocation215_spill] sm:$0xff] %v12045_v42  ;;  %v4236_v20 = vsel %vm12014_vm7, %v6573_v25, -inf  ;;  %vm12056_vm5 = vcmp.eq.s32.totalorder %v4256_v32, 1  ;;  %v14676_v31 = vld [vmem:[#allocation63_spill] sm:$0xff]  ;;  %v2010_v32 = vpop.xlane.xlu1 %2009  ;;  %vm4315_vm11 = vcmp.eq.s32.totalorder %v6171_v57, 116 }
 0x36e   : > { %14672 = vst [vmem:[#allocation216_spill] sm:$0xff] %v12047_v39  ;;  %2579 = vmax.xlane.f32.xlu1 %v14675_v5  ;;  %2576 = vmax.xlane.f32.xlu0 %v14676_v31  ;;  %v12062_v44 = vmax.f32 %v4235_v48, %v4236_v20  ;;  %v4265_v4 = vsel %vm12056_vm5, %v6615_v33, -inf  ;;  %v4263_v8 = vsel %vm12056_vm5, %v6545_v27, -inf  ;;  %v4269_v61 = vsel %vm12056_vm5, %v6613_v37, -inf  ;;  %v2007_v36 = vpop.xlane.xlu0 %2006  ;;  %vm14678_vm2 = vmmov %vm14669_vm10  ;;  %v14683_v39 = vld [vmem:[#allocation126_spill] sm:$0xff] }
 0x36f   : > { %vm4262_vm9 = vcmp.eq.s32.totalorder %v4260_v41, 1  ;;  %v4267_v3 = vsel %vm12056_vm5, %v6547_v2, -inf  ;;  %v4284_v20 = vsel %vm4283_vm8, 1, %v13748_v29  ;;  %v4877_v19 = vsel %vm14678_vm2, %v4873_v45, %v2010_v32  ;;  %vm14679_vm7 = vmmov %vm14678_vm2 }
 0x370   : > { %14677 = vst [vmem:[#allocation62_spill] sm:$0xff] %v12062_v44  ;;  %v4876_v23 = vsel %vm14679_vm7, %v4872_v24, %v2007_v36  ;;  %v4266_v9 = vsel %vm4262_vm9, %v6631_v0, -inf  ;;  %v4264_v48 = vsel %vm4262_vm9, %v6571_v12, -inf  ;;  %v4270_v55 = vsel %vm4262_vm9, %v6629_v30, -inf  ;;  %v14682_v44 = vld [vmem:[#allocation125_spill] sm:$0xff] }
 0x371   : > { %v12084_v5 = vmax.f32 %v4265_v4, %v4266_v9  ;;  %v12086_v41 = vmax.f32 %v4263_v8, %v4264_v48  ;;  %v4268_v31 = vsel %vm4262_vm9, %v6573_v25, -inf  ;;  %v12092_v42 = vmax.f32 %v4269_v61, %v4270_v55  ;;  %v2036_v4 = vpop.xlane.xlu1 %2035 }
 0x372   : > { %2585 = vmax.xlane.f32.xlu1 %v14682_v44  ;;  %2582 = vmax.xlane.f32.xlu0 %v14683_v39  ;;  %v12094_v45 = vmax.f32 %v4267_v3, %v4268_v31  ;;  %v4288_v24 = vrot.slane %v4284_v20, %v6175_v59  ;;  %v4316_v32 = vsel %vm4315_vm11, 1, %v13748_v29  ;;  %v2033_v36 = vpop.xlane.xlu0 %2032  ;;  %v4292_v8 = vrot.slane %v4284_v20, %v6181_v62 }
 0x373   : > { %14680 = vst [vmem:[#allocation63_spill] sm:$0xff] %v12084_v5  ;;  %14681 = vst [vmem:[#allocation217_spill] sm:$0xff] %v12086_v41  ;;  %v4320_v9 = vrot.slane %v4316_v32, %v6175_v59  ;;  %v4324_v48 = vrot.slane %v4316_v32, %v6181_v62  ;;  %vm4347_vm8 = vcmp.eq.s32.totalorder %v6171_v57, 117  ;;  %vm14686_vm10 = vcmask 97280  }
 0x374   : > { %14684 = vst [vmem:[#allocation125_spill] sm:$0xff] %v12092_v42  ;;  %14685 = vst [vmem:[#allocation126_spill] sm:$0xff] %v12094_v45  ;;  %v4879_v39 = vsel %vm14686_vm10, %v4875_v47, %v2036_v4  ;;  %vm12104_vm5 = vcmp.eq.s32.totalorder %v4288_v24, 1  ;;  %v4348_v3 = vsel %vm4347_vm8, 1, %v13748_v29  ;;  %vm12109_vm9 = vcmp.eq.s32.totalorder %v4292_v8, 1 }
 0x375   : > { %vm14687_vm13 = vmmov %vm14686_vm10  ;;  %v4297_v20 = vsel %vm12104_vm5, %v6615_v33, -inf  ;;  %v4295_v47 = vsel %vm12104_vm5, %v6545_v27, -inf  ;;  %v4298_v31 = vsel %vm12109_vm9, %v6631_v0, -inf  ;;  %v4296_v24 = vsel %vm12109_vm9, %v6571_v12, -inf }
 0x376   : > { %v4878_v44 = vsel %vm14687_vm13, %v4874_v17, %v2033_v36  ;;  %v4301_v17 = vsel %vm12104_vm5, %v6613_v37, -inf  ;;  %2611 = vmax.xlane.f32.xlu1 %v9484_v58  ;;  %2608 = vmax.xlane.f32.xlu0 %v9486_v54  ;;  %v4302_v32 = vsel %vm12109_vm9, %v6629_v30, -inf  ;;  %v4299_v4 = vsel %vm12104_vm5, %v6547_v2, -inf  ;;  %v2042_v36 = vpop.xlane.xlu1 %2041  ;;  %v2039_v58 = vpop.xlane.xlu0 %2038  ;;  %vm14693_vm11 = vmmov %vm14686_vm10 }
 0x377   : > { %v12136_v8 = vmax.f32 %v4297_v20, %v4298_v31  ;;  %v12138_v54 = vmax.f32 %v4295_v47, %v4296_v24  ;;  %v12140_v45 = vmax.f32 %v4301_v17, %v4302_v32  ;;  %v4300_v42 = vsel %vm12109_vm9, %v6573_v25, -inf  ;;  %vm14694_vm2 = vmmov %vm14686_vm10  ;;  %v14704_v20 = vld [vmem:[#allocation129_spill] sm:$0xff] }
 0x378   : > { %v4881_v41 = vsel %vm14693_vm11, %v4877_v19, %v2042_v36  ;;  %v4880_v5 = vsel %vm14694_vm2, %v4876_v23, %v2039_v58  ;;  %v12147_v50 = vmax.f32 %v4299_v4, %v4300_v42  ;;  %vm12149_vm7 = vcmp.eq.s32.totalorder %v4320_v9, 1  ;;  %v14700_v23 = vld [vmem:[#allocation64_spill] sm:$0xff] }
 0x379   : > { %14692 = vst [vmem:[#allocation218_spill] sm:$0xff] %v12140_v45  ;;  %vm12153_vm8 = vcmp.eq.s32.totalorder %v4324_v48, 1  ;;  %v4329_v47 = vsel %vm12149_vm7, %v6615_v33, -inf  ;;  %v4327_v19 = vsel %vm12149_vm7, %v6545_v27, -inf  ;;  %v4333_v42 = vsel %vm12149_vm7, %v6613_v37, -inf }
 0x37a   : > { %14695 = vst [vmem:[#allocation219_spill] sm:$0xff] %v12147_v50  ;;  %2617 = vmax.xlane.f32.xlu1 %v9488_v11  ;;  %2614 = vmax.xlane.f32.xlu0 %v14700_v23  ;;  %v4330_v9 = vsel %vm12153_vm8, %v6631_v0, -inf  ;;  %v4328_v48 = vsel %vm12153_vm8, %v6571_v12, -inf  ;;  %v4334_v55 = vsel %vm12153_vm8, %v6629_v30, -inf  ;;  %v4331_v17 = vsel %vm12149_vm7, %v6547_v2, -inf  ;;  %v2068_v31 = vpop.xlane.xlu1 %2067  ;;  %v2065_v11 = vpop.xlane.xlu0 %2064 }
 0x37b   : > { %v12180_v24 = vmax.f32 %v4329_v47, %v4330_v9  ;;  %v12182_v32 = vmax.f32 %v4327_v19, %v4328_v48  ;;  %v12184_v4 = vmax.f32 %v4333_v42, %v4334_v55  ;;  %v4332_v36 = vsel %vm12153_vm8, %v6573_v25, -inf  ;;  %v14703_v47 = vld [vmem:[#allocation128_spill] sm:$0xff] }
 0x37c   : > { %v4883_v58 = vsel %vm4759_vm0, %v4879_v39, %v2068_v31  ;;  %v4882_v23 = vsel %vm4759_vm0, %v4878_v44, %v2065_v11  ;;  %v12191_v50 = vmax.f32 %v4331_v17, %v4332_v36  ;;  %v4352_v61 = vrot.slane %v4348_v3, %v6175_v59 }
 0x37d   : > { %14701 = vst [vmem:[#allocation64_spill] sm:$0xff] %v12184_v4  ;;  %v4356_v45 = vrot.slane %v4348_v3, %v6181_v62  ;;  %vm4379_vm10 = vcmp.eq.s32.totalorder %v6171_v57, 118  ;;  %vm4411_vm13 = vcmp.eq.s32.totalorder %v6171_v57, 119  ;;  %vm4443_vm5 = vcmp.eq.s32.totalorder %v6171_v57, 120 }
 0x37e   : > { %14702 = vst [vmem:[#allocation220_spill] sm:$0xff] %v12191_v50  ;;  %2643 = vmax.xlane.f32.xlu1 %v14703_v47  ;;  %2640 = vmax.xlane.f32.xlu0 %v14704_v20  ;;  %vm12200_vm9 = vcmp.eq.s32.totalorder %v4352_v61, 1  ;;  %v4380_v44 = vsel %vm4379_vm10, 1, %v13748_v29  ;;  %v4412_v19 = vsel %vm4411_vm13, 1, %v13748_v29  ;;  %v12207_v3 = vsel %vm4443_vm5, 1, %v13748_v29  ;;  %v2074_v42 = vpop.xlane.xlu1 %2073  ;;  %v2071_v9 = vpop.xlane.xlu0 %2070 }
 0x37f   : > { %vm12209_vm11 = vcmp.eq.s32.totalorder %v4356_v45, 1  ;;  %v4361_v55 = vsel %vm12200_vm9, %v6615_v33, -inf  ;;  %v4359_v17 = vsel %vm12200_vm9, %v6545_v27, -inf  ;;  %v4365_v31 = vsel %vm12200_vm9, %v6613_v37, -inf }
 0x380   : > { %v4885_v11 = vsel %vm4759_vm0, %v4881_v41, %v2074_v42  ;;  %v4884_v36 = vsel %vm4759_vm0, %v4880_v5, %v2071_v9  ;;  %v4362_v45 = vsel %vm12209_vm11, %v6631_v0, -inf  ;;  %v4360_v61 = vsel %vm12209_vm11, %v6571_v12, -inf  ;;  %v14711_v41 = vld [vmem:[#allocation130_spill] sm:$0xff]  ;;  %v14712_v42 = vld [vmem:[#allocation31_spill] sm:$0xff] }
 0x381   : > { %v12230_v47 = vmax.f32 %v4361_v55, %v4362_v45  ;;  %v12232_v20 = vmax.f32 %v4359_v17, %v4360_v61  ;;  %v4366_v50 = vsel %vm12209_vm11, %v6629_v30, -inf  ;;  %v4363_v5 = vsel %vm12200_vm9, %v6547_v2, -inf }
 0x382   : > { %2649 = vmax.xlane.f32.xlu1 %v14711_v41  ;;  %2646 = vmax.xlane.f32.xlu0 %v14712_v42  ;;  %v12242_v9 = vmax.f32 %v4365_v31, %v4366_v50  ;;  %v4364_v55 = vsel %vm12209_vm11, %v6573_v25, -inf  ;;  %v4384_v17 = vrot.slane %v4380_v44, %v6175_v59  ;;  %v4388_v45 = vrot.slane %v4380_v44, %v6181_v62  ;;  %v2100_v61 = vpop.xlane.xlu1 %2099 }
 0x383   : > { %14709 = vst [vmem:[#allocation128_spill] sm:$0xff] %v12230_v47  ;;  %14710 = vst [vmem:[#allocation129_spill] sm:$0xff] %v12232_v20  ;;  %v2097_v20 = vpop.xlane.xlu0 %2096  ;;  %v12249_v47 = vmax.f32 %v4363_v5, %v4364_v55  ;;  %v4416_v39 = vrot.slane %v4412_v19, %v6175_v59  ;;  %v4420_v41 = vrot.slane %v4412_v19, %v6181_v62  ;;  %vm4475_vm9 = vcmp.eq.s32.totalorder %v6171_v57, 121 }
 0x384   : > { %14713 = vst [vmem:[#allocation130_spill] sm:$0xff] %v12242_v9  ;;  %v4448_v50 = vrot.slane %v12207_v3, %v6175_v59  ;;  %v4887_v31 = vsel %vm4764_vm4, %v4883_v58, %v2100_v61  ;;  %v4886_v48 = vsel %vm4764_vm4, %v4882_v23, %v2097_v20  ;;  %vm12257_vm2 = vcmp.eq.s32.totalorder %v4384_v17, 1  ;;  %v14719_v20 = vld [vmem:[#allocation32_spill] sm:$0xff] }
 0x385   : > { %14714 = vst [vmem:[#allocation31_spill] sm:$0xff] %v12249_v47  ;;  %vm12261_vm7 = vcmp.eq.s32.totalorder %v4388_v45, 1  ;;  %v4393_v5 = vsel %vm12257_vm2, %v6615_v33, -inf  ;;  %v4391_v58 = vsel %vm12257_vm2, %v6545_v27, -inf  ;;  %v4397_v45 = vsel %vm12257_vm2, %v6613_v37, -inf }
 0x386   : > { %v4394_v19 = vsel %vm12261_vm7, %v6631_v0, -inf  ;;  %v4392_v23 = vsel %vm12261_vm7, %v6571_v12, -inf  ;;  %2675 = vmax.xlane.f32.xlu1 %v9588_v56  ;;  %2672 = vmax.xlane.f32.xlu0 %v14719_v20  ;;  %v4398_v61 = vsel %vm12261_vm7, %v6629_v30, -inf  ;;  %v2106_v47 = vpop.xlane.xlu1 %2105  ;;  %v4395_v56 = vsel %vm12257_vm2, %v6547_v2, -inf }
 0x387   : > { %v12279_v55 = vmax.f32 %v4393_v5, %v4394_v19  ;;  %v12281_v17 = vmax.f32 %v4391_v58, %v4392_v23  ;;  %v2103_v9 = vpop.xlane.xlu0 %2102  ;;  %v12289_v4 = vmax.f32 %v4397_v45, %v4398_v61  ;;  %v4396_v5 = vsel %vm12261_vm7, %v6573_v25, -inf  ;;  %v14745_v19 = vld [vmem:[#allocation22_spill] sm:$0xff] }
 0x388   : > { %vm12297_vm8 = vcmp.eq.s32.totalorder %v4416_v39, 1  ;;  %v4889_v58 = vsel %vm4764_vm4, %v4885_v11, %v2106_v47  ;;  %v4888_v23 = vsel %vm4764_vm4, %v4884_v36, %v2103_v9  ;;  %v12303_v20 = vmax.f32 %v4395_v56, %v4396_v5  ;;  %v14727_v47 = vld [vmem:[#allocation131_spill] sm:$0xff]  ;;  %v14728_v9 = vld [vmem:[#allocation132_spill] sm:$0xff] }
 0x389   : > { %14720 = vst [vmem:[#allocation32_spill] sm:$0xff] %v12281_v17  ;;  %14721 = vst [vmem:[#allocation221_spill] sm:$0xff] %v12289_v4  ;;  %vm12305_vm10 = vcmp.eq.s32.totalorder %v4420_v41, 1  ;;  %v4425_v42 = vsel %vm12297_vm8, %v6615_v33, -inf  ;;  %v4423_v11 = vsel %vm12297_vm8, %v6545_v27, -inf  ;;  %v4429_v61 = vsel %vm12297_vm8, %v6613_v37, -inf }
 0x38a   : > { %14724 = vst [vmem:[#allocation222_spill] sm:$0xff] %v12303_v20  ;;  %v4426_v39 = vsel %vm12305_vm10, %v6631_v0, -inf  ;;  %v4424_v36 = vsel %vm12305_vm10, %v6571_v12, -inf  ;;  %2681 = vmax.xlane.f32.xlu1 %v14727_v47  ;;  %2678 = vmax.xlane.f32.xlu0 %v14728_v9  ;;  %v4430_v56 = vsel %vm12305_vm10, %v6629_v30, -inf  ;;  %v2132_v5 = vpop.xlane.xlu1 %2131  ;;  %v4427_v47 = vsel %vm12297_vm8, %v6547_v2, -inf }
 0x38b   : > { %v12323_v41 = vmax.f32 %v4425_v42, %v4426_v39  ;;  %v12325_v44 = vmax.f32 %v4423_v11, %v4424_v36  ;;  %v2129_v20 = vpop.xlane.xlu0 %2128  ;;  %v12333_v4 = vmax.f32 %v4429_v61, %v4430_v56  ;;  %v4428_v42 = vsel %vm12305_vm10, %v6573_v25, -inf }
 0x38c   : > { %v4452_v39 = vrot.slane %v12207_v3, %v6181_v62  ;;  %v12344_v11 = vsel %vm4769_vm3, %v4887_v31, %v2132_v5  ;;  %v12347_v36 = vsel %vm4769_vm3, %v4886_v48, %v2129_v20  ;;  %v12349_v9 = vmax.f32 %v4427_v47, %v4428_v42 }
 0x38d   : > { %14729 = vst [vmem:[#allocation131_spill] sm:$0xff] %v12323_v41  ;;  %14730 = vst [vmem:[#allocation132_spill] sm:$0xff] %v12325_v44  ;;  %vm12351_vm13 = vcmp.eq.s32.totalorder %v4448_v50, 1  ;;  %vm4507_vm11 = vcmp.eq.s32.totalorder %v6171_v57, 122  ;;  %vm4539_vm2 = vcmp.eq.s32.totalorder %v6171_v57, 123  ;;  %vm4571_vm7 = vcmp.eq.s32.totalorder %v6171_v57, 124 }
 0x38e   : > { %14731 = vst [vmem:[#allocation223_spill] sm:$0xff] %v12333_v4  ;;  %14732 = vst [vmem:[#allocation224_spill] sm:$0xff] %v12344_v11  ;;  %vm12355_vm5 = vcmp.eq.s32.totalorder %v4452_v39, 1  ;;  %v4457_v3 = vsel %vm12351_vm13, %v6615_v33, -inf  ;;  %v4455_v31 = vsel %vm12351_vm13, %v6545_v27, -inf  ;;  %v4461_v48 = vsel %vm12351_vm13, %v6613_v37, -inf  ;;  %2707 = vmax.xlane.f32.xlu1 %v9636_v52  ;;  %2704 = vmax.xlane.f32.xlu0 %v9638_v16  ;;  %v2138_v5 = vpop.xlane.xlu1 %2137 }
 0x38f   : > { %14733 = vst [vmem:[#allocation225_spill] sm:$0xff] %v12347_v36  ;;  %14734 = vst [vmem:[#allocation226_spill] sm:$0xff] %v12349_v9  ;;  %v4458_v50 = vsel %vm12355_vm5, %v6631_v0, -inf  ;;  %v4456_v20 = vsel %vm12355_vm5, %v6571_v12, -inf  ;;  %v4462_v45 = vsel %vm12355_vm5, %v6629_v30, -inf  ;;  %v4459_v56 = vsel %vm12351_vm13, %v6547_v2, -inf  ;;  %v2135_v52 = vpop.xlane.xlu0 %2134 }
 0x390   : > { %v12382_v47 = vmax.f32 %v4457_v3, %v4458_v50  ;;  %v12384_v16 = vmax.f32 %v4455_v31, %v4456_v20  ;;  %v12386_v42 = vmax.f32 %v4461_v48, %v4462_v45  ;;  %v4460_v39 = vsel %vm12355_vm5, %v6573_v25, -inf  ;;  %v14746_v31 = vld [vmem:[#allocation65_spill] sm:$0xff] }
 0x391   : > { %v12392_v11 = vsel %vm4769_vm3, %v4889_v58, %v2138_v5  ;;  %v12395_v36 = vsel %vm4769_vm3, %v4888_v23, %v2135_v52  ;;  %v12397_v61 = vmax.f32 %v4459_v56, %v4460_v39  ;;  %v4476_v3 = vsel %vm4475_vm9, 1, %v13748_v29 }
 0x392   : > { %14739 = vst [vmem:[#allocation227_spill] sm:$0xff] %v12382_v47  ;;  %14740 = vst [vmem:[#allocation228_spill] sm:$0xff] %v12384_v16  ;;  %2713 = vmax.xlane.f32.xlu1 %v14745_v19  ;;  %2710 = vmax.xlane.f32.xlu0 %v14746_v31  ;;  %v4480_v58 = vrot.slane %v4476_v3, %v6175_v59  ;;  %v4484_v23 = vrot.slane %v4476_v3, %v6181_v62  ;;  %v4508_v48 = vsel %vm4507_vm11, 1, %v13748_v29  ;;  %v2164_v20 = vpop.xlane.xlu1 %2163 }
 0x393   : > { %14741 = vst [vmem:[#allocation229_spill] sm:$0xff] %v12386_v42  ;;  %14742 = vst [vmem:[#allocation230_spill] sm:$0xff] %v12392_v11  ;;  %v4540_v50 = vsel %vm4539_vm2, 1, %v13748_v29  ;;  %v2161_v45 = vpop.xlane.xlu0 %2160  ;;  %v4512_v56 = vrot.slane %v4508_v48, %v6175_v59  ;;  %v4516_v5 = vrot.slane %v4508_v48, %v6181_v62  ;;  %v4572_v31 = vsel %vm4571_vm7, 1, %v13748_v29 }
 0x394   : > { %14743 = vst [vmem:[#allocation231_spill] sm:$0xff] %v12395_v36  ;;  %14744 = vst [vmem:[#allocation232_spill] sm:$0xff] %v12397_v61  ;;  %v4544_v52 = vrot.slane %v4540_v50, %v6175_v59  ;;  %vm12413_vm8 = vcmp.eq.s32.totalorder %v4480_v58, 1  ;;  %vm12417_vm10 = vcmp.eq.s32.totalorder %v4484_v23, 1  ;;  %v4548_v3 = vrot.slane %v4540_v50, %v6181_v62  ;;  %v14751_v36 = vld [vmem:[#allocation133_spill] sm:$0xff]  ;;  %v14752_v50 = vld [vmem:[#allocation134_spill] sm:$0xff] }
 0x395   : > { %v4489_v11 = vsel %vm12413_vm8, %v6615_v33, -inf  ;;  %v4490_v48 = vsel %vm12417_vm10, %v6631_v0, -inf  ;;  %v4487_v58 = vsel %vm12413_vm8, %v6545_v27, -inf  ;;  %v4488_v23 = vsel %vm12417_vm10, %v6571_v12, -inf }
 0x396   : > { %2739 = vmax.xlane.f32.xlu1 %v14751_v36  ;;  %2736 = vmax.xlane.f32.xlu0 %v14752_v50  ;;  %v12437_v61 = vmax.f32 %v4489_v11, %v4490_v48  ;;  %v12439_v42 = vmax.f32 %v4487_v58, %v4488_v23  ;;  %v4493_v16 = vsel %vm12413_vm8, %v6613_v37, -inf  ;;  %v4494_v47 = vsel %vm12417_vm10, %v6629_v30, -inf  ;;  %v2170_v9 = vpop.xlane.xlu1 %2169  ;;  %v14761_v50 = vld [vmem:[#allocation136_spill] sm:$0xff] }
 0x397   : > { %v2167_v4 = vpop.xlane.xlu0 %2166  ;;  %v12447_v44 = vmax.f32 %v4493_v16, %v4494_v47  ;;  %v4491_v36 = vsel %vm12413_vm8, %v6547_v2, -inf  ;;  %v4492_v11 = vsel %vm12417_vm10, %v6573_v25, -inf  ;;  %vm12455_vm13 = vcmp.eq.s32.totalorder %v4512_v56, 1 }
 0x398   : > { %14753 = vst [vmem:[#allocation22_spill] sm:$0xff] %v12437_v61  ;;  %14754 = vst [vmem:[#allocation65_spill] sm:$0xff] %v12439_v42  ;;  %v12459_v58 = vmax.f32 %v4491_v36, %v4492_v11  ;;  %vm12461_vm5 = vcmp.eq.s32.totalorder %v4516_v5, 1  ;;  %v4521_v47 = vsel %vm12455_vm13, %v6615_v33, -inf  ;;  %v4519_v16 = vsel %vm12455_vm13, %v6545_v27, -inf  ;;  %v14762_v36 = vld [vmem:[#allocation137_spill] sm:$0xff] }
 0x399   : > { %14755 = vst [vmem:[#allocation133_spill] sm:$0xff] %v12447_v44  ;;  %v4522_v56 = vsel %vm12461_vm5, %v6631_v0, -inf  ;;  %v4520_v39 = vsel %vm12461_vm5, %v6571_v12, -inf  ;;  %v4525_v5 = vsel %vm12455_vm13, %v6613_v37, -inf  ;;  %v4526_v19 = vsel %vm12461_vm5, %v6629_v30, -inf }
 0x39a   : > { %14758 = vst [vmem:[#allocation134_spill] sm:$0xff] %v12459_v58  ;;  %vm4603_vm9 = vcmp.eq.s32.totalorder %v6171_v57, 125  ;;  %2745 = vmax.xlane.f32.xlu1 %v14761_v50  ;;  %2742 = vmax.xlane.f32.xlu0 %v14762_v36  ;;  %v12486_v11 = vmax.f32 %v4521_v47, %v4522_v56  ;;  %v12488_v58 = vmax.f32 %v4519_v16, %v4520_v39  ;;  %v4523_v42 = vsel %vm12455_vm13, %v6547_v2, -inf  ;;  %v2196_v61 = vpop.xlane.xlu1 %2195 }
 0x39b   : > { %v12490_v44 = vmax.f32 %v4525_v5, %v4526_v19  ;;  %v2193_v41 = vpop.xlane.xlu0 %2192  ;;  %v4524_v17 = vsel %vm12461_vm5, %v6573_v25, -inf  ;;  %vm12498_vm11 = vcmp.eq.s32.totalorder %v4544_v52, 1  ;;  %vm12502_vm2 = vcmp.eq.s32.totalorder %v4548_v3, 1 }
 0x39c   : > { %v4576_v16 = vrot.slane %v4572_v31, %v6175_v59  ;;  %v4895_v56 = vsel %vm4699_vm12, %v2164_v20, %v2196_v61  ;;  %v4894_v48 = vsel %vm4699_vm12, %v2161_v45, %v2193_v41  ;;  %v12509_v39 = vmax.f32 %v4523_v42, %v4524_v17  ;;  %v14769_v41 = vld [vmem:[#allocation23_spill] sm:$0xff]  ;;  %v14770_v42 = vld [vmem:[#allocation33_spill] sm:$0xff] }
 0x39d   : > { %14763 = vst [vmem:[#allocation136_spill] sm:$0xff] %v12490_v44  ;;  %v4553_v23 = vsel %vm12498_vm11, %v6615_v33, -inf  ;;  %v4554_v52 = vsel %vm12502_vm2, %v6631_v0, -inf  ;;  %v4551_v3 = vsel %vm12498_vm11, %v6545_v27, -inf  ;;  %v4552_v61 = vsel %vm12502_vm2, %v6571_v12, -inf }
 0x39e   : > { %14768 = vst [vmem:[#allocation137_spill] sm:$0xff] %v12509_v39  ;;  %v4557_v17 = vsel %vm12498_vm11, %v6613_v37, -inf  ;;  %2771 = vmax.xlane.f32.xlu1 %v14769_v41  ;;  %2768 = vmax.xlane.f32.xlu0 %v14770_v42  ;;  %v12528_v20 = vmax.f32 %v4553_v23, %v4554_v52  ;;  %v12530_v45 = vmax.f32 %v4551_v3, %v4552_v61  ;;  %v4558_v5 = vsel %vm12502_vm2, %v6629_v30, -inf  ;;  %v2202_v36 = vpop.xlane.xlu1 %2201 }
 0x39f   : > { %v4555_v19 = vsel %vm12498_vm11, %v6547_v2, -inf  ;;  %v2199_v39 = vpop.xlane.xlu0 %2198  ;;  %v12538_v44 = vmax.f32 %v4557_v17, %v4558_v5  ;;  %v4556_v41 = vsel %vm12502_vm2, %v6573_v25, -inf  ;;  %v4580_v23 = vrot.slane %v4572_v31, %v6181_v62 }
 0x3a0   : > { %14771 = vst [vmem:[#allocation23_spill] sm:$0xff] %v12528_v20  ;;  %14772 = vst [vmem:[#allocation33_spill] sm:$0xff] %v12530_v45  ;;  %vm12544_vm7 = vcmp.eq.s32.totalorder %v4576_v16, 1  ;;  %v4897_v3 = vsel %vm4699_vm12, %v2170_v9, %v2202_v36  ;;  %v4896_v61 = vsel %vm4699_vm12, %v2167_v4, %v2199_v39  ;;  %v12550_v50 = vmax.f32 %v4555_v19, %v4556_v41  ;;  %v14777_v4 = vld [vmem:[#allocation138_spill] sm:$0xff]  ;;  %v14778_v16 = vld [vmem:[#allocation139_spill] sm:$0xff] }
 0x3a1   : > { %14773 = vst [vmem:[#allocation233_spill] sm:$0xff] %v12538_v44  ;;  %v4585_v17 = vsel %vm12544_vm7, %v6615_v33, -inf  ;;  %vm4582_vm8 = vcmp.eq.s32.totalorder %v4580_v23, 1  ;;  %v4583_v47 = vsel %vm12544_vm7, %v6545_v27, -inf  ;;  %v4589_v31 = vsel %vm12544_vm7, %v6613_v37, -inf }
 0x3a2   : > { %14776 = vst [vmem:[#allocation234_spill] sm:$0xff] %v12550_v50  ;;  %v4587_v9 = vsel %vm12544_vm7, %v6547_v2, -inf  ;;  %2777 = vmax.xlane.f32.xlu1 %v14777_v4  ;;  %2774 = vmax.xlane.f32.xlu0 %v14778_v16  ;;  %v4586_v39 = vsel %vm4582_vm8, %v6631_v0, -inf  ;;  %v4584_v42 = vsel %vm4582_vm8, %v6571_v12, -inf  ;;  %v4590_v5 = vsel %vm4582_vm8, %v6629_v30, -inf  ;;  %v2228_v36 = vpop.xlane.xlu1 %2227 }
 0x3a3   : > { %v4588_v19 = vsel %vm4582_vm8, %v6573_v25, -inf  ;;  %v2225_v41 = vpop.xlane.xlu0 %2224  ;;  %v12570_v23 = vmax.f32 %v4585_v17, %v4586_v39  ;;  %v12572_v50 = vmax.f32 %v4583_v47, %v4584_v42  ;;  %v12574_v52 = vmax.f32 %v4589_v31, %v4590_v5  ;;  %v14779_v31 = vld [vmem:[#allocation140_spill] sm:$0xff] }
 0x3a4   : > { %v12576_v44 = vmax.f32 %v4587_v9, %v4588_v19  ;;  %v4899_v4 = vsel %vm4704_vm6, %v4895_v56, %v2228_v36  ;;  %v4898_v16 = vsel %vm4704_vm6, %v4894_v48, %v2225_v41  ;;  %v4604_v45 = vsel %vm4603_vm9, 1, %v13748_v29  ;;  %v14780_v9 = vld [vmem:[#allocation141_spill] sm:$0xff] }
 0x3a5   : > { %vm4635_vm10 = vcmp.eq.s32.totalorder %v6171_v57, 126  ;;  %v4608_v20 = vrot.slane %v4604_v45, %v6175_v59  ;;  %v4612_v17 = vrot.slane %v4604_v45, %v6181_v62  ;;  %vm4667_vm13 = vcmp.eq.s32.totalorder %v6171_v57, 127 }
 0x3a6   : > { %v4636_v47 = vsel %vm4635_vm10, 1, %v13748_v29  ;;  %2803 = vmax.xlane.f32.xlu1 %v14779_v31  ;;  %2800 = vmax.xlane.f32.xlu0 %v14780_v9  ;;  %v4668_v39 = vsel %vm4667_vm13, 1, %v13748_v29  ;;  %v2234_v42 = vpop.xlane.xlu1 %2233  ;;  %v14787_v31 = vld [vmem:[#allocation68_spill] sm:$0xff]  ;;  %vm14810_vm10 = vcmask 48128  }
 0x3a7   : > { %v4640_v56 = vrot.slane %v4636_v47, %v6175_v59  ;;  %v4644_v48 = vrot.slane %v4636_v47, %v6181_v62  ;;  %v2231_v5 = vpop.xlane.xlu0 %2230  ;;  %vm12593_vm5 = vcmp.eq.s32.totalorder %v4608_v20, 1  ;;  %vm12597_vm9 = vcmp.eq.s32.totalorder %v4612_v17, 1  ;;  %vm14811_vm13 = vmmov %vm14810_vm10 }
 0x3a8   : > { %v4672_v57 = vrot.slane %v4668_v39, %v6175_v59  ;;  %v4676_v36 = vrot.slane %v4668_v39, %v6181_v62  ;;  %v4901_v41 = vsel %vm4704_vm6, %v4897_v3, %v2234_v42  ;;  %v4900_v47 = vsel %vm4704_vm6, %v4896_v61, %v2231_v5  ;;  %v14786_v61 = vld [vmem:[#allocation67_spill] sm:$0xff] }
 0x3a9   : > { %v4617_v29 = vsel %vm12593_vm5, %v6615_v33, -inf  ;;  %v4618_v20 = vsel %vm12597_vm9, %v6631_v0, -inf  ;;  %v4615_v59 = vsel %vm12593_vm5, %v6545_v27, -inf  ;;  %v4616_v62 = vsel %vm12597_vm9, %v6571_v12, -inf }
 0x3aa   : > { %v12611_v17 = vmax.f32 %v4617_v29, %v4618_v20  ;;  %v4621_v3 = vsel %vm12593_vm5, %v6613_v37, -inf  ;;  %2809 = vmax.xlane.f32.xlu1 %v14786_v61  ;;  %2806 = vmax.xlane.f32.xlu0 %v14787_v31  ;;  %v12624_v9 = vmax.f32 %v4615_v59, %v4616_v62  ;;  %v4622_v39 = vsel %vm12597_vm9, %v6629_v30, -inf  ;;  %v2260_v29 = vpop.xlane.xlu1 %2259 }
 0x3ab   : > { %v4619_v42 = vsel %vm12593_vm5, %v6547_v2, -inf  ;;  %v4620_v5 = vsel %vm12597_vm9, %v6573_v25, -inf  ;;  %v2257_v20 = vpop.xlane.xlu0 %2256  ;;  %vm12639_vm11 = vcmp.eq.s32.totalorder %v4640_v56, 1  ;;  %vm12643_vm2 = vcmp.eq.s32.totalorder %v4644_v48, 1  ;;  %vm14813_vm5 = vmmov %vm14810_vm10 }
 0x3ac   : > { %14785 = vst [vmem:[#allocation138_spill] sm:$0xff] %v12611_v17  ;;  %v12635_v17 = vmax.f32 %v4621_v3, %v4622_v39  ;;  %v12637_v61 = vmax.f32 %v4619_v42, %v4620_v5  ;;  %v4903_v19 = vsel %vm4709_vm15, %v4899_v4, %v2260_v29  ;;  %v4902_v31 = vsel %vm4709_vm15, %v4898_v16, %v2257_v20  ;;  %v14794_v39 = vld [vmem:[#allocation69_spill] sm:$0xff]  ;;  %v14795_v42 = vld [vmem:[#allocation143_spill] sm:$0xff]  ;;  %vm14814_vm9 = vmmov %vm14813_vm5 }
 0x3ad   : > { %v4649_v45 = vsel %vm12639_vm11, %v6615_v33, -inf  ;;  %v4650_v3 = vsel %vm12643_vm2, %v6631_v0, -inf  ;;  %v4647_v48 = vsel %vm12639_vm11, %v6545_v27, -inf  ;;  %v4648_v4 = vsel %vm12643_vm2, %v6571_v12, -inf }
 0x3ae   : > { %14788 = vst [vmem:[#allocation139_spill] sm:$0xff] %v12637_v61  ;;  %v12655_v56 = vmax.f32 %v4649_v45, %v4650_v3  ;;  %v4653_v16 = vsel %vm12639_vm11, %v6613_v37, -inf  ;;  %2835 = vmax.xlane.f32.xlu1 %v14794_v39  ;;  %2832 = vmax.xlane.f32.xlu0 %v14795_v42  ;;  %v12668_v5 = vmax.f32 %v4647_v48, %v4648_v4  ;;  %v4654_v29 = vsel %vm12643_vm2, %v6629_v30, -inf  ;;  %v2266_v3 = vpop.xlane.xlu1 %2265  ;;  %v14804_v4 = vld [vmem:[#allocation147_spill] sm:$0xff] }
 0x3af   : > { %v4651_v20 = vsel %vm12639_vm11, %v6547_v2, -inf  ;;  %v4652_v45 = vsel %vm12643_vm2, %v6573_v25, -inf  ;;  %v12679_v61 = vmax.f32 %v4653_v16, %v4654_v29  ;;  %vm12683_vm7 = vcmp.eq.s32.totalorder %v4672_v57, 1 }
 0x3b0   : > { %14793 = vst [vmem:[#allocation140_spill] sm:$0xff] %v12655_v56  ;;  %v2263_v56 = vpop.xlane.xlu0 %2262  ;;  %v12681_v39 = vmax.f32 %v4651_v20, %v4652_v45  ;;  %vm12687_vm8 = vcmp.eq.s32.totalorder %v4676_v36, 1  ;;  %v4905_v59 = vsel %vm4709_vm15, %v4901_v41, %v2266_v3  ;;  %v4681_v62 = vsel %vm12683_vm7, %v6615_v33, -inf  ;;  %v14801_v33 = vld [vmem:[#allocation146_spill] sm:$0xff] }
 0x3b1   : > { %v4904_v42 = vsel %vm4709_vm15, %v4900_v47, %v2263_v56  ;;  %v4682_v16 = vsel %vm12687_vm8, %v6631_v0, -inf  ;;  %v4679_v36 = vsel %vm12683_vm7, %v6545_v27, -inf  ;;  %v4680_v41 = vsel %vm12687_vm8, %v6571_v12, -inf  ;;  %v14800_v56 = vld [vmem:[#allocation145_spill] sm:$0xff] }
 0x3b2   : > { %v12699_v57 = vmax.f32 %v4681_v62, %v4682_v16  ;;  %v4685_v47 = vsel %vm12683_vm7, %v6613_v37, -inf  ;;  %2841 = vmax.xlane.f32.xlu1 %v14800_v56  ;;  %2838 = vmax.xlane.f32.xlu0 %v14801_v33  ;;  %v12712_v29 = vmax.f32 %v4679_v36, %v4680_v41  ;;  %v4686_v0 = vsel %vm12687_vm8, %v6629_v30, -inf  ;;  %v2292_v20 = vpop.xlane.xlu1 %2291  ;;  %v14802_v36 = vld [vmem:[#allocation70_spill] sm:$0xff]  ;;  %v14803_v30 = vld [vmem:[#allocation71_spill] sm:$0xff] }
 0x3b3   : > { %v4683_v27 = vsel %vm12683_vm7, %v6547_v2, -inf  ;;  %v4684_v12 = vsel %vm12687_vm8, %v6573_v25, -inf  ;;  %v12723_v45 = vmax.f32 %v4685_v47, %v4686_v0  ;;  %v4907_v62 = vsel %vm13573_vm1, %v4903_v19, %v2292_v20  ;;  %v14805_v47 = vld [vmem:[#allocation149_spill] sm:$0xff] }
 0x3b4   : > { %v2289_v37 = vpop.xlane.xlu0 %2288  ;;  %v12725_v3 = vmax.f32 %v4683_v27, %v4684_v12  ;;  %v14806_v0 = vld [vmem:[#allocation25_spill] sm:$0xff]  ;;  %v14807_v27 = vld [vmem:[#allocation150_spill] sm:$0xff]  ;;  %vm14815_vm11 = vcmask 56320  }
 0x3b5   : > { %v4906_v16 = vsel %vm13573_vm1, %v4902_v31, %v2289_v37  ;;  %v14808_v37 = vld [vmem:[#allocation151_spill] sm:$0xff]  ;;  %vm14816_vm2 = vmmov %vm14815_vm11 }
 0x3b6   : > { %2867 = vmax.xlane.f32.xlu1 %v14802_v36  ;;  %2864 = vmax.xlane.f32.xlu0 %v14803_v30  ;;  %v2298_v48 = vpop.xlane.xlu1 %2297  ;;  %v14809_v36 = vld [vmem:[#allocation152_spill] sm:$0xff]  ;;  %vm14819_vm7 = vmmov %vm14816_vm2 }
 0x3b7   : > { %v4909_v41 = vsel %vm13573_vm1, %v4905_v59, %v2298_v48  ;;  %vm14820_vm8 = vmmov %vm14816_vm2 }
 0x3b8   : > { %v2295_v2 = vpop.xlane.xlu0 %2294 }
 0x3b9   : > { %v4908_v25 = vsel %vm13573_vm1, %v4904_v42, %v2295_v2  ;;  %v14812_v2 = vld [vmem:[#allocation34_spill] sm:$0xff] }
 0x3ba   : > { %2873 = vmax.xlane.f32.xlu1 %v14804_v4  ;;  %2870 = vmax.xlane.f32.xlu0 %v14805_v47  ;;  %v2324_v56 = vpop.xlane.xlu1 %2323 }
 0x3bb   : > { %v4911_v19 = vsel %vm13572_vm14, %v4907_v62, %v2324_v56 }
 0x3bc   : > { %v2321_v33 = vpop.xlane.xlu0 %2320 }
 0x3bd   : > { %v4910_v31 = vsel %vm13572_vm14, %v4906_v16, %v2321_v33 }
 0x3be   : > { %2899 = vmax.xlane.f32.xlu1 %v14806_v0  ;;  %2896 = vmax.xlane.f32.xlu0 %v14807_v27  ;;  %v2330_v12 = vpop.xlane.xlu1 %2329  ;;  %v14817_v0 = vld [vmem:[#allocation35_spill] sm:$0xff]  ;;  %v14818_v27 = vld [vmem:[#allocation26_spill] sm:$0xff] }
 0x3bf   : > { %v4913_v59 = vsel %vm13572_vm14, %v4909_v41, %v2330_v12 }
 0x3c0   : > { %v2327_v20 = vpop.xlane.xlu0 %2326 }
 0x3c1   : > { %v4912_v42 = vsel %vm13572_vm14, %v4908_v25, %v2327_v20 }
 0x3c2   : > { %2905 = vmax.xlane.f32.xlu1 %v14808_v37  ;;  %2902 = vmax.xlane.f32.xlu0 %v14809_v36  ;;  %v2356_v30 = vpop.xlane.xlu1 %2355 }
 0x3c3   : > { %v4915_v62 = vsel %vm14810_vm10, %v4911_v19, %v2356_v30  ;;  %vm14823_vm10 = vcmask 64512  }
 0x3c4   : > { %v2353_v48 = vpop.xlane.xlu0 %2352 }
 0x3c5   : > { %v4914_v16 = vsel %vm14811_vm13, %v4910_v31, %v2353_v48  ;;  %vm14824_vm13 = vmmov %vm14823_vm10  ;;  %v14825_v48 = vld [vmem:[#allocation153_spill] sm:$0xff] }
 0x3c6   : > { %2931 = vmax.xlane.f32.xlu1 %v14812_v2  ;;  %2928 = vmax.xlane.f32.xlu0 %v9991_v14  ;;  %v2362_v4 = vpop.xlane.xlu1 %2361 }
 0x3c7   : > { %v4917_v41 = vsel %vm14813_vm5, %v4913_v59, %v2362_v4  ;;  %vm14827_vm5 = vmmov %vm14823_vm10 }
 0x3c8   : > { %v2359_v47 = vpop.xlane.xlu0 %2358 }
 0x3c9   : > { %v4916_v25 = vsel %vm14814_vm9, %v4912_v42, %v2359_v47  ;;  %v14821_v42 = vld [vmem:[#allocation72_spill] sm:$0xff]  ;;  %vm14828_vm9 = vmmov %vm14827_vm5 }
 0x3ca   : > { %2937 = vmax.xlane.f32.xlu1 %v9993_v15  ;;  %2934 = vmax.xlane.f32.xlu0 %v10001_v18  ;;  %v2388_v56 = vpop.xlane.xlu1 %2387  ;;  %v14822_v15 = vld [vmem:[#allocation73_spill] sm:$0xff] }
 0x3cb   : > { %v4919_v19 = vsel %vm14815_vm11, %v4915_v62, %v2388_v56  ;;  %v14826_v62 = vld [vmem:[#allocation16_spill] sm:$0xff]  ;;  %vm14831_vm11 = vcmask 72704  }
 0x3cc   : > { %v2385_v33 = vpop.xlane.xlu0 %2384 }
 0x3cd   : > { %v4918_v31 = vsel %vm14816_vm2, %v4914_v16, %v2385_v33  ;;  %vm14832_vm2 = vmmov %vm14831_vm11 }
 0x3ce   : > { %2963 = vmax.xlane.f32.xlu1 %v14817_v0  ;;  %2960 = vmax.xlane.f32.xlu0 %v14818_v27  ;;  %v2394_v14 = vpop.xlane.xlu1 %2393  ;;  %v14833_v0 = vld [vmem:[#allocation156_spill] sm:$0xff]  ;;  %v14834_v27 = vld [vmem:[#allocation157_spill] sm:$0xff] }
 0x3cf   : > { %v4921_v20 = vsel %vm14819_vm7, %v4917_v41, %v2394_v14  ;;  %v14829_v41 = vld [vmem:[#allocation154_spill] sm:$0xff]  ;;  %vm14835_vm7 = vmmov %vm14832_vm2 }
 0x3d0   : > { %v2391_v12 = vpop.xlane.xlu0 %2390 }
 0x3d1   : > { %v4920_v59 = vsel %vm14820_vm8, %v4916_v25, %v2391_v12  ;;  %v14830_v25 = vld [vmem:[#allocation155_spill] sm:$0xff]  ;;  %vm14836_vm8 = vmmov %vm14832_vm2 }
 0x3d2   : > { %2969 = vmax.xlane.f32.xlu1 %v14821_v42  ;;  %2966 = vmax.xlane.f32.xlu0 %v14822_v15  ;;  %v2420_v18 = vpop.xlane.xlu1 %2419  ;;  %v14837_v42 = vld [vmem:[#allocation27_spill] sm:$0xff]  ;;  %v14838_v15 = vld [vmem:[#allocation158_spill] sm:$0xff] }
 0x3d3   : > { %v4923_v36 = vsel %vm14823_vm10, %v4919_v19, %v2420_v18  ;;  %vm14839_vm10 = vcmask 80896  }
 0x3d4   : > { %v2417_v37 = vpop.xlane.xlu0 %2416 }
 0x3d5   : > { %v4922_v30 = vsel %vm14824_vm13, %v4918_v31, %v2417_v37  ;;  %vm14840_vm13 = vmmov %vm14839_vm10 }
 0x3d6   : > { %2995 = vmax.xlane.f32.xlu1 %v14825_v48  ;;  %2992 = vmax.xlane.f32.xlu0 %v14826_v62  ;;  %v2426_v16 = vpop.xlane.xlu1 %2425  ;;  %v14841_v48 = vld [vmem:[#allocation159_spill] sm:$0xff]  ;;  %v14842_v62 = vld [vmem:[#allocation160_spill] sm:$0xff] }
 0x3d7   : > { %v4925_v4 = vsel %vm14827_vm5, %v4921_v20, %v2426_v16  ;;  %vm14843_vm5 = vmmov %vm14839_vm10 }
 0x3d8   : > { %v2423_v2 = vpop.xlane.xlu0 %2422 }
 0x3d9   : > { %v4924_v47 = vsel %vm14828_vm9, %v4920_v59, %v2423_v2  ;;  %vm14844_vm9 = vmmov %vm14843_vm5 }
 0x3da   : > { %3001 = vmax.xlane.f32.xlu1 %v14829_v41  ;;  %2998 = vmax.xlane.f32.xlu0 %v14830_v25  ;;  %v2452_v56 = vpop.xlane.xlu1 %2451  ;;  %v14845_v41 = vld [vmem:[#allocation18_spill] sm:$0xff]  ;;  %v14846_v25 = vld [vmem:[#allocation161_spill] sm:$0xff] }
 0x3db   : > { %v4927_v19 = vsel %vm14831_vm11, %v4923_v36, %v2452_v56  ;;  %vm14847_vm11 = vcmask 89088  }
 0x3dc   : > { %v2449_v33 = vpop.xlane.xlu0 %2448 }
 0x3dd   : > { %v4926_v31 = vsel %vm14832_vm2, %v4922_v30, %v2449_v33  ;;  %vm14848_vm2 = vmmov %vm14847_vm11 }
 0x3de   : > { %3027 = vmax.xlane.f32.xlu1 %v14833_v0  ;;  %3024 = vmax.xlane.f32.xlu0 %v14834_v27  ;;  %v2458_v14 = vpop.xlane.xlu1 %2457 }
 0x3df   : > { %v4929_v20 = vsel %vm14835_vm7, %v4925_v4, %v2458_v14  ;;  %vm14849_vm7 = vmmov %vm14848_vm2 }
 0x3e0   : > { %v2455_v12 = vpop.xlane.xlu0 %2454 }
 0x3e1   : > { %v4928_v59 = vsel %vm14836_vm8, %v4924_v47, %v2455_v12  ;;  %vm14850_vm8 = vmmov %vm14848_vm2 }
 0x3e2   : > { %3033 = vmax.xlane.f32.xlu1 %v14837_v42  ;;  %3030 = vmax.xlane.f32.xlu0 %v14838_v15  ;;  %v2484_v18 = vpop.xlane.xlu1 %2483 }
 0x3e3   : > { %v4931_v36 = vsel %vm14839_vm10, %v4927_v19, %v2484_v18  ;;  %vm14853_vm10 = vcmask 97280  }
 0x3e4   : > { %v2481_v37 = vpop.xlane.xlu0 %2480 }
 0x3e5   : > { %v4930_v30 = vsel %vm14840_vm13, %v4926_v31, %v2481_v37  ;;  %vm14854_vm13 = vmmov %vm14853_vm10 }
 0x3e6   : > { %3059 = vmax.xlane.f32.xlu1 %v14841_v48  ;;  %3056 = vmax.xlane.f32.xlu0 %v14842_v62  ;;  %v2490_v16 = vpop.xlane.xlu1 %2489 }
 0x3e7   : > { %v4933_v4 = vsel %vm14843_vm5, %v4929_v20, %v2490_v16  ;;  %v14851_v20 = vld [vmem:[#allocation36_spill] sm:$0xff]  ;;  %vm14855_vm5 = vmmov %vm14853_vm10 }
 0x3e8   : > { %v2487_v2 = vpop.xlane.xlu0 %2486 }
 0x3e9   : > { %v4932_v47 = vsel %vm14844_vm9, %v4928_v59, %v2487_v2  ;;  %v14852_v59 = vld [vmem:[#allocation37_spill] sm:$0xff]  ;;  %vm14856_vm9 = vmmov %vm14855_vm5 }
 0x3ea   : > { %3065 = vmax.xlane.f32.xlu1 %v14845_v41  ;;  %3062 = vmax.xlane.f32.xlu0 %v14846_v25  ;;  %v14857_v41 = vld [vmem:[#allocation74_spill] sm:$0xff] }
 0x3eb   : > { %v2516_v56 = vpop.xlane.xlu1 %2515 }
 0x3ec   : > { %v2513_v33 = vpop.xlane.xlu0 %2512  ;;  %v4935_v19 = vsel %vm14847_vm11, %v4931_v36, %v2516_v56  ;;  %vm14886_vm11 = vcmask 48128  }
 0x3ed   : > { %v4934_v31 = vsel %vm14848_vm2, %v4930_v30, %v2513_v33  ;;  %vm14887_vm2 = vmmov %vm14886_vm11 }
 0x3ee   : > { %3091 = vmax.xlane.f32.xlu1 %v10240_v49  ;;  %3088 = vmax.xlane.f32.xlu0 %v10242_v38 }
 0x3ef   : > { %v2522_v0 = vpop.xlane.xlu1 %2521 }
 0x3f0   : > { %v2519_v27 = vpop.xlane.xlu0 %2518  ;;  %v4937_v14 = vsel %vm14849_vm7, %v4933_v4, %v2522_v0  ;;  %v14859_v0 = vld [vmem:[#allocation39_spill] sm:$0xff]  ;;  %vm14890_vm7 = vmmov %vm14887_vm2 }
 0x3f1   : > { %v4936_v12 = vsel %vm14850_vm8, %v4932_v47, %v2519_v27  ;;  %vm14891_vm8 = vmmov %vm14887_vm2 }
 0x3f2   : > { %3097 = vmax.xlane.f32.xlu1 %v14851_v20  ;;  %3094 = vmax.xlane.f32.xlu0 %v14852_v59 }
 0x3f3   : > { %v2548_v42 = vpop.xlane.xlu1 %2547 }
 0x3f4   : > { %v2545_v15 = vpop.xlane.xlu0 %2544  ;;  %v4939_v18 = vsel %vm14853_vm10, %v4935_v19, %v2548_v42  ;;  %vm14894_vm10 = vcmask 56320  }
 0x3f5   : > { %v4938_v37 = vsel %vm14854_vm13, %v4934_v31, %v2545_v15  ;;  %v14861_v15 = vld [vmem:[#allocation162_spill] sm:$0xff]  ;;  %vm14895_vm13 = vmmov %vm14894_vm10 }
 0x3f6   : > { %3123 = vmax.xlane.f32.xlu1 %v10284_v63  ;;  %3120 = vmax.xlane.f32.xlu0 %v10286_v22 }
 0x3f7   : > { %v2554_v49 = vpop.xlane.xlu1 %2553 }
 0x3f8   : > { %v2551_v38 = vpop.xlane.xlu0 %2550  ;;  %v4941_v36 = vsel %vm14855_vm5, %v4937_v14, %v2554_v49  ;;  %vm14898_vm5 = vmmov %vm14894_vm10 }
 0x3f9   : > { %v4940_v30 = vsel %vm14856_vm9, %v4936_v12, %v2551_v38  ;;  %v14863_v38 = vld [vmem:[#allocation76_spill] sm:$0xff]  ;;  %vm14899_vm9 = vmmov %vm14898_vm5 }
 0x3fa   : > { %3129 = vmax.xlane.f32.xlu1 %v10288_v28  ;;  %3126 = vmax.xlane.f32.xlu0 %v10295_v7  ;;  %v14858_v28 = vld [vmem:[#allocation38_spill] sm:$0xff] }
 0x3fb   : > { %v2580_v48 = vpop.xlane.xlu1 %2579 }
 0x3fc   : > { %v2577_v62 = vpop.xlane.xlu0 %2576  ;;  %v4943_v16 = vsel %vm4759_vm0, %v4939_v18, %v2580_v48  ;;  %v14862_v18 = vld [vmem:[#allocation163_spill] sm:$0xff]  ;;  %v14865_v48 = vld [vmem:[#allocation165_spill] sm:$0xff] }
 0x3fd   : > { %v4942_v2 = vsel %vm4759_vm0, %v4938_v37, %v2577_v62  ;;  %v14866_v62 = vld [vmem:[#allocation166_spill] sm:$0xff] }
 0x3fe   : > { %3155 = vmax.xlane.f32.xlu1 %v10334_v13  ;;  %3152 = vmax.xlane.f32.xlu0 %v10336_v46 }
 0x3ff   : > { %v2586_v63 = vpop.xlane.xlu1 %2585 }
 0x400   : > { %v2583_v22 = vpop.xlane.xlu0 %2582  ;;  %v4945_v4 = vsel %vm4759_vm0, %v4941_v36, %v2586_v63  ;;  %v14864_v36 = vld [vmem:[#allocation164_spill] sm:$0xff] }
 0x401   : > { %v4944_v47 = vsel %vm4759_vm0, %v4940_v30, %v2583_v22 }
 0x402   : > { %3161 = vmax.xlane.f32.xlu1 %v14857_v41  ;;  %3158 = vmax.xlane.f32.xlu0 %v14858_v28 }
 0x403   : > { %v2612_v7 = vpop.xlane.xlu1 %2611 }
 0x404   : > { %v2609_v25 = vpop.xlane.xlu0 %2608  ;;  %v4947_v56 = vsel %vm4764_vm4, %v4943_v16, %v2612_v7 }
 0x405   : > { %v4946_v33 = vsel %vm4764_vm4, %v4942_v2, %v2609_v25 }
 0x406   : > { %3187 = vmax.xlane.f32.xlu1 %v10386_v10  ;;  %3184 = vmax.xlane.f32.xlu0 %v10388_v51  ;;  %v14860_v10 = vld [vmem:[#allocation75_spill] sm:$0xff] }
 0x407   : > { %v2618_v13 = vpop.xlane.xlu1 %2617 }
 0x408   : > { %v2615_v46 = vpop.xlane.xlu0 %2614  ;;  %v4949_v19 = vsel %vm4764_vm4, %v4945_v4, %v2618_v13  ;;  %v14867_v4 = vld [vmem:[#allocation77_spill] sm:$0xff] }
 0x409   : > { %v4948_v31 = vsel %vm4764_vm4, %v4944_v47, %v2615_v46  ;;  %v14868_v47 = vld [vmem:[#allocation40_spill] sm:$0xff] }
 0x40a   : > { %3193 = vmax.xlane.f32.xlu1 %v10396_v34  ;;  %3190 = vmax.xlane.f32.xlu0 %v14859_v0  ;;  %v14871_v0 = vld [vmem:[#allocation168_spill] sm:$0xff] }
 0x40b   : > { %v2644_v27 = vpop.xlane.xlu1 %2643 }
 0x40c   : > { %v2641_v14 = vpop.xlane.xlu0 %2640  ;;  %v12816_v12 = vsel %vm4769_vm3, %v4947_v56, %v2644_v27  ;;  %v14869_v56 = vld [vmem:[#allocation78_spill] sm:$0xff]  ;;  %v14872_v27 = vld [vmem:[#allocation79_spill] sm:$0xff] }
 0x40d   : > { %v12819_v20 = vsel %vm4769_vm3, %v4946_v33, %v2641_v14  ;;  %v14870_v33 = vld [vmem:[#allocation167_spill] sm:$0xff] }
 0x40e   : > { %3219 = vmax.xlane.f32.xlu1 %v10430_v1  ;;  %3216 = vmax.xlane.f32.xlu0 %v14860_v10 }
 0x40f   : > { %v2650_v51 = vpop.xlane.xlu1 %2649 }
 0x410   : > { %v2647_v59 = vpop.xlane.xlu0 %2646  ;;  %v12824_v42 = vsel %vm4769_vm3, %v4949_v19, %v2650_v51 }
 0x411   : > { %v12827_v34 = vsel %vm4769_vm3, %v4948_v31, %v2647_v59 }
 0x412   : > { %3225 = vmax.xlane.f32.xlu1 %v14861_v15  ;;  %3222 = vmax.xlane.f32.xlu0 %v14862_v18  ;;  %v14873_v15 = vld [vmem:[#allocation80_spill] sm:$0xff]  ;;  %v14874_v18 = vld [vmem:[#allocation169_spill] sm:$0xff] }
 0x413   : > { %v2676_v37 = vpop.xlane.xlu1 %2675 }
 0x414   : > { %v2673_v49 = vpop.xlane.xlu0 %2672 }
 0x416   : > { %3251 = vmax.xlane.f32.xlu1 %v14863_v38  ;;  %3248 = vmax.xlane.f32.xlu0 %v14864_v36 }
 0x417   : > { %v2682_v1 = vpop.xlane.xlu1 %2681 }
 0x418   : > { %v2679_v30 = vpop.xlane.xlu0 %2678 }
 0x41a   : > { %3257 = vmax.xlane.f32.xlu1 %v14865_v48  ;;  %3254 = vmax.xlane.f32.xlu0 %v14866_v62 }
 0x41b   : > { %v2708_v16 = vpop.xlane.xlu1 %2707 }
 0x41c   : > { %v2705_v2 = vpop.xlane.xlu0 %2704  ;;  %v4955_v63 = vsel %vm4699_vm12, %v2676_v37, %v2708_v16 }
 0x41d   : > { %v4954_v22 = vsel %vm4699_vm12, %v2673_v49, %v2705_v2  ;;  %v14876_v2 = vld [vmem:[#allocation82_spill] sm:$0xff] }
 0x41e   : > { %3283 = vmax.xlane.f32.xlu1 %v14867_v4  ;;  %3280 = vmax.xlane.f32.xlu0 %v14868_v47 }
 0x41f   : > { %v2714_v41 = vpop.xlane.xlu1 %2713 }
 0x420   : > { %v2711_v28 = vpop.xlane.xlu0 %2710  ;;  %v4957_v7 = vsel %vm4699_vm12, %v2682_v1, %v2714_v41  ;;  %v14875_v1 = vld [vmem:[#allocation81_spill] sm:$0xff] }
 0x421   : > { %v4956_v25 = vsel %vm4699_vm12, %v2679_v30, %v2711_v28  ;;  %v14878_v28 = vld [vmem:[#allocation170_spill] sm:$0xff] }
 0x422   : > { %3289 = vmax.xlane.f32.xlu1 %v14869_v56  ;;  %3286 = vmax.xlane.f32.xlu0 %v14870_v33 }
 0x423   : > { %v2740_v13 = vpop.xlane.xlu1 %2739 }
 0x424   : > { %v2737_v46 = vpop.xlane.xlu0 %2736  ;;  %v4959_v19 = vsel %vm4704_vm6, %v4955_v63, %v2740_v13  ;;  %v14877_v63 = vld [vmem:[#allocation41_spill] sm:$0xff]  ;;  %v14880_v13 = vld [vmem:[#allocation172_spill] sm:$0xff] }
 0x425   : > { %v4958_v31 = vsel %vm4704_vm6, %v4954_v22, %v2737_v46  ;;  %v14881_v46 = vld [vmem:[#allocation83_spill] sm:$0xff] }
 0x426   : > { %3315 = vmax.xlane.f32.xlu1 %v14871_v0  ;;  %3312 = vmax.xlane.f32.xlu0 %v14872_v27 }
 0x427   : > { %v2746_v14 = vpop.xlane.xlu1 %2745 }
 0x428   : > { %v2743_v10 = vpop.xlane.xlu0 %2742  ;;  %v4961_v51 = vsel %vm4704_vm6, %v4957_v7, %v2746_v14  ;;  %v14882_v14 = vld [vmem:[#allocation84_spill] sm:$0xff] }
 0x429   : > { %v4960_v59 = vsel %vm4704_vm6, %v4956_v25, %v2743_v10  ;;  %v14883_v10 = vld [vmem:[#allocation173_spill] sm:$0xff] }
 0x42a   : > { %3321 = vmax.xlane.f32.xlu1 %v14873_v15  ;;  %3318 = vmax.xlane.f32.xlu0 %v14874_v18 }
 0x42b   : > { %v2772_v37 = vpop.xlane.xlu1 %2771 }
 0x42c   : > { %v2769_v49 = vpop.xlane.xlu0 %2768  ;;  %v4963_v38 = vsel %vm4709_vm15, %v4959_v19, %v2772_v37  ;;  %v14884_v37 = vld [vmem:[#allocation85_spill] sm:$0xff] }
 0x42d   : > { %v4962_v36 = vsel %vm4709_vm15, %v4958_v31, %v2769_v49  ;;  %v14885_v49 = vld [vmem:[#allocation86_spill] sm:$0xff] }
 0x42e   : > { %3347 = vmax.xlane.f32.xlu1 %v10632_v43  ;;  %3344 = vmax.xlane.f32.xlu0 %v14875_v1  ;;  %v14879_v43 = vld [vmem:[#allocation171_spill] sm:$0xff] }
 0x42f   : > { %v2778_v30 = vpop.xlane.xlu1 %2777 }
 0x430   : > { %v2775_v48 = vpop.xlane.xlu0 %2774  ;;  %v4965_v62 = vsel %vm4709_vm15, %v4961_v51, %v2778_v30 }
 0x431   : > { %v4964_v16 = vsel %vm4709_vm15, %v4960_v59, %v2775_v48  ;;  %v14888_v48 = vld [vmem:[#allocation87_spill] sm:$0xff] }
 0x432   : > { %3353 = vmax.xlane.f32.xlu1 %v14876_v2  ;;  %3350 = vmax.xlane.f32.xlu0 %v14877_v63 }
 0x433   : > { %v2804_v22 = vpop.xlane.xlu1 %2803 }
 0x434   : > { %v2801_v4 = vpop.xlane.xlu0 %2800  ;;  %v4967_v47 = vsel %vm13573_vm1, %v4963_v38, %v2804_v22 }
 0x435   : > { %v4966_v41 = vsel %vm13573_vm1, %v4962_v36, %v2801_v4  ;;  %v14892_v4 = vld [vmem:[#allocation174_spill] sm:$0xff] }
 0x436   : > { %3379 = vmax.xlane.f32.xlu1 %v14878_v28  ;;  %3376 = vmax.xlane.f32.xlu0 %v14879_v43 }
 0x437   : > { %v2810_v7 = vpop.xlane.xlu1 %2809 }
 0x438   : > { %v2807_v25 = vpop.xlane.xlu0 %2806  ;;  %v4969_v56 = vsel %vm13573_vm1, %v4965_v62, %v2810_v7  ;;  %v14889_v62 = vld [vmem:[#allocation42_spill] sm:$0xff] }
 0x439   : > { %v4968_v33 = vsel %vm13573_vm1, %v4964_v16, %v2807_v25  ;;  %v14896_v25 = vld [vmem:[#allocation88_spill] sm:$0xff] }
 0x43a   : > { %3385 = vmax.xlane.f32.xlu1 %v14880_v13  ;;  %3382 = vmax.xlane.f32.xlu0 %v14881_v46 }
 0x43b   : > { %v2836_v19 = vpop.xlane.xlu1 %2835 }
 0x43c   : > { %v2833_v31 = vpop.xlane.xlu0 %2832  ;;  %v4971_v0 = vsel %vm13572_vm14, %v4967_v47, %v2836_v19  ;;  %v14893_v47 = vld [vmem:[#allocation43_spill] sm:$0xff] }
 0x43d   : > { %v4970_v27 = vsel %vm13572_vm14, %v4966_v41, %v2833_v31  ;;  %v14900_v31 = vld [vmem:[#allocation176_spill] sm:$0xff] }
 0x43e   : > { %3411 = vmax.xlane.f32.xlu1 %v14882_v14  ;;  %3408 = vmax.xlane.f32.xlu0 %v14883_v10 }
 0x43f   : > { %v2842_v51 = vpop.xlane.xlu1 %2841 }
 0x440   : > { %v2839_v59 = vpop.xlane.xlu0 %2838  ;;  %v4973_v15 = vsel %vm13572_vm14, %v4969_v56, %v2842_v51  ;;  %v14897_v56 = vld [vmem:[#allocation175_spill] sm:$0xff] }
 0x441   : > { %v4972_v18 = vsel %vm13572_vm14, %v4968_v33, %v2839_v59 }
 0x442   : > { %3417 = vmax.xlane.f32.xlu1 %v14884_v37  ;;  %3414 = vmax.xlane.f32.xlu0 %v14885_v49  ;;  %v14906_v49 = vld [vmem:[#allocation89_spill] sm:$0xff] }
 0x443   : > { %v2868_v38 = vpop.xlane.xlu1 %2867 }
 0x444   : > { %v2865_v36 = vpop.xlane.xlu0 %2864  ;;  %v4975_v1 = vsel %vm14886_vm11, %v4971_v0, %v2868_v38  ;;  %v14901_v0 = vld [vmem:[#allocation177_spill] sm:$0xff]  ;;  %vm14902_vm11 = vcmask 64512   ;;  %v14907_v38 = vld [vmem:[#allocation90_spill] sm:$0xff] }
 0x445   : > { %v4974_v30 = vsel %vm14887_vm2, %v4970_v27, %v2865_v36  ;;  %vm14903_vm2 = vmmov %vm14902_vm11 }
 0x446   : > { %3443 = vmax.xlane.f32.xlu1 %v14888_v48  ;;  %3440 = vmax.xlane.f32.xlu0 %v14889_v62  ;;  %v14910_v62 = vld [vmem:[#allocation178_spill] sm:$0xff] }
 0x447   : > { %v2874_v16 = vpop.xlane.xlu1 %2873 }
 0x448   : > { %v2871_v2 = vpop.xlane.xlu0 %2870  ;;  %v4977_v63 = vsel %vm14890_vm7, %v4973_v15, %v2874_v16  ;;  %vm14904_vm7 = vmmov %vm14903_vm2 }
 0x449   : > { %v4976_v22 = vsel %vm14891_vm8, %v4972_v18, %v2871_v2  ;;  %vm14905_vm8 = vmmov %vm14903_vm2 }
 0x44a   : > { %3449 = vmax.xlane.f32.xlu1 %v14892_v4  ;;  %3446 = vmax.xlane.f32.xlu0 %v14893_v47  ;;  %v14915_v4 = vld [vmem:[#allocation181_spill] sm:$0xff] }
 0x44b   : > { %v2900_v41 = vpop.xlane.xlu1 %2899 }
 0x44c   : > { %v2897_v28 = vpop.xlane.xlu0 %2896  ;;  %v4979_v43 = vsel %vm14894_vm10, %v4975_v1, %v2900_v41  ;;  %vm14908_vm10 = vcmask 72704  }
 0x44d   : > { %v4978_v7 = vsel %vm14895_vm13, %v4974_v30, %v2897_v28  ;;  %vm14909_vm13 = vmmov %vm14908_vm10 }
 0x44e   : > { %3475 = vmax.xlane.f32.xlu1 %v14896_v25  ;;  %3472 = vmax.xlane.f32.xlu0 %v14897_v56  ;;  %v14919_v25 = vld [vmem:[#allocation92_spill] sm:$0xff] }
 0x44f   : > { %v2906_v33 = vpop.xlane.xlu1 %2905 }
 0x450   : > { %v2903_v13 = vpop.xlane.xlu0 %2902  ;;  %v4981_v46 = vsel %vm14898_vm5, %v4977_v63, %v2906_v33  ;;  %vm14912_vm5 = vmmov %vm14908_vm10 }
 0x451   : > { %v4980_v19 = vsel %vm14899_vm9, %v4976_v22, %v2903_v13  ;;  %vm14913_vm9 = vmmov %vm14912_vm5  ;;  %v14914_v22 = vld [vmem:[#allocation180_spill] sm:$0xff] }
 0x452   : > { %3481 = vmax.xlane.f32.xlu1 %v14900_v31  ;;  %3478 = vmax.xlane.f32.xlu0 %v14901_v0  ;;  %v14923_v31 = vld [vmem:[#allocation183_spill] sm:$0xff] }
 0x453   : > { %v2932_v27 = vpop.xlane.xlu1 %2931 }
 0x454   : > { %v2929_v14 = vpop.xlane.xlu0 %2928  ;;  %v4983_v10 = vsel %vm14902_vm11, %v4979_v43, %v2932_v27  ;;  %vm14916_vm11 = vcmask 80896  }
 0x455   : > { %v4982_v51 = vsel %vm14903_vm2, %v4978_v7, %v2929_v14  ;;  %vm14917_vm2 = vmmov %vm14916_vm11  ;;  %v14918_v7 = vld [vmem:[#allocation91_spill] sm:$0xff] }
 0x456   : > { %3507 = vmax.xlane.f32.xlu1 %v10878_v21  ;;  %3504 = vmax.xlane.f32.xlu0 %v10880_v26  ;;  %v14911_v21 = vld [vmem:[#allocation179_spill] sm:$0xff] }
 0x457   : > { %v2938_v59 = vpop.xlane.xlu1 %2937 }
 0x458   : > { %v2935_v15 = vpop.xlane.xlu0 %2934  ;;  %v4985_v18 = vsel %vm14904_vm7, %v4981_v46, %v2938_v59  ;;  %vm14920_vm7 = vmmov %vm14917_vm2  ;;  %v14927_v59 = vld [vmem:[#allocation46_spill] sm:$0xff] }
 0x459   : > { %v4984_v37 = vsel %vm14905_vm8, %v4980_v19, %v2935_v15  ;;  %vm14921_vm8 = vmmov %vm14917_vm2  ;;  %v14922_v19 = vld [vmem:[#allocation182_spill] sm:$0xff] }
 0x45a   : > { %3513 = vmax.xlane.f32.xlu1 %v14906_v49  ;;  %3510 = vmax.xlane.f32.xlu0 %v14907_v38  ;;  %v14930_v38 = vld [vmem:[#allocation184_spill] sm:$0xff] }
 0x45b   : > { %v2964_v36 = vpop.xlane.xlu1 %2963 }
 0x45c   : > { %v2961_v1 = vpop.xlane.xlu0 %2960  ;;  %v4987_v30 = vsel %vm14908_vm10, %v4983_v10, %v2964_v36  ;;  %vm14924_vm10 = vcmask 89088   ;;  %v14931_v36 = vld [vmem:[#allocation93_spill] sm:$0xff] }
 0x45d   : > { %v4986_v48 = vsel %vm14909_vm13, %v4982_v51, %v2961_v1  ;;  %vm14925_vm13 = vmmov %vm14924_vm10  ;;  %v14926_v51 = vld [vmem:[#allocation45_spill] sm:$0xff] }
 0x45e   : > { %3539 = vmax.xlane.f32.xlu1 %v14910_v62  ;;  %3536 = vmax.xlane.f32.xlu0 %v14911_v21  ;;  %v14934_v21 = vld [vmem:[#allocation95_spill] sm:$0xff] }
 0x45f   : > { %v2970_v26 = vpop.xlane.xlu1 %2969 }
 0x460   : > { %v2967_v16 = vpop.xlane.xlu0 %2966  ;;  %v4989_v2 = vsel %vm14912_vm5, %v4985_v18, %v2970_v26  ;;  %vm14928_vm5 = vmmov %vm14924_vm10  ;;  %v14935_v26 = vld [vmem:[#allocation97_spill] sm:$0xff] }
 0x461   : > { %v4988_v63 = vsel %vm14913_vm9, %v4984_v37, %v2967_v16  ;;  %vm14929_vm9 = vmmov %vm14928_vm5 }
 0x462   : > { %3545 = vmax.xlane.f32.xlu1 %v14914_v22  ;;  %3542 = vmax.xlane.f32.xlu0 %v14915_v4  ;;  %v14938_v4 = vld [vmem:[#allocation185_spill] sm:$0xff] }
 0x463   : > { %v2996_v47 = vpop.xlane.xlu1 %2995 }
 0x464   : > { %v2993_v41 = vpop.xlane.xlu0 %2992  ;;  %v4991_v28 = vsel %vm14916_vm11, %v4987_v30, %v2996_v47  ;;  %vm14932_vm11 = vcmask 97280   ;;  %v14939_v47 = vld [vmem:[#allocation188_spill] sm:$0xff] }
 0x465   : > { %v4990_v43 = vsel %vm14917_vm2, %v4986_v48, %v2993_v41  ;;  %vm14933_vm2 = vmmov %vm14932_vm11 }
 0x466   : > { %3571 = vmax.xlane.f32.xlu1 %v14918_v7  ;;  %3568 = vmax.xlane.f32.xlu0 %v14919_v25  ;;  %v14940_v25 = vld [vmem:[#allocation47_spill] sm:$0xff] }
 0x467   : > { %v3002_v56 = vpop.xlane.xlu1 %3001 }
 0x468   : > { %v2999_v33 = vpop.xlane.xlu0 %2998  ;;  %v4993_v13 = vsel %vm14920_vm7, %v4989_v2, %v3002_v56  ;;  %vm14936_vm7 = vmmov %vm14933_vm2  ;;  %v14941_v56 = vld [vmem:[#allocation98_spill] sm:$0xff] }
 0x469   : > { %v4992_v46 = vsel %vm14921_vm8, %v4988_v63, %v2999_v33  ;;  %vm14937_vm8 = vmmov %vm14933_vm2 }
 0x46a   : > { %3577 = vmax.xlane.f32.xlu1 %v14922_v19  ;;  %3574 = vmax.xlane.f32.xlu0 %v14923_v31  ;;  %v14942_v31 = vld [vmem:[#allocation189_spill] sm:$0xff] }
 0x46b   : > { %v3028_v0 = vpop.xlane.xlu1 %3027 }
 0x46c   : > { %v3025_v27 = vpop.xlane.xlu0 %3024  ;;  %v4995_v14 = vsel %vm14924_vm10, %v4991_v28, %v3028_v0  ;;  %v14943_v0 = vld [vmem:[#allocation191_spill] sm:$0xff]  ;;  %vm14973_vm10 = vcmask 48128  }
 0x46d   : > { %v4994_v10 = vsel %vm14925_vm13, %v4990_v43, %v3025_v27  ;;  %vm14974_vm13 = vmmov %vm14973_vm10 }
 0x46e   : > { %3603 = vmax.xlane.f32.xlu1 %v14926_v51  ;;  %3600 = vmax.xlane.f32.xlu0 %v14927_v59  ;;  %v14944_v59 = vld [vmem:[#allocation99_spill] sm:$0xff] }
 0x46f   : > { %v3034_v15 = vpop.xlane.xlu1 %3033 }
 0x470   : > { %v3031_v18 = vpop.xlane.xlu0 %3030  ;;  %v4997_v37 = vsel %vm14928_vm5, %v4993_v13, %v3034_v15  ;;  %v14945_v15 = vld [vmem:[#allocation48_spill] sm:$0xff]  ;;  %vm14977_vm5 = vmmov %vm14973_vm10 }
 0x471   : > { %v4996_v49 = vsel %vm14929_vm9, %v4992_v46, %v3031_v18  ;;  %vm14978_vm9 = vmmov %vm14977_vm5 }
 0x472   : > { %3609 = vmax.xlane.f32.xlu1 %v14930_v38  ;;  %3606 = vmax.xlane.f32.xlu0 %v14931_v36  ;;  %v14946_v36 = vld [vmem:[#allocation192_spill] sm:$0xff] }
 0x473   : > { %v3060_v1 = vpop.xlane.xlu1 %3059 }
 0x474   : > { %v3057_v30 = vpop.xlane.xlu0 %3056  ;;  %v4999_v48 = vsel %vm14932_vm11, %v4995_v14, %v3060_v1  ;;  %v14947_v1 = vld [vmem:[#allocation193_spill] sm:$0xff]  ;;  %vm14981_vm11 = vcmask 56320  }
 0x475   : > { %v4998_v62 = vsel %vm14933_vm2, %v4994_v10, %v3057_v30  ;;  %vm14982_vm2 = vmmov %vm14981_vm11 }
 0x476   : > { %3635 = vmax.xlane.f32.xlu1 %v14934_v21  ;;  %3632 = vmax.xlane.f32.xlu0 %v14935_v26  ;;  %v14948_v26 = vld [vmem:[#allocation101_spill] sm:$0xff] }
 0x477   : > { %v3066_v16 = vpop.xlane.xlu1 %3065 }
 0x478   : > { %v3063_v2 = vpop.xlane.xlu0 %3062  ;;  %v5001_v63 = vsel %vm14936_vm7, %v4997_v37, %v3066_v16  ;;  %v14949_v16 = vld [vmem:[#allocation102_spill] sm:$0xff]  ;;  %vm14985_vm7 = vmmov %vm14982_vm2 }
 0x479   : > { %v5000_v22 = vsel %vm14937_vm8, %v4996_v49, %v3063_v2  ;;  %vm14986_vm8 = vmmov %vm14982_vm2 }
 0x47a   : > { %3641 = vmax.xlane.f32.xlu1 %v14938_v4  ;;  %3638 = vmax.xlane.f32.xlu0 %v14939_v47  ;;  %v14950_v47 = vld [vmem:[#allocation103_spill] sm:$0xff] }
 0x47b   : > { %v3092_v41 = vpop.xlane.xlu1 %3091 }
 0x47c   : > { %v3089_v28 = vpop.xlane.xlu0 %3088  ;;  %v5003_v43 = vsel %vm4759_vm0, %v4999_v48, %v3092_v41  ;;  %v14951_v41 = vld [vmem:[#allocation49_spill] sm:$0xff] }
 0x47d   : > { %v5002_v7 = vsel %vm4759_vm0, %v4998_v62, %v3089_v28 }
 0x47e   : > { %3667 = vmax.xlane.f32.xlu1 %v14940_v25  ;;  %3664 = vmax.xlane.f32.xlu0 %v14941_v56  ;;  %v14953_v25 = vld [vmem:[#allocation195_spill] sm:$0xff] }
 0x47f   : > { %v3098_v33 = vpop.xlane.xlu1 %3097 }
 0x480   : > { %v3095_v13 = vpop.xlane.xlu0 %3094  ;;  %v5005_v46 = vsel %vm4759_vm0, %v5001_v63, %v3098_v33 }
 0x481   : > { %v5004_v19 = vsel %vm4759_vm0, %v5000_v22, %v3095_v13  ;;  %v14954_v13 = vld [vmem:[#allocation196_spill] sm:$0xff] }
 0x482   : > { %3673 = vmax.xlane.f32.xlu1 %v14942_v31  ;;  %3670 = vmax.xlane.f32.xlu0 %v14943_v0 }
 0x483   : > { %v3124_v27 = vpop.xlane.xlu1 %3123 }
 0x484   : > { %v3121_v14 = vpop.xlane.xlu0 %3120  ;;  %v5007_v10 = vsel %vm4764_vm4, %v5003_v43, %v3124_v27 }
 0x485   : > { %v5006_v51 = vsel %vm4764_vm4, %v5002_v7, %v3121_v14  ;;  %v14952_v7 = vld [vmem:[#allocation194_spill] sm:$0xff] }
 0x486   : > { %3699 = vmax.xlane.f32.xlu1 %v14944_v59  ;;  %3696 = vmax.xlane.f32.xlu0 %v14945_v15  ;;  %v14956_v14 = vld [vmem:[#allocation50_spill] sm:$0xff] }
 0x487   : > { %v3130_v18 = vpop.xlane.xlu1 %3129 }
 0x488   : > { %v3127_v37 = vpop.xlane.xlu0 %3126  ;;  %v5009_v49 = vsel %vm4764_vm4, %v5005_v46, %v3130_v18  ;;  %v14955_v46 = vld [vmem:[#allocation197_spill] sm:$0xff] }
 0x489   : > { %v5008_v38 = vsel %vm4764_vm4, %v5004_v19, %v3127_v37  ;;  %v14958_v37 = vld [vmem:[#allocation198_spill] sm:$0xff] }
 0x48a   : > { %3705 = vmax.xlane.f32.xlu1 %v14946_v36  ;;  %3702 = vmax.xlane.f32.xlu0 %v14947_v1 }
 0x48b   : > { %v3156_v30 = vpop.xlane.xlu1 %3155 }
 0x48c   : > { %v3153_v48 = vpop.xlane.xlu0 %3152  ;;  %v12948_v62 = vsel %vm4769_vm3, %v5007_v10, %v3156_v30  ;;  %v14957_v10 = vld [vmem:[#allocation51_spill] sm:$0xff] }
 0x48d   : > { %v12951_v21 = vsel %vm4769_vm3, %v5006_v51, %v3153_v48 }
 0x48e   : > { %3731 = vmax.xlane.f32.xlu1 %v14948_v26  ;;  %3728 = vmax.xlane.f32.xlu0 %v14949_v16 }
 0x48f   : > { %v3162_v2 = vpop.xlane.xlu1 %3161 }
 0x490   : > { %v3159_v63 = vpop.xlane.xlu0 %3158  ;;  %v12956_v22 = vsel %vm4769_vm3, %v5009_v49, %v3162_v2  ;;  %v14959_v49 = vld [vmem:[#allocation199_spill] sm:$0xff] }
 0x491   : > { %v12959_v4 = vsel %vm4769_vm3, %v5008_v38, %v3159_v63  ;;  %v14960_v63 = vld [vmem:[#allocation104_spill] sm:$0xff] }
 0x492   : > { %3737 = vmax.xlane.f32.xlu1 %v14950_v47  ;;  %3734 = vmax.xlane.f32.xlu0 %v14951_v41 }
 0x493   : > { %v3188_v28 = vpop.xlane.xlu1 %3187 }
 0x494   : > { %v3185_v43 = vpop.xlane.xlu0 %3184 }
 0x496   : > { %3763 = vmax.xlane.f32.xlu1 %v14952_v7  ;;  %3760 = vmax.xlane.f32.xlu0 %v14953_v25  ;;  %v14961_v7 = vld [vmem:[#allocation105_spill] sm:$0xff] }
 0x497   : > { %v3194_v56 = vpop.xlane.xlu1 %3193 }
 0x498   : > { %v3191_v33 = vpop.xlane.xlu0 %3190 }
 0x49a   : > { %3769 = vmax.xlane.f32.xlu1 %v14954_v13  ;;  %3766 = vmax.xlane.f32.xlu0 %v14955_v46  ;;  %v14963_v13 = vld [vmem:[#allocation53_spill] sm:$0xff] }
 0x49b   : > { %v3220_v19 = vpop.xlane.xlu1 %3219 }
 0x49c   : > { %v3217_v31 = vpop.xlane.xlu0 %3216  ;;  %v5015_v0 = vsel %vm4699_vm12, %v3188_v28, %v3220_v19 }
 0x49d   : > { %v5014_v27 = vsel %vm4699_vm12, %v3185_v43, %v3217_v31 }
 0x49e   : > { %3795 = vmax.xlane.f32.xlu1 %v14956_v14  ;;  %3792 = vmax.xlane.f32.xlu0 %v14957_v10  ;;  %v14966_v14 = vld [vmem:[#allocation201_spill] sm:$0xff] }
 0x49f   : > { %v3226_v51 = vpop.xlane.xlu1 %3225 }
 0x4a0   : > { %v3223_v59 = vpop.xlane.xlu0 %3222  ;;  %v5017_v15 = vsel %vm4699_vm12, %v3194_v56, %v3226_v51 }
 0x4a1   : > { %v5016_v18 = vsel %vm4699_vm12, %v3191_v33, %v3223_v59 }
 0x4a2   : > { %3801 = vmax.xlane.f32.xlu1 %v14958_v37  ;;  %3798 = vmax.xlane.f32.xlu0 %v14959_v49  ;;  %v14968_v37 = vld [vmem:[#allocation108_spill] sm:$0xff] }
 0x4a3   : > { %v3252_v38 = vpop.xlane.xlu1 %3251 }
 0x4a4   : > { %v3249_v36 = vpop.xlane.xlu0 %3248  ;;  %v5019_v1 = vsel %vm4704_vm6, %v5015_v0, %v3252_v38 }
 0x4a5   : > { %v5018_v30 = vsel %vm4704_vm6, %v5014_v27, %v3249_v36  ;;  %v14965_v27 = vld [vmem:[#allocation200_spill] sm:$0xff] }
 0x4a6   : > { %3827 = vmax.xlane.f32.xlu1 %v11395_v40  ;;  %3824 = vmax.xlane.f32.xlu0 %v11397_v60  ;;  %v14962_v40 = vld [vmem:[#allocation12_spill] sm:$0xff] }
 0x4a7   : > { %v3258_v48 = vpop.xlane.xlu1 %3257 }
 0x4a8   : > { %v3255_v26 = vpop.xlane.xlu0 %3254  ;;  %v5021_v16 = vsel %vm4704_vm6, %v5017_v15, %v3258_v48  ;;  %v14970_v48 = vld [vmem:[#allocation109_spill] sm:$0xff] }
 0x4a9   : > { %v5020_v2 = vsel %vm4704_vm6, %v5016_v18, %v3255_v26  ;;  %v14967_v18 = vld [vmem:[#allocation107_spill] sm:$0xff] }
 0x4aa   : > { %3833 = vmax.xlane.f32.xlu1 %v11399_v6  ;;  %3830 = vmax.xlane.f32.xlu0 %v14960_v63  ;;  %v14964_v6 = vld [vmem:[#allocation55_spill] sm:$0xff] }
 0x4ab   : > { %v3284_v47 = vpop.xlane.xlu1 %3283 }
 0x4ac   : > { %v3281_v41 = vpop.xlane.xlu0 %3280  ;;  %v5023_v28 = vsel %vm4709_vm15, %v5019_v1, %v3284_v47  ;;  %v14971_v47 = vld [vmem:[#allocation202_spill] sm:$0xff] }
 0x4ad   : > { %v5022_v43 = vsel %vm4709_vm15, %v5018_v30, %v3281_v41  ;;  %v14969_v30 = vld [vmem:[#allocation13_spill] sm:$0xff]  ;;  %v14972_v41 = vld [vmem:[#allocation110_spill] sm:$0xff] }
 0x4ae   : > { %3859 = vmax.xlane.f32.xlu1 %v14961_v7  ;;  %3856 = vmax.xlane.f32.xlu0 %v14962_v40 }
 0x4af   : > { %v3290_v60 = vpop.xlane.xlu1 %3289 }
 0x4b0   : > { %v3287_v25 = vpop.xlane.xlu0 %3286  ;;  %v5025_v56 = vsel %vm4709_vm15, %v5021_v16, %v3290_v60  ;;  %v14975_v60 = vld [vmem:[#allocation28_spill] sm:$0xff] }
 0x4b1   : > { %v5024_v33 = vsel %vm4709_vm15, %v5020_v2, %v3287_v25  ;;  %v14976_v25 = vld [vmem:[#allocation203_spill] sm:$0xff] }
 0x4b2   : > { %3865 = vmax.xlane.f32.xlu1 %v14963_v13  ;;  %3862 = vmax.xlane.f32.xlu0 %v14964_v6 }
 0x4b3   : > { %v3316_v46 = vpop.xlane.xlu1 %3315 }
 0x4b4   : > { %v3313_v19 = vpop.xlane.xlu0 %3312  ;;  %v5027_v31 = vsel %vm13573_vm1, %v5023_v28, %v3316_v46  ;;  %v14979_v46 = vld [vmem:[#allocation112_spill] sm:$0xff] }
 0x4b5   : > { %v5026_v0 = vsel %vm13573_vm1, %v5022_v43, %v3313_v19  ;;  %v14980_v19 = vld [vmem:[#allocation113_spill] sm:$0xff] }
 0x4b6   : > { %3891 = vmax.xlane.f32.xlu1 %v14965_v27  ;;  %3888 = vmax.xlane.f32.xlu0 %v14966_v14 }
 0x4b7   : > { %v3322_v10 = vpop.xlane.xlu1 %3321 }
 0x4b8   : > { %v3319_v51 = vpop.xlane.xlu0 %3318  ;;  %v5029_v59 = vsel %vm13573_vm1, %v5025_v56, %v3322_v10  ;;  %v14983_v10 = vld [vmem:[#allocation114_spill] sm:$0xff] }
 0x4b9   : > { %v5028_v15 = vsel %vm13573_vm1, %v5024_v33, %v3319_v51  ;;  %v14984_v51 = vld [vmem:[#allocation29_spill] sm:$0xff] }
 0x4ba   : > { %3897 = vmax.xlane.f32.xlu1 %v14967_v18  ;;  %3894 = vmax.xlane.f32.xlu0 %v14968_v37 }
 0x4bb   : > { %v3348_v49 = vpop.xlane.xlu1 %3347 }
 0x4bc   : > { %v3345_v38 = vpop.xlane.xlu0 %3344  ;;  %v5031_v36 = vsel %vm13572_vm14, %v5027_v31, %v3348_v49  ;;  %v14987_v49 = vld [vmem:[#allocation204_spill] sm:$0xff] }
 0x4bd   : > { %v5030_v1 = vsel %vm13572_vm14, %v5026_v0, %v3345_v38  ;;  %v14988_v38 = vld [vmem:[#allocation14_spill] sm:$0xff] }
 0x4be   : > { %3923 = vmax.xlane.f32.xlu1 %v14969_v30  ;;  %3920 = vmax.xlane.f32.xlu0 %v14970_v48 }
 0x4bf   : > { %v3354_v26 = vpop.xlane.xlu1 %3353 }
 0x4c0   : > { %v3351_v16 = vpop.xlane.xlu0 %3350  ;;  %v5033_v2 = vsel %vm13572_vm14, %v5029_v59, %v3354_v26  ;;  %v14991_v26 = vld [vmem:[#allocation115_spill] sm:$0xff] }
 0x4c1   : > { %v5032_v63 = vsel %vm13572_vm14, %v5028_v15, %v3351_v16  ;;  %v14992_v16 = vld [vmem:[#allocation205_spill] sm:$0xff] }
 0x4c2   : > { %3929 = vmax.xlane.f32.xlu1 %v14971_v47  ;;  %3926 = vmax.xlane.f32.xlu0 %v14972_v41 }
 0x4c3   : > { %v3380_v28 = vpop.xlane.xlu1 %3379 }
 0x4c4   : > { %v3377_v43 = vpop.xlane.xlu0 %3376  ;;  %v5035_v7 = vsel %vm14973_vm10, %v5031_v36, %v3380_v28  ;;  %vm14989_vm10 = vcmask 64512   ;;  %v14995_v28 = vld [vmem:[#allocation206_spill] sm:$0xff] }
 0x4c5   : > { %v5034_v40 = vsel %vm14974_vm13, %v5030_v1, %v3377_v43  ;;  %vm14990_vm13 = vmmov %vm14989_vm10  ;;  %v14996_v43 = vld [vmem:[#allocation207_spill] sm:$0xff] }
 0x4c6   : > { %3955 = vmax.xlane.f32.xlu1 %v14975_v60  ;;  %3952 = vmax.xlane.f32.xlu0 %v14976_v25 }
 0x4c7   : > { %v3386_v56 = vpop.xlane.xlu1 %3385 }
 0x4c8   : > { %v3383_v33 = vpop.xlane.xlu0 %3382  ;;  %v5037_v13 = vsel %vm14977_vm5, %v5033_v2, %v3386_v56  ;;  %vm14993_vm5 = vmmov %vm14989_vm10  ;;  %v14999_v56 = vld [vmem:[#allocation56_spill] sm:$0xff] }
 0x4c9   : > { %v5036_v6 = vsel %vm14978_vm9, %v5032_v63, %v3383_v33  ;;  %vm14994_vm9 = vmmov %vm14993_vm5  ;;  %v15000_v33 = vld [vmem:[#allocation116_spill] sm:$0xff] }
 0x4ca   : > { %3961 = vmax.xlane.f32.xlu1 %v14979_v46  ;;  %3958 = vmax.xlane.f32.xlu0 %v14980_v19 }
 0x4cb   : > { %v3412_v31 = vpop.xlane.xlu1 %3411 }
 0x4cc   : > { %v3409_v0 = vpop.xlane.xlu0 %3408  ;;  %v5039_v27 = vsel %vm14981_vm11, %v5035_v7, %v3412_v31  ;;  %vm14997_vm11 = vcmask 72704   ;;  %v15003_v31 = vld [vmem:[#allocation15_spill] sm:$0xff] }
 0x4cd   : > { %v5038_v14 = vsel %vm14982_vm2, %v5034_v40, %v3409_v0  ;;  %vm14998_vm2 = vmmov %vm14997_vm11  ;;  %v15004_v0 = vld [vmem:[#allocation57_spill] sm:$0xff] }
 0x4ce   : > { %3987 = vmax.xlane.f32.xlu1 %v14983_v10  ;;  %3984 = vmax.xlane.f32.xlu0 %v14984_v51 }
 0x4cf   : > { %v3418_v59 = vpop.xlane.xlu1 %3417 }
 0x4d0   : > { %v3415_v15 = vpop.xlane.xlu0 %3414  ;;  %v5041_v18 = vsel %vm14985_vm7, %v5037_v13, %v3418_v59  ;;  %vm15001_vm7 = vmmov %vm14998_vm2  ;;  %v15007_v59 = vld [vmem:[#allocation208_spill] sm:$0xff] }
 0x4d1   : > { %v5040_v37 = vsel %vm14986_vm8, %v5036_v6, %v3415_v15  ;;  %vm15002_vm8 = vmmov %vm14998_vm2  ;;  %v15008_v15 = vld [vmem:[#allocation118_spill] sm:$0xff] }
 0x4d2   : > { %3993 = vmax.xlane.f32.xlu1 %v14987_v49  ;;  %3990 = vmax.xlane.f32.xlu0 %v14988_v38 }
 0x4d3   : > { %v3444_v36 = vpop.xlane.xlu1 %3443 }
 0x4d4   : > { %v3441_v1 = vpop.xlane.xlu0 %3440  ;;  %v5043_v30 = vsel %vm14989_vm10, %v5039_v27, %v3444_v36  ;;  %vm15005_vm10 = vcmask 80896   ;;  %v15011_v36 = vld [vmem:[#allocation58_spill] sm:$0xff] }
 0x4d5   : > { %v5042_v48 = vsel %vm14990_vm13, %v5038_v14, %v3441_v1  ;;  %vm15006_vm13 = vmmov %vm15005_vm10  ;;  %v15012_v1 = vld [vmem:[#allocation209_spill] sm:$0xff] }
 0x4d6   : > { %4019 = vmax.xlane.f32.xlu1 %v14991_v26  ;;  %4016 = vmax.xlane.f32.xlu0 %v14992_v16 }
 0x4d7   : > { %v3450_v2 = vpop.xlane.xlu1 %3449 }
 0x4d8   : > { %v3447_v63 = vpop.xlane.xlu0 %3446  ;;  %v5045_v47 = vsel %vm14993_vm5, %v5041_v18, %v3450_v2  ;;  %vm15009_vm5 = vmmov %vm15005_vm10 }
 0x4d9   : > { %v5044_v41 = vsel %vm14994_vm9, %v5040_v37, %v3447_v63  ;;  %vm15010_vm9 = vmmov %vm15009_vm5 }
 0x4da   : > { %4025 = vmax.xlane.f32.xlu1 %v14995_v28  ;;  %4022 = vmax.xlane.f32.xlu0 %v14996_v43  ;;  %v15017_v28 = vld [vmem:[#allocation119_spill] sm:$0xff]  ;;  %v15018_v43 = vld [vmem:[#allocation120_spill] sm:$0xff] }
 0x4db   : > { %v3476_v7 = vpop.xlane.xlu1 %3475 }
 0x4dc   : > { %v3473_v40 = vpop.xlane.xlu0 %3472  ;;  %v5047_v60 = vsel %vm14997_vm11, %v5043_v30, %v3476_v7  ;;  %vm15013_vm11 = vcmask 89088  }
 0x4dd   : > { %v5046_v25 = vsel %vm14998_vm2, %v5042_v48, %v3473_v40  ;;  %vm15014_vm2 = vmmov %vm15013_vm11 }
 0x4de   : > { %4051 = vmax.xlane.f32.xlu1 %v14999_v56  ;;  %4048 = vmax.xlane.f32.xlu0 %v15000_v33  ;;  %v15021_v56 = vld [vmem:[#allocation121_spill] sm:$0xff] }
 0x4df   : > { %v3482_v13 = vpop.xlane.xlu1 %3481 }
 0x4e0   : > { %v3479_v6 = vpop.xlane.xlu0 %3478  ;;  %v5049_v46 = vsel %vm15001_vm7, %v5045_v47, %v3482_v13  ;;  %vm15015_vm7 = vmmov %vm15014_vm2 }
 0x4e1   : > { %v5048_v19 = vsel %vm15002_vm8, %v5044_v41, %v3479_v6  ;;  %vm15016_vm8 = vmmov %vm15014_vm2 }
 0x4e2   : > { %4057 = vmax.xlane.f32.xlu1 %v15003_v31  ;;  %4054 = vmax.xlane.f32.xlu0 %v15004_v0 }
 0x4e3   : > { %v3508_v27 = vpop.xlane.xlu1 %3507 }
 0x4e4   : > { %v3505_v14 = vpop.xlane.xlu0 %3504  ;;  %v5051_v10 = vsel %vm15005_vm10, %v5047_v60, %v3508_v27  ;;  %vm15019_vm10 = vcmask 97280  }
 0x4e5   : > { %v5050_v51 = vsel %vm15006_vm13, %v5046_v25, %v3505_v14  ;;  %vm15020_vm13 = vmmov %vm15019_vm10 }
 0x4e6   : > { %4083 = vmax.xlane.f32.xlu1 %v15007_v59  ;;  %4080 = vmax.xlane.f32.xlu0 %v15008_v15 }
 0x4e7   : > { %v3514_v18 = vpop.xlane.xlu1 %3513 }
 0x4e8   : > { %v3511_v37 = vpop.xlane.xlu0 %3510  ;;  %v5053_v49 = vsel %vm15009_vm5, %v5049_v46, %v3514_v18  ;;  %vm15023_vm5 = vmmov %vm15019_vm10  ;;  %v15025_v46 = vld [vmem:[#allocation59_spill] sm:$0xff] }
 0x4e9   : > { %v5052_v38 = vsel %vm15010_vm9, %v5048_v19, %v3511_v37  ;;  %vm15024_vm9 = vmmov %vm15023_vm5  ;;  %v15026_v19 = vld [vmem:[#allocation122_spill] sm:$0xff] }
 0x4ea   : > { %4089 = vmax.xlane.f32.xlu1 %v15011_v36  ;;  %4086 = vmax.xlane.f32.xlu0 %v15012_v1 }
 0x4eb   : > { %v3540_v30 = vpop.xlane.xlu1 %3539 }
 0x4ec   : > { %v3537_v48 = vpop.xlane.xlu0 %3536  ;;  %v5055_v26 = vsel %vm15013_vm11, %v5051_v10, %v3540_v30  ;;  %v15027_v10 = vld [vmem:[#allocation210_spill] sm:$0xff]  ;;  %vm15058_vm11 = vcmask 48128  }
 0x4ed   : > { %v5054_v16 = vsel %vm15014_vm2, %v5050_v51, %v3537_v48  ;;  %v15028_v51 = vld [vmem:[#allocation211_spill] sm:$0xff]  ;;  %vm15059_vm2 = vmmov %vm15058_vm11 }
 0x4ee   : > { %4115 = vmax.xlane.f32.xlu1 %v11844_v35  ;;  %4112 = vmax.xlane.f32.xlu0 %v11846_v53  ;;  %v15022_v35 = vld [vmem:[#allocation30_spill] sm:$0xff] }
 0x4ef   : > { %v3546_v2 = vpop.xlane.xlu1 %3545 }
 0x4f0   : > { %v3543_v63 = vpop.xlane.xlu0 %3542  ;;  %v5057_v47 = vsel %vm15015_vm7, %v5053_v49, %v3546_v2  ;;  %v15029_v49 = vld [vmem:[#allocation123_spill] sm:$0xff]  ;;  %vm15062_vm7 = vmmov %vm15059_vm2 }
 0x4f1   : > { %v5056_v41 = vsel %vm15016_vm8, %v5052_v38, %v3543_v63  ;;  %v15030_v38 = vld [vmem:[#allocation124_spill] sm:$0xff]  ;;  %vm15063_vm8 = vmmov %vm15059_vm2 }
 0x4f2   : > { %4121 = vmax.xlane.f32.xlu1 %v15017_v28  ;;  %4118 = vmax.xlane.f32.xlu0 %v15018_v43  ;;  %v15033_v28 = vld [vmem:[#allocation213_spill] sm:$0xff] }
 0x4f3   : > { %v3572_v7 = vpop.xlane.xlu1 %3571  ;;  %v15034_v43 = vld [vmem:[#allocation61_spill] sm:$0xff] }
 0x4f4   : > { %v3569_v40 = vpop.xlane.xlu0 %3568  ;;  %v5059_v60 = vsel %vm15019_vm10, %v5055_v26, %v3572_v7  ;;  %v15031_v26 = vld [vmem:[#allocation19_spill] sm:$0xff]  ;;  %vm15066_vm10 = vcmask 56320  }
 0x4f5   : > { %v5058_v25 = vsel %vm15020_vm13, %v5054_v16, %v3569_v40  ;;  %v15032_v16 = vld [vmem:[#allocation212_spill] sm:$0xff]  ;;  %vm15067_vm13 = vmmov %vm15066_vm10 }
 0x4f6   : > { %4147 = vmax.xlane.f32.xlu1 %v15021_v56  ;;  %4144 = vmax.xlane.f32.xlu0 %v15022_v35  ;;  %v15035_v56 = vld [vmem:[#allocation214_spill] sm:$0xff]  ;;  %v15036_v35 = vld [vmem:[#allocation215_spill] sm:$0xff] }
 0x4f7   : > { %v3578_v53 = vpop.xlane.xlu1 %3577 }
 0x4f8   : > { %v3575_v33 = vpop.xlane.xlu0 %3574  ;;  %v5061_v13 = vsel %vm15023_vm5, %v5057_v47, %v3578_v53  ;;  %vm15081_vm5 = vcmask 64512  }
 0x4f9   : > { %v5060_v6 = vsel %vm15024_vm9, %v5056_v41, %v3575_v33  ;;  %vm15082_vm9 = vcmask 72704  }
 0x4fa   : > { %4153 = vmax.xlane.f32.xlu1 %v15025_v46  ;;  %4150 = vmax.xlane.f32.xlu0 %v15026_v19  ;;  %v15037_v46 = vld [vmem:[#allocation216_spill] sm:$0xff]  ;;  %v15038_v19 = vld [vmem:[#allocation62_spill] sm:$0xff] }
 0x4fb   : > { %v3604_v31 = vpop.xlane.xlu1 %3603 }
 0x4fc   : > { %v3601_v0 = vpop.xlane.xlu0 %3600  ;;  %v5063_v27 = vsel %vm4759_vm0, %v5059_v60, %v3604_v31 }
 0x4fd   : > { %v5062_v14 = vsel %vm4759_vm0, %v5058_v25, %v3601_v0 }
 0x4fe   : > { %4179 = vmax.xlane.f32.xlu1 %v15027_v10  ;;  %4176 = vmax.xlane.f32.xlu0 %v15028_v51 }
 0x4ff   : > { %v3610_v59 = vpop.xlane.xlu1 %3609 }
 0x500   : > { %v3607_v15 = vpop.xlane.xlu0 %3606  ;;  %v5065_v18 = vsel %vm4759_vm0, %v5061_v13, %v3610_v59  ;;  %v15041_v59 = vld [vmem:[#allocation125_spill] sm:$0xff] }
 0x501   : > { %v5064_v37 = vsel %vm4759_vm0, %v5060_v6, %v3607_v15  ;;  %v15042_v15 = vld [vmem:[#allocation126_spill] sm:$0xff] }
 0x502   : > { %4185 = vmax.xlane.f32.xlu1 %v15029_v49  ;;  %4182 = vmax.xlane.f32.xlu0 %v15030_v38 }
 0x503   : > { %v3636_v36 = vpop.xlane.xlu1 %3635 }
 0x504   : > { %v3633_v1 = vpop.xlane.xlu0 %3632  ;;  %v5067_v30 = vsel %vm4764_vm4, %v5063_v27, %v3636_v36  ;;  %v15039_v27 = vld [vmem:[#allocation63_spill] sm:$0xff] }
 0x505   : > { %v5066_v48 = vsel %vm4764_vm4, %v5062_v14, %v3633_v1  ;;  %v15040_v14 = vld [vmem:[#allocation217_spill] sm:$0xff] }
 0x506   : > { %4211 = vmax.xlane.f32.xlu1 %v15031_v26  ;;  %4208 = vmax.xlane.f32.xlu0 %v15032_v16  ;;  %v15043_v26 = vld [vmem:[#allocation218_spill] sm:$0xff]  ;;  %v15044_v16 = vld [vmem:[#allocation219_spill] sm:$0xff] }
 0x507   : > { %v3642_v2 = vpop.xlane.xlu1 %3641 }
 0x508   : > { %v3639_v63 = vpop.xlane.xlu0 %3638  ;;  %v5069_v47 = vsel %vm4764_vm4, %v5065_v18, %v3642_v2 }
 0x509   : > { %v5068_v41 = vsel %vm4764_vm4, %v5064_v37, %v3639_v63 }
 0x50a   : > { %4217 = vmax.xlane.f32.xlu1 %v15033_v28  ;;  %4214 = vmax.xlane.f32.xlu0 %v15034_v43 }
 0x50b   : > { %v3668_v7 = vpop.xlane.xlu1 %3667 }
 0x50c   : > { %v3665_v40 = vpop.xlane.xlu0 %3664  ;;  %v13080_v60 = vsel %vm4769_vm3, %v5067_v30, %v3668_v7  ;;  %v15045_v7 = vld [vmem:[#allocation64_spill] sm:$0xff] }
 0x50d   : > { %v13083_v25 = vsel %vm4769_vm3, %v5066_v48, %v3665_v40  ;;  %v15046_v40 = vld [vmem:[#allocation220_spill] sm:$0xff] }
 0x50e   : > { %4243 = vmax.xlane.f32.xlu1 %v15035_v56  ;;  %4240 = vmax.xlane.f32.xlu0 %v15036_v35 }
 0x50f   : > { %v3674_v53 = vpop.xlane.xlu1 %3673 }
 0x510   : > { %v3671_v33 = vpop.xlane.xlu0 %3670  ;;  %v13088_v13 = vsel %vm4769_vm3, %v5069_v47, %v3674_v53 }
 0x511   : > { %v13091_v6 = vsel %vm4769_vm3, %v5068_v41, %v3671_v33 }
 0x512   : > { %4249 = vmax.xlane.f32.xlu1 %v15037_v46  ;;  %4246 = vmax.xlane.f32.xlu0 %v15038_v19  ;;  %v15047_v46 = vld [vmem:[#allocation128_spill] sm:$0xff] }
 0x513   : > { %v3700_v31 = vpop.xlane.xlu1 %3699 }
 0x514   : > { %v3697_v0 = vpop.xlane.xlu0 %3696 }
 0x516   : > { %4275 = vmax.xlane.f32.xlu1 %v15039_v27  ;;  %4272 = vmax.xlane.f32.xlu0 %v15040_v14  ;;  %v15049_v27 = vld [vmem:[#allocation130_spill] sm:$0xff]  ;;  %v15050_v14 = vld [vmem:[#allocation31_spill] sm:$0xff] }
 0x517   : > { %v3706_v10 = vpop.xlane.xlu1 %3705 }
 0x518   : > { %v3703_v51 = vpop.xlane.xlu0 %3702 }
 0x51a   : > { %4281 = vmax.xlane.f32.xlu1 %v15041_v59  ;;  %4278 = vmax.xlane.f32.xlu0 %v15042_v15 }
 0x51b   : > { %v3732_v18 = vpop.xlane.xlu1 %3731 }
 0x51c   : > { %v3729_v37 = vpop.xlane.xlu0 %3728  ;;  %v5075_v49 = vsel %vm4699_vm12, %v3700_v31, %v3732_v18  ;;  %v15051_v18 = vld [vmem:[#allocation32_spill] sm:$0xff] }
 0x51d   : > { %v5074_v38 = vsel %vm4699_vm12, %v3697_v0, %v3729_v37 }
 0x51e   : > { %4307 = vmax.xlane.f32.xlu1 %v12136_v8  ;;  %4304 = vmax.xlane.f32.xlu0 %v12138_v54 }
 0x51f   : > { %v3738_v36 = vpop.xlane.xlu1 %3737 }
 0x520   : > { %v3735_v1 = vpop.xlane.xlu0 %3734  ;;  %v5077_v30 = vsel %vm4699_vm12, %v3706_v10, %v3738_v36 }
 0x521   : > { %v5076_v48 = vsel %vm4699_vm12, %v3703_v51, %v3735_v1  ;;  %v15052_v1 = vld [vmem:[#allocation221_spill] sm:$0xff] }
 0x522   : > { %4313 = vmax.xlane.f32.xlu1 %v15043_v26  ;;  %4310 = vmax.xlane.f32.xlu0 %v15044_v16 }
 0x523   : > { %v3764_v2 = vpop.xlane.xlu1 %3763 }
 0x524   : > { %v3761_v63 = vpop.xlane.xlu0 %3760  ;;  %v5079_v47 = vsel %vm4704_vm6, %v5075_v49, %v3764_v2 }
 0x525   : > { %v5078_v41 = vsel %vm4704_vm6, %v5074_v38, %v3761_v63  ;;  %v15054_v63 = vld [vmem:[#allocation131_spill] sm:$0xff] }
 0x526   : > { %4339 = vmax.xlane.f32.xlu1 %v12180_v24  ;;  %4336 = vmax.xlane.f32.xlu0 %v12182_v32  ;;  %v15048_v24 = vld [vmem:[#allocation129_spill] sm:$0xff] }
 0x527   : > { %v3770_v8 = vpop.xlane.xlu1 %3769 }
 0x528   : > { %v3767_v54 = vpop.xlane.xlu0 %3766  ;;  %v5081_v28 = vsel %vm4704_vm6, %v5077_v30, %v3770_v8  ;;  %v15053_v30 = vld [vmem:[#allocation222_spill] sm:$0xff] }
 0x529   : > { %v5080_v43 = vsel %vm4704_vm6, %v5076_v48, %v3767_v54 }
 0x52a   : > { %4345 = vmax.xlane.f32.xlu1 %v15045_v7  ;;  %4342 = vmax.xlane.f32.xlu0 %v15046_v40 }
 0x52b   : > { %v3796_v56 = vpop.xlane.xlu1 %3795 }
 0x52c   : > { %v3793_v35 = vpop.xlane.xlu0 %3792  ;;  %v5083_v53 = vsel %vm4709_vm15, %v5079_v47, %v3796_v56 }
 0x52d   : > { %v5082_v33 = vsel %vm4709_vm15, %v5078_v41, %v3793_v35 }
 0x52e   : > { %4371 = vmax.xlane.f32.xlu1 %v15047_v46  ;;  %4368 = vmax.xlane.f32.xlu0 %v15048_v24 }
 0x52f   : > { %v3802_v32 = vpop.xlane.xlu1 %3801 }
 0x530   : > { %v3799_v19 = vpop.xlane.xlu0 %3798  ;;  %v5085_v31 = vsel %vm4709_vm15, %v5081_v28, %v3802_v32  ;;  %v15056_v28 = vld [vmem:[#allocation223_spill] sm:$0xff] }
 0x531   : > { %v5084_v0 = vsel %vm4709_vm15, %v5080_v43, %v3799_v19  ;;  %v15057_v43 = vld [vmem:[#allocation226_spill] sm:$0xff] }
 0x532   : > { %4377 = vmax.xlane.f32.xlu1 %v15049_v27  ;;  %4374 = vmax.xlane.f32.xlu0 %v15050_v14 }
 0x533   : > { %v3828_v10 = vpop.xlane.xlu1 %3827 }
 0x534   : > { %v3825_v51 = vpop.xlane.xlu0 %3824  ;;  %v5087_v59 = vsel %vm13573_vm1, %v5083_v53, %v3828_v10  ;;  %v15060_v53 = vld [vmem:[#allocation227_spill] sm:$0xff] }
 0x535   : > { %v5086_v15 = vsel %vm13573_vm1, %v5082_v33, %v3825_v51  ;;  %v15061_v33 = vld [vmem:[#allocation228_spill] sm:$0xff] }
 0x536   : > { %4403 = vmax.xlane.f32.xlu1 %v12279_v55  ;;  %4400 = vmax.xlane.f32.xlu0 %v15051_v18  ;;  %v15055_v55 = vld [vmem:[#allocation132_spill] sm:$0xff] }
 0x537   : > { %v3834_v37 = vpop.xlane.xlu1 %3833 }
 0x538   : > { %v3831_v49 = vpop.xlane.xlu0 %3830  ;;  %v5089_v38 = vsel %vm13573_vm1, %v5085_v31, %v3834_v37  ;;  %v15064_v31 = vld [vmem:[#allocation229_spill] sm:$0xff] }
 0x539   : > { %v5088_v36 = vsel %vm13573_vm1, %v5084_v0, %v3831_v49  ;;  %v15065_v0 = vld [vmem:[#allocation232_spill] sm:$0xff]  ;;  %v15070_v49 = vld [vmem:[#allocation133_spill] sm:$0xff] }
 0x53a   : > { %4409 = vmax.xlane.f32.xlu1 %v15052_v1  ;;  %4406 = vmax.xlane.f32.xlu0 %v15053_v30 }
 0x53b   : > { %v3860_v48 = vpop.xlane.xlu1 %3859 }
 0x53c   : > { %v3857_v26 = vpop.xlane.xlu0 %3856  ;;  %v5091_v16 = vsel %vm13572_vm14, %v5087_v59, %v3860_v48  ;;  %v15068_v59 = vld [vmem:[#allocation22_spill] sm:$0xff] }
 0x53d   : > { %v5090_v2 = vsel %vm13572_vm14, %v5086_v15, %v3857_v26  ;;  %v15069_v15 = vld [vmem:[#allocation65_spill] sm:$0xff]  ;;  %v15072_v26 = vld [vmem:[#allocation136_spill] sm:$0xff] }
 0x53e   : > { %4435 = vmax.xlane.f32.xlu1 %v15054_v63  ;;  %4432 = vmax.xlane.f32.xlu0 %v15055_v55  ;;  %v15074_v55 = vld [vmem:[#allocation23_spill] sm:$0xff] }
 0x53f   : > { %v3866_v47 = vpop.xlane.xlu1 %3865 }
 0x540   : > { %v3863_v41 = vpop.xlane.xlu0 %3862  ;;  %v5093_v8 = vsel %vm13572_vm14, %v5089_v38, %v3866_v47  ;;  %v15071_v38 = vld [vmem:[#allocation134_spill] sm:$0xff]  ;;  %v15075_v47 = vld [vmem:[#allocation33_spill] sm:$0xff] }
 0x541   : > { %v5092_v54 = vsel %vm13572_vm14, %v5088_v36, %v3863_v41 }
 0x542   : > { %4441 = vmax.xlane.f32.xlu1 %v15056_v28  ;;  %4438 = vmax.xlane.f32.xlu0 %v15057_v43 }
 0x543   : > { %v3892_v7 = vpop.xlane.xlu1 %3891 }
 0x544   : > { %v3889_v40 = vpop.xlane.xlu0 %3888  ;;  %v5095_v56 = vsel %vm15058_vm11, %v5091_v16, %v3892_v7  ;;  %v15073_v16 = vld [vmem:[#allocation137_spill] sm:$0xff]  ;;  %vm15083_vm11 = vcmask 80896  }
 0x545   : > { %v5094_v35 = vsel %vm15059_vm2, %v5090_v2, %v3889_v40  ;;  %vm15084_vm2 = vmmov %vm15066_vm10 }
 0x546   : > { %4467 = vmax.xlane.f32.xlu1 %v15060_v53  ;;  %4464 = vmax.xlane.f32.xlu0 %v15061_v33 }
 0x547   : > { %v3898_v46 = vpop.xlane.xlu1 %3897 }
 0x548   : > { %v3895_v24 = vpop.xlane.xlu0 %3894  ;;  %v5097_v32 = vsel %vm15062_vm7, %v5093_v8, %v3898_v46  ;;  %vm15085_vm7 = vcmask 89088  }
 0x549   : > { %v13145_v19 = vsel %vm15063_vm8, %v5092_v54, %v3895_v24  ;;  %vm15086_vm8 = vmmov %vm15081_vm5 }
 0x54a   : > { %4473 = vmax.xlane.f32.xlu1 %v15064_v31  ;;  %4470 = vmax.xlane.f32.xlu0 %v15065_v0 }
 0x54b   : > { %v3924_v27 = vpop.xlane.xlu1 %3923 }
 0x54c   : > { %v3921_v14 = vpop.xlane.xlu0 %3920  ;;  %v5099_v10 = vsel %vm15066_vm10, %v5095_v56, %v3924_v27  ;;  %vm15087_vm10 = vcmask 97280  }
 0x54d   : > { %v13151_v51 = vsel %vm15067_vm13, %v5094_v35, %v3921_v14  ;;  %v15078_v35 = vld [vmem:[#allocation138_spill] sm:$0xff]  ;;  %vm15088_vm13 = vmmov %vm15082_vm9 }
 0x54e   : > { %4499 = vmax.xlane.f32.xlu1 %v15068_v59  ;;  %4496 = vmax.xlane.f32.xlu0 %v15069_v15 }
 0x54f   : > { %v3930_v18 = vpop.xlane.xlu1 %3929 }
 0x550   : > { %v13155_v37 = vpop.xlane.xlu0 %3926 }
 0x552   : > { %4505 = vmax.xlane.f32.xlu1 %v15070_v49  ;;  %4502 = vmax.xlane.f32.xlu0 %v15071_v38 }
 0x553   : > { %v3956_v36 = vpop.xlane.xlu1 %3955 }
 0x554   : > { %v13159_v1 = vpop.xlane.xlu0 %3952 }
 0x556   : > { %4531 = vmax.xlane.f32.xlu1 %v12486_v11  ;;  %4528 = vmax.xlane.f32.xlu0 %v12488_v58  ;;  %v15076_v11 = vld [vmem:[#allocation233_spill] sm:$0xff]  ;;  %v15077_v58 = vld [vmem:[#allocation234_spill] sm:$0xff] }
 0x557   : > { %v3962_v30 = vpop.xlane.xlu1 %3961 }
 0x558   : > { %v13163_v48 = vpop.xlane.xlu0 %3958 }
 0x55a   : > { %4537 = vmax.xlane.f32.xlu1 %v15072_v26  ;;  %4534 = vmax.xlane.f32.xlu0 %v15073_v16 }
 0x55b   : > { %v3988_v2 = vpop.xlane.xlu1 %3987 }
 0x55c   : > { %v13167_v63 = vpop.xlane.xlu0 %3984 }
 0x55e   : > { %4563 = vmax.xlane.f32.xlu1 %v15074_v55  ;;  %4560 = vmax.xlane.f32.xlu0 %v15075_v47 }
 0x55f   : > { %v3994_v41 = vpop.xlane.xlu1 %3993 }
 0x560   : > { %v13171_v8 = vpop.xlane.xlu0 %3990 }
 0x562   : > { %4569 = vmax.xlane.f32.xlu1 %v15076_v11  ;;  %4566 = vmax.xlane.f32.xlu0 %v15077_v58  ;;  %v15093_v11 = vld [vmem:[#allocation186_spill] sm:$0xff] }
 0x563   : > { %v4020_v54 = vpop.xlane.xlu1 %4019 }
 0x564   : > { %v13175_v28 = vpop.xlane.xlu0 %4016 }
 0x566   : > { %4595 = vmax.xlane.f32.xlu1 %v12570_v23  ;;  %4592 = vmax.xlane.f32.xlu0 %v12572_v50  ;;  %v15079_v50 = vld [vmem:[#allocation139_spill] sm:$0xff] }
 0x567   : > { %v4026_v43 = vpop.xlane.xlu1 %4025 }
 0x568   : > { %v13179_v7 = vpop.xlane.xlu0 %4022 }
 0x56a   : > { %4601 = vmax.xlane.f32.xlu1 %v12574_v52  ;;  %4598 = vmax.xlane.f32.xlu0 %v12576_v44  ;;  %v15080_v52 = vld [vmem:[#allocation140_spill] sm:$0xff]  ;;  %v5103_v44 = vsel %vm15081_vm5, %v5099_v10, %v3956_v36  ;;  %vm15089_vm5 = vmmov %vm15083_vm11 }
 0x56b   : > { %v4052_v40 = vpop.xlane.xlu1 %4051 }
 0x56c   : > { %v13183_v56 = vpop.xlane.xlu0 %4048 }
 0x56e   : > { %4627 = vmax.xlane.f32.xlu1 %v15078_v35  ;;  %4624 = vmax.xlane.f32.xlu0 %v12624_v9  ;;  %v5107_v9 = vsel %vm15082_vm9, %v5103_v44, %v3988_v2  ;;  %vm15090_vm9 = vmmov %vm15085_vm7  ;;  %v15097_v44 = vld [vmem:[#allocation224_spill] sm:$0xff] }
 0x56f   : > { %v4058_v53 = vpop.xlane.xlu1 %4057  ;;  %v5111_v0 = vsel %vm15083_vm11, %v5107_v9, %v4020_v54  ;;  %vm15091_vm11 = vmmov %vm15087_vm10 }
 0x570   : > { %v13187_v33 = vpop.xlane.xlu0 %4054  ;;  %v5115_v27 = vsel %vm15085_vm7, %v5111_v0, %v4052_v40  ;;  %v15095_v40 = vld [vmem:[#allocation190_spill] sm:$0xff]  ;;  %vm15101_vm7 = vmmov %vm15088_vm13 }
 0x572   : > { %4633 = vmax.xlane.f32.xlu1 %v12635_v17  ;;  %4630 = vmax.xlane.f32.xlu0 %v15079_v50  ;;  %v5101_v17 = vsel %vm15084_vm2, %v5097_v32, %v3930_v18  ;;  %vm15100_vm2 = vmmov %vm15086_vm8 }
 0x573   : > { %v4084_v23 = vpop.xlane.xlu1 %4083  ;;  %v5105_v14 = vsel %vm15086_vm8, %v5101_v17, %v3962_v30  ;;  %vm15102_vm8 = vmmov %vm15089_vm5 }
 0x574   : > { %v13191_v46 = vpop.xlane.xlu0 %4080  ;;  %v5109_v15 = vsel %vm15088_vm13, %v5105_v14, %v3994_v41  ;;  %v15099_v14 = vld [vmem:[#allocation230_spill] sm:$0xff]  ;;  %vm15104_vm13 = vmmov %vm15090_vm9 }
 0x575   : > { %v5113_v32 = vsel %vm15089_vm5, %v5109_v15, %v4026_v43  ;;  %v15094_v43 = vld [vmem:[#allocation94_spill] sm:$0xff]  ;;  %vm15105_vm5 = vmmov %vm15100_vm2 }
 0x576   : > { %4659 = vmax.xlane.f32.xlu1 %v15080_v52  ;;  %4656 = vmax.xlane.f32.xlu0 %v12668_v5  ;;  %v5119_v5 = vsel %vm15087_vm10, %v5115_v27, %v4084_v23  ;;  %v5117_v18 = vsel %vm15090_vm9, %v5113_v32, %v4058_v53  ;;  %v15096_v52 = vld [vmem:[#allocation225_spill] sm:$0xff]  ;;  %v15098_v27 = vld [vmem:[#allocation231_spill] sm:$0xff]  ;;  %vm15103_vm10 = vcmask 56320   ;;  %vm15106_vm9 = vmmov %vm15091_vm11 }
 0x577   : > { %v4090_v24 = vpop.xlane.xlu1 %4089 }
 0x578   : > { %v13196_v31 = vpop.xlane.xlu0 %4086 }
 0x57a   : > { %4665 = vmax.xlane.f32.xlu1 %v12679_v61  ;;  %4662 = vmax.xlane.f32.xlu0 %v12681_v39  ;;  %v5121_v61 = vsel %vm15091_vm11, %v5117_v18, %v4090_v24  ;;  %vm15107_vm11 = vmmov %vm15101_vm7 }
 0x57b   : > { %v4116_v10 = vpop.xlane.xlu1 %4115 }
 0x57c   : > { %v13206_v59 = vpop.xlane.xlu0 %4112  ;;  %v13210_v49 = vsel %vm4759_vm0, %v5119_v5, %v4116_v10 }
 0x57e   : > { %4691 = vmax.xlane.f32.xlu1 %v12699_v57  ;;  %4688 = vmax.xlane.f32.xlu0 %v12712_v29 }
 0x57f   : > { %v4122_v39 = vpop.xlane.xlu1 %4121 }
 0x580   : > { %v13217_v38 = vpop.xlane.xlu0 %4118  ;;  %v13220_v36 = vsel %vm4759_vm0, %v5121_v61, %v4122_v39 }
 0x582   : > { %4697 = vmax.xlane.f32.xlu1 %v12723_v45  ;;  %4694 = vmax.xlane.f32.xlu0 %v12725_v3  ;;  %v15092_v45 = vld [vmem:[#allocation187_spill] sm:$0xff] }
 0x583   : > { %v13224_v30 = vpop.xlane.xlu1 %4147 }
 0x584   : > { %v13226_v26 = vpop.xlane.xlu0 %4144 }
 0x587   : > { %v13228_v16 = vpop.xlane.xlu1 %4153 }
 0x588   : > { %v13230_v57 = vpop.xlane.xlu0 %4150 }
 0x58b   : > { %v13232_v29 = vpop.xlane.xlu1 %4179 }
 0x58c   : > { %v13234_v2 = vpop.xlane.xlu0 %4176 }
 0x58f   : > { %v13236_v55 = vpop.xlane.xlu1 %4185 }
 0x590   : > { %v13238_v47 = vpop.xlane.xlu0 %4182 }
 0x593   : > { %5200 = vrot.lane.b32.xlu1 %v15092_v45, %s5901_s0  ;;  %v4212_v3 = vpop.xlane.xlu1 %4211 }
 0x594   : > { %v4209_v41 = vpop.xlane.xlu0 %4208 }
 0x597   : > { %5202 = vrot.lane.b32.xlu1 %v15093_v11, %s5901_s0  ;;  %v4218_v58 = vpop.xlane.xlu1 %4217 }
 0x598   : > { %v4215_v54 = vpop.xlane.xlu0 %4214  ;;  %5198 = vrot.lane.b32.xlu0 %v15094_v43, %s5901_s0 }
 0x59b   : > { %5204 = vrot.lane.b32.xlu1 %v15095_v40, %s5901_s0  ;;  %v4244_v35 = vpop.xlane.xlu1 %4243  ;;  %v5102_v40 = vsel %vm15100_vm2, %v13151_v51, %v13159_v1  ;;  %vm15108_vm2 = vmmov %vm15102_vm8 }
 0x59c   : > { %v4241_v53 = vpop.xlane.xlu0 %4240  ;;  %v5135_v50 = vsel %vm4699_vm12, %v4212_v3, %v4244_v35  ;;  %5214 = vrot.lane.b32.xlu0 %v15096_v52, %s5902_s18  ;;  %v5106_v35 = vsel %vm15101_vm7, %v5102_v40, %v13167_v63  ;;  %vm15109_vm7 = vmmov %vm15104_vm13 }
 0x59d   : > { %v5134_v23 = vsel %vm4699_vm12, %v4209_v41, %v4241_v53 }
 0x59f   : > { %5216 = vrot.lane.b32.xlu1 %v15097_v44, %s5902_s18  ;;  %v4250_v24 = vpop.xlane.xlu1 %4249 }
 0x5a0   : > { %v4247_v9 = vpop.xlane.xlu0 %4246  ;;  %v5137_v0 = vsel %vm4699_vm12, %v4218_v58, %v4250_v24  ;;  %5218 = vrot.lane.b32.xlu0 %v15098_v27, %s5902_s18 }
 0x5a1   : > { %v5136_v17 = vsel %vm4699_vm12, %v4215_v54, %v4247_v9 }
 0x5a3   : > { %5220 = vrot.lane.b32.xlu1 %v15099_v14, %s5902_s18  ;;  %v4276_v5 = vpop.xlane.xlu1 %4275 }
 0x5a4   : > { %v4273_v10 = vpop.xlane.xlu0 %4272  ;;  %v5139_v15 = vsel %vm4704_vm6, %v5135_v50, %v4276_v5  ;;  %5230 = vrot.lane.b32.xlu0 %v12819_v20, %s5903_s20 }
 0x5a5   : > { %v5138_v32 = vsel %vm4704_vm6, %v5134_v23, %v4273_v10 }
 0x5a7   : > { %5232 = vrot.lane.b32.xlu1 %v12816_v12, %s5903_s20  ;;  %v4282_v18 = vpop.xlane.xlu1 %4281 }
 0x5a8   : > { %v4279_v61 = vpop.xlane.xlu0 %4278  ;;  %v5141_v39 = vsel %vm4704_vm6, %v5137_v0, %v4282_v18  ;;  %5234 = vrot.lane.b32.xlu0 %v12827_v34, %s5903_s20 }
 0x5a9   : > { %v5140_v45 = vsel %vm4704_vm6, %v5136_v17, %v4279_v61 }
 0x5ab   : > { %5236 = vrot.lane.b32.xlu1 %v12824_v42, %s5903_s20  ;;  %v4308_v3 = vpop.xlane.xlu1 %4307 }
 0x5ac   : > { %v4305_v41 = vpop.xlane.xlu0 %4304  ;;  %v5143_v11 = vsel %vm4709_vm15, %v5139_v15, %v4308_v3  ;;  %5246 = vrot.lane.b32.xlu0 %v12951_v21, %s5904_s25 }
 0x5ad   : > { %v5142_v58 = vsel %vm4709_vm15, %v5138_v32, %v4305_v41 }
 0x5af   : > { %5248 = vrot.lane.b32.xlu1 %v12948_v62, %s5904_s25  ;;  %v4314_v12 = vpop.xlane.xlu1 %4313 }
 0x5b0   : > { %v4311_v20 = vpop.xlane.xlu0 %4310  ;;  %v5145_v54 = vsel %vm4709_vm15, %v5141_v39, %v4314_v12  ;;  %5250 = vrot.lane.b32.xlu0 %v12959_v4, %s5904_s25  ;;  %v5110_v4 = vsel %vm15102_vm8, %v5106_v35, %v13175_v28  ;;  %vm15110_vm8 = vmmov %vm15106_vm9 }
 0x5b1   : > { %v5144_v43 = vsel %vm4709_vm15, %v5140_v45, %v4311_v20  ;;  %v5114_v51 = vsel %vm15104_vm13, %v5110_v4, %v13183_v56 }
 0x5b2   : > { %v5118_v63 = vsel %vm15106_vm9, %v5114_v51, %v13191_v46 }
 0x5b3   : > { %5252 = vrot.lane.b32.xlu1 %v12956_v22, %s5904_s25  ;;  %v4340_v42 = vpop.xlane.xlu1 %4339  ;;  %v5100_v22 = vsel %vm15103_vm10, %v13145_v19, %v13155_v37  ;;  %vm15111_vm10 = vcmask 48128  }
 0x5b4   : > { %v4337_v34 = vpop.xlane.xlu0 %4336  ;;  %v5147_v21 = vsel %vm13573_vm1, %v5143_v11, %v4340_v42  ;;  %5262 = vrot.lane.b32.xlu0 %v13083_v25, %s5905_s26  ;;  %v5104_v25 = vsel %vm15105_vm5, %v5100_v22, %v13163_v48  ;;  %vm15112_vm13 = vmmov %vm15111_vm10  ;;  %vm15113_vm5 = vcmask 56320  }
 0x5b5   : > { %v5146_v62 = vsel %vm13573_vm1, %v5142_v58, %v4337_v34  ;;  %v5108_v19 = vsel %vm15107_vm11, %v5104_v25, %v13171_v8  ;;  %vm15114_vm9 = vmmov %vm15113_vm5  ;;  %vm15115_vm11 = vcmask 64512  }
 0x5b6   : > { %v5112_v37 = vsel %vm15108_vm2, %v5108_v19, %v13179_v7  ;;  %vm15116_vm2 = vmmov %vm15115_vm11 }
 0x5b7   : > { %5264 = vrot.lane.b32.xlu1 %v13080_v60, %s5905_s26  ;;  %v4346_v1 = vpop.xlane.xlu1 %4345  ;;  %v5122_v60 = vsel %vm4759_vm0, %v5118_v63, %v13206_v59  ;;  %v5116_v56 = vsel %vm15109_vm7, %v5112_v37, %v13187_v33  ;;  %v5127_v33 = vsel %vm4764_vm4, %v13210_v49, %v13224_v30  ;;  %v5129_v49 = vsel %vm4764_vm4, %v13220_v36, %v13228_v16 }
 0x5b8   : > { %v4343_v53 = vpop.xlane.xlu0 %4342  ;;  %v5149_v50 = vsel %vm13573_vm1, %v5145_v54, %v4346_v1  ;;  %5266 = vrot.lane.b32.xlu0 %v13091_v6, %s5905_s26  ;;  %v5126_v48 = vsel %vm4764_vm4, %v5122_v60, %v13226_v26  ;;  %v5120_v8 = vsel %vm15110_vm8, %v5116_v56, %v13196_v31  ;;  %v5133_v30 = vsel %vm4769_vm3, %v5129_v49, %v13236_v55 }
 0x5b9   : > { %v5148_v28 = vsel %vm13573_vm1, %v5144_v43, %v4343_v53  ;;  %v5130_v46 = vsel %vm4769_vm3, %v5126_v48, %v13234_v2  ;;  %v5124_v26 = vsel %vm4759_vm0, %v5120_v8, %v13217_v38  ;;  %v5131_v2 = vsel %vm4769_vm3, %v5127_v33, %v13232_v29  ;;  %vm15120_vm1 = vmmov %vm15111_vm10 }
 0x5ba   : > { %vm15117_vm7 = vcmask 72704  }
 0x5bb   : > { %5268 = vrot.lane.b32.xlu1 %v13088_v13, %s5905_s26  ;;  %v4372_v6 = vpop.xlane.xlu1 %4371  ;;  %v5128_v13 = vsel %vm4764_vm4, %v5124_v26, %v13230_v57  ;;  %vm15118_vm8 = vmmov %vm15117_vm7 }
 0x5bc   : > { %v4369_v23 = vpop.xlane.xlu0 %4368  ;;  %v5151_v59 = vsel %vm13572_vm14, %v5147_v21, %v4372_v6  ;;  %5278 = vrot.lane.b32.xlu0 %v5130_v46, %s5906_s17  ;;  %v5132_v31 = vsel %vm4769_vm3, %v5128_v13, %v13238_v47 }
 0x5bd   : > { %v5150_v7 = vsel %vm13572_vm14, %v5146_v62, %v4369_v23 }
 0x5bf   : > { %5280 = vrot.lane.b32.xlu1 %v5131_v2, %s5906_s17  ;;  %v4378_v52 = vpop.xlane.xlu1 %4377 }
 0x5c0   : > { %v4375_v44 = vpop.xlane.xlu0 %4374  ;;  %v5153_v24 = vsel %vm13572_vm14, %v5149_v50, %v4378_v52  ;;  %5282 = vrot.lane.b32.xlu0 %v5132_v31, %s5906_s17 }
 0x5c1   : > { %v5152_v38 = vsel %vm13572_vm14, %v5148_v28, %v4375_v44  ;;  %vm15119_vm14 = vmmov %vm15111_vm10 }
 0x5c3   : > { %5284 = vrot.lane.b32.xlu1 %v5133_v30, %s5906_s17  ;;  %v4404_v57 = vpop.xlane.xlu1 %4403 }
 0x5c4   : > { %v4401_v29 = vpop.xlane.xlu0 %4400  ;;  %v5155_v35 = vsel %vm15111_vm10, %v5151_v59, %v4404_v57  ;;  %vm15121_vm10 = vcmask 80896  }
 0x5c5   : > { %v5154_v4 = vsel %vm15112_vm13, %v5150_v7, %v4401_v29  ;;  %vm15122_vm13 = vmmov %vm15121_vm10 }
 0x5c7   : > { %v4410_v9 = vpop.xlane.xlu1 %4409 }
 0x5c8   : > { %v4407_v47 = vpop.xlane.xlu0 %4406  ;;  %v5157_v19 = vsel %vm15119_vm14, %v5153_v24, %v4410_v9  ;;  %vm15128_vm14 = vcmask 97280  }
 0x5c9   : > { %v5156_v60 = vsel %vm15120_vm1, %v5152_v38, %v4407_v47  ;;  %vm15129_vm1 = vmmov %vm15128_vm14 }
 0x5cb   : > { %v4436_v0 = vpop.xlane.xlu1 %4435 }
 0x5cc   : > { %v4433_v17 = vpop.xlane.xlu0 %4432  ;;  %v5159_v1 = vsel %vm15113_vm5, %v5155_v35, %v4436_v0 }
 0x5cd   : > { %v5158_v53 = vsel %vm15114_vm9, %v5154_v4, %v4433_v17  ;;  %vm15123_vm9 = vmmov %vm15113_vm5 }
 0x5cf   : > { %v4442_v27 = vpop.xlane.xlu1 %4441 }
 0x5d0   : > { %v4439_v14 = vpop.xlane.xlu0 %4438  ;;  %v5161_v6 = vsel %vm15113_vm5, %v5157_v19, %v4442_v27  ;;  %vm15132_vm5 = vcmask 80896  }
 0x5d1   : > { %v5160_v23 = vsel %vm15123_vm9, %v5156_v60, %v4439_v14  ;;  %vm15133_vm9 = vmmov %vm15132_vm5  ;;  %v15147_v60 = vld [vmem:[#allocation117_spill] sm:$0xff] }
 0x5d3   : > { %v4468_v5 = vpop.xlane.xlu1 %4467 }
 0x5d4   : > { %v4465_v10 = vpop.xlane.xlu0 %4464  ;;  %v5163_v25 = vsel %vm15115_vm11, %v5159_v1, %v4468_v5  ;;  %vm15124_vm11 = vcmask 89088  }
 0x5d5   : > { %v5162_v63 = vsel %vm15116_vm2, %v5158_v53, %v4465_v10  ;;  %vm15125_vm2 = vmmov %vm15124_vm11  ;;  %v15143_v53 = vld [vmem:[#allocation54_spill] sm:$0xff] }
 0x5d7   : > { %v4474_v15 = vpop.xlane.xlu1 %4473 }
 0x5d8   : > { %v4471_v32 = vpop.xlane.xlu0 %4470 }
 0x5db   : > { %v4500_v18 = vpop.xlane.xlu1 %4499 }
 0x5dc   : > { %v4497_v61 = vpop.xlane.xlu0 %4496  ;;  %v5167_v50 = vsel %vm15117_vm7, %v5163_v25, %v4500_v18  ;;  %vm15126_vm7 = vcmask 64512  }
 0x5dd   : > { %v5166_v28 = vsel %vm15118_vm8, %v5162_v63, %v4497_v61  ;;  %v5165_v7 = vsel %vm15126_vm7, %v5161_v6, %v4474_v15  ;;  %vm15127_vm8 = vmmov %vm15126_vm7 }
 0x5de   : > { %v5164_v26 = vsel %vm15127_vm8, %v5160_v23, %v4471_v32  ;;  %vm15135_vm7 = vmmov %vm15129_vm1  ;;  %v15151_v23 = vld [vmem:[#allocation60_spill] sm:$0xff] }
 0x5df   : > { %v4506_v39 = vpop.xlane.xlu1 %4505  ;;  %vm15136_vm8 = vmmov %vm15129_vm1 }
 0x5e0   : > { %v4503_v36 = vpop.xlane.xlu0 %4502 }
 0x5e3   : > { %v4532_v16 = vpop.xlane.xlu1 %4531 }
 0x5e4   : > { %v4529_v45 = vpop.xlane.xlu0 %4528  ;;  %v5171_v37 = vsel %vm15121_vm10, %v5167_v50, %v4532_v16  ;;  %vm15130_vm10 = vcmask 72704  }
 0x5e5   : > { %v5170_v48 = vsel %vm15122_vm13, %v5166_v28, %v4529_v45  ;;  %v5169_v2 = vsel %vm15130_vm10, %v5165_v7, %v4506_v39  ;;  %vm15131_vm13 = vmmov %vm15130_vm10  ;;  %v15145_v28 = vld [vmem:[#allocation111_spill] sm:$0xff]  ;;  %vm15148_vm10 = vcmask 56320  }
 0x5e6   : > { %v5168_v31 = vsel %vm15131_vm13, %v5164_v26, %v4503_v36  ;;  %v15153_v26 = vld [vmem:[#allocation20_spill] sm:$0xff] }
 0x5e7   : > { %v4538_v55 = vpop.xlane.xlu1 %4537 }
 0x5e8   : > { %v4535_v3 = vpop.xlane.xlu0 %4534  ;;  %v5173_v24 = vsel %vm15132_vm5, %v5169_v2, %v4538_v55 }
 0x5e9   : > { %v5172_v38 = vsel %vm15133_vm9, %v5168_v31, %v4535_v3  ;;  %vm15158_vm9 = vmmov %vm15135_vm7 }
 0x5eb   : > { %v4564_v41 = vpop.xlane.xlu1 %4563 }
 0x5ec   : > { %v4561_v11 = vpop.xlane.xlu0 %4560  ;;  %v5175_v8 = vsel %vm15124_vm11, %v5171_v37, %v4564_v41  ;;  %vm15134_vm11 = vmmov %vm15125_vm2 }
 0x5ed   : > { %v5174_v59 = vsel %vm15125_vm2, %v5170_v48, %v4561_v11 }
 0x5ef   : > { %v4570_v58 = vpop.xlane.xlu1 %4569 }
 0x5f0   : > { %v4567_v12 = vpop.xlane.xlu0 %4566  ;;  %v5177_v9 = vsel %vm15134_vm11, %v5173_v24, %v4570_v58  ;;  %vm5310_vm11 = vcmask 261120  }
 0x5f1   : > { %v5176_v47 = vsel %vm15125_vm2, %v5172_v38, %v4567_v12  ;;  %v15159_v38 = vld [vmem:[#allocation135_spill] sm:$0xff] }
 0x5f3   : > { %v4596_v20 = vpop.xlane.xlu1 %4595 }
 0x5f4   : > { %v4593_v54 = vpop.xlane.xlu0 %4592  ;;  %v5179_v33 = vsel %vm15128_vm14, %v5175_v8, %v4596_v20  ;;  %v15137_v20 = vld [vmem:[#allocation44_spill] sm:$0xff]  ;;  %vm15142_vm14 = vcmask 31744  }
 0x5f5   : > { %v5178_v13 = vsel %vm15129_vm1, %v5174_v59, %v4593_v54  ;;  %v15138_v54 = vld [vmem:[#allocation106_spill] sm:$0xff]  ;;  %vm15144_vm1 = vcmask 39936  }
 0x5f7   : > { %v4602_v43 = vpop.xlane.xlu1 %4601 }
 0x5f8   : > { %v4599_v42 = vpop.xlane.xlu0 %4598  ;;  %v5181_v27 = vsel %vm15135_vm7, %v5177_v9, %v4602_v43  ;;  %v4701_v43 = vsel %vm4699_vm12, %v15138_v54, %v15137_v20  ;;  %vm15146_vm12 = vcmask 48128   ;;  %vm15162_vm7 = vcmask 130048   ;;  %v15167_v20 = vld [vmem:[#allocation148_spill] sm:$0xff] }
 0x5f9   : > { %v5180_v14 = vsel %vm15136_vm8, %v5176_v47, %v4599_v42  ;;  %v15161_v47 = vld [vmem:[#allocation24_spill] sm:$0xff]  ;;  %vm15164_vm8 = vmmov %vm15162_vm7 }
 0x5fb   : > { %v4628_v34 = vpop.xlane.xlu1 %4627 }
 0x5fc   : > { %v4625_v40 = vpop.xlane.xlu0 %4624  ;;  %v5183_v52 = vsel %vm4759_vm0, %v5179_v33, %v4628_v34 }
 0x5fd   : > { %v5182_v44 = vsel %vm4759_vm0, %v5178_v13, %v4625_v40  ;;  %v15139_v40 = vld [vmem:[#allocation96_spill] sm:$0xff]  ;;  %v15155_v13 = vld [vmem:[#allocation127_spill] sm:$0xff] }
 0x5ff   : > { %v4634_v21 = vpop.xlane.xlu1 %4633 }
 0x600   : > { %v4631_v62 = vpop.xlane.xlu0 %4630  ;;  %v5185_v5 = vsel %vm4759_vm0, %v5181_v27, %v4634_v21  ;;  %v4706_v21 = vsel %vm4704_vm6, %v4701_v43, %v15139_v40  ;;  %vm15150_vm6 = vcmask 64512   ;;  %v15163_v27 = vld [vmem:[#allocation142_spill] sm:$0xff]  ;;  %v5341_v43 = vld [vmem:[#allocation2 + $0x8] sm:$0xff] }
 0x601   : > { %v5184_v10 = vsel %vm4759_vm0, %v5180_v14, %v4631_v62  ;;  %v15140_v62 = vld [vmem:[#allocation100_spill] sm:$0xff] }
 0x602   : > { %v4711_v35 = vsel %vm4709_vm15, %v4706_v21, %v15140_v62  ;;  %vm15152_vm15 = vmmov %vm15131_vm13 }
 0x603   : > { %v4660_v22 = vpop.xlane.xlu1 %4659  ;;  %vm15154_vm13 = vmmov %vm15132_vm5 }
 0x604   : > { %v4657_v51 = vpop.xlane.xlu0 %4656  ;;  %v5187_v49 = vsel %vm4764_vm4, %v5183_v52, %v4660_v22  ;;  %vm15156_vm5 = vmmov %vm15125_vm2  ;;  %vm5315_vm2 = vcmask 392192  }
 0x605   : > { %v5186_v30 = vsel %vm4764_vm4, %v5182_v44, %v4657_v51  ;;  %v15141_v51 = vld [vmem:[#allocation52_spill] sm:$0xff]  ;;  %v15157_v44 = vld [vmem:[#allocation21_spill] sm:$0xff] }
 0x606   : > { %v4716_v1 = vsel %vm15142_vm14, %v4711_v35, %v15141_v51  ;;  %vm5320_vm14 = vcmask 523264  }
 0x607   : > { %v4666_v56 = vpop.xlane.xlu1 %4665  ;;  %v4721_v25 = vsel %vm15144_vm1, %v4716_v1, %v15143_v53  ;;  %vm15166_vm1 = vmmov %vm15162_vm7 }
 0x608   : > { %v4663_v46 = vpop.xlane.xlu0 %4662  ;;  %v5189_v15 = vsel %vm4764_vm4, %v5185_v5, %v4666_v56  ;;  %v4726_v19 = vsel %vm15146_vm12, %v4721_v25, %v15145_v28  ;;  %vm15168_vm12 = vmmov %vm15166_vm1 }
 0x609   : > { %v5188_v32 = vsel %vm4764_vm4, %v5184_v10, %v4663_v46  ;;  %v4731_v37 = vsel %vm15148_vm10, %v4726_v19, %v15147_v60  ;;  %v15149_v46 = vld [vmem:[#allocation17_spill] sm:$0xff]  ;;  %v5343_v19 = vld [vmem:[#allocation2 + $0x18] sm:$0xff]  ;;  %v5342_v60 = vld [vmem:[#allocation2 + $0x10] sm:$0xff] }
 0x60a   : > { %v4736_v6 = vsel %vm15150_vm6, %v4731_v37, %v15149_v46 }
 0x60b   : > { %v4692_v57 = vpop.xlane.xlu1 %4691  ;;  %v4741_v8 = vsel %vm15152_vm15, %v4736_v6, %v15151_v23 }
 0x60c   : > { %v4689_v29 = vpop.xlane.xlu0 %4688  ;;  %v5191_v0 = vsel %vm4769_vm3, %v5187_v49, %v4692_v57  ;;  %v4746_v33 = vsel %vm15154_vm13, %v4741_v8, %v15153_v26 }
 0x60d   : > { %v5190_v17 = vsel %vm4769_vm3, %v5186_v30, %v4689_v29  ;;  %5296 = vrot.lane.b32.xlu1 %v5191_v0, %s5907_s23  ;;  %v4751_v2 = vsel %vm15156_vm5, %v4746_v33, %v15155_v13  ;;  %v15160_v29 = vld [vmem:[#allocation66_spill] sm:$0xff] }
 0x60e   : > { %5294 = vrot.lane.b32.xlu0 %v5190_v17, %s5907_s23  ;;  %v4756_v24 = vsel %vm15158_vm9, %v4751_v2, %v15157_v44 }
 0x60f   : > { %v4698_v18 = vpop.xlane.xlu1 %4697  ;;  %v4761_v49 = vsel %vm4759_vm0, %v4756_v24, %v15159_v38  ;;  %vm5325_vm0 = vcmask 654336  }
 0x610   : > { %v4695_v61 = vpop.xlane.xlu0 %4694  ;;  %v5193_v39 = vsel %vm4769_vm3, %v5189_v15, %v4698_v18  ;;  %v4766_v9 = vsel %vm4764_vm4, %v4761_v49, %v15160_v29  ;;  %vm5330_vm4 = vcmask 785408  }
 0x611   : > { %v5192_v36 = vsel %vm4769_vm3, %v5188_v32, %v4695_v61  ;;  %5300 = vrot.lane.b32.xlu1 %v5193_v39, %s5907_s23  ;;  %v4771_v0 = vsel %vm4769_vm3, %v4766_v9, %v15161_v47  ;;  %vm5335_vm3 = vcmask 916480  }
 0x612   : > { %5298 = vrot.lane.b32.xlu0 %v5192_v36, %s5907_s23 }
 0x613   : > { %v5201_v16 = vpop.permute.xlu1 %5200 }
 0x614   : > { %v5199_v55 = vpop.permute.xlu0 %5198  ;;  %v5307_v17 = vsel %vm15162_vm7, %v4771_v0, %v5201_v16  ;;  %v15165_v16 = vld [vmem:[#allocation144_spill] sm:$0xff] }
 0x615   : > { %v5306_v14 = vsel %vm15164_vm8, %v15163_v27, %v5199_v55 }
 0x617   : > { %v5203_v45 = vpop.permute.xlu1 %5202 }
 0x618   : > { %v5215_v41 = vpop.permute.xlu0 %5214  ;;  %v5308_v55 = vsel %vm15166_vm1, %v15165_v16, %v5203_v45 }
 0x619   : > { %v5311_v5 = vsel %vm5310_vm11, %v5306_v14, %v5215_v41 }
 0x61b   : > { %v5205_v3 = vpop.permute.xlu1 %5204 }
 0x61c   : > { %v5219_v58 = vpop.permute.xlu0 %5218  ;;  %v5309_v41 = vsel %vm15168_vm12, %v15167_v20, %v5205_v3 }
 0x61f   : > { %v5217_v11 = vpop.permute.xlu1 %5216 }
 0x620   : > { %v5231_v42 = vpop.permute.xlu0 %5230  ;;  %v5312_v10 = vsel %vm5310_vm11, %v5307_v17, %v5217_v11 }
 0x621   : > { %v5316_v18 = vsel %vm5315_vm2, %v5311_v5, %v5231_v42  ;;  %v5340_v42 = vld [vmem:[#allocation2] sm:$0xff] }
 0x623   : > { %v5221_v12 = vpop.permute.xlu1 %5220 }
 0x624   : > { %v5235_v4 = vpop.permute.xlu0 %5234  ;;  %v5314_v40 = vsel %vm5310_vm11, %v5309_v41, %v5221_v12 }
 0x627   : > { %v5233_v34 = vpop.permute.xlu1 %5232 }
 0x628   : > { %v5247_v63 = vpop.permute.xlu0 %5246  ;;  %v5317_v61 = vsel %vm5315_vm2, %v5312_v10, %v5233_v34  ;;  %v5313_v34 = vsel %vm5310_vm11, %v5308_v55, %v5219_v58 }
 0x629   : > { %v5321_v39 = vsel %vm5320_vm14, %v5316_v18, %v5247_v63  ;;  %v5318_v45 = vsel %vm5315_vm2, %v5313_v34, %v5235_v4 }
 0x62b   : > { %v5237_v22 = vpop.permute.xlu1 %5236 }
 0x62c   : > { %v5251_v48 = vpop.permute.xlu0 %5250  ;;  %v5319_v3 = vsel %vm5315_vm2, %v5314_v40, %v5237_v22 }
 0x62d   : > { %v5323_v25 = vsel %vm5320_vm14, %v5318_v45, %v5251_v48 }
 0x62f   : > { %v5249_v50 = vpop.permute.xlu1 %5248 }
 0x630   : > { %v5263_v59 = vpop.permute.xlu0 %5262  ;;  %v5322_v36 = vsel %vm5320_vm14, %v5317_v61, %v5249_v50 }
 0x631   : > { %v5326_v11 = vsel %vm5325_vm0, %v5321_v39, %v5263_v59 }
 0x633   : > { %v5253_v56 = vpop.permute.xlu1 %5252 }
 0x634   : > { %v5267_v31 = vpop.permute.xlu0 %5266  ;;  %v5324_v58 = vsel %vm5320_vm14, %v5319_v3, %v5253_v56 }
 0x635   : > { %v5328_v50 = vsel %vm5325_vm0, %v5323_v25, %v5267_v31 }
 0x637   : > { %v5265_v7 = vpop.permute.xlu1 %5264 }
 0x638   : > { %v5279_v30 = vpop.permute.xlu0 %5278  ;;  %v5327_v54 = vsel %vm5325_vm0, %v5322_v36, %v5265_v7 }
 0x639   : > { %v5331_v21 = vsel %vm5330_vm4, %v5326_v11, %v5279_v30 }
 0x63b   : > { %v5269_v52 = vpop.permute.xlu1 %5268 }
 0x63c   : > { %v5283_v15 = vpop.permute.xlu0 %5282  ;;  %v5329_v28 = vsel %vm5325_vm0, %v5324_v58, %v5269_v52 }
 0x63d   : > { %v5333_v4 = vsel %vm5330_vm4, %v5328_v50, %v5283_v15 }
 0x63f   : > { %v5281_v57 = vpop.permute.xlu1 %5280 }
 0x640   : > { %v5332_v62 = vsel %vm5330_vm4, %v5327_v54, %v5281_v57 }
 0x643   : > { %v5285_v32 = vpop.permute.xlu1 %5284 }
 0x644   : > { %v5334_v22 = vsel %vm5330_vm4, %v5329_v28, %v5285_v32 }
 0x67f   : > { %v5297_v35 = vpop.permute.xlu1 %5296 }
 0x680   : > { %v5295_v51 = vpop.permute.xlu0 %5294  ;;  %v5337_v1 = vsel %vm5335_vm3, %v5332_v62, %v5297_v35 }
 0x681   : > { %v5336_v53 = vsel %vm5335_vm3, %v5331_v21, %v5295_v51  ;;  %v5345_v63 = vmax.f32 %v5341_v43, %v5337_v1 }
 0x682   : > { %v5344_v12 = vmax.f32 %v5340_v42, %v5336_v53 }
 0x683   : > { %5349 = vst [vmem:[#allocation2 + $0x8] sm:$0xff] %v5345_v63  ;;  %v5301_v37 = vpop.permute.xlu1 %5300 }
 0x684   : > { %5348 = vst [vmem:[#allocation2] sm:$0xff] %v5344_v12  ;;  %v5299_v46 = vpop.permute.xlu0 %5298  ;;  %v5339_v48 = vsel %vm5335_vm3, %v5334_v22, %v5301_v37 }
 0x685   : > { %v5338_v56 = vsel %vm5335_vm3, %v5333_v4, %v5299_v46  ;;  %v5347_v6 = vmax.f32 %v5343_v19, %v5339_v48 }
 0x686   : > { %v5346_v23 = vmax.f32 %v5342_v60, %v5338_v56 }
 0x687   : > { %5351 = vst [vmem:[#allocation2 + $0x18] sm:$0xff] %v5347_v6 }
 0x688   : > { %5350 = vst [vmem:[#allocation2 + $0x10] sm:$0xff] %v5346_v23 }
 0x689 PF: > { %v5369_v8 = vld [vmem:[%s13525_s5 + $0x10] sm:$0xff]  ;;  %v5367_v59 = vld [vmem:[%s13525_s5] sm:$0xff]  ;;  %v5908_v7 = vmov 0   ;;  %v5370_v26 = vld [vmem:[%s13525_s5 + $0x18] sm:$0xff]  ;;  %s5604_s24 = sshll.u32 %s5887_s12, 7  ;;  %s5464_s27 = sshll.u32 %s6033_s28, 4  ;;  %s13467_s27 = int_to_ptr.vmem [resolvable:$true] %s5464_s27 }
 0x68a   : > { %5782 = vset.pattern.permute.xlu1 %v5908_v7  ;;  %5781 = vset.pattern.permute.xlu0 %v5908_v7  ;;  %v5368_v33 = vld [vmem:[%s13525_s5 + $0x8] sm:$0xff]  ;;  %v5395_v2 = vld [vmem:[%s13526_s6] sm:$0xff]  ;;  %v5398_v31 = vld [vmem:[%s13526_s6 + $0x18] sm:$0xff]  ;;  %s13465_s12 = scalar_lea.hbm %s13527_s7, %s5604_s24  ;;  %s15169_s8 = sand.u32 1, %s5879_s10  }
 0x68b   : > { %5383 = vperm.xlu1 %5782, %v5369_v8   ;;  %5373 = vperm.xlu0 %5781, %v5367_v59   ;;  %v5396_v13 = vld [vmem:[%s13526_s6 + $0x8] sm:$0xff]  ;;  %v5397_v52 = vld [vmem:[%s13526_s6 + $0x10] sm:$0xff]  ;;  %v5355_v44 = vld [vmem:[#allocation2] sm:$0xff]  ;;  %s13475_s9 = scalar_lea.sflag [#allocation7], %s15169_s8  ;;  %s5815_s13 = scalar_lea.vmem %s13467_s27, 512 }
 0x68c   : > { %v5356_v24 = vld [vmem:[#allocation2 + $0x8] sm:$0xff]  ;;  %vm5359_vm10 = vcmp.gt.f32.partialorder %v5355_v44, -inf  ;;  %p5816_p12 = scmp.ne.s32.totalorder %s13467_s27, %s5815_s13  ;;  %s5909_s15 = smov [#allocation6]  }
 0x68d   : > { %vm5360_vm6 = vcmp.gt.f32.partialorder %v5356_v24, -inf  ;;  %v5363_v29 = vsel %vm5359_vm10, %v5355_v44, 0.0  ;;  %s5819_s16 = sshll.u32 %s5909_s15, 4  ;;  %s5820_s16 = int_to_ptr.vmem [resolvable:$false] %s5819_s16 }
 0x68e   : > { %v5358_v57 = vld [vmem:[#allocation2 + $0x18] sm:$0xff]  ;;  %v5364_v0 = vsel %vm5360_vm6, %v5356_v24, 0.0  ;;  %p5817_p13 = pnand %p5816_p12, %p5999_p0  ;;  %s5821_s0 = scalar_lea.vmem %s5820_s16, 1024 }
 0x68f   : > { %5388 = vperm.xlu1 %5782, %v5370_v26   ;;  %5378 = vperm.xlu0 %5781, %v5368_v33   ;;  %v5357_v30 = vld [vmem:[#allocation2 + $0x10] sm:$0xff]  ;;  %vm5362_vm13 = vcmp.gt.f32.partialorder %v5358_v57, -inf  ;;  %p5822_p2 = scmp.lt.s32.totalorder %s13467_s27, %s5820_s16  ;;  %p5823_p3 = scmp.lt.s32.totalorder %s5821_s0, %s5815_s13 }
 0x690   : > { %vm5361_vm15 = vcmp.gt.f32.partialorder %v5357_v30, -inf  ;;  %v5366_v5 = vsel %vm5362_vm13, %v5358_v57, 0.0  ;;  %p5818_p1 = pneg %p5817_p13 }
 0x691   : > { %v5365_v14 = vsel %vm5361_vm15, %v5357_v30, 0.0  ;;  %p5824_p5 = por %p5823_p3, %p5822_p2 }
 0x693   : > { %5406 = vperm.xlu1 %5782, %v5396_v13   ;;  %5401 = vperm.xlu0 %5781, %v5395_v2   ;;  %p5825_p6 = pnand %p5824_p5, %p5818_p1 }
 0x697   : > { %5416 = vperm.xlu1 %5782, %v5398_v31   ;;  %5411 = vperm.xlu0 %5781, %v5397_v52  }
 0x70a   : > { %v5384_v38 = vpop.permute.xlu1 %5383  ;;  %v5374_v49 = vpop.permute.xlu0 %5373 }
 0x70b   : > { %v5391_v17 = vmul.f32 %v5374_v49, %v5363_v29  ;;  %v5393_v61 = vmul.f32 %v5384_v38, %v5365_v14 }
 0x70e   : > { %v5389_v9 = vpop.permute.xlu1 %5388  ;;  %v5379_v47 = vpop.permute.xlu0 %5378 }
 0x70f   : > { %v5392_v27 = vmul.f32 %v5379_v47, %v5364_v0  ;;  %v5394_v39 = vmul.f32 %v5389_v9, %v5366_v5 }
 0x712   : > { %v5407_v10 = vpop.permute.xlu1 %5406  ;;  %v5402_v15 = vpop.permute.xlu0 %5401 }
 0x713   : > { %v5420_v32 = vadd.f32 %v5407_v10, %v5392_v27  ;;  %v5419_v18 = vadd.f32 %v5402_v15, %v5391_v17 }
 0x715   : > { %v5428_v36 = vmul.f32 0.70710677, %v5420_v32  ;;  %v5427_v16 = vmul.f32 0.70710677, %v5419_v18  ;;  %v5424_v40 = vmul.f32 0.5, %v5420_v32  ;;  %v5423_v62 = vmul.f32 0.5, %v5419_v18 }
 0x716   : > { %v5417_v55 = vpop.permute.xlu1 %5416  ;;  %v5412_v20 = vpop.permute.xlu0 %5411 }
 0x717   : > { %5783 = verf.f32 %v5428_v36  ;;  %v5422_v41 = vadd.f32 %v5417_v55, %v5394_v39  ;;  %v5421_v11 = vadd.f32 %v5412_v20, %v5393_v61 }
 0x718   : > { %5785 = verf.f32 %v5427_v16 }
 0x719   : > { %v5430_v54 = vmul.f32 0.70710677, %v5422_v41  ;;  %v5429_v43 = vmul.f32 0.70710677, %v5421_v11  ;;  %v5426_v25 = vmul.f32 0.5, %v5422_v41  ;;  %v5425_v12 = vmul.f32 0.5, %v5421_v11 }
 0x71b   : > { %5787 = verf.f32 %v5430_v54 }
 0x71c   : > { %5789 = verf.f32 %v5429_v43 }
 0x721   : > { %v5784_v42 = vpop.eup %5783 }
 0x722   : > { %v5786_v34 = vpop.eup %5785  ;;  %v5436_v21 = vadd.f32 1.0, %v5784_v42 }
 0x723   : > { %v5435_v35 = vadd.f32 1.0, %v5786_v34 }
 0x724   : > { %v5440_v51 = vmul.f32 %v5436_v21, %v5424_v40 }
 0x725   : > { %v5788_v45 = vpop.eup %5787  ;;  %v5439_v3 = vmul.f32 %v5435_v35, %v5423_v62 }
 0x726   : > { %v5790_v1 = vpop.eup %5789  ;;  %v5444_v53 = vsel %vm5360_vm6, %v5440_v51, 0.0  ;;  %v5438_v58 = vadd.f32 1.0, %v5788_v45 }
 0x727   : > { %5448 = vst [vmem:[%s6033_s28 + $0x8] sm:$0xff] %v5444_v53  ;;  %v5443_v63 = vsel %vm5359_vm10, %v5439_v3, 0.0  ;;  %v5437_v50 = vadd.f32 1.0, %v5790_v1 }
 0x728   : > { %5447 = vst [vmem:[%s6033_s28] sm:$0xff] %v5443_v63  ;;  %v5442_v28 = vmul.f32 %v5438_v58, %v5426_v25 }
 0x729   : > { %v5441_v19 = vmul.f32 %v5437_v50, %v5425_v12 }
 0x72a   : > { %v5446_v60 = vsel %vm5362_vm13, %v5442_v28, 0.0 }
 0x72b   : > { %5450 = vst [vmem:[%s6033_s28 + $0x18] sm:$0xff] %v5446_v60  ;;  %v5445_v4 = vsel %vm5361_vm15, %v5441_v19, 0.0 }
 0x72c   : > { %5449 = vst [vmem:[%s6033_s28 + $0x10] sm:$0xff] %v5445_v4 }
 0x72d   : > { %5828 = shalt.err (!%p5825_p6)
}
 0x72e   : > { %s5829_s28 = scalar_lea.hbm %s13465_s12, 512  ;;  %s5833_s25 = scalar_lea.hbm %s13527_s7, 1024 }
 0x72f   : > { %p5830_p7 = scmp.ne.s32.totalorder %s13465_s12, %s5829_s28  ;;  %p5834_p10 = scmp.lt.u32.totalorder %s13465_s12, %s13527_s7 }
 0x730   : > { %p5835_p11 = scmp.lt.u32.totalorder %s5833_s25, %s5829_s28  ;;  %p5837_p13 = scmp.lt.u32.totalorder %s5829_s28, %s13465_s12 }
 0x731   : > { %p5831_p8 = pnand %p5830_p7, %p5999_p0 }
 0x732   : > { %p5836_p12 = por %p5835_p11, %p5834_p10 }
 0x733   : > { %p5832_p9 = pneg %p5831_p8 }
 0x734   : > { %p5838_p1 = por %p5837_p13, %p5836_p12 }
 0x736   : > { %p5839_p2 = pnand %p5838_p1, %p5832_p9 }
 0x738   : > { %5842 = shalt.err (!%p5839_p2)
}
 0x739   : > { %s5910_s23 = smov 128   ;;  %s5911_s24 = smov 256  }
 0x73a   : > { %s5912_s29 = smov 8  }
 0x73b   : > { %5711 = dma.vmem_to_hbm [thread:$0]  (%p5999_p0), %s13467_s27, 512, %s13465_s12, %s13475_s9, %s5910_s23, %s5911_s24, %s5912_s29  }
 0x73c PF: > { %p5717_p3 = scmp.ge.s32.totalorder %s5895_s14, 2  ;;  %s5479_s30 = sand.u32 1, %s5875_s1  }
 0x73d   : > { %s5480_s8 = scalar_lea.sflag [#allocation7], %s5479_s30 }
 0x73e   : > { %p5714_p5 = pnand %p5717_p3, %p6006_p4 }
 0x740   : > { %5870 = dma.done.wait (!%p5714_p5), %s5480_s8, 512  }
 0x741   : > { %5872 = vsyncadd (!%p5714_p5), %s5480_s8, 4294966784  ;;  %s30_s14 = sadd.s32 1, %s5895_s14   ;;  %s15170_s12 = sld [smem:[#allocation10_spill]] }
 0x742   : > { %p27_p6 = scmp.ge.s32.totalorder %s30_s14, 4   ;;  %s15171_s13 = sld [smem:[#allocation11_spill]] }
 0x743   : > { %s15172_s1 = smov %s5879_s10  ;;  %s15173_s10 = smov %s5883_s11 }
 0x744   : > { %s15174_s11 = smov %s6012_s22  ;;  %29 = sbr.rel (!%p27_p6) target bundleno = 29 (0x1d), region = 90 }
 0x74b   :  { %5485 = vsyncpa [#allocation7], 1 }
 0x74c   :  { %5487 = vsyncpa [#allocation7 + $0x1], 1 }

</bundles_post_ra>
